<compile_context>
chip_gen: v7x
topology: tpu7x:2x2x1
jax: 0.10.0
libtpu: 0.0.40
codegen_flags: <defaults>
</compile_context>

<pallas_src>
import functools

import numpy as np
import jax
import jax.numpy as jnp
from jax.experimental import pallas as pl
from jax.experimental.pallas import tpu as pltpu


# Rows of the packed per-layer vector block (biases + LayerNorm params).
_R_BQ_S, _R_BK_S, _R_BV_S, _R_BO_S = 0, 1, 2, 3
_R_BQ_C, _R_BK_C, _R_BV_C, _R_BO_C = 4, 5, 6, 7
_R_B2 = 8
_R_LN1_G, _R_LN1_B = 9, 10
_R_LN2_G, _R_LN2_B = 11, 12
_R_LN3_G, _R_LN3_B = 13, 14
_NUM_VEC_ROWS = 16  # padded to a multiple of 8 sublanes

# Flipped to False (once per process) if this JAX build rejects
# BlockSpec(pipeline_mode=pl.Buffered(1)) on the constant inputs.
_CONST_SINGLE_BUFFERING = True


def image2token_kernel(
    x_ref, query_ref, wp_ref, bp_ref,
    w_qkv_s_ref, w_o_s_ref,
    w_q_c_ref, w_kv_c_ref, w_o_c_ref,
    w1_ref, w2_ref, b1_ref, vec_ref,
    out_ref,
    mem_scratch,
    *, num_heads, matmul_dtype, kv_valid,
):
    l = pl.program_id(1)
    bt, n_q, d = out_ref.shape          # batch tile, query length, hidden
    n_kv = x_ref.shape[1]               # padded visual-token count (lane-dense)
    hd = d // num_heads
    scale = 1.0 / float(np.sqrt(hd))

    def mm(a, b):
        return jnp.dot(a.astype(matmul_dtype), b.astype(matmul_dtype),
                       preferred_element_type=jnp.float32)

    # Layer 0: build memory = visual_proj(x) and load the learned query into
    # the carry (out_ref doubles as the layer-to-layer accumulator).
    @pl.when(l == 0)
    def _init():
        x2 = x_ref[...].reshape(bt * n_kv, x_ref.shape[2])
        mem = mm(x2, wp_ref[...]) + bp_ref[...]
        mem_scratch[...] = mem.astype(mem_scratch.dtype)
        out_ref[...] = jnp.broadcast_to(query_ref[...], out_ref.shape)

    vec = vec_ref[0]                    # (16, D) f32: biases + LN gains/offsets

    def row(r):
        return vec[r:r + 1, :]          # (1, D), broadcastable

    def layer_norm(h, g_row, b_row):
        mu = jnp.mean(h, axis=-1, keepdims=True)
        var = jnp.mean(jnp.square(h - mu), axis=-1, keepdims=True)
        return (h - mu) * jax.lax.rsqrt(var + 1e-5) * row(g_row) + row(b_row)

    def attend(q, k, v, nq, nk, nk_valid):
        # q: (bt*nq, D) already scaled by 1/sqrt(hd); k, v: (bt*nk, D).
        # Heads become the leading batch dim so the score and p@V contractions
        # are each ONE batched einsum (single MXU stream) instead of H tiny
        # K=64 matmuls with H live partial outputs.
        def split_heads(t, n):
            t = t.astype(matmul_dtype)
            heads = [t[:, h * hd:(h + 1) * hd].reshape(bt, n, hd)
                     for h in range(num_heads)]
            return jnp.stack(heads, axis=1).reshape(bt * num_heads, n, hd)

        qh = split_heads(q, nq)
        kh = split_heads(k, nk)
        vh = split_heads(v, nk)
        s = jnp.einsum('bqd,bkd->bqk', qh, kh,
                       preferred_element_type=jnp.float32)    # (bt*H, nq, nk)
        if nk_valid < nk:               # static mask for zero-padded kv rows
            kpos = jax.lax.broadcasted_iota(jnp.int32, (1, 1, nk), 2)
            s = jnp.where(kpos < nk_valid, s, -1e30)
        m = jnp.max(s, axis=-1, keepdims=True)
        p = jnp.exp(s - m)
        denom = jnp.sum(p, axis=-1, keepdims=True)            # (bt*H, nq, 1)
        o = jnp.einsum('bqk,bkd->bqd', p.astype(matmul_dtype), vh,
                       preferred_element_type=jnp.float32)    # (bt*H, nq, hd)
        # Normalise the small (nq, hd) output instead of the (nq, nk) scores.
        o = o * pl.reciprocal(denom, approx=True)
        o = o.reshape(bt, num_heads, nq, hd)
        # Heads back onto the lane axis: (bt, nq, H*hd) -> (bt*nq, D).
        o = jnp.concatenate([o[:, h] for h in range(num_heads)], axis=-1)
        return o.reshape(bt * nq, d)

    h2 = out_ref[...].reshape(bt * n_q, d)          # carried activations (f32)

    # ---- self-attention (post-norm) ----
    qkv = mm(h2, w_qkv_s_ref[0])                    # (bt*Lq, 3D), one matmul
    q = (qkv[:, 0:d] + row(_R_BQ_S)) * scale        # scale folded into q
    k = qkv[:, d:2 * d] + row(_R_BK_S)
    v = qkv[:, 2 * d:3 * d] + row(_R_BV_S)
    a = mm(attend(q, k, v, n_q, n_q, n_q), w_o_s_ref[0]) + row(_R_BO_S)
    h2 = layer_norm(h2 + a, _R_LN1_G, _R_LN1_B)

    # ---- cross-attention over the projected visual tokens ----
    mem = mem_scratch[...]                          # (bt*S_pad, D)
    qc = (mm(h2, w_q_c_ref[0]) + row(_R_BQ_C)) * scale
    kv = mm(mem, w_kv_c_ref[0])                     # (bt*S_pad, 2D), one matmul
    kc = kv[:, 0:d] + row(_R_BK_C)
    vc = kv[:, d:2 * d] + row(_R_BV_C)
    a = mm(attend(qc, kc, vc, n_q, n_kv, kv_valid), w_o_c_ref[0]) + row(_R_BO_C)
    h2 = layer_norm(h2 + a, _R_LN2_G, _R_LN2_B)

    # ---- feed-forward (ReLU) ----
    f = jnp.maximum(mm(h2, w1_ref[0]) + b1_ref[0], 0.0)
    f = mm(f, w2_ref[0]) + row(_R_B2)
    h2 = layer_norm(h2 + f, _R_LN3_G, _R_LN3_B)

    out_ref[...] = h2.reshape(bt, n_q, d)


def _pack_params(p, matmul_dtype):
    """Fuse q/k/v weights and the per-layer D-sized vectors into big blocks."""
    L, D, _ = p['wq_s'].shape
    F = p['w1'].shape[-1]
    wd = matmul_dtype
    f32 = jnp.float32
    vec_rows = [
        p['bq_s'], p['bk_s'], p['bv_s'], p['bo_s'],
        p['bq_c'], p['bk_c'], p['bv_c'], p['bo_c'],
        p['b2'],
        p['ln1_g'], p['ln1_b'], p['ln2_g'], p['ln2_b'],
        p['ln3_g'], p['ln3_b'],
        jnp.zeros((L, D), f32),                     # pad to 16 rows
    ]
    return dict(
        query=p['query'].astype(f32),
        wp=p['wp'].astype(wd),
        bp=p['bp'].reshape(1, D).astype(f32),
        w_qkv_s=jnp.concatenate([p['wq_s'], p['wk_s'], p['wv_s']], -1).astype(wd),
        w_o_s=p['wo_s'].astype(wd),
        w_q_c=p['wq_c'].astype(wd),
        w_kv_c=jnp.concatenate([p['wk_c'], p['wv_c']], -1).astype(wd),
        w_o_c=p['wo_c'].astype(wd),
        w1=p['w1'].astype(wd),
        w2=p['w2'].astype(wd),
        b1=p['b1'].reshape(L, 1, F).astype(f32),
        vecs=jnp.stack([r.astype(f32) for r in vec_rows], axis=1),  # (L,16,D)
    )


def _vmem_capacity_bytes():
    """Physical per-core VMEM, to size vmem_limit_bytes per generation."""
    try:
        cap = getattr(pltpu.get_tpu_info(), "vmem_capacity_bytes", None)
        if cap:
            return int(cap)
    except Exception:
        pass
    return 64 * 2 ** 20            # conservative default (v7x per-TensorCore)


def image2token(x, params, *, num_heads, matmul_dtype=jnp.bfloat16,
                num_batch_tiles=1, kv_pad_multiple=128):
    """Image2Token forward as one Pallas kernel.

    Host-side tuning policy (from the perf review):
      * num_batch_tiles: smallest value whose activations + memory scratch fit
        VMEM -- every extra tile re-streams all L layers' weights from HBM.
        Use a multiple of 2 on v7x so both TensorCores get a "parallel" tile.
      * (B // num_batch_tiles) * Lq is the MXU M dim of every projection/FFN
        matmul -- keep it >= 128 (v5e) / 256 (v6e, v7x) when possible.
    """
    global _CONST_SINGLE_BUFFERING

    B, S, Dv = x.shape
    _, Lq, D = params['query'].shape
    L, _, F = params['w1'].shape
    assert D % num_heads == 0 and B % num_batch_tiles == 0
    Bt = B // num_batch_tiles

    # Lane-dense cross-attention: pad the visual-token axis to a multiple of
    # 128 (padded keys are masked inside the kernel with a static iota).
    mult = max(int(kv_pad_multiple or 1), 1)
    S_pad = ((S + mult - 1) // mult) * mult
    if S_pad != S:
        x = jnp.pad(x, ((0, 0), (0, S_pad - S), (0, 0)))

    pk = _pack_params(params, matmul_dtype)
    order = ('query', 'wp', 'bp', 'w_qkv_s', 'w_o_s', 'w_q_c', 'w_kv_c',
             'w_o_c', 'w1', 'w2', 'b1', 'vecs')
    per_layer_keys = ('w_qkv_s', 'w_o_s', 'w_q_c', 'w_kv_c', 'w_o_c',
                      'w1', 'w2', 'b1', 'vecs')

    # --- VMEM budget: double-buffered streamed blocks + carry + mem scratch,
    #     capped at ~85% of this generation's physical VMEM (128 MiB on
    #     v5e/v6e, 64 MiB on v7x) instead of a fixed 48 MiB.
    in_block_bytes = x.nbytes // num_batch_tiles
    for kname in order:
        in_block_bytes += pk[kname].nbytes // (L if kname in per_layer_keys else 1)
    out_block_bytes = Bt * Lq * D * 4
    scratch_bytes = Bt * S_pad * D * jnp.dtype(matmul_dtype).itemsize
    est = 2 * in_block_bytes + 2 * out_block_bytes + scratch_bytes
    vmem_limit = int(min(max(2 * est, 32 * 2 ** 20),
                         int(0.85 * _vmem_capacity_bytes())))

    # --- advisory cost estimate for the XLA scheduler
    hd = D // num_heads
    per_layer_flops = 2 * B * (
        Lq * D * 3 * D                      # fused self q/k/v projection
        + 3 * Lq * D * D                    # self-out, cross-q, cross-out
        + S_pad * D * 2 * D                 # fused cross k/v projection
        + 2 * Lq * D * F                    # FFN
        + num_heads * (Lq * Lq + Lq * S_pad) * hd * 2)  # scores + p@V
    flops = 2 * B * S_pad * Dv * D + L * per_layer_flops
    transcendentals = L * B * num_heads * (Lq * Lq + Lq * S_pad)
    bytes_accessed = int(x.nbytes + B * Lq * D * 4
                         + num_batch_tiles * sum(pk[k].nbytes for k in order))

    kernel = functools.partial(image2token_kernel, num_heads=num_heads,
                               matmul_dtype=matmul_dtype, kv_valid=S)

    def build_and_run(single_buffer_consts):
        # Constant blocks (index never changes) only need one VMEM buffer;
        # streamed per-layer weights keep the default double buffering.
        const_mode = (pl.Buffered(1)
                      if single_buffer_consts and hasattr(pl, 'Buffered')
                      else None)
        x_mode = const_mode if num_batch_tiles == 1 else None

        def spec(block_shape, index_map, mode):
            if mode is None:
                return pl.BlockSpec(block_shape, index_map)
            return pl.BlockSpec(block_shape, index_map, pipeline_mode=mode)

        def per_layer_spec(shape):
            n = len(shape)
            return pl.BlockSpec((1,) + shape,
                                lambda b, l, n=n: (l,) + (0,) * n)

        def const_spec(shape):
            n = len(shape)
            return spec(shape, lambda b, l, n=n: (0,) * n, const_mode)

        in_specs = [spec((Bt, S_pad, Dv), lambda b, l: (b, 0, 0), x_mode)]
        for kname in order:
            a = pk[kname]
            if kname in per_layer_keys:
                in_specs.append(per_layer_spec(a.shape[1:]))
            else:
                in_specs.append(const_spec(a.shape))

        fn = pl.pallas_call(
            kernel,
            out_shape=jax.ShapeDtypeStruct((B, Lq, D), jnp.float32),
            grid_spec=pltpu.PrefetchScalarGridSpec(
                num_scalar_prefetch=0,
                # Layer axis innermost + "arbitrary": required for the carry
                # in out_ref and the persistent mem_scratch to be correct.
                grid=(num_batch_tiles, L),
                in_specs=in_specs,
                out_specs=pl.BlockSpec((Bt, Lq, D), lambda b, l: (b, 0, 0)),
                scratch_shapes=[pltpu.VMEM((Bt * S_pad, D), matmul_dtype)],
            ),
            compiler_params=pltpu.CompilerParams(
                dimension_semantics=("parallel", "arbitrary"),
                vmem_limit_bytes=vmem_limit,
            ),
            cost_estimate=pl.CostEstimate(
                flops=int(flops),
                transcendentals=int(transcendentals),
                bytes_accessed=bytes_accessed,
            ),
        )
        return fn(x, *(pk[k] for k in order))

    if _CONST_SINGLE_BUFFERING:
        try:
            # Block here so a build that rejects pipeline_mode (at trace,
            # lowering or runtime) is caught and retried without it.
            return jax.block_until_ready(build_and_run(True))
        except Exception:
            _CONST_SINGLE_BUFFERING = False
    return build_and_run(False)


def reference(x, params, *, num_heads):
    """Pure-JAX mirror of Image2Token.forward (eval mode, post-norm decoder)."""
    B = x.shape[0]
    _, Lq, D = params['query'].shape
    H = num_heads
    hd = D // H

    def ln(h, g, b):
        mu = h.mean(-1, keepdims=True)
        var = ((h - mu) ** 2).mean(-1, keepdims=True)
        return (h - mu) / jnp.sqrt(var + 1e-5) * g + b

    def mha(q_in, kv_in, wq, bq, wk, bk, wv, bv, wo, bo):
        nq, nk = q_in.shape[1], kv_in.shape[1]
        q = (q_in @ wq + bq).reshape(B, nq, H, hd)
        k = (kv_in @ wk + bk).reshape(B, nk, H, hd)
        v = (kv_in @ wv + bv).reshape(B, nk, H, hd)
        s = jnp.einsum('bqhd,bkhd->bhqk', q, k) / np.sqrt(hd)
        p = jax.nn.softmax(s, axis=-1)
        o = jnp.einsum('bhqk,bkhd->bqhd', p, v).reshape(B, nq, D)
        return o @ wo + bo

    mem = x @ params['wp'] + params['bp']
    h = jnp.broadcast_to(params['query'], (B, Lq, D))
    L = params['w1'].shape[0]
    for l in range(L):
        sa = mha(h, h, params['wq_s'][l], params['bq_s'][l],
                 params['wk_s'][l], params['bk_s'][l],
                 params['wv_s'][l], params['bv_s'][l],
                 params['wo_s'][l], params['bo_s'][l])
        h = ln(h + sa, params['ln1_g'][l], params['ln1_b'][l])
        ca = mha(h, mem, params['wq_c'][l], params['bq_c'][l],
                 params['wk_c'][l], params['bk_c'][l],
                 params['wv_c'][l], params['bv_c'][l],
                 params['wo_c'][l], params['bo_c'][l])
        h = ln(h + ca, params['ln2_g'][l], params['ln2_b'][l])
        f = jnp.maximum(h @ params['w1'][l] + params['b1'][l], 0.0)
        f = f @ params['w2'][l] + params['b2'][l]
        h = ln(h + f, params['ln3_g'][l], params['ln3_b'][l])
    return h


def init_params(key, *, num_layers, visual_hidden, text_hidden, ffn_hidden,
                max_length):
    L, Dv, D, F, Lq = num_layers, visual_hidden, text_hidden, ffn_hidden, max_length
    keys = iter(jax.random.split(key, 32))

    def w(shape, scale=0.05):
        return jax.random.normal(next(keys), shape, jnp.float32) * scale

    p = dict(
        wp=w((Dv, D)), bp=w((D,)),
        query=w((1, Lq, D), 1.0),
        w1=w((L, D, F)), b1=w((L, F)),
        w2=w((L, F, D)), b2=w((L, D)),
    )
    for tag in ('s', 'c'):              # self-attn, cross-attn
        for name in ('q', 'k', 'v', 'o'):
            p[f'w{name}_{tag}'] = w((L, D, D))
            p[f'b{name}_{tag}'] = w((L, D))
    for i in (1, 2, 3):
        p[f'ln{i}_g'] = jnp.ones((L, D), jnp.float32)
        p[f'ln{i}_b'] = jnp.zeros((L, D), jnp.float32)
    return p


if __name__ == "__main__":
    # Small shapes consistent with the module (nhead = text_hidden // 64).
    B, S = 2, 8                    # batch, number of visual tokens
    Dv, D, F = 64, 128, 256        # visual hidden, text hidden, FFN hidden
    Lq, L = 16, 3                  # max_length (query tokens), num_layers
    H = D // 64                    # nhead, as in the PyTorch module

    key = jax.random.PRNGKey(0)
    kx, kp = jax.random.split(key)
    x = jax.random.normal(kx, (B, S, Dv), jnp.float32)
    params = init_params(kp, num_layers=L, visual_hidden=Dv, text_hidden=D,
                         ffn_hidden=F, max_length=Lq)

    ref = jax.block_until_ready(reference(x, params, num_heads=H))

    # Exact-semantics check with f32 matmuls (tolerance covers only the EUP
    # approximate reciprocal used for softmax normalisation).
    out_f32 = jax.block_until_ready(
        image2token(x, params, num_heads=H, matmul_dtype=jnp.float32))
    np.testing.assert_allclose(np.asarray(out_f32), np.asarray(ref),
                               rtol=2e-3, atol=2e-3)

    # Default (recommended) path: bf16 MXU matmuls, f32 LayerNorm / softmax /
    # carry.  Loose tolerance = bf16 operand rounding over 3 decoder layers.
    out_bf16 = jax.block_until_ready(image2token(x, params, num_heads=H))
    np.testing.assert_allclose(np.asarray(out_bf16), np.asarray(ref),
                               rtol=5e-2, atol=1.5e-1)

    print("KERNEL_OK")
</pallas_src>

<mosaic_0001>
module attributes {stable_mosaic.version = 11 : i64} {
  func.func @image2token_kernel(%arg0: i32, %arg1: i32, %arg2: memref<2x128x64xf32, #tpu.memory_space<vmem>>, %arg3: memref<1x16x128xf32, #tpu.memory_space<vmem>>, %arg4: memref<64x128xf32, #tpu.memory_space<vmem>>, %arg5: memref<1x128xf32, #tpu.memory_space<vmem>>, %arg6: memref<1x128x384xf32, #tpu.memory_space<vmem>>, %arg7: memref<1x128x128xf32, #tpu.memory_space<vmem>>, %arg8: memref<1x128x128xf32, #tpu.memory_space<vmem>>, %arg9: memref<1x128x256xf32, #tpu.memory_space<vmem>>, %arg10: memref<1x128x128xf32, #tpu.memory_space<vmem>>, %arg11: memref<1x128x256xf32, #tpu.memory_space<vmem>>, %arg12: memref<1x256x128xf32, #tpu.memory_space<vmem>>, %arg13: memref<1x1x256xf32, #tpu.memory_space<vmem>>, %arg14: memref<1x16x128xf32, #tpu.memory_space<vmem>>, %arg15: memref<2x16x128xf32, #tpu.memory_space<vmem>>, %arg16: memref<256x128xf32, #tpu.memory_space<vmem>>) attributes {dimension_semantics = [#tpu.dimension_semantics<parallel>, #tpu.dimension_semantics<arbitrary>], iteration_bounds = array<i64: 1, 3>, scalar_prefetch = 0 : i64, scratch_operands = 1 : i64, tpu.core_type = #tpu.core_type<tc>, window_params = [{pipeline_mode = #tpu.pipeline_mode<synchronous>, transform_indices = @transform_0, window_bounds = array<i64: 2, 128, 64>}, {pipeline_mode = #tpu.pipeline_mode<synchronous>, transform_indices = @transform_1, window_bounds = array<i64: 1, 16, 128>}, {pipeline_mode = #tpu.pipeline_mode<synchronous>, transform_indices = @transform_2, window_bounds = array<i64: 64, 128>}, {pipeline_mode = #tpu.pipeline_mode<synchronous>, transform_indices = @transform_3, window_bounds = array<i64: 1, 128>}, {transform_indices = @transform_4, window_bounds = array<i64: 1, 128, 384>}, {transform_indices = @transform_5, window_bounds = array<i64: 1, 128, 128>}, {transform_indices = @transform_6, window_bounds = array<i64: 1, 128, 128>}, {transform_indices = @transform_7, window_bounds = array<i64: 1, 128, 256>}, {transform_indices = @transform_8, window_bounds = array<i64: 1, 128, 128>}, {transform_indices = @transform_9, window_bounds = array<i64: 1, 128, 256>}, {transform_indices = @transform_10, window_bounds = array<i64: 1, 256, 128>}, {transform_indices = @transform_11, window_bounds = array<i64: 1, 1, 256>}, {transform_indices = @transform_12, window_bounds = array<i64: 1, 16, 128>}, {transform_indices = @transform_13, window_bounds = array<i64: 2, 16, 128>}]} {
    %c0_i32 = arith.constant 0 : i32
    %0 = arith.cmpi eq, %arg1, %c0_i32 : i32
    %1 = arith.extui %0 : i1 to i32
    %c0_i32_0 = arith.constant 0 : i32
    %2 = arith.cmpi ne, %1, %c0_i32_0 : i32
    scf.if %2 {
      %c0_68 = arith.constant 0 : index
      %c0_69 = arith.constant 0 : index
      %c0_70 = arith.constant 0 : index
      %241 = vector.load %arg2[%c0_68, %c0_69, %c0_70] : memref<2x128x64xf32, #tpu.memory_space<vmem>>, vector<2x128x64xf32>
      %242 = vector.shape_cast %241 : vector<2x128x64xf32> to vector<256x64xf32>
      %c0_71 = arith.constant 0 : index
      %c0_72 = arith.constant 0 : index
      %243 = vector.load %arg4[%c0_71, %c0_72] : memref<64x128xf32, #tpu.memory_space<vmem>>, vector<64x128xf32>
      %cst_73 = arith.constant dense<0.000000e+00> : vector<256x128xf32>
      %244 = tpu.matmul %242, %243, %cst_73 {dimension_numbers = #tpu.dot_dimension_numbers<[1], [0], [0], [1], [0, 0, 1, 1], [], []>} : vector<256x64xf32>, vector<64x128xf32>, vector<256x128xf32> -> vector<256x128xf32>
      %c0_74 = arith.constant 0 : index
      %c0_75 = arith.constant 0 : index
      %245 = vector.load %arg5[%c0_74, %c0_75] : memref<1x128xf32, #tpu.memory_space<vmem>>, vector<1x128xf32>
      %246 = vector.broadcast %245 : vector<1x128xf32> to vector<256x128xf32>
      %247 = arith.addf %244, %246 : vector<256x128xf32>
      %c0_76 = arith.constant 0 : index
      %c0_77 = arith.constant 0 : index
      %248 = vector.load %arg16[%c0_76, %c0_77] : memref<256x128xf32, #tpu.memory_space<vmem>>, vector<256x128xf32>
      tpu.vector_store %arg16[%c0_76, %c0_77], %247 {strides = array<i32>} : memref<256x128xf32, #tpu.memory_space<vmem>>, vector<256x128xf32>,
      %c0_78 = arith.constant 0 : index
      %c0_79 = arith.constant 0 : index
      %c0_80 = arith.constant 0 : index
      %249 = vector.load %arg3[%c0_78, %c0_79, %c0_80] : memref<1x16x128xf32, #tpu.memory_space<vmem>>, vector<1x16x128xf32>
      %250 = vector.shape_cast %249 : vector<1x16x128xf32> to vector<1x16x128xf32>
      %251 = vector.broadcast %250 : vector<1x16x128xf32> to vector<2x16x128xf32>
      %c0_81 = arith.constant 0 : index
      %c0_82 = arith.constant 0 : index
      %c0_83 = arith.constant 0 : index
      %252 = vector.load %arg15[%c0_81, %c0_82, %c0_83] : memref<2x16x128xf32, #tpu.memory_space<vmem>>, vector<2x16x128xf32>
      tpu.vector_store %arg15[%c0_81, %c0_82, %c0_83], %251 {strides = array<i32>} : memref<2x16x128xf32, #tpu.memory_space<vmem>>, vector<2x16x128xf32>,
    } else {
    }
    %c0 = arith.constant 0 : index
    %c0_1 = arith.constant 0 : index
    %c0_2 = arith.constant 0 : index
    %3 = vector.load %arg14[%c0, %c0_1, %c0_2] : memref<1x16x128xf32, #tpu.memory_space<vmem>>, vector<1x16x128xf32>
    %4 = vector.shape_cast %3 : vector<1x16x128xf32> to vector<16x128xf32>
    %c0_3 = arith.constant 0 : index
    %c0_4 = arith.constant 0 : index
    %c0_5 = arith.constant 0 : index
    %5 = vector.load %arg15[%c0_3, %c0_4, %c0_5] : memref<2x16x128xf32, #tpu.memory_space<vmem>>, vector<2x16x128xf32>
    %6 = vector.shape_cast %5 : vector<2x16x128xf32> to vector<32x128xf32>
    %c0_6 = arith.constant 0 : index
    %c0_7 = arith.constant 0 : index
    %c0_8 = arith.constant 0 : index
    %7 = vector.load %arg6[%c0_6, %c0_7, %c0_8] : memref<1x128x384xf32, #tpu.memory_space<vmem>>, vector<1x128x384xf32>
    %8 = vector.shape_cast %7 : vector<1x128x384xf32> to vector<128x384xf32>
    %cst = arith.constant dense<0.000000e+00> : vector<32x384xf32>
    %9 = tpu.matmul %6, %8, %cst {dimension_numbers = #tpu.dot_dimension_numbers<[1], [0], [0], [1], [0, 0, 1, 1], [], []>} : vector<32x128xf32>, vector<128x384xf32>, vector<32x384xf32> -> vector<32x384xf32>
    %10 = vector.extract_strided_slice %9 {offsets = [0, 0], sizes = [32, 128], strides = [1, 1]} : vector<32x384xf32> to vector<32x128xf32>
    %11 = vector.extract_strided_slice %4 {offsets = [0, 0], sizes = [1, 128], strides = [1, 1]} : vector<16x128xf32> to vector<1x128xf32>
    %12 = vector.broadcast %11 : vector<1x128xf32> to vector<32x128xf32>
    %13 = arith.addf %10, %12 : vector<32x128xf32>
    %cst_9 = arith.constant 1.250000e-01 : f32
    %14 = vector.broadcast %cst_9 : f32 to vector<32x128xf32>
    %15 = arith.mulf %13, %14 : vector<32x128xf32>
    %16 = vector.extract_strided_slice %9 {offsets = [0, 128], sizes = [32, 128], strides = [1, 1]} : vector<32x384xf32> to vector<32x128xf32>
    %17 = vector.extract_strided_slice %4 {offsets = [1, 0], sizes = [1, 128], strides = [1, 1]} : vector<16x128xf32> to vector<1x128xf32>
    %18 = vector.broadcast %17 : vector<1x128xf32> to vector<32x128xf32>
    %19 = arith.addf %16, %18 : vector<32x128xf32>
    %20 = vector.extract_strided_slice %9 {offsets = [0, 256], sizes = [32, 128], strides = [1, 1]} : vector<32x384xf32> to vector<32x128xf32>
    %21 = vector.extract_strided_slice %4 {offsets = [2, 0], sizes = [1, 128], strides = [1, 1]} : vector<16x128xf32> to vector<1x128xf32>
    %22 = vector.broadcast %21 : vector<1x128xf32> to vector<32x128xf32>
    %23 = arith.addf %20, %22 : vector<32x128xf32>
    %24 = vector.extract_strided_slice %15 {offsets = [0, 0], sizes = [32, 64], strides = [1, 1]} : vector<32x128xf32> to vector<32x64xf32>
    %25 = vector.shape_cast %24 : vector<32x64xf32> to vector<2x16x64xf32>
    %26 = vector.extract_strided_slice %15 {offsets = [0, 64], sizes = [32, 64], strides = [1, 1]} : vector<32x128xf32> to vector<32x64xf32>
    %27 = vector.shape_cast %26 : vector<32x64xf32> to vector<2x16x64xf32>
    %28 = vector.shape_cast %25 : vector<2x16x64xf32> to vector<2x1x16x64xf32>
    %29 = vector.shape_cast %27 : vector<2x16x64xf32> to vector<2x1x16x64xf32>
    %30 = tpu.concatenate %28, %29 in 1 : vector<2x1x16x64xf32>, vector<2x1x16x64xf32> -> vector<2x2x16x64xf32>
    %31 = vector.shape_cast %30 : vector<2x2x16x64xf32> to vector<4x16x64xf32>
    %32 = vector.extract_strided_slice %19 {offsets = [0, 0], sizes = [32, 64], strides = [1, 1]} : vector<32x128xf32> to vector<32x64xf32>
    %33 = vector.shape_cast %32 : vector<32x64xf32> to vector<2x16x64xf32>
    %34 = vector.extract_strided_slice %19 {offsets = [0, 64], sizes = [32, 64], strides = [1, 1]} : vector<32x128xf32> to vector<32x64xf32>
    %35 = vector.shape_cast %34 : vector<32x64xf32> to vector<2x16x64xf32>
    %36 = vector.shape_cast %33 : vector<2x16x64xf32> to vector<2x1x16x64xf32>
    %37 = vector.shape_cast %35 : vector<2x16x64xf32> to vector<2x1x16x64xf32>
    %38 = tpu.concatenate %36, %37 in 1 : vector<2x1x16x64xf32>, vector<2x1x16x64xf32> -> vector<2x2x16x64xf32>
    %39 = vector.shape_cast %38 : vector<2x2x16x64xf32> to vector<4x16x64xf32>
    %40 = vector.extract_strided_slice %23 {offsets = [0, 0], sizes = [32, 64], strides = [1, 1]} : vector<32x128xf32> to vector<32x64xf32>
    %41 = vector.shape_cast %40 : vector<32x64xf32> to vector<2x16x64xf32>
    %42 = vector.extract_strided_slice %23 {offsets = [0, 64], sizes = [32, 64], strides = [1, 1]} : vector<32x128xf32> to vector<32x64xf32>
    %43 = vector.shape_cast %42 : vector<32x64xf32> to vector<2x16x64xf32>
    %44 = vector.shape_cast %41 : vector<2x16x64xf32> to vector<2x1x16x64xf32>
    %45 = vector.shape_cast %43 : vector<2x16x64xf32> to vector<2x1x16x64xf32>
    %46 = tpu.concatenate %44, %45 in 1 : vector<2x1x16x64xf32>, vector<2x1x16x64xf32> -> vector<2x2x16x64xf32>
    %47 = vector.shape_cast %46 : vector<2x2x16x64xf32> to vector<4x16x64xf32>
    "tpu.trace_start"() <{level = 10 : i32, message = "bqd,bkd->bqk"}> : () -> ()
    %cst_10 = arith.constant dense<0.000000e+00> : vector<4x16x16xf32>
    %48 = tpu.matmul %31, %39, %cst_10 {dimension_numbers = #tpu.dot_dimension_numbers<[2], [2], [1], [1], [0, 0, 0, 1, 1, 1], [0], [0]>} : vector<4x16x64xf32>, vector<4x16x64xf32>, vector<4x16x16xf32> -> vector<4x16x16xf32>
    "tpu.trace_stop"() : () -> ()
    %cst_11 = arith.constant dense<0xFF800000> : vector<4x16xf32>
    %49 = vector.multi_reduction <maximumf>, %48, %cst_11 [2] : vector<4x16x16xf32> to vector<4x16xf32>
    %50 = vector.shape_cast %49 : vector<4x16xf32> to vector<4x16x1xf32>
    %51 = vector.broadcast %50 : vector<4x16x1xf32> to vector<4x16x16xf32>
    %52 = arith.subf %48, %51 : vector<4x16x16xf32>
    %53 = math.exp %52 : vector<4x16x16xf32>
    %cst_12 = arith.constant dense<0.000000e+00> : vector<4x16xf32>
    %54 = vector.multi_reduction <add>, %53, %cst_12 [2] : vector<4x16x16xf32> to vector<4x16xf32>
    %55 = vector.shape_cast %54 : vector<4x16xf32> to vector<4x16x1xf32>
    "tpu.trace_start"() <{level = 10 : i32, message = "bqk,bkd->bqd"}> : () -> ()
    %cst_13 = arith.constant dense<0.000000e+00> : vector<4x16x64xf32>
    %56 = tpu.matmul %53, %47, %cst_13 {dimension_numbers = #tpu.dot_dimension_numbers<[2], [1], [1], [2], [0, 0, 0, 1, 1, 2], [0], [0]>} : vector<4x16x16xf32>, vector<4x16x64xf32>, vector<4x16x64xf32> -> vector<4x16x64xf32>
    "tpu.trace_stop"() : () -> ()
    %57 = tpu.reciprocal %55 {approx = true} : vector<4x16x1xf32> -> vector<4x16x1xf32>
    %58 = vector.broadcast %57 : vector<4x16x1xf32> to vector<4x16x64xf32>
    %59 = arith.mulf %56, %58 : vector<4x16x64xf32>
    %60 = vector.shape_cast %59 : vector<4x16x64xf32> to vector<2x2x16x64xf32>
    %61 = vector.extract_strided_slice %60 {offsets = [0, 0, 0, 0], sizes = [2, 1, 16, 64], strides = [1, 1, 1, 1]} : vector<2x2x16x64xf32> to vector<2x1x16x64xf32>
    %62 = vector.shape_cast %61 : vector<2x1x16x64xf32> to vector<2x16x64xf32>
    %63 = vector.extract_strided_slice %60 {offsets = [0, 1, 0, 0], sizes = [2, 1, 16, 64], strides = [1, 1, 1, 1]} : vector<2x2x16x64xf32> to vector<2x1x16x64xf32>
    %64 = vector.shape_cast %63 : vector<2x1x16x64xf32> to vector<2x16x64xf32>
    %65 = tpu.concatenate %62, %64 in 2 : vector<2x16x64xf32>, vector<2x16x64xf32> -> vector<2x16x128xf32>
    %66 = vector.shape_cast %65 : vector<2x16x128xf32> to vector<32x128xf32>
    %c0_14 = arith.constant 0 : index
    %c0_15 = arith.constant 0 : index
    %c0_16 = arith.constant 0 : index
    %67 = vector.load %arg7[%c0_14, %c0_15, %c0_16] : memref<1x128x128xf32, #tpu.memory_space<vmem>>, vector<1x128x128xf32>
    %68 = vector.shape_cast %67 : vector<1x128x128xf32> to vector<128x128xf32>
    %cst_17 = arith.constant dense<0.000000e+00> : vector<32x128xf32>
    %69 = tpu.matmul %66, %68, %cst_17 {dimension_numbers = #tpu.dot_dimension_numbers<[1], [0], [0], [1], [0, 0, 1, 1], [], []>} : vector<32x128xf32>, vector<128x128xf32>, vector<32x128xf32> -> vector<32x128xf32>
    %70 = vector.extract_strided_slice %4 {offsets = [3, 0], sizes = [1, 128], strides = [1, 1]} : vector<16x128xf32> to vector<1x128xf32>
    %71 = vector.broadcast %70 : vector<1x128xf32> to vector<32x128xf32>
    %72 = arith.addf %69, %71 : vector<32x128xf32>
    %73 = arith.addf %6, %72 : vector<32x128xf32>
    %cst_18 = arith.constant dense<0.000000e+00> : vector<32xf32>
    %74 = vector.multi_reduction <add>, %73, %cst_18 [1] : vector<32x128xf32> to vector<32xf32>
    %75 = vector.shape_cast %74 : vector<32xf32> to vector<32x1xf32>
    %cst_19 = arith.constant 1.280000e+02 : f32
    %76 = vector.broadcast %cst_19 : f32 to vector<32x1xf32>
    %77 = arith.divf %75, %76 : vector<32x1xf32>
    %78 = vector.broadcast %77 : vector<32x1xf32> to vector<32x128xf32>
    %79 = arith.subf %73, %78 : vector<32x128xf32>
    %80 = arith.mulf %79, %79 : vector<32x128xf32>
    %cst_20 = arith.constant dense<0.000000e+00> : vector<32xf32>
    %81 = vector.multi_reduction <add>, %80, %cst_20 [1] : vector<32x128xf32> to vector<32xf32>
    %82 = vector.shape_cast %81 : vector<32xf32> to vector<32x1xf32>
    %cst_21 = arith.constant 1.280000e+02 : f32
    %83 = vector.broadcast %cst_21 : f32 to vector<32x1xf32>
    %84 = arith.divf %82, %83 : vector<32x1xf32>
    %85 = vector.broadcast %77 : vector<32x1xf32> to vector<32x128xf32>
    %86 = arith.subf %73, %85 : vector<32x128xf32>
    %cst_22 = arith.constant 9.99999974E-6 : f32
    %87 = vector.broadcast %cst_22 : f32 to vector<32x1xf32>
    %88 = arith.addf %84, %87 : vector<32x1xf32>
    %89 = math.rsqrt %88 : vector<32x1xf32>
    %90 = vector.broadcast %89 : vector<32x1xf32> to vector<32x128xf32>
    %91 = arith.mulf %86, %90 : vector<32x128xf32>
    %92 = vector.extract_strided_slice %4 {offsets = [9, 0], sizes = [1, 128], strides = [1, 1]} : vector<16x128xf32> to vector<1x128xf32>
    %93 = vector.broadcast %92 : vector<1x128xf32> to vector<32x128xf32>
    %94 = arith.mulf %91, %93 : vector<32x128xf32>
    %95 = vector.extract_strided_slice %4 {offsets = [10, 0], sizes = [1, 128], strides = [1, 1]} : vector<16x128xf32> to vector<1x128xf32>
    %96 = vector.broadcast %95 : vector<1x128xf32> to vector<32x128xf32>
    %97 = arith.addf %94, %96 : vector<32x128xf32>
    %c0_23 = arith.constant 0 : index
    %c0_24 = arith.constant 0 : index
    %98 = vector.load %arg16[%c0_23, %c0_24] : memref<256x128xf32, #tpu.memory_space<vmem>>, vector<256x128xf32>
    %c0_25 = arith.constant 0 : index
    %c0_26 = arith.constant 0 : index
    %c0_27 = arith.constant 0 : index
    %99 = vector.load %arg8[%c0_25, %c0_26, %c0_27] : memref<1x128x128xf32, #tpu.memory_space<vmem>>, vector<1x128x128xf32>
    %100 = vector.shape_cast %99 : vector<1x128x128xf32> to vector<128x128xf32>
    %cst_28 = arith.constant dense<0.000000e+00> : vector<32x128xf32>
    %101 = tpu.matmul %97, %100, %cst_28 {dimension_numbers = #tpu.dot_dimension_numbers<[1], [0], [0], [1], [0, 0, 1, 1], [], []>} : vector<32x128xf32>, vector<128x128xf32>, vector<32x128xf32> -> vector<32x128xf32>
    %102 = vector.extract_strided_slice %4 {offsets = [4, 0], sizes = [1, 128], strides = [1, 1]} : vector<16x128xf32> to vector<1x128xf32>
    %103 = vector.broadcast %102 : vector<1x128xf32> to vector<32x128xf32>
    %104 = arith.addf %101, %103 : vector<32x128xf32>
    %cst_29 = arith.constant 1.250000e-01 : f32
    %105 = vector.broadcast %cst_29 : f32 to vector<32x128xf32>
    %106 = arith.mulf %104, %105 : vector<32x128xf32>
    %c0_30 = arith.constant 0 : index
    %c0_31 = arith.constant 0 : index
    %c0_32 = arith.constant 0 : index
    %107 = vector.load %arg9[%c0_30, %c0_31, %c0_32] : memref<1x128x256xf32, #tpu.memory_space<vmem>>, vector<1x128x256xf32>
    %108 = vector.shape_cast %107 : vector<1x128x256xf32> to vector<128x256xf32>
    %cst_33 = arith.constant dense<0.000000e+00> : vector<256x256xf32>
    %109 = tpu.matmul %98, %108, %cst_33 {dimension_numbers = #tpu.dot_dimension_numbers<[1], [0], [0], [1], [0, 0, 1, 1], [], []>} : vector<256x128xf32>, vector<128x256xf32>, vector<256x256xf32> -> vector<256x256xf32>
    %110 = vector.extract_strided_slice %109 {offsets = [0, 0], sizes = [256, 128], strides = [1, 1]} : vector<256x256xf32> to vector<256x128xf32>
    %111 = vector.extract_strided_slice %4 {offsets = [5, 0], sizes = [1, 128], strides = [1, 1]} : vector<16x128xf32> to vector<1x128xf32>
    %112 = vector.broadcast %111 : vector<1x128xf32> to vector<256x128xf32>
    %113 = arith.addf %110, %112 : vector<256x128xf32>
    %114 = vector.extract_strided_slice %109 {offsets = [0, 128], sizes = [256, 128], strides = [1, 1]} : vector<256x256xf32> to vector<256x128xf32>
    %115 = vector.extract_strided_slice %4 {offsets = [6, 0], sizes = [1, 128], strides = [1, 1]} : vector<16x128xf32> to vector<1x128xf32>
    %116 = vector.broadcast %115 : vector<1x128xf32> to vector<256x128xf32>
    %117 = arith.addf %114, %116 : vector<256x128xf32>
    %118 = vector.extract_strided_slice %106 {offsets = [0, 0], sizes = [32, 64], strides = [1, 1]} : vector<32x128xf32> to vector<32x64xf32>
    %119 = vector.shape_cast %118 : vector<32x64xf32> to vector<2x16x64xf32>
    %120 = vector.extract_strided_slice %106 {offsets = [0, 64], sizes = [32, 64], strides = [1, 1]} : vector<32x128xf32> to vector<32x64xf32>
    %121 = vector.shape_cast %120 : vector<32x64xf32> to vector<2x16x64xf32>
    %122 = vector.shape_cast %119 : vector<2x16x64xf32> to vector<2x1x16x64xf32>
    %123 = vector.shape_cast %121 : vector<2x16x64xf32> to vector<2x1x16x64xf32>
    %124 = tpu.concatenate %122, %123 in 1 : vector<2x1x16x64xf32>, vector<2x1x16x64xf32> -> vector<2x2x16x64xf32>
    %125 = vector.shape_cast %124 : vector<2x2x16x64xf32> to vector<4x16x64xf32>
    %126 = vector.extract_strided_slice %113 {offsets = [0, 0], sizes = [256, 64], strides = [1, 1]} : vector<256x128xf32> to vector<256x64xf32>
    %127 = vector.shape_cast %126 : vector<256x64xf32> to vector<2x128x64xf32>
    %128 = vector.extract_strided_slice %113 {offsets = [0, 64], sizes = [256, 64], strides = [1, 1]} : vector<256x128xf32> to vector<256x64xf32>
    %129 = vector.shape_cast %128 : vector<256x64xf32> to vector<2x128x64xf32>
    %130 = vector.shape_cast %127 : vector<2x128x64xf32> to vector<2x1x128x64xf32>
    %131 = vector.shape_cast %129 : vector<2x128x64xf32> to vector<2x1x128x64xf32>
    %132 = tpu.concatenate %130, %131 in 1 : vector<2x1x128x64xf32>, vector<2x1x128x64xf32> -> vector<2x2x128x64xf32>
    %133 = vector.shape_cast %132 : vector<2x2x128x64xf32> to vector<4x128x64xf32>
    %134 = vector.extract_strided_slice %117 {offsets = [0, 0], sizes = [256, 64], strides = [1, 1]} : vector<256x128xf32> to vector<256x64xf32>
    %135 = vector.shape_cast %134 : vector<256x64xf32> to vector<2x128x64xf32>
    %136 = vector.extract_strided_slice %117 {offsets = [0, 64], sizes = [256, 64], strides = [1, 1]} : vector<256x128xf32> to vector<256x64xf32>
    %137 = vector.shape_cast %136 : vector<256x64xf32> to vector<2x128x64xf32>
    %138 = vector.shape_cast %135 : vector<2x128x64xf32> to vector<2x1x128x64xf32>
    %139 = vector.shape_cast %137 : vector<2x128x64xf32> to vector<2x1x128x64xf32>
    %140 = tpu.concatenate %138, %139 in 1 : vector<2x1x128x64xf32>, vector<2x1x128x64xf32> -> vector<2x2x128x64xf32>
    %141 = vector.shape_cast %140 : vector<2x2x128x64xf32> to vector<4x128x64xf32>
    "tpu.trace_start"() <{level = 10 : i32, message = "bqd,bkd->bqk"}> : () -> ()
    %cst_34 = arith.constant dense<0.000000e+00> : vector<4x16x128xf32>
    %142 = tpu.matmul %125, %133, %cst_34 {dimension_numbers = #tpu.dot_dimension_numbers<[2], [2], [1], [1], [0, 0, 0, 1, 1, 1], [0], [0]>} : vector<4x16x64xf32>, vector<4x128x64xf32>, vector<4x16x128xf32> -> vector<4x16x128xf32>
    "tpu.trace_stop"() : () -> ()
    %143 = tpu.iota {dimensions = array<i32: 2>} : vector<1x1x128xi32>
    %c8_i32 = arith.constant 8 : i32
    %144 = vector.broadcast %c8_i32 : i32 to vector<1x1x128xi32>
    %145 = arith.cmpi slt, %143, %144 : vector<1x1x128xi32>
    %cst_35 = arith.constant -1.000000e+30 : f32
    %146 = vector.shape_cast %145 : vector<1x1x128xi1> to vector<1x1x128xi1>
    %147 = vector.broadcast %146 : vector<1x1x128xi1> to vector<4x16x128xi1>
    %148 = vector.broadcast %cst_35 : f32 to vector<4x16x128xf32>
    %149 = arith.select %147, %142, %148 : vector<4x16x128xi1>, vector<4x16x128xf32>
    %cst_36 = arith.constant dense<0xFF800000> : vector<4x16xf32>
    %150 = vector.multi_reduction <maximumf>, %149, %cst_36 [2] : vector<4x16x128xf32> to vector<4x16xf32>
    %151 = vector.shape_cast %150 : vector<4x16xf32> to vector<4x16x1xf32>
    %152 = vector.broadcast %151 : vector<4x16x1xf32> to vector<4x16x128xf32>
    %153 = arith.subf %149, %152 : vector<4x16x128xf32>
    %154 = math.exp %153 : vector<4x16x128xf32>
    %cst_37 = arith.constant dense<0.000000e+00> : vector<4x16xf32>
    %155 = vector.multi_reduction <add>, %154, %cst_37 [2] : vector<4x16x128xf32> to vector<4x16xf32>
    %156 = vector.shape_cast %155 : vector<4x16xf32> to vector<4x16x1xf32>
    "tpu.trace_start"() <{level = 10 : i32, message = "bqk,bkd->bqd"}> : () -> ()
    %cst_38 = arith.constant dense<0.000000e+00> : vector<4x16x64xf32>
    %157 = tpu.matmul %154, %141, %cst_38 {dimension_numbers = #tpu.dot_dimension_numbers<[2], [1], [1], [2], [0, 0, 0, 1, 1, 2], [0], [0]>} : vector<4x16x128xf32>, vector<4x128x64xf32>, vector<4x16x64xf32> -> vector<4x16x64xf32>
    "tpu.trace_stop"() : () -> ()
    %158 = tpu.reciprocal %156 {approx = true} : vector<4x16x1xf32> -> vector<4x16x1xf32>
    %159 = vector.broadcast %158 : vector<4x16x1xf32> to vector<4x16x64xf32>
    %160 = arith.mulf %157, %159 : vector<4x16x64xf32>
    %161 = vector.shape_cast %160 : vector<4x16x64xf32> to vector<2x2x16x64xf32>
    %162 = vector.extract_strided_slice %161 {offsets = [0, 0, 0, 0], sizes = [2, 1, 16, 64], strides = [1, 1, 1, 1]} : vector<2x2x16x64xf32> to vector<2x1x16x64xf32>
    %163 = vector.shape_cast %162 : vector<2x1x16x64xf32> to vector<2x16x64xf32>
    %164 = vector.extract_strided_slice %161 {offsets = [0, 1, 0, 0], sizes = [2, 1, 16, 64], strides = [1, 1, 1, 1]} : vector<2x2x16x64xf32> to vector<2x1x16x64xf32>
    %165 = vector.shape_cast %164 : vector<2x1x16x64xf32> to vector<2x16x64xf32>
    %166 = tpu.concatenate %163, %165 in 2 : vector<2x16x64xf32>, vector<2x16x64xf32> -> vector<2x16x128xf32>
    %167 = vector.shape_cast %166 : vector<2x16x128xf32> to vector<32x128xf32>
    %c0_39 = arith.constant 0 : index
    %c0_40 = arith.constant 0 : index
    %c0_41 = arith.constant 0 : index
    %168 = vector.load %arg10[%c0_39, %c0_40, %c0_41] : memref<1x128x128xf32, #tpu.memory_space<vmem>>, vector<1x128x128xf32>
    %169 = vector.shape_cast %168 : vector<1x128x128xf32> to vector<128x128xf32>
    %cst_42 = arith.constant dense<0.000000e+00> : vector<32x128xf32>
    %170 = tpu.matmul %167, %169, %cst_42 {dimension_numbers = #tpu.dot_dimension_numbers<[1], [0], [0], [1], [0, 0, 1, 1], [], []>} : vector<32x128xf32>, vector<128x128xf32>, vector<32x128xf32> -> vector<32x128xf32>
    %171 = vector.extract_strided_slice %4 {offsets = [7, 0], sizes = [1, 128], strides = [1, 1]} : vector<16x128xf32> to vector<1x128xf32>
    %172 = vector.broadcast %171 : vector<1x128xf32> to vector<32x128xf32>
    %173 = arith.addf %170, %172 : vector<32x128xf32>
    %174 = arith.addf %97, %173 : vector<32x128xf32>
    %cst_43 = arith.constant dense<0.000000e+00> : vector<32xf32>
    %175 = vector.multi_reduction <add>, %174, %cst_43 [1] : vector<32x128xf32> to vector<32xf32>
    %176 = vector.shape_cast %175 : vector<32xf32> to vector<32x1xf32>
    %cst_44 = arith.constant 1.280000e+02 : f32
    %177 = vector.broadcast %cst_44 : f32 to vector<32x1xf32>
    %178 = arith.divf %176, %177 : vector<32x1xf32>
    %179 = vector.broadcast %178 : vector<32x1xf32> to vector<32x128xf32>
    %180 = arith.subf %174, %179 : vector<32x128xf32>
    %181 = arith.mulf %180, %180 : vector<32x128xf32>
    %cst_45 = arith.constant dense<0.000000e+00> : vector<32xf32>
    %182 = vector.multi_reduction <add>, %181, %cst_45 [1] : vector<32x128xf32> to vector<32xf32>
    %183 = vector.shape_cast %182 : vector<32xf32> to vector<32x1xf32>
    %cst_46 = arith.constant 1.280000e+02 : f32
    %184 = vector.broadcast %cst_46 : f32 to vector<32x1xf32>
    %185 = arith.divf %183, %184 : vector<32x1xf32>
    %186 = vector.broadcast %178 : vector<32x1xf32> to vector<32x128xf32>
    %187 = arith.subf %174, %186 : vector<32x128xf32>
    %cst_47 = arith.constant 9.99999974E-6 : f32
    %188 = vector.broadcast %cst_47 : f32 to vector<32x1xf32>
    %189 = arith.addf %185, %188 : vector<32x1xf32>
    %190 = math.rsqrt %189 : vector<32x1xf32>
    %191 = vector.broadcast %190 : vector<32x1xf32> to vector<32x128xf32>
    %192 = arith.mulf %187, %191 : vector<32x128xf32>
    %193 = vector.extract_strided_slice %4 {offsets = [11, 0], sizes = [1, 128], strides = [1, 1]} : vector<16x128xf32> to vector<1x128xf32>
    %194 = vector.broadcast %193 : vector<1x128xf32> to vector<32x128xf32>
    %195 = arith.mulf %192, %194 : vector<32x128xf32>
    %196 = vector.extract_strided_slice %4 {offsets = [12, 0], sizes = [1, 128], strides = [1, 1]} : vector<16x128xf32> to vector<1x128xf32>
    %197 = vector.broadcast %196 : vector<1x128xf32> to vector<32x128xf32>
    %198 = arith.addf %195, %197 : vector<32x128xf32>
    %c0_48 = arith.constant 0 : index
    %c0_49 = arith.constant 0 : index
    %c0_50 = arith.constant 0 : index
    %199 = vector.load %arg11[%c0_48, %c0_49, %c0_50] : memref<1x128x256xf32, #tpu.memory_space<vmem>>, vector<1x128x256xf32>
    %200 = vector.shape_cast %199 : vector<1x128x256xf32> to vector<128x256xf32>
    %cst_51 = arith.constant dense<0.000000e+00> : vector<32x256xf32>
    %201 = tpu.matmul %198, %200, %cst_51 {dimension_numbers = #tpu.dot_dimension_numbers<[1], [0], [0], [1], [0, 0, 1, 1], [], []>} : vector<32x128xf32>, vector<128x256xf32>, vector<32x256xf32> -> vector<32x256xf32>
    %c0_52 = arith.constant 0 : index
    %c0_53 = arith.constant 0 : index
    %c0_54 = arith.constant 0 : index
    %202 = vector.load %arg13[%c0_52, %c0_53, %c0_54] : memref<1x1x256xf32, #tpu.memory_space<vmem>>, vector<1x1x256xf32>
    %203 = vector.shape_cast %202 : vector<1x1x256xf32> to vector<1x256xf32>
    %204 = vector.broadcast %203 : vector<1x256xf32> to vector<32x256xf32>
    %205 = arith.addf %201, %204 : vector<32x256xf32>
    %cst_55 = arith.constant 0.000000e+00 : f32
    %206 = vector.broadcast %cst_55 : f32 to vector<32x256xf32>
    %207 = arith.maximumf %205, %206 : vector<32x256xf32>
    %c0_56 = arith.constant 0 : index
    %c0_57 = arith.constant 0 : index
    %c0_58 = arith.constant 0 : index
    %208 = vector.load %arg12[%c0_56, %c0_57, %c0_58] : memref<1x256x128xf32, #tpu.memory_space<vmem>>, vector<1x256x128xf32>
    %209 = vector.shape_cast %208 : vector<1x256x128xf32> to vector<256x128xf32>
    %cst_59 = arith.constant dense<0.000000e+00> : vector<32x128xf32>
    %210 = tpu.matmul %207, %209, %cst_59 {dimension_numbers = #tpu.dot_dimension_numbers<[1], [0], [0], [1], [0, 0, 1, 1], [], []>} : vector<32x256xf32>, vector<256x128xf32>, vector<32x128xf32> -> vector<32x128xf32>
    %211 = vector.extract_strided_slice %4 {offsets = [8, 0], sizes = [1, 128], strides = [1, 1]} : vector<16x128xf32> to vector<1x128xf32>
    %212 = vector.broadcast %211 : vector<1x128xf32> to vector<32x128xf32>
    %213 = arith.addf %210, %212 : vector<32x128xf32>
    %214 = arith.addf %198, %213 : vector<32x128xf32>
    %cst_60 = arith.constant dense<0.000000e+00> : vector<32xf32>
    %215 = vector.multi_reduction <add>, %214, %cst_60 [1] : vector<32x128xf32> to vector<32xf32>
    %216 = vector.shape_cast %215 : vector<32xf32> to vector<32x1xf32>
    %cst_61 = arith.constant 1.280000e+02 : f32
    %217 = vector.broadcast %cst_61 : f32 to vector<32x1xf32>
    %218 = arith.divf %216, %217 : vector<32x1xf32>
    %219 = vector.broadcast %218 : vector<32x1xf32> to vector<32x128xf32>
    %220 = arith.subf %214, %219 : vector<32x128xf32>
    %221 = arith.mulf %220, %220 : vector<32x128xf32>
    %cst_62 = arith.constant dense<0.000000e+00> : vector<32xf32>
    %222 = vector.multi_reduction <add>, %221, %cst_62 [1] : vector<32x128xf32> to vector<32xf32>
    %223 = vector.shape_cast %222 : vector<32xf32> to vector<32x1xf32>
    %cst_63 = arith.constant 1.280000e+02 : f32
    %224 = vector.broadcast %cst_63 : f32 to vector<32x1xf32>
    %225 = arith.divf %223, %224 : vector<32x1xf32>
    %226 = vector.broadcast %218 : vector<32x1xf32> to vector<32x128xf32>
    %227 = arith.subf %214, %226 : vector<32x128xf32>
    %cst_64 = arith.constant 9.99999974E-6 : f32
    %228 = vector.broadcast %cst_64 : f32 to vector<32x1xf32>
    %229 = arith.addf %225, %228 : vector<32x1xf32>
    %230 = math.rsqrt %229 : vector<32x1xf32>
    %231 = vector.broadcast %230 : vector<32x1xf32> to vector<32x128xf32>
    %232 = arith.mulf %227, %231 : vector<32x128xf32>
    %233 = vector.extract_strided_slice %4 {offsets = [13, 0], sizes = [1, 128], strides = [1, 1]} : vector<16x128xf32> to vector<1x128xf32>
    %234 = vector.broadcast %233 : vector<1x128xf32> to vector<32x128xf32>
    %235 = arith.mulf %232, %234 : vector<32x128xf32>
    %236 = vector.extract_strided_slice %4 {offsets = [14, 0], sizes = [1, 128], strides = [1, 1]} : vector<16x128xf32> to vector<1x128xf32>
    %237 = vector.broadcast %236 : vector<1x128xf32> to vector<32x128xf32>
    %238 = arith.addf %235, %237 : vector<32x128xf32>
    %239 = vector.shape_cast %238 : vector<32x128xf32> to vector<2x16x128xf32>
    %c0_65 = arith.constant 0 : index
    %c0_66 = arith.constant 0 : index
    %c0_67 = arith.constant 0 : index
    %240 = vector.load %arg15[%c0_65, %c0_66, %c0_67] : memref<2x16x128xf32, #tpu.memory_space<vmem>>, vector<2x16x128xf32>
    tpu.vector_store %arg15[%c0_65, %c0_66, %c0_67], %239 {strides = array<i32>} : memref<2x16x128xf32, #tpu.memory_space<vmem>>, vector<2x16x128xf32>,
    return
  }
  func.func @transform_0(%arg0: i32, %arg1: i32) -> (i32, i32, i32) {
    %c0_i32 = arith.constant 0 : i32
    %c0_i32_0 = arith.constant 0 : i32
    %c0_i32_1 = arith.constant 0 : i32
    return %arg0, %c0_i32, %c0_i32_0 : i32, i32, i32
  }
  func.func @transform_1(%arg0: i32, %arg1: i32) -> (i32, i32, i32) {
    %c0_i32 = arith.constant 0 : i32
    %c0_i32_0 = arith.constant 0 : i32
    %c0_i32_1 = arith.constant 0 : i32
    %c0_i32_2 = arith.constant 0 : i32
    return %c0_i32, %c0_i32_0, %c0_i32_1 : i32, i32, i32
  }
  func.func @transform_2(%arg0: i32, %arg1: i32) -> (i32, i32) {
    %c0_i32 = arith.constant 0 : i32
    %c0_i32_0 = arith.constant 0 : i32
    %c0_i32_1 = arith.constant 0 : i32
    return %c0_i32, %c0_i32_0 : i32, i32
  }
  func.func @transform_3(%arg0: i32, %arg1: i32) -> (i32, i32) {
    %c0_i32 = arith.constant 0 : i32
    %c0_i32_0 = arith.constant 0 : i32
    %c0_i32_1 = arith.constant 0 : i32
    return %c0_i32, %c0_i32_0 : i32, i32
  }
  func.func @transform_4(%arg0: i32, %arg1: i32) -> (i32, i32, i32) {
    %c0_i32 = arith.constant 0 : i32
    %c0_i32_0 = arith.constant 0 : i32
    %c0_i32_1 = arith.constant 0 : i32
    return %arg1, %c0_i32, %c0_i32_0 : i32, i32, i32
  }
  func.func @transform_5(%arg0: i32, %arg1: i32) -> (i32, i32, i32) {
    %c0_i32 = arith.constant 0 : i32
    %c0_i32_0 = arith.constant 0 : i32
    %c0_i32_1 = arith.constant 0 : i32
    return %arg1, %c0_i32, %c0_i32_0 : i32, i32, i32
  }
  func.func @transform_6(%arg0: i32, %arg1: i32) -> (i32, i32, i32) {
    %c0_i32 = arith.constant 0 : i32
    %c0_i32_0 = arith.constant 0 : i32
    %c0_i32_1 = arith.constant 0 : i32
    return %arg1, %c0_i32, %c0_i32_0 : i32, i32, i32
  }
  func.func @transform_7(%arg0: i32, %arg1: i32) -> (i32, i32, i32) {
    %c0_i32 = arith.constant 0 : i32
    %c0_i32_0 = arith.constant 0 : i32
    %c0_i32_1 = arith.constant 0 : i32
    return %arg1, %c0_i32, %c0_i32_0 : i32, i32, i32
  }
  func.func @transform_8(%arg0: i32, %arg1: i32) -> (i32, i32, i32) {
    %c0_i32 = arith.constant 0 : i32
    %c0_i32_0 = arith.constant 0 : i32
    %c0_i32_1 = arith.constant 0 : i32
    return %arg1, %c0_i32, %c0_i32_0 : i32, i32, i32
  }
  func.func @transform_9(%arg0: i32, %arg1: i32) -> (i32, i32, i32) {
    %c0_i32 = arith.constant 0 : i32
    %c0_i32_0 = arith.constant 0 : i32
    %c0_i32_1 = arith.constant 0 : i32
    return %arg1, %c0_i32, %c0_i32_0 : i32, i32, i32
  }
  func.func @transform_10(%arg0: i32, %arg1: i32) -> (i32, i32, i32) {
    %c0_i32 = arith.constant 0 : i32
    %c0_i32_0 = arith.constant 0 : i32
    %c0_i32_1 = arith.constant 0 : i32
    return %arg1, %c0_i32, %c0_i32_0 : i32, i32, i32
  }
  func.func @transform_11(%arg0: i32, %arg1: i32) -> (i32, i32, i32) {
    %c0_i32 = arith.constant 0 : i32
    %c0_i32_0 = arith.constant 0 : i32
    %c0_i32_1 = arith.constant 0 : i32
    return %arg1, %c0_i32, %c0_i32_0 : i32, i32, i32
  }
  func.func @transform_12(%arg0: i32, %arg1: i32) -> (i32, i32, i32) {
    %c0_i32 = arith.constant 0 : i32
    %c0_i32_0 = arith.constant 0 : i32
    %c0_i32_1 = arith.constant 0 : i32
    return %arg1, %c0_i32, %c0_i32_0 : i32, i32, i32
  }
  func.func @transform_13(%arg0: i32, %arg1: i32) -> (i32, i32, i32) {
    %c0_i32 = arith.constant 0 : i32
    %c0_i32_0 = arith.constant 0 : i32
    %c0_i32_1 = arith.constant 0 : i32
    return %arg0, %c0_i32, %c0_i32_0 : i32, i32, i32
  }
}

module attributes {stable_mosaic.version = 11 : i64} {
  func.func @image2token_kernel(%arg0: i32, %arg1: i32, %arg2: memref<2x128x64xf32, #tpu.memory_space<vmem>>, %arg3: memref<1x16x128xf32, #tpu.memory_space<vmem>>, %arg4: memref<64x128xf32, #tpu.memory_space<vmem>>, %arg5: memref<1x128xf32, #tpu.memory_space<vmem>>, %arg6: memref<1x128x384xf32, #tpu.memory_space<vmem>>, %arg7: memref<1x128x128xf32, #tpu.memory_space<vmem>>, %arg8: memref<1x128x128xf32, #tpu.memory_space<vmem>>, %arg9: memref<1x128x256xf32, #tpu.memory_space<vmem>>, %arg10: memref<1x128x128xf32, #tpu.memory_space<vmem>>, %arg11: memref<1x128x256xf32, #tpu.memory_space<vmem>>, %arg12: memref<1x256x128xf32, #tpu.memory_space<vmem>>, %arg13: memref<1x1x256xf32, #tpu.memory_space<vmem>>, %arg14: memref<1x16x128xf32, #tpu.memory_space<vmem>>, %arg15: memref<2x16x128xf32, #tpu.memory_space<vmem>>, %arg16: memref<256x128xf32, #tpu.memory_space<vmem>>) attributes {dimension_semantics = [#tpu.dimension_semantics<parallel>, #tpu.dimension_semantics<arbitrary>], iteration_bounds = array<i64: 1, 3>, scalar_prefetch = 0 : i64, scratch_operands = 1 : i64, tpu.core_type = #tpu.core_type<tc>, window_params = [{transform_indices = @transform_0, window_bounds = array<i64: 2, 128, 64>}, {pipeline_mode = #tpu.pipeline_mode<synchronous>, transform_indices = @transform_1, window_bounds = array<i64: 1, 16, 128>}, {pipeline_mode = #tpu.pipeline_mode<synchronous>, transform_indices = @transform_2, window_bounds = array<i64: 64, 128>}, {pipeline_mode = #tpu.pipeline_mode<synchronous>, transform_indices = @transform_3, window_bounds = array<i64: 1, 128>}, {transform_indices = @transform_4, window_bounds = array<i64: 1, 128, 384>}, {transform_indices = @transform_5, window_bounds = array<i64: 1, 128, 128>}, {transform_indices = @transform_6, window_bounds = array<i64: 1, 128, 128>}, {transform_indices = @transform_7, window_bounds = array<i64: 1, 128, 256>}, {transform_indices = @transform_8, window_bounds = array<i64: 1, 128, 128>}, {transform_indices = @transform_9, window_bounds = array<i64: 1, 128, 256>}, {transform_indices = @transform_10, window_bounds = array<i64: 1, 256, 128>}, {transform_indices = @transform_11, window_bounds = array<i64: 1, 1, 256>}, {transform_indices = @transform_12, window_bounds = array<i64: 1, 16, 128>}, {transform_indices = @transform_13, window_bounds = array<i64: 2, 16, 128>}]} {
    %c0_i32 = arith.constant 0 : i32
    %0 = arith.cmpi eq, %arg1, %c0_i32 : i32
    %1 = arith.extui %0 : i1 to i32
    %c0_i32_0 = arith.constant 0 : i32
    %2 = arith.cmpi ne, %1, %c0_i32_0 : i32
    scf.if %2 {
      %c0_68 = arith.constant 0 : index
      %c0_69 = arith.constant 0 : index
      %c0_70 = arith.constant 0 : index
      %241 = vector.load %arg2[%c0_68, %c0_69, %c0_70] : memref<2x128x64xf32, #tpu.memory_space<vmem>>, vector<2x128x64xf32>
      %242 = vector.shape_cast %241 : vector<2x128x64xf32> to vector<256x64xf32>
      %c0_71 = arith.constant 0 : index
      %c0_72 = arith.constant 0 : index
      %243 = vector.load %arg4[%c0_71, %c0_72] : memref<64x128xf32, #tpu.memory_space<vmem>>, vector<64x128xf32>
      %cst_73 = arith.constant dense<0.000000e+00> : vector<256x128xf32>
      %244 = tpu.matmul %242, %243, %cst_73 {dimension_numbers = #tpu.dot_dimension_numbers<[1], [0], [0], [1], [0, 0, 1, 1], [], []>} : vector<256x64xf32>, vector<64x128xf32>, vector<256x128xf32> -> vector<256x128xf32>
      %c0_74 = arith.constant 0 : index
      %c0_75 = arith.constant 0 : index
      %245 = vector.load %arg5[%c0_74, %c0_75] : memref<1x128xf32, #tpu.memory_space<vmem>>, vector<1x128xf32>
      %246 = vector.broadcast %245 : vector<1x128xf32> to vector<256x128xf32>
      %247 = arith.addf %244, %246 : vector<256x128xf32>
      %c0_76 = arith.constant 0 : index
      %c0_77 = arith.constant 0 : index
      %248 = vector.load %arg16[%c0_76, %c0_77] : memref<256x128xf32, #tpu.memory_space<vmem>>, vector<256x128xf32>
      tpu.vector_store %arg16[%c0_76, %c0_77], %247 {strides = array<i32>} : memref<256x128xf32, #tpu.memory_space<vmem>>, vector<256x128xf32>,
      %c0_78 = arith.constant 0 : index
      %c0_79 = arith.constant 0 : index
      %c0_80 = arith.constant 0 : index
      %249 = vector.load %arg3[%c0_78, %c0_79, %c0_80] : memref<1x16x128xf32, #tpu.memory_space<vmem>>, vector<1x16x128xf32>
      %250 = vector.shape_cast %249 : vector<1x16x128xf32> to vector<1x16x128xf32>
      %251 = vector.broadcast %250 : vector<1x16x128xf32> to vector<2x16x128xf32>
      %c0_81 = arith.constant 0 : index
      %c0_82 = arith.constant 0 : index
      %c0_83 = arith.constant 0 : index
      %252 = vector.load %arg15[%c0_81, %c0_82, %c0_83] : memref<2x16x128xf32, #tpu.memory_space<vmem>>, vector<2x16x128xf32>
      tpu.vector_store %arg15[%c0_81, %c0_82, %c0_83], %251 {strides = array<i32>} : memref<2x16x128xf32, #tpu.memory_space<vmem>>, vector<2x16x128xf32>,
    } else {
    }
    %c0 = arith.constant 0 : index
    %c0_1 = arith.constant 0 : index
    %c0_2 = arith.constant 0 : index
    %3 = vector.load %arg14[%c0, %c0_1, %c0_2] : memref<1x16x128xf32, #tpu.memory_space<vmem>>, vector<1x16x128xf32>
    %4 = vector.shape_cast %3 : vector<1x16x128xf32> to vector<16x128xf32>
    %c0_3 = arith.constant 0 : index
    %c0_4 = arith.constant 0 : index
    %c0_5 = arith.constant 0 : index
    %5 = vector.load %arg15[%c0_3, %c0_4, %c0_5] : memref<2x16x128xf32, #tpu.memory_space<vmem>>, vector<2x16x128xf32>
    %6 = vector.shape_cast %5 : vector<2x16x128xf32> to vector<32x128xf32>
    %c0_6 = arith.constant 0 : index
    %c0_7 = arith.constant 0 : index
    %c0_8 = arith.constant 0 : index
    %7 = vector.load %arg6[%c0_6, %c0_7, %c0_8] : memref<1x128x384xf32, #tpu.memory_space<vmem>>, vector<1x128x384xf32>
    %8 = vector.shape_cast %7 : vector<1x128x384xf32> to vector<128x384xf32>
    %cst = arith.constant dense<0.000000e+00> : vector<32x384xf32>
    %9 = tpu.matmul %6, %8, %cst {dimension_numbers = #tpu.dot_dimension_numbers<[1], [0], [0], [1], [0, 0, 1, 1], [], []>} : vector<32x128xf32>, vector<128x384xf32>, vector<32x384xf32> -> vector<32x384xf32>
    %10 = vector.extract_strided_slice %9 {offsets = [0, 0], sizes = [32, 128], strides = [1, 1]} : vector<32x384xf32> to vector<32x128xf32>
    %11 = vector.extract_strided_slice %4 {offsets = [0, 0], sizes = [1, 128], strides = [1, 1]} : vector<16x128xf32> to vector<1x128xf32>
    %12 = vector.broadcast %11 : vector<1x128xf32> to vector<32x128xf32>
    %13 = arith.addf %10, %12 : vector<32x128xf32>
    %cst_9 = arith.constant 1.250000e-01 : f32
    %14 = vector.broadcast %cst_9 : f32 to vector<32x128xf32>
    %15 = arith.mulf %13, %14 : vector<32x128xf32>
    %16 = vector.extract_strided_slice %9 {offsets = [0, 128], sizes = [32, 128], strides = [1, 1]} : vector<32x384xf32> to vector<32x128xf32>
    %17 = vector.extract_strided_slice %4 {offsets = [1, 0], sizes = [1, 128], strides = [1, 1]} : vector<16x128xf32> to vector<1x128xf32>
    %18 = vector.broadcast %17 : vector<1x128xf32> to vector<32x128xf32>
    %19 = arith.addf %16, %18 : vector<32x128xf32>
    %20 = vector.extract_strided_slice %9 {offsets = [0, 256], sizes = [32, 128], strides = [1, 1]} : vector<32x384xf32> to vector<32x128xf32>
    %21 = vector.extract_strided_slice %4 {offsets = [2, 0], sizes = [1, 128], strides = [1, 1]} : vector<16x128xf32> to vector<1x128xf32>
    %22 = vector.broadcast %21 : vector<1x128xf32> to vector<32x128xf32>
    %23 = arith.addf %20, %22 : vector<32x128xf32>
    %24 = vector.extract_strided_slice %15 {offsets = [0, 0], sizes = [32, 64], strides = [1, 1]} : vector<32x128xf32> to vector<32x64xf32>
    %25 = vector.shape_cast %24 : vector<32x64xf32> to vector<2x16x64xf32>
    %26 = vector.extract_strided_slice %15 {offsets = [0, 64], sizes = [32, 64], strides = [1, 1]} : vector<32x128xf32> to vector<32x64xf32>
    %27 = vector.shape_cast %26 : vector<32x64xf32> to vector<2x16x64xf32>
    %28 = vector.shape_cast %25 : vector<2x16x64xf32> to vector<2x1x16x64xf32>
    %29 = vector.shape_cast %27 : vector<2x16x64xf32> to vector<2x1x16x64xf32>
    %30 = tpu.concatenate %28, %29 in 1 : vector<2x1x16x64xf32>, vector<2x1x16x64xf32> -> vector<2x2x16x64xf32>
    %31 = vector.shape_cast %30 : vector<2x2x16x64xf32> to vector<4x16x64xf32>
    %32 = vector.extract_strided_slice %19 {offsets = [0, 0], sizes = [32, 64], strides = [1, 1]} : vector<32x128xf32> to vector<32x64xf32>
    %33 = vector.shape_cast %32 : vector<32x64xf32> to vector<2x16x64xf32>
    %34 = vector.extract_strided_slice %19 {offsets = [0, 64], sizes = [32, 64], strides = [1, 1]} : vector<32x128xf32> to vector<32x64xf32>
    %35 = vector.shape_cast %34 : vector<32x64xf32> to vector<2x16x64xf32>
    %36 = vector.shape_cast %33 : vector<2x16x64xf32> to vector<2x1x16x64xf32>
    %37 = vector.shape_cast %35 : vector<2x16x64xf32> to vector<2x1x16x64xf32>
    %38 = tpu.concatenate %36, %37 in 1 : vector<2x1x16x64xf32>, vector<2x1x16x64xf32> -> vector<2x2x16x64xf32>
    %39 = vector.shape_cast %38 : vector<2x2x16x64xf32> to vector<4x16x64xf32>
    %40 = vector.extract_strided_slice %23 {offsets = [0, 0], sizes = [32, 64], strides = [1, 1]} : vector<32x128xf32> to vector<32x64xf32>
    %41 = vector.shape_cast %40 : vector<32x64xf32> to vector<2x16x64xf32>
    %42 = vector.extract_strided_slice %23 {offsets = [0, 64], sizes = [32, 64], strides = [1, 1]} : vector<32x128xf32> to vector<32x64xf32>
    %43 = vector.shape_cast %42 : vector<32x64xf32> to vector<2x16x64xf32>
    %44 = vector.shape_cast %41 : vector<2x16x64xf32> to vector<2x1x16x64xf32>
    %45 = vector.shape_cast %43 : vector<2x16x64xf32> to vector<2x1x16x64xf32>
    %46 = tpu.concatenate %44, %45 in 1 : vector<2x1x16x64xf32>, vector<2x1x16x64xf32> -> vector<2x2x16x64xf32>
    %47 = vector.shape_cast %46 : vector<2x2x16x64xf32> to vector<4x16x64xf32>
    "tpu.trace_start"() <{level = 10 : i32, message = "bqd,bkd->bqk"}> : () -> ()
    %cst_10 = arith.constant dense<0.000000e+00> : vector<4x16x16xf32>
    %48 = tpu.matmul %31, %39, %cst_10 {dimension_numbers = #tpu.dot_dimension_numbers<[2], [2], [1], [1], [0, 0, 0, 1, 1, 1], [0], [0]>} : vector<4x16x64xf32>, vector<4x16x64xf32>, vector<4x16x16xf32> -> vector<4x16x16xf32>
    "tpu.trace_stop"() : () -> ()
    %cst_11 = arith.constant dense<0xFF800000> : vector<4x16xf32>
    %49 = vector.multi_reduction <maximumf>, %48, %cst_11 [2] : vector<4x16x16xf32> to vector<4x16xf32>
    %50 = vector.shape_cast %49 : vector<4x16xf32> to vector<4x16x1xf32>
    %51 = vector.broadcast %50 : vector<4x16x1xf32> to vector<4x16x16xf32>
    %52 = arith.subf %48, %51 : vector<4x16x16xf32>
    %53 = math.exp %52 : vector<4x16x16xf32>
    %cst_12 = arith.constant dense<0.000000e+00> : vector<4x16xf32>
    %54 = vector.multi_reduction <add>, %53, %cst_12 [2] : vector<4x16x16xf32> to vector<4x16xf32>
    %55 = vector.shape_cast %54 : vector<4x16xf32> to vector<4x16x1xf32>
    "tpu.trace_start"() <{level = 10 : i32, message = "bqk,bkd->bqd"}> : () -> ()
    %cst_13 = arith.constant dense<0.000000e+00> : vector<4x16x64xf32>
    %56 = tpu.matmul %53, %47, %cst_13 {dimension_numbers = #tpu.dot_dimension_numbers<[2], [1], [1], [2], [0, 0, 0, 1, 1, 2], [0], [0]>} : vector<4x16x16xf32>, vector<4x16x64xf32>, vector<4x16x64xf32> -> vector<4x16x64xf32>
    "tpu.trace_stop"() : () -> ()
    %57 = tpu.reciprocal %55 {approx = true} : vector<4x16x1xf32> -> vector<4x16x1xf32>
    %58 = vector.broadcast %57 : vector<4x16x1xf32> to vector<4x16x64xf32>
    %59 = arith.mulf %56, %58 : vector<4x16x64xf32>
    %60 = vector.shape_cast %59 : vector<4x16x64xf32> to vector<2x2x16x64xf32>
    %61 = vector.extract_strided_slice %60 {offsets = [0, 0, 0, 0], sizes = [2, 1, 16, 64], strides = [1, 1, 1, 1]} : vector<2x2x16x64xf32> to vector<2x1x16x64xf32>
    %62 = vector.shape_cast %61 : vector<2x1x16x64xf32> to vector<2x16x64xf32>
    %63 = vector.extract_strided_slice %60 {offsets = [0, 1, 0, 0], sizes = [2, 1, 16, 64], strides = [1, 1, 1, 1]} : vector<2x2x16x64xf32> to vector<2x1x16x64xf32>
    %64 = vector.shape_cast %63 : vector<2x1x16x64xf32> to vector<2x16x64xf32>
    %65 = tpu.concatenate %62, %64 in 2 : vector<2x16x64xf32>, vector<2x16x64xf32> -> vector<2x16x128xf32>
    %66 = vector.shape_cast %65 : vector<2x16x128xf32> to vector<32x128xf32>
    %c0_14 = arith.constant 0 : index
    %c0_15 = arith.constant 0 : index
    %c0_16 = arith.constant 0 : index
    %67 = vector.load %arg7[%c0_14, %c0_15, %c0_16] : memref<1x128x128xf32, #tpu.memory_space<vmem>>, vector<1x128x128xf32>
    %68 = vector.shape_cast %67 : vector<1x128x128xf32> to vector<128x128xf32>
    %cst_17 = arith.constant dense<0.000000e+00> : vector<32x128xf32>
    %69 = tpu.matmul %66, %68, %cst_17 {dimension_numbers = #tpu.dot_dimension_numbers<[1], [0], [0], [1], [0, 0, 1, 1], [], []>} : vector<32x128xf32>, vector<128x128xf32>, vector<32x128xf32> -> vector<32x128xf32>
    %70 = vector.extract_strided_slice %4 {offsets = [3, 0], sizes = [1, 128], strides = [1, 1]} : vector<16x128xf32> to vector<1x128xf32>
    %71 = vector.broadcast %70 : vector<1x128xf32> to vector<32x128xf32>
    %72 = arith.addf %69, %71 : vector<32x128xf32>
    %73 = arith.addf %6, %72 : vector<32x128xf32>
    %cst_18 = arith.constant dense<0.000000e+00> : vector<32xf32>
    %74 = vector.multi_reduction <add>, %73, %cst_18 [1] : vector<32x128xf32> to vector<32xf32>
    %75 = vector.shape_cast %74 : vector<32xf32> to vector<32x1xf32>
    %cst_19 = arith.constant 1.280000e+02 : f32
    %76 = vector.broadcast %cst_19 : f32 to vector<32x1xf32>
    %77 = arith.divf %75, %76 : vector<32x1xf32>
    %78 = vector.broadcast %77 : vector<32x1xf32> to vector<32x128xf32>
    %79 = arith.subf %73, %78 : vector<32x128xf32>
    %80 = arith.mulf %79, %79 : vector<32x128xf32>
    %cst_20 = arith.constant dense<0.000000e+00> : vector<32xf32>
    %81 = vector.multi_reduction <add>, %80, %cst_20 [1] : vector<32x128xf32> to vector<32xf32>
    %82 = vector.shape_cast %81 : vector<32xf32> to vector<32x1xf32>
    %cst_21 = arith.constant 1.280000e+02 : f32
    %83 = vector.broadcast %cst_21 : f32 to vector<32x1xf32>
    %84 = arith.divf %82, %83 : vector<32x1xf32>
    %85 = vector.broadcast %77 : vector<32x1xf32> to vector<32x128xf32>
    %86 = arith.subf %73, %85 : vector<32x128xf32>
    %cst_22 = arith.constant 9.99999974E-6 : f32
    %87 = vector.broadcast %cst_22 : f32 to vector<32x1xf32>
    %88 = arith.addf %84, %87 : vector<32x1xf32>
    %89 = math.rsqrt %88 : vector<32x1xf32>
    %90 = vector.broadcast %89 : vector<32x1xf32> to vector<32x128xf32>
    %91 = arith.mulf %86, %90 : vector<32x128xf32>
    %92 = vector.extract_strided_slice %4 {offsets = [9, 0], sizes = [1, 128], strides = [1, 1]} : vector<16x128xf32> to vector<1x128xf32>
    %93 = vector.broadcast %92 : vector<1x128xf32> to vector<32x128xf32>
    %94 = arith.mulf %91, %93 : vector<32x128xf32>
    %95 = vector.extract_strided_slice %4 {offsets = [10, 0], sizes = [1, 128], strides = [1, 1]} : vector<16x128xf32> to vector<1x128xf32>
    %96 = vector.broadcast %95 : vector<1x128xf32> to vector<32x128xf32>
    %97 = arith.addf %94, %96 : vector<32x128xf32>
    %c0_23 = arith.constant 0 : index
    %c0_24 = arith.constant 0 : index
    %98 = vector.load %arg16[%c0_23, %c0_24] : memref<256x128xf32, #tpu.memory_space<vmem>>, vector<256x128xf32>
    %c0_25 = arith.constant 0 : index
    %c0_26 = arith.constant 0 : index
    %c0_27 = arith.constant 0 : index
    %99 = vector.load %arg8[%c0_25, %c0_26, %c0_27] : memref<1x128x128xf32, #tpu.memory_space<vmem>>, vector<1x128x128xf32>
    %100 = vector.shape_cast %99 : vector<1x128x128xf32> to vector<128x128xf32>
    %cst_28 = arith.constant dense<0.000000e+00> : vector<32x128xf32>
    %101 = tpu.matmul %97, %100, %cst_28 {dimension_numbers = #tpu.dot_dimension_numbers<[1], [0], [0], [1], [0, 0, 1, 1], [], []>} : vector<32x128xf32>, vector<128x128xf32>, vector<32x128xf32> -> vector<32x128xf32>
    %102 = vector.extract_strided_slice %4 {offsets = [4, 0], sizes = [1, 128], strides = [1, 1]} : vector<16x128xf32> to vector<1x128xf32>
    %103 = vector.broadcast %102 : vector<1x128xf32> to vector<32x128xf32>
    %104 = arith.addf %101, %103 : vector<32x128xf32>
    %cst_29 = arith.constant 1.250000e-01 : f32
    %105 = vector.broadcast %cst_29 : f32 to vector<32x128xf32>
    %106 = arith.mulf %104, %105 : vector<32x128xf32>
    %c0_30 = arith.constant 0 : index
    %c0_31 = arith.constant 0 : index
    %c0_32 = arith.constant 0 : index
    %107 = vector.load %arg9[%c0_30, %c0_31, %c0_32] : memref<1x128x256xf32, #tpu.memory_space<vmem>>, vector<1x128x256xf32>
    %108 = vector.shape_cast %107 : vector<1x128x256xf32> to vector<128x256xf32>
    %cst_33 = arith.constant dense<0.000000e+00> : vector<256x256xf32>
    %109 = tpu.matmul %98, %108, %cst_33 {dimension_numbers = #tpu.dot_dimension_numbers<[1], [0], [0], [1], [0, 0, 1, 1], [], []>} : vector<256x128xf32>, vector<128x256xf32>, vector<256x256xf32> -> vector<256x256xf32>
    %110 = vector.extract_strided_slice %109 {offsets = [0, 0], sizes = [256, 128], strides = [1, 1]} : vector<256x256xf32> to vector<256x128xf32>
    %111 = vector.extract_strided_slice %4 {offsets = [5, 0], sizes = [1, 128], strides = [1, 1]} : vector<16x128xf32> to vector<1x128xf32>
    %112 = vector.broadcast %111 : vector<1x128xf32> to vector<256x128xf32>
    %113 = arith.addf %110, %112 : vector<256x128xf32>
    %114 = vector.extract_strided_slice %109 {offsets = [0, 128], sizes = [256, 128], strides = [1, 1]} : vector<256x256xf32> to vector<256x128xf32>
    %115 = vector.extract_strided_slice %4 {offsets = [6, 0], sizes = [1, 128], strides = [1, 1]} : vector<16x128xf32> to vector<1x128xf32>
    %116 = vector.broadcast %115 : vector<1x128xf32> to vector<256x128xf32>
    %117 = arith.addf %114, %116 : vector<256x128xf32>
    %118 = vector.extract_strided_slice %106 {offsets = [0, 0], sizes = [32, 64], strides = [1, 1]} : vector<32x128xf32> to vector<32x64xf32>
    %119 = vector.shape_cast %118 : vector<32x64xf32> to vector<2x16x64xf32>
    %120 = vector.extract_strided_slice %106 {offsets = [0, 64], sizes = [32, 64], strides = [1, 1]} : vector<32x128xf32> to vector<32x64xf32>
    %121 = vector.shape_cast %120 : vector<32x64xf32> to vector<2x16x64xf32>
    %122 = vector.shape_cast %119 : vector<2x16x64xf32> to vector<2x1x16x64xf32>
    %123 = vector.shape_cast %121 : vector<2x16x64xf32> to vector<2x1x16x64xf32>
    %124 = tpu.concatenate %122, %123 in 1 : vector<2x1x16x64xf32>, vector<2x1x16x64xf32> -> vector<2x2x16x64xf32>
    %125 = vector.shape_cast %124 : vector<2x2x16x64xf32> to vector<4x16x64xf32>
    %126 = vector.extract_strided_slice %113 {offsets = [0, 0], sizes = [256, 64], strides = [1, 1]} : vector<256x128xf32> to vector<256x64xf32>
    %127 = vector.shape_cast %126 : vector<256x64xf32> to vector<2x128x64xf32>
    %128 = vector.extract_strided_slice %113 {offsets = [0, 64], sizes = [256, 64], strides = [1, 1]} : vector<256x128xf32> to vector<256x64xf32>
    %129 = vector.shape_cast %128 : vector<256x64xf32> to vector<2x128x64xf32>
    %130 = vector.shape_cast %127 : vector<2x128x64xf32> to vector<2x1x128x64xf32>
    %131 = vector.shape_cast %129 : vector<2x128x64xf32> to vector<2x1x128x64xf32>
    %132 = tpu.concatenate %130, %131 in 1 : vector<2x1x128x64xf32>, vector<2x1x128x64xf32> -> vector<2x2x128x64xf32>
    %133 = vector.shape_cast %132 : vector<2x2x128x64xf32> to vector<4x128x64xf32>
    %134 = vector.extract_strided_slice %117 {offsets = [0, 0], sizes = [256, 64], strides = [1, 1]} : vector<256x128xf32> to vector<256x64xf32>
    %135 = vector.shape_cast %134 : vector<256x64xf32> to vector<2x128x64xf32>
    %136 = vector.extract_strided_slice %117 {offsets = [0, 64], sizes = [256, 64], strides = [1, 1]} : vector<256x128xf32> to vector<256x64xf32>
    %137 = vector.shape_cast %136 : vector<256x64xf32> to vector<2x128x64xf32>
    %138 = vector.shape_cast %135 : vector<2x128x64xf32> to vector<2x1x128x64xf32>
    %139 = vector.shape_cast %137 : vector<2x128x64xf32> to vector<2x1x128x64xf32>
    %140 = tpu.concatenate %138, %139 in 1 : vector<2x1x128x64xf32>, vector<2x1x128x64xf32> -> vector<2x2x128x64xf32>
    %141 = vector.shape_cast %140 : vector<2x2x128x64xf32> to vector<4x128x64xf32>
    "tpu.trace_start"() <{level = 10 : i32, message = "bqd,bkd->bqk"}> : () -> ()
    %cst_34 = arith.constant dense<0.000000e+00> : vector<4x16x128xf32>
    %142 = tpu.matmul %125, %133, %cst_34 {dimension_numbers = #tpu.dot_dimension_numbers<[2], [2], [1], [1], [0, 0, 0, 1, 1, 1], [0], [0]>} : vector<4x16x64xf32>, vector<4x128x64xf32>, vector<4x16x128xf32> -> vector<4x16x128xf32>
    "tpu.trace_stop"() : () -> ()
    %143 = tpu.iota {dimensions = array<i32: 2>} : vector<1x1x128xi32>
    %c8_i32 = arith.constant 8 : i32
    %144 = vector.broadcast %c8_i32 : i32 to vector<1x1x128xi32>
    %145 = arith.cmpi slt, %143, %144 : vector<1x1x128xi32>
    %cst_35 = arith.constant -1.000000e+30 : f32
    %146 = vector.shape_cast %145 : vector<1x1x128xi1> to vector<1x1x128xi1>
    %147 = vector.broadcast %146 : vector<1x1x128xi1> to vector<4x16x128xi1>
    %148 = vector.broadcast %cst_35 : f32 to vector<4x16x128xf32>
    %149 = arith.select %147, %142, %148 : vector<4x16x128xi1>, vector<4x16x128xf32>
    %cst_36 = arith.constant dense<0xFF800000> : vector<4x16xf32>
    %150 = vector.multi_reduction <maximumf>, %149, %cst_36 [2] : vector<4x16x128xf32> to vector<4x16xf32>
    %151 = vector.shape_cast %150 : vector<4x16xf32> to vector<4x16x1xf32>
    %152 = vector.broadcast %151 : vector<4x16x1xf32> to vector<4x16x128xf32>
    %153 = arith.subf %149, %152 : vector<4x16x128xf32>
    %154 = math.exp %153 : vector<4x16x128xf32>
    %cst_37 = arith.constant dense<0.000000e+00> : vector<4x16xf32>
    %155 = vector.multi_reduction <add>, %154, %cst_37 [2] : vector<4x16x128xf32> to vector<4x16xf32>
    %156 = vector.shape_cast %155 : vector<4x16xf32> to vector<4x16x1xf32>
    "tpu.trace_start"() <{level = 10 : i32, message = "bqk,bkd->bqd"}> : () -> ()
    %cst_38 = arith.constant dense<0.000000e+00> : vector<4x16x64xf32>
    %157 = tpu.matmul %154, %141, %cst_38 {dimension_numbers = #tpu.dot_dimension_numbers<[2], [1], [1], [2], [0, 0, 0, 1, 1, 2], [0], [0]>} : vector<4x16x128xf32>, vector<4x128x64xf32>, vector<4x16x64xf32> -> vector<4x16x64xf32>
    "tpu.trace_stop"() : () -> ()
    %158 = tpu.reciprocal %156 {approx = true} : vector<4x16x1xf32> -> vector<4x16x1xf32>
    %159 = vector.broadcast %158 : vector<4x16x1xf32> to vector<4x16x64xf32>
    %160 = arith.mulf %157, %159 : vector<4x16x64xf32>
    %161 = vector.shape_cast %160 : vector<4x16x64xf32> to vector<2x2x16x64xf32>
    %162 = vector.extract_strided_slice %161 {offsets = [0, 0, 0, 0], sizes = [2, 1, 16, 64], strides = [1, 1, 1, 1]} : vector<2x2x16x64xf32> to vector<2x1x16x64xf32>
    %163 = vector.shape_cast %162 : vector<2x1x16x64xf32> to vector<2x16x64xf32>
    %164 = vector.extract_strided_slice %161 {offsets = [0, 1, 0, 0], sizes = [2, 1, 16, 64], strides = [1, 1, 1, 1]} : vector<2x2x16x64xf32> to vector<2x1x16x64xf32>
    %165 = vector.shape_cast %164 : vector<2x1x16x64xf32> to vector<2x16x64xf32>
    %166 = tpu.concatenate %163, %165 in 2 : vector<2x16x64xf32>, vector<2x16x64xf32> -> vector<2x16x128xf32>
    %167 = vector.shape_cast %166 : vector<2x16x128xf32> to vector<32x128xf32>
    %c0_39 = arith.constant 0 : index
    %c0_40 = arith.constant 0 : index
    %c0_41 = arith.constant 0 : index
    %168 = vector.load %arg10[%c0_39, %c0_40, %c0_41] : memref<1x128x128xf32, #tpu.memory_space<vmem>>, vector<1x128x128xf32>
    %169 = vector.shape_cast %168 : vector<1x128x128xf32> to vector<128x128xf32>
    %cst_42 = arith.constant dense<0.000000e+00> : vector<32x128xf32>
    %170 = tpu.matmul %167, %169, %cst_42 {dimension_numbers = #tpu.dot_dimension_numbers<[1], [0], [0], [1], [0, 0, 1, 1], [], []>} : vector<32x128xf32>, vector<128x128xf32>, vector<32x128xf32> -> vector<32x128xf32>
    %171 = vector.extract_strided_slice %4 {offsets = [7, 0], sizes = [1, 128], strides = [1, 1]} : vector<16x128xf32> to vector<1x128xf32>
    %172 = vector.broadcast %171 : vector<1x128xf32> to vector<32x128xf32>
    %173 = arith.addf %170, %172 : vector<32x128xf32>
    %174 = arith.addf %97, %173 : vector<32x128xf32>
    %cst_43 = arith.constant dense<0.000000e+00> : vector<32xf32>
    %175 = vector.multi_reduction <add>, %174, %cst_43 [1] : vector<32x128xf32> to vector<32xf32>
    %176 = vector.shape_cast %175 : vector<32xf32> to vector<32x1xf32>
    %cst_44 = arith.constant 1.280000e+02 : f32
    %177 = vector.broadcast %cst_44 : f32 to vector<32x1xf32>
    %178 = arith.divf %176, %177 : vector<32x1xf32>
    %179 = vector.broadcast %178 : vector<32x1xf32> to vector<32x128xf32>
    %180 = arith.subf %174, %179 : vector<32x128xf32>
    %181 = arith.mulf %180, %180 : vector<32x128xf32>
    %cst_45 = arith.constant dense<0.000000e+00> : vector<32xf32>
    %182 = vector.multi_reduction <add>, %181, %cst_45 [1] : vector<32x128xf32> to vector<32xf32>
    %183 = vector.shape_cast %182 : vector<32xf32> to vector<32x1xf32>
    %cst_46 = arith.constant 1.280000e+02 : f32
    %184 = vector.broadcast %cst_46 : f32 to vector<32x1xf32>
    %185 = arith.divf %183, %184 : vector<32x1xf32>
    %186 = vector.broadcast %178 : vector<32x1xf32> to vector<32x128xf32>
    %187 = arith.subf %174, %186 : vector<32x128xf32>
    %cst_47 = arith.constant 9.99999974E-6 : f32
    %188 = vector.broadcast %cst_47 : f32 to vector<32x1xf32>
    %189 = arith.addf %185, %188 : vector<32x1xf32>
    %190 = math.rsqrt %189 : vector<32x1xf32>
    %191 = vector.broadcast %190 : vector<32x1xf32> to vector<32x128xf32>
    %192 = arith.mulf %187, %191 : vector<32x128xf32>
    %193 = vector.extract_strided_slice %4 {offsets = [11, 0], sizes = [1, 128], strides = [1, 1]} : vector<16x128xf32> to vector<1x128xf32>
    %194 = vector.broadcast %193 : vector<1x128xf32> to vector<32x128xf32>
    %195 = arith.mulf %192, %194 : vector<32x128xf32>
    %196 = vector.extract_strided_slice %4 {offsets = [12, 0], sizes = [1, 128], strides = [1, 1]} : vector<16x128xf32> to vector<1x128xf32>
    %197 = vector.broadcast %196 : vector<1x128xf32> to vector<32x128xf32>
    %198 = arith.addf %195, %197 : vector<32x128xf32>
    %c0_48 = arith.constant 0 : index
    %c0_49 = arith.constant 0 : index
    %c0_50 = arith.constant 0 : index
    %199 = vector.load %arg11[%c0_48, %c0_49, %c0_50] : memref<1x128x256xf32, #tpu.memory_space<vmem>>, vector<1x128x256xf32>
    %200 = vector.shape_cast %199 : vector<1x128x256xf32> to vector<128x256xf32>
    %cst_51 = arith.constant dense<0.000000e+00> : vector<32x256xf32>
    %201 = tpu.matmul %198, %200, %cst_51 {dimension_numbers = #tpu.dot_dimension_numbers<[1], [0], [0], [1], [0, 0, 1, 1], [], []>} : vector<32x128xf32>, vector<128x256xf32>, vector<32x256xf32> -> vector<32x256xf32>
    %c0_52 = arith.constant 0 : index
    %c0_53 = arith.constant 0 : index
    %c0_54 = arith.constant 0 : index
    %202 = vector.load %arg13[%c0_52, %c0_53, %c0_54] : memref<1x1x256xf32, #tpu.memory_space<vmem>>, vector<1x1x256xf32>
    %203 = vector.shape_cast %202 : vector<1x1x256xf32> to vector<1x256xf32>
    %204 = vector.broadcast %203 : vector<1x256xf32> to vector<32x256xf32>
    %205 = arith.addf %201, %204 : vector<32x256xf32>
    %cst_55 = arith.constant 0.000000e+00 : f32
    %206 = vector.broadcast %cst_55 : f32 to vector<32x256xf32>
    %207 = arith.maximumf %205, %206 : vector<32x256xf32>
    %c0_56 = arith.constant 0 : index
    %c0_57 = arith.constant 0 : index
    %c0_58 = arith.constant 0 : index
    %208 = vector.load %arg12[%c0_56, %c0_57, %c0_58] : memref<1x256x128xf32, #tpu.memory_space<vmem>>, vector<1x256x128xf32>
    %209 = vector.shape_cast %208 : vector<1x256x128xf32> to vector<256x128xf32>
    %cst_59 = arith.constant dense<0.000000e+00> : vector<32x128xf32>
    %210 = tpu.matmul %207, %209, %cst_59 {dimension_numbers = #tpu.dot_dimension_numbers<[1], [0], [0], [1], [0, 0, 1, 1], [], []>} : vector<32x256xf32>, vector<256x128xf32>, vector<32x128xf32> -> vector<32x128xf32>
    %211 = vector.extract_strided_slice %4 {offsets = [8, 0], sizes = [1, 128], strides = [1, 1]} : vector<16x128xf32> to vector<1x128xf32>
    %212 = vector.broadcast %211 : vector<1x128xf32> to vector<32x128xf32>
    %213 = arith.addf %210, %212 : vector<32x128xf32>
    %214 = arith.addf %198, %213 : vector<32x128xf32>
    %cst_60 = arith.constant dense<0.000000e+00> : vector<32xf32>
    %215 = vector.multi_reduction <add>, %214, %cst_60 [1] : vector<32x128xf32> to vector<32xf32>
    %216 = vector.shape_cast %215 : vector<32xf32> to vector<32x1xf32>
    %cst_61 = arith.constant 1.280000e+02 : f32
    %217 = vector.broadcast %cst_61 : f32 to vector<32x1xf32>
    %218 = arith.divf %216, %217 : vector<32x1xf32>
    %219 = vector.broadcast %218 : vector<32x1xf32> to vector<32x128xf32>
    %220 = arith.subf %214, %219 : vector<32x128xf32>
    %221 = arith.mulf %220, %220 : vector<32x128xf32>
    %cst_62 = arith.constant dense<0.000000e+00> : vector<32xf32>
    %222 = vector.multi_reduction <add>, %221, %cst_62 [1] : vector<32x128xf32> to vector<32xf32>
    %223 = vector.shape_cast %222 : vector<32xf32> to vector<32x1xf32>
    %cst_63 = arith.constant 1.280000e+02 : f32
    %224 = vector.broadcast %cst_63 : f32 to vector<32x1xf32>
    %225 = arith.divf %223, %224 : vector<32x1xf32>
    %226 = vector.broadcast %218 : vector<32x1xf32> to vector<32x128xf32>
    %227 = arith.subf %214, %226 : vector<32x128xf32>
    %cst_64 = arith.constant 9.99999974E-6 : f32
    %228 = vector.broadcast %cst_64 : f32 to vector<32x1xf32>
    %229 = arith.addf %225, %228 : vector<32x1xf32>
    %230 = math.rsqrt %229 : vector<32x1xf32>
    %231 = vector.broadcast %230 : vector<32x1xf32> to vector<32x128xf32>
    %232 = arith.mulf %227, %231 : vector<32x128xf32>
    %233 = vector.extract_strided_slice %4 {offsets = [13, 0], sizes = [1, 128], strides = [1, 1]} : vector<16x128xf32> to vector<1x128xf32>
    %234 = vector.broadcast %233 : vector<1x128xf32> to vector<32x128xf32>
    %235 = arith.mulf %232, %234 : vector<32x128xf32>
    %236 = vector.extract_strided_slice %4 {offsets = [14, 0], sizes = [1, 128], strides = [1, 1]} : vector<16x128xf32> to vector<1x128xf32>
    %237 = vector.broadcast %236 : vector<1x128xf32> to vector<32x128xf32>
    %238 = arith.addf %235, %237 : vector<32x128xf32>
    %239 = vector.shape_cast %238 : vector<32x128xf32> to vector<2x16x128xf32>
    %c0_65 = arith.constant 0 : index
    %c0_66 = arith.constant 0 : index
    %c0_67 = arith.constant 0 : index
    %240 = vector.load %arg15[%c0_65, %c0_66, %c0_67] : memref<2x16x128xf32, #tpu.memory_space<vmem>>, vector<2x16x128xf32>
    tpu.vector_store %arg15[%c0_65, %c0_66, %c0_67], %239 {strides = array<i32>} : memref<2x16x128xf32, #tpu.memory_space<vmem>>, vector<2x16x128xf32>,
    return
  }
  func.func @transform_0(%arg0: i32, %arg1: i32) -> (i32, i32, i32) {
    %c0_i32 = arith.constant 0 : i32
    %c0_i32_0 = arith.constant 0 : i32
    %c0_i32_1 = arith.constant 0 : i32
    return %arg0, %c0_i32, %c0_i32_0 : i32, i32, i32
  }
  func.func @transform_1(%arg0: i32, %arg1: i32) -> (i32, i32, i32) {
    %c0_i32 = arith.constant 0 : i32
    %c0_i32_0 = arith.constant 0 : i32
    %c0_i32_1 = arith.constant 0 : i32
    %c0_i32_2 = arith.constant 0 : i32
    return %c0_i32, %c0_i32_0, %c0_i32_1 : i32, i32, i32
  }
  func.func @transform_2(%arg0: i32, %arg1: i32) -> (i32, i32) {
    %c0_i32 = arith.constant 0 : i32
    %c0_i32_0 = arith.constant 0 : i32
    %c0_i32_1 = arith.constant 0 : i32
    return %c0_i32, %c0_i32_0 : i32, i32
  }
  func.func @transform_3(%arg0: i32, %arg1: i32) -> (i32, i32) {
    %c0_i32 = arith.constant 0 : i32
    %c0_i32_0 = arith.constant 0 : i32
    %c0_i32_1 = arith.constant 0 : i32
    return %c0_i32, %c0_i32_0 : i32, i32
  }
  func.func @transform_4(%arg0: i32, %arg1: i32) -> (i32, i32, i32) {
    %c0_i32 = arith.constant 0 : i32
    %c0_i32_0 = arith.constant 0 : i32
    %c0_i32_1 = arith.constant 0 : i32
    return %arg1, %c0_i32, %c0_i32_0 : i32, i32, i32
  }
  func.func @transform_5(%arg0: i32, %arg1: i32) -> (i32, i32, i32) {
    %c0_i32 = arith.constant 0 : i32
    %c0_i32_0 = arith.constant 0 : i32
    %c0_i32_1 = arith.constant 0 : i32
    return %arg1, %c0_i32, %c0_i32_0 : i32, i32, i32
  }
  func.func @transform_6(%arg0: i32, %arg1: i32) -> (i32, i32, i32) {
    %c0_i32 = arith.constant 0 : i32
    %c0_i32_0 = arith.constant 0 : i32
    %c0_i32_1 = arith.constant 0 : i32
    return %arg1, %c0_i32, %c0_i32_0 : i32, i32, i32
  }
  func.func @transform_7(%arg0: i32, %arg1: i32) -> (i32, i32, i32) {
    %c0_i32 = arith.constant 0 : i32
    %c0_i32_0 = arith.constant 0 : i32
    %c0_i32_1 = arith.constant 0 : i32
    return %arg1, %c0_i32, %c0_i32_0 : i32, i32, i32
  }
  func.func @transform_8(%arg0: i32, %arg1: i32) -> (i32, i32, i32) {
    %c0_i32 = arith.constant 0 : i32
    %c0_i32_0 = arith.constant 0 : i32
    %c0_i32_1 = arith.constant 0 : i32
    return %arg1, %c0_i32, %c0_i32_0 : i32, i32, i32
  }
  func.func @transform_9(%arg0: i32, %arg1: i32) -> (i32, i32, i32) {
    %c0_i32 = arith.constant 0 : i32
    %c0_i32_0 = arith.constant 0 : i32
    %c0_i32_1 = arith.constant 0 : i32
    return %arg1, %c0_i32, %c0_i32_0 : i32, i32, i32
  }
  func.func @transform_10(%arg0: i32, %arg1: i32) -> (i32, i32, i32) {
    %c0_i32 = arith.constant 0 : i32
    %c0_i32_0 = arith.constant 0 : i32
    %c0_i32_1 = arith.constant 0 : i32
    return %arg1, %c0_i32, %c0_i32_0 : i32, i32, i32
  }
  func.func @transform_11(%arg0: i32, %arg1: i32) -> (i32, i32, i32) {
    %c0_i32 = arith.constant 0 : i32
    %c0_i32_0 = arith.constant 0 : i32
    %c0_i32_1 = arith.constant 0 : i32
    return %arg1, %c0_i32, %c0_i32_0 : i32, i32, i32
  }
  func.func @transform_12(%arg0: i32, %arg1: i32) -> (i32, i32, i32) {
    %c0_i32 = arith.constant 0 : i32
    %c0_i32_0 = arith.constant 0 : i32
    %c0_i32_1 = arith.constant 0 : i32
    return %arg1, %c0_i32, %c0_i32_0 : i32, i32, i32
  }
  func.func @transform_13(%arg0: i32, %arg1: i32) -> (i32, i32, i32) {
    %c0_i32 = arith.constant 0 : i32
    %c0_i32_0 = arith.constant 0 : i32
    %c0_i32_1 = arith.constant 0 : i32
    return %arg0, %c0_i32, %c0_i32_0 : i32, i32, i32
  }
}

</mosaic_0001>

<bundles_post_ra>
// kernel: tpu_custom_call.1
= control target key start
LH: loop header
LB: loop body
LE: loop exit
PB: predicated region body
PF: predicated region fallthrough
CT: control target
= control target key end

     0   :  { %s9130_s0 = inlined_call_operand.vmem [shape: f32[2,128,64], index: 0, kind: input, shape index: {}]   ;;  %s9131_s1 = inlined_call_operand.vmem [shape: f32[1,16,128], index: 1, kind: input, shape index: {}]   ;;  %s9132_s2 = inlined_call_operand.hbm [shape: f32[64,128], index: 2, kind: input, shape index: {}]   ;;  %s9133_s3 = inlined_call_operand.hbm [shape: f32[1,128], index: 3, kind: input, shape index: {}]   ;;  %s9134_s4 = inlined_call_operand.hbm [shape: f32[3,128,384], index: 4, kind: input, shape index: {}]   ;;  %s9135_s5 = inlined_call_operand.vmem [shape: f32[3,128,128], index: 5, kind: input, shape index: {}]   ;;  %s9136_s6 = inlined_call_operand.hbm [shape: f32[3,128,128], index: 6, kind: input, shape index: {}]   ;;  %s9137_s7 = inlined_call_operand.hbm [shape: f32[3,128,256], index: 7, kind: input, shape index: {}]   ;;  %s9138_s8 = inlined_call_operand.hbm [shape: f32[3,128,128], index: 8, kind: input, shape index: {}]   ;;  %s9139_s9 = inlined_call_operand.hbm [shape: f32[3,128,256], index: 9, kind: input, shape index: {}]   ;;  %s9140_s10 = inlined_call_operand.hbm [shape: f32[3,256,128], index: 10, kind: input, shape index: {}]   ;;  %s9141_s11 = inlined_call_operand.vmem [shape: f32[3,1,256], index: 11, kind: input, shape index: {}]   ;;  %s9142_s12 = inlined_call_operand.hbm [shape: f32[3,16,128], index: 12, kind: input, shape index: {}]   ;;  %s9143_s13 = inlined_call_operand.hbm [shape: f32[2,16,128], index: 13, kind: output, shape index: {}]  }
   0x1   :  { %9197 = sst [smem:[#allocation46_spill]] %s9130_s0 }
   0x2   :  { %9198 = sst [smem:[#allocation47_spill]] %s9131_s1 }
   0x3   :  { %9199 = sst [smem:[#allocation48_spill]] %s9132_s2 }
   0x4   :  { %9200 = sst [smem:[#allocation49_spill]] %s9134_s4 }
   0x5   :  { %9201 = sst [smem:[#allocation50_spill]] %s9135_s5 }
   0x6   :  { %9202 = sst [smem:[#allocation51_spill]] %s9136_s6 }
   0x7   :  { %9203 = sst [smem:[#allocation52_spill]] %s9137_s7 }
   0x8   :  { %9204 = sst [smem:[#allocation53_spill]] %s9141_s11 }
   0x9   :  { %9205 = sst [smem:[#allocation54_spill]] %s9143_s13 }
   0xa   :  { %18 = vsyncpa [#allocation4], 0 }
   0xb   :  { %19 = vsyncpa [#allocation7], 0 }
   0xc   :  { %20 = vsyncpa [#allocation5], 0  ;;  %s7328_s25 = smov 0   ;;  %s7330_s26 = smov 0  }
   0xd   :  { %s7332_s27 = smov 0   ;;  %s7334_s28 = smov 0  }
   0xe   :  { %s7336_s29 = smov 0   ;;  %s7338_s30 = smov 0  }
   0xf LB: > { %9206 = sst [smem:[#allocation20_spill]] %s7224_s27  ;;  %s7357_s14 = sadd.s32 4294967295, %s7236_s30   ;;  %s7236_s30 = sphi %s7338_s30, %s26_s30   ;;  %s7232_s29 = sphi %s7336_s29, %s9324_s29   ;;  %s7228_s28 = sphi %s7334_s28, %s9323_s28   ;;  %s7224_s27 = sphi %s7332_s27, %s9319_s27   ;;  %s7220_s26 = sphi %s7330_s26, %s9322_s26   ;;  %s7216_s25 = sphi %s7328_s25, %s9321_s25  }
  0x10   : > { %9207 = sst [smem:[#allocation21_spill]] %s7228_s28  ;;  %p141_p0 = scmp.ne.s32.totalorder %s7224_s27, %s7220_s26 }
  0x11   : > { %p142_p1 = scmp.eq.s32.totalorder %s7236_s30, 0  ;;  %p147_p2 = scmp.ne.s32.totalorder %s7220_s26, %s7216_s25 }
  0x12   : > { %p9147_p3 = scmp.eq.s32.totalorder %s7357_s14, 0  ;;  %p4756_p5 = scmp.ge.s32.totalorder %s7236_s30, 1 }
  0x13   : > { %p143_p4 = por %p142_p1, %p141_p0  ;;  %p392_p7 = scmp.lt.s32.totalorder %s7236_s30, 4 }
  0x14   : > { %p7368_p6 = por %p9147_p3, %p147_p2  ;;  %s7238_s18 = smov [#allocation3]  }
  0x15   : > { %p7373_p8 = pnand %p4756_p5, %p392_p7  ;;  %s417_s19 = sshll.u32 %s7238_s18, 4  ;;  %s418_s19 = int_to_ptr.vmem [resolvable:$true] %s417_s19 }
  0x16   : > { %s9208_s16 = scalar_select %p7368_p6, 1, 0 }
  0x17   : > { %s9210_s17 = scalar_select %p7373_p8, 1, 0 }
  0x18   : > { %9209 = sst [smem:[#allocation22_spill]] %s9208_s16  ;;  %p6494_p9 = pneg %p7373_p8 }
  0x19   : > { %p6525_p10 = scmp.lt.s32.totalorder %s7236_s30, 3  ;;  %s35_s22 = sadd.s32 1, %s7232_s29 }
  0x1a   : > { %p7382_p11 = pnand %p6494_p9, %p9147_p3  ;;  %s9213_s2 = sld [smem:[#allocation48_spill]] }
  0x1b   : > { %p7386_p12 = pnand %p6525_p10, %p143_p4 }
  0x1c   : > { %s9211_s20 = scalar_select %p7382_p11, 1, 0 }
  0x1d   : > { %s9212_s21 = scalar_select %p7386_p12, 1, 0 }
  0x1e   : > { %p9158_p0 = pneg %p7382_p11 }
  0x20   : > { %s6882_s25 = scalar_lea.hbm %s9213_s2, 1024 }
  0x21   : > { %p6883_p13 = scmp.ne.s32.totalorder %s9213_s2, %s6882_s25  ;;  %p6889_p4 = scmp.lt.u32.totalorder %s6882_s25, %s9213_s2 }
  0x23   : > { %p6885_p1 = pnand %p9158_p0, %p6883_p13 }
  0x25   : > { %p6886_p2 = pneg %p6885_p1 }
  0x27   : > { %p6891_p5 = pnand %p6889_p4, %p6886_p2 }
  0x29   : > { %6894 = shalt.err (!%p6891_p5)
}
  0x2a   : > { %s6895_s0 = scalar_lea.vmem %s418_s19, 1024  ;;  %p6903_p3 = scmp.lt.s32.totalorder %s418_s19, %s418_s19 }
  0x2b   : > { %p6896_p7 = scmp.ne.s32.totalorder %s418_s19, %s6895_s0  ;;  %p6904_p6 = scmp.lt.s32.totalorder %s6895_s0, %s6895_s0 }
  0x2d   : > { %p6898_p9 = pnand %p6896_p7, %p9158_p0  ;;  %p6905_p8 = por %p6904_p6, %p6903_p3 }
  0x2f   : > { %p6899_p10 = pneg %p6898_p9 }
  0x31   : > { %p6906_p12 = pnand %p6905_p8, %p6899_p10 }
  0x33   : > { %6909 = shalt.err (!%p6906_p12)
}
  0x34   : > { %s9154_s15 = smov 128   ;;  %s9156_s1 = smov 8  }
  0x35   : > { %6497 = dma.hbm_to_vmem [thread:$0]  (!%p7382_p11), %s9213_s2, 1024, %s418_s19, [#allocation4], %s9154_s15, %s9154_s15, %s9156_s1  }
  0x36   : > { %p36_p3 = scmp.ge.s32.totalorder %s35_s22, 3  ;;  %s442_s0 = sand.u32 1, %s7236_s30  }
  0x37   : > { %s7418_s24 = sand.u32 1, %s7224_s27   ;;  %s6466_s11 = smul.u32 6144, %s7232_s29 }
  0x38   : > { %s9326_s22 = smov (%p36_p3, %s35_s22), 0  ;;  %s6465_s25 = smul.u32 384, %s7418_s24 }
  0x39   : > { %9214 = sst [smem:[#allocation23_spill]] %s9326_s22  ;;  %s131_s18 = ssub.s32 %s7232_s29, %s9326_s22 }
  0x3a   : > { %p132_p6 = scmp.eq.s32.totalorder %s131_s18, 0  ;;  %s9215_s4 = sld [smem:[#allocation49_spill]] }
  0x3b   : > { %s446_s19 = scalar_lea.vmem [#allocation8], %s6465_s25  ;;  %s9216_s23 = sadd.s32 1, %s7224_s27 }
  0x3c   : > { %s453_s13 = sshll.u32 %s446_s19, 4  ;;  %s9162_s1 = sshll.u32 %s7418_s24, 7  ;;  %s7436_s13 = int_to_ptr.vmem [resolvable:$true] %s453_s13 }
  0x3d   : > { %s7434_s15 = scalar_select %p132_p6, %s7224_s27, %s9216_s23  }
  0x3e   : > { %s7439_s2 = scalar_lea.sflag [#allocation4], %s442_s0  ;;  %p9218_p12 = scmp.ne.s32.totalorder %s9212_s21, 0 }
  0x3f   : > { %9217 = sst [smem:[#allocation24_spill]] %s7434_s15 }
  0x40   : > { %s7429_s16 = scalar_lea.hbm %s9215_s4, %s6466_s11  ;;  %p7445_p13 = pneg %p9218_p12 }
  0x41   : > { %s6910_s18 = scalar_lea.hbm %s7429_s16, 6144  ;;  %s6915_s25 = scalar_lea.hbm %s9215_s4, 18432 }
  0x42   : > { %p6911_p8 = scmp.ne.s32.totalorder %s7429_s16, %s6910_s18  ;;  %p6916_p4 = scmp.lt.u32.totalorder %s7429_s16, %s9215_s4 }
  0x43   : > { %s9219_s5 = scalar_select %p7445_p13, 1, 0 }
  0x44   : > { %p6913_p1 = pnand %p7445_p13, %p6911_p8  ;;  %p6917_p5 = scmp.lt.u32.totalorder %s6915_s25, %s6910_s18 }
  0x45   : > { %p6919_p9 = scmp.lt.u32.totalorder %s6910_s18, %s7429_s16 }
  0x46   : > { %p6914_p2 = pneg %p6913_p1  ;;  %p6918_p7 = por %p6917_p5, %p6916_p4 }
  0x48   : > { %p6920_p10 = por %p6919_p9, %p6918_p7 }
  0x4a   : > { %p6921_p3 = pnand %p6920_p10, %p6914_p2 }
  0x4c   : > { %6924 = shalt.err (!%p6921_p3)
}
  0x4d   : > { %s6925_s0 = scalar_lea.vmem %s7436_s13, 6144  ;;  %s7241_s11 = smov [#allocation8]  }
  0x4e   : > { %p6926_p6 = scmp.ne.s32.totalorder %s7436_s13, %s6925_s0  ;;  %s6930_s28 = sshll.u32 %s7241_s11, 4  ;;  %s6931_s28 = int_to_ptr.vmem [resolvable:$false] %s6930_s28 }
  0x4f   : > { %s6932_s19 = scalar_lea.vmem %s6931_s28, 12288  ;;  %p6933_p0 = scmp.lt.s32.totalorder %s7436_s13, %s6931_s28 }
  0x50   : > { %p6928_p8 = pnand %p6926_p6, %p7445_p13  ;;  %p6934_p11 = scmp.lt.s32.totalorder %s6932_s19, %s6925_s0 }
  0x52   : > { %p6929_p1 = pneg %p6928_p8  ;;  %p6935_p4 = por %p6934_p11, %p6933_p0 }
  0x54   : > { %p6936_p5 = pnand %p6935_p4, %p6929_p1 }
  0x56   : > { %6939 = shalt.err (!%p6936_p5)
}
  0x57   : > { %s7242_s18 = smov 384   ;;  %s7243_s25 = smov 24  }
  0x58   : > { %6504 = dma.hbm_to_vmem [thread:$0]  (!%p9218_p12), %s7429_s16, 6144, %s7436_s13, %s7439_s2, %s7242_s18, %s7242_s18, %s7243_s25  }
  0x59   : > { %s9163_s23 = sshll.u32 %s7232_s29, 11  ;;  %s9220_s6 = sld [smem:[#allocation51_spill]] }
  0x5a   : > { %s475_s19 = scalar_lea.vmem [#allocation9], %s9162_s1  ;;  %s7482_s22 = sshll.u32 %s7418_s24, 8 }
  0x5b   : > { %s482_s4 = sshll.u32 %s475_s19, 4  ;;  %s7479_s4 = int_to_ptr.vmem [resolvable:$true] %s482_s4 }
  0x5f   : > { %s7475_s28 = scalar_lea.hbm %s9220_s6, %s9163_s23  ;;  %s6945_s18 = scalar_lea.hbm %s9220_s6, 6144 }
  0x60   : > { %s6940_s15 = scalar_lea.hbm %s7475_s28, 2048  ;;  %p6946_p7 = scmp.lt.u32.totalorder %s7475_s28, %s9220_s6 }
  0x61   : > { %p6941_p11 = scmp.ne.s32.totalorder %s7475_s28, %s6940_s15  ;;  %p6947_p9 = scmp.lt.u32.totalorder %s6945_s18, %s6940_s15 }
  0x62   : > { %p6949_p3 = scmp.lt.u32.totalorder %s6940_s15, %s7475_s28 }
  0x63   : > { %p6943_p0 = pnand %p6941_p11, %p7445_p13  ;;  %p6948_p10 = por %p6947_p9, %p6946_p7 }
  0x65   : > { %p6944_p2 = pneg %p6943_p0  ;;  %p6950_p6 = por %p6949_p3, %p6948_p10 }
  0x67   : > { %p6951_p8 = pnand %p6950_p6, %p6944_p2 }
  0x69   : > { %6954 = shalt.err (!%p6951_p8)
}
  0x6a   : > { %s6955_s0 = scalar_lea.vmem %s7479_s4, 2048  ;;  %s7244_s19 = smov [#allocation9]  }
  0x6b   : > { %p6956_p1 = scmp.ne.s32.totalorder %s7479_s4, %s6955_s0  ;;  %s6960_s16 = sshll.u32 %s7244_s19, 4  ;;  %s6961_s16 = int_to_ptr.vmem [resolvable:$false] %s6960_s16 }
  0x6c   : > { %s6962_s13 = scalar_lea.vmem %s6961_s16, 4096  ;;  %p6963_p11 = scmp.lt.s32.totalorder %s7479_s4, %s6961_s16 }
  0x6d   : > { %p6958_p4 = pnand %p6956_p1, %p7445_p13  ;;  %p6964_p0 = scmp.lt.s32.totalorder %s6962_s13, %s6955_s0 }
  0x6f   : > { %p6959_p5 = pneg %p6958_p4  ;;  %p6965_p7 = por %p6964_p0, %p6963_p11 }
  0x71   : > { %p6966_p9 = pnand %p6965_p7, %p6959_p5 }
  0x73   : > { %6969 = shalt.err (!%p6966_p9)
}
  0x74   : > { %s9221_s15 = smov 8   ;;  %s9222_s18 = smov 128  }
  0x75   : > { %6507 = dma.hbm_to_vmem [thread:$0]  (!%p9218_p12), %s7475_s28, 2048, %s7479_s4, %s7439_s2, %s9222_s18, %s9222_s18, %s9221_s15  }
  0x76   : > { %s7510_s25 = sshll.u32 %s7232_s29, 12  ;;  %s9223_s7 = sld [smem:[#allocation52_spill]] }
  0x77   : > { %s496_s16 = scalar_lea.vmem [#allocation10], %s7482_s22 }
  0x78   : > { %s503_s13 = sshll.u32 %s496_s16, 4  ;;  %s7519_s13 = int_to_ptr.vmem [resolvable:$true] %s503_s13 }
  0x7c   : > { %s7516_s19 = scalar_lea.hbm %s9223_s7, %s7510_s25  ;;  %s6975_s23 = scalar_lea.hbm %s9223_s7, 12288 }
  0x7d   : > { %s6970_s1 = scalar_lea.hbm %s7516_s19, 4096  ;;  %p6976_p6 = scmp.lt.u32.totalorder %s7516_s19, %s9223_s7 }
  0x7e   : > { %p6971_p2 = scmp.ne.s32.totalorder %s7516_s19, %s6970_s1  ;;  %p6977_p8 = scmp.lt.u32.totalorder %s6975_s23, %s6970_s1 }
  0x7f   : > { %p6979_p4 = scmp.lt.u32.totalorder %s6970_s1, %s7516_s19 }
  0x80   : > { %p6973_p10 = pnand %p6971_p2, %p7445_p13  ;;  %p6978_p1 = por %p6977_p8, %p6976_p6 }
  0x82   : > { %p6974_p3 = pneg %p6973_p10  ;;  %p6980_p5 = por %p6979_p4, %p6978_p1 }
  0x84   : > { %p6981_p11 = pnand %p6980_p5, %p6974_p3 }
  0x86   : > { %6984 = shalt.err (!%p6981_p11)
}
  0x87   : > { %s6985_s16 = scalar_lea.vmem %s7519_s13, 4096  ;;  %s7245_s4 = smov [#allocation10]  }
  0x88   : > { %p6986_p0 = scmp.ne.s32.totalorder %s7519_s13, %s6985_s16  ;;  %s6990_s28 = sshll.u32 %s7245_s4, 4  ;;  %s6991_s28 = int_to_ptr.vmem [resolvable:$false] %s6990_s28 }
  0x89   : > { %s6992_s11 = scalar_lea.vmem %s6991_s28, 8192  ;;  %p6993_p2 = scmp.lt.s32.totalorder %s7519_s13, %s6991_s28 }
  0x8a   : > { %p6988_p7 = pnand %p6986_p0, %p7445_p13  ;;  %p6994_p10 = scmp.lt.s32.totalorder %s6992_s11, %s6985_s16 }
  0x8c   : > { %p6989_p9 = pneg %p6988_p7  ;;  %p6995_p6 = por %p6994_p10, %p6993_p2 }
  0x8e   : > { %p6996_p8 = pnand %p6995_p6, %p6989_p9 }
  0x90   : > { %6999 = shalt.err (!%p6996_p8)
}
  0x91   : > { %s7246_s1 = smov 256   ;;  %s7247_s23 = smov 16  }
  0x92   : > { %6510 = dma.hbm_to_vmem [thread:$0]  (!%p9218_p12), %s7516_s19, 4096, %s7519_s13, %s7439_s2, %s7246_s1, %s7246_s1, %s7247_s23  }
  0x93   : > { %s9224_s0 = sshll.u32 %s7232_s29, 11  ;;  %s9225_s11 = sshll.u32 %s7418_s24, 7 }
  0x94   : > { %s7551_s28 = scalar_lea.hbm %s9138_s8, %s9224_s0  ;;  %s517_s6 = scalar_lea.vmem [#allocation11], %s9225_s11 }
  0x95   : > { %s524_s7 = sshll.u32 %s517_s6, 4  ;;  %s7000_s27 = scalar_lea.hbm %s7551_s28, 2048  ;;  %s7555_s7 = int_to_ptr.vmem [resolvable:$true] %s524_s7 }
  0x96   : > { %p7001_p3 = scmp.ne.s32.totalorder %s7551_s28, %s7000_s27  ;;  %s7005_s4 = scalar_lea.hbm %s9138_s8, 6144 }
  0x97   : > { %p7006_p5 = scmp.lt.u32.totalorder %s7551_s28, %s9138_s8  ;;  %p7007_p11 = scmp.lt.u32.totalorder %s7005_s4, %s7000_s27 }
  0x98   : > { %p7003_p1 = pnand %p7001_p3, %p7445_p13  ;;  %p7009_p7 = scmp.lt.u32.totalorder %s7000_s27, %s7551_s28 }
  0x99   : > { %p7008_p0 = por %p7007_p11, %p7006_p5 }
  0x9a   : > { %p7004_p4 = pneg %p7003_p1 }
  0x9b   : > { %p7010_p9 = por %p7009_p7, %p7008_p0 }
  0x9d   : > { %p7011_p2 = pnand %p7010_p9, %p7004_p4 }
  0x9f   : > { %7014 = shalt.err (!%p7011_p2)
}
  0xa0   : > { %s7015_s6 = scalar_lea.vmem %s7555_s7, 2048  ;;  %s7248_s11 = smov [#allocation11]  }
  0xa1   : > { %p7016_p10 = scmp.ne.s32.totalorder %s7555_s7, %s7015_s6  ;;  %s7020_s19 = sshll.u32 %s7248_s11, 4  ;;  %s7021_s19 = int_to_ptr.vmem [resolvable:$false] %s7020_s19 }
  0xa2   : > { %s7022_s13 = scalar_lea.vmem %s7021_s19, 4096  ;;  %p7023_p3 = scmp.lt.s32.totalorder %s7555_s7, %s7021_s19 }
  0xa3   : > { %p7018_p6 = pnand %p7016_p10, %p7445_p13  ;;  %p7024_p1 = scmp.lt.s32.totalorder %s7022_s13, %s7015_s6 }
  0xa5   : > { %p7019_p8 = pneg %p7018_p6  ;;  %p7025_p5 = por %p7024_p1, %p7023_p3 }
  0xa7   : > { %p7026_p11 = pnand %p7025_p5, %p7019_p8 }
  0xa9   : > { %7029 = shalt.err (!%p7026_p11)
}
  0xaa   : > { %6513 = dma.hbm_to_vmem [thread:$0]  (!%p9218_p12), %s7551_s28, 2048, %s7555_s7, %s7439_s2, %s9222_s18, %s9222_s18, %s9221_s15  }
  0xab   : > { %s7586_s0 = scalar_lea.hbm %s9139_s9, %s7510_s25  ;;  %s538_s16 = scalar_lea.vmem [#allocation12], %s7482_s22 }
  0xac   : > { %s545_s6 = sshll.u32 %s538_s16, 4  ;;  %s7030_s11 = scalar_lea.hbm %s7586_s0, 4096  ;;  %s7589_s6 = int_to_ptr.vmem [resolvable:$true] %s545_s6 }
  0xad   : > { %p7031_p4 = scmp.ne.s32.totalorder %s7586_s0, %s7030_s11  ;;  %s7035_s28 = scalar_lea.hbm %s9139_s9, 12288 }
  0xae   : > { %p7036_p9 = scmp.lt.u32.totalorder %s7586_s0, %s9139_s9  ;;  %p7037_p2 = scmp.lt.u32.totalorder %s7035_s28, %s7030_s11 }
  0xaf   : > { %p7033_p0 = pnand %p7031_p4, %p7445_p13  ;;  %p7039_p6 = scmp.lt.u32.totalorder %s7030_s11, %s7586_s0 }
  0xb0   : > { %p7038_p10 = por %p7037_p2, %p7036_p9 }
  0xb1   : > { %p7034_p7 = pneg %p7033_p0 }
  0xb2   : > { %p7040_p8 = por %p7039_p6, %p7038_p10 }
  0xb4   : > { %p7041_p3 = pnand %p7040_p8, %p7034_p7 }
  0xb6   : > { %7044 = shalt.err (!%p7041_p3)
}
  0xb7   : > { %s7045_s4 = scalar_lea.vmem %s7589_s6, 4096  ;;  %s7249_s16 = smov [#allocation12]  }
  0xb8   : > { %p7046_p1 = scmp.ne.s32.totalorder %s7589_s6, %s7045_s4  ;;  %s7050_s19 = sshll.u32 %s7249_s16, 4  ;;  %s7051_s19 = int_to_ptr.vmem [resolvable:$false] %s7050_s19 }
  0xb9   : > { %s7052_s7 = scalar_lea.vmem %s7051_s19, 8192  ;;  %p7053_p4 = scmp.lt.s32.totalorder %s7589_s6, %s7051_s19 }
  0xba   : > { %p7048_p5 = pnand %p7046_p1, %p7445_p13  ;;  %p7054_p0 = scmp.lt.s32.totalorder %s7052_s7, %s7045_s4 }
  0xbc   : > { %p7049_p11 = pneg %p7048_p5  ;;  %p7055_p9 = por %p7054_p0, %p7053_p4 }
  0xbe   : > { %p7056_p2 = pnand %p7055_p9, %p7049_p11 }
  0xc0   : > { %7059 = shalt.err (!%p7056_p2)
}
  0xc1   : > { %6516 = dma.hbm_to_vmem [thread:$0]  (!%p9218_p12), %s7586_s0, 4096, %s7589_s6, %s7439_s2, %s7246_s1, %s7246_s1, %s7247_s23  }
  0xc2   : > { %s7620_s13 = scalar_lea.hbm %s9140_s10, %s7510_s25  ;;  %s559_s27 = scalar_lea.vmem [#allocation13], %s7482_s22 }
  0xc3   : > { %s566_s4 = sshll.u32 %s559_s27, 4  ;;  %s7060_s16 = scalar_lea.hbm %s7620_s13, 4096  ;;  %s7623_s4 = int_to_ptr.vmem [resolvable:$true] %s566_s4 }
  0xc4   : > { %p7061_p7 = scmp.ne.s32.totalorder %s7620_s13, %s7060_s16  ;;  %s7065_s23 = scalar_lea.hbm %s9140_s10, 12288 }
  0xc5   : > { %p7066_p8 = scmp.lt.u32.totalorder %s7620_s13, %s9140_s10  ;;  %p7067_p3 = scmp.lt.u32.totalorder %s7065_s23, %s7060_s16 }
  0xc6   : > { %p7063_p10 = pnand %p7061_p7, %p7445_p13  ;;  %p7069_p5 = scmp.lt.u32.totalorder %s7060_s16, %s7620_s13 }
  0xc7   : > { %p7068_p1 = por %p7067_p3, %p7066_p8 }
  0xc8   : > { %p7064_p6 = pneg %p7063_p10 }
  0xc9   : > { %p7070_p11 = por %p7069_p5, %p7068_p1 }
  0xcb   : > { %p7071_p4 = pnand %p7070_p11, %p7064_p6 }
  0xcd   : > { %7074 = shalt.err (!%p7071_p4)
}
  0xce   : > { %s7075_s22 = scalar_lea.vmem %s7623_s4, 4096  ;;  %s7250_s6 = smov [#allocation13]  }
  0xcf   : > { %p7076_p0 = scmp.ne.s32.totalorder %s7623_s4, %s7075_s22  ;;  %s7080_s7 = sshll.u32 %s7250_s6, 4  ;;  %s7081_s7 = int_to_ptr.vmem [resolvable:$false] %s7080_s7 }
  0xd0   : > { %s7082_s11 = scalar_lea.vmem %s7081_s7, 8192  ;;  %p7083_p7 = scmp.lt.s32.totalorder %s7623_s4, %s7081_s7 }
  0xd1   : > { %p7078_p9 = pnand %p7076_p0, %p7445_p13  ;;  %p7084_p10 = scmp.lt.s32.totalorder %s7082_s11, %s7075_s22 }
  0xd3   : > { %p7079_p2 = pneg %p7078_p9  ;;  %p7085_p8 = por %p7084_p10, %p7083_p7 }
  0xd5   : > { %p7086_p3 = pnand %p7085_p8, %p7079_p2 }
  0xd7   : > { %7089 = shalt.err (!%p7086_p3)
}
  0xd8   : > { %6519 = dma.hbm_to_vmem [thread:$0]  (!%p9218_p12), %s7620_s13, 4096, %s7623_s4, %s7439_s2, %s9222_s18, %s9222_s18, %s9221_s15  }
  0xd9   : > { %s7251_s28 = smov [#allocation6]   ;;  %s4777_s16 = sshll.u32 %s7418_s24, 4 }
  0xda   : > { %s431_s27 = sshll.u32 %s7251_s28, 4  ;;  %s7090_s23 = scalar_lea.hbm %s9133_s3, 16  ;;  %s432_s27 = int_to_ptr.vmem [resolvable:$true] %s431_s27 }
  0xdb   : > { %p7091_p6 = scmp.ne.s32.totalorder %s9133_s3, %s7090_s23  ;;  %p9226_p1 = scmp.ne.s32.totalorder %s9211_s20, 0 }
  0xdc   : > { %p7097_p0 = scmp.lt.u32.totalorder %s7090_s23, %s9133_s3 }
  0xdd   : > { %p9227_p5 = pneg %p9226_p1 }
  0xdf   : > { %p7093_p11 = pnand %p7091_p6, %p9227_p5 }
  0xe1   : > { %p7094_p4 = pneg %p7093_p11 }
  0xe3   : > { %p7099_p9 = pnand %p7097_p0, %p7094_p4 }
  0xe5   : > { %7102 = shalt.err (!%p7099_p9)
}
  0xe6   : > { %s7103_s24 = scalar_lea.vmem %s432_s27, 16  ;;  %p9228_p7 = pmov %p9227_p5 }
  0xe7   : > { %p7104_p2 = scmp.ne.s32.totalorder %s432_s27, %s7103_s24  ;;  %s7110_s13 = scalar_lea.vmem %s432_s27, 32 }
  0xe8   : > { %p7111_p3 = scmp.lt.s32.totalorder %s432_s27, %s432_s27  ;;  %p7112_p12 = scmp.lt.s32.totalorder %s7110_s13, %s7103_s24 }
  0xe9   : > { %p7106_p10 = pnand %p7104_p2, %p9228_p7 }
  0xea   : > { %p7113_p13 = por %p7112_p12, %p7111_p3 }
  0xeb   : > { %p7107_p8 = pneg %p7106_p10 }
  0xed   : > { %p7114_p5 = pnand %p7113_p13, %p7107_p8 }
  0xef   : > { %7117 = shalt.err (!%p7114_p5)
}
  0xf0   : > { %6500 = dma.hbm_to_vmem [thread:$0]  (!%p9226_p1), %s9133_s3, 16, %s432_s27, [#allocation7]  }
  0xf1   : > { %s4931_s11 = sshll.u32 %s7232_s29, 8  ;;  %s587_s28 = scalar_lea.vmem [#allocation14], %s4777_s16 }
  0xf2   : > { %s594_s19 = sshll.u32 %s587_s28, 4  ;;  %s7675_s0 = scalar_lea.hbm %s9142_s12, %s4931_s11  ;;  %s7677_s19 = int_to_ptr.vmem [resolvable:$true] %s594_s19 }
  0xf3   : > { %s7118_s20 = scalar_lea.hbm %s7675_s0, 256  ;;  %p9229_p13 = scmp.ne.s32.totalorder %s9219_s5, 0 }
  0xf4   : > { %p7119_p12 = scmp.ne.s32.totalorder %s7675_s0, %s7118_s20  ;;  %s7123_s16 = scalar_lea.hbm %s9142_s12, 768 }
  0xf5   : > { %p7124_p1 = scmp.lt.u32.totalorder %s7675_s0, %s9142_s12  ;;  %p7125_p4 = scmp.lt.u32.totalorder %s7123_s16, %s7118_s20 }
  0xf6   : > { %p7121_p6 = pnand %p7119_p12, %p9229_p13  ;;  %p7127_p9 = scmp.lt.u32.totalorder %s7118_s20, %s7675_s0 }
  0xf7   : > { %p7126_p0 = por %p7125_p4, %p7124_p1 }
  0xf8   : > { %p7122_p11 = pneg %p7121_p6 }
  0xf9   : > { %p7128_p2 = por %p7127_p9, %p7126_p0 }
  0xfb   : > { %p7129_p7 = pnand %p7128_p2, %p7122_p11 }
  0xfd   : > { %7132 = shalt.err (!%p7129_p7)
}
  0xfe   : > { %s7133_s24 = scalar_lea.vmem %s7677_s19, 256  ;;  %s7252_s13 = smov [#allocation14]  }
  0xff   : > { %p7134_p10 = scmp.ne.s32.totalorder %s7677_s19, %s7133_s24  ;;  %s7138_s4 = sshll.u32 %s7252_s13, 4  ;;  %s7139_s4 = int_to_ptr.vmem [resolvable:$false] %s7138_s4 }
 0x100   : > { %s7140_s7 = scalar_lea.vmem %s7139_s4, 512  ;;  %p7141_p5 = scmp.lt.s32.totalorder %s7677_s19, %s7139_s4 }
 0x101   : > { %p7136_p8 = pnand %p7134_p10, %p9229_p13  ;;  %p7142_p12 = scmp.lt.s32.totalorder %s7140_s7, %s7133_s24 }
 0x103   : > { %p7137_p3 = pneg %p7136_p8  ;;  %p7143_p6 = por %p7142_p12, %p7141_p5 }
 0x105   : > { %p7144_p1 = pnand %p7143_p6, %p7137_p3 }
 0x107   : > { %7147 = shalt.err (!%p7144_p1)
}
 0x108   : > { %p9230_p11 = scmp.ne.s32.totalorder %s9212_s21, 0  ;;  %p9231_p13 = scmp.ne.s32.totalorder %s9210_s17, 0 }
 0x10a   : > { %6522 = dma.hbm_to_vmem [thread:$0]  (!%p9230_p11), %s7675_s0, 256, %s7677_s19, %s7439_s2, %s9222_s18, %s9222_s18, %s9221_s15  }
 0x10b   : > { %606 = sbr.rel (%p9231_p13) target bundleno = 4592 (0x11f0), region = 72 }
 0x112   : > { %p9232_p4 = scmp.eq.s32.totalorder %s7357_s14, 0 }
 0x114   : > { %7199 = dma.done.wait (%p9232_p4), [#allocation4], 1024   ;;  %p9233_p0 = pmov %p9232_p4 }
 0x116   : > { %7201 = vsyncadd (%p9233_p0), [#allocation4], 4294966272  ;;  %p9234_p9 = pmov %p9233_p0 }
 0x117   : > { %p9235_p2 = pmov %p9233_p0 }
 0x118   : > { %7203 = dma.done.wait (%p9234_p9), [#allocation7], 16  }
 0x119   : > { %7205 = vsyncadd (%p9235_p2), [#allocation7], 4294967280  ;;  %s9236_s21 = sld [smem:[#allocation22_spill]]  ;;  %s616_s5 = sand.u32 1, %s7357_s14  }
 0x11a   : > { %s618_s2 = sand.u32 1, %s7220_s26   ;;  %s617_s17 = scalar_lea.sflag [#allocation4], %s616_s5 }
 0x11b   : > { %s6467_s15 = smul.u32 384, %s618_s2 }
 0x11d   : > { %s7716_s18 = scalar_lea.vmem [#allocation8], %s6467_s15 }
 0x11f   : > { %p9237_p7 = scmp.ne.s32.totalorder %s9236_s21, 0 }
 0x121   : > { %7207 = dma.done.wait (%p9237_p7), %s617_s17, 22784  }
 0x122   : > { %7209 = vsyncadd (%p9237_p7), %s617_s17, 4294944512  ;;  %s9238_s11 = sld [smem:[#allocation21_spill]]  ;;  %s4783_s28 = sshll.u32 %s618_s2, 7 }
 0x123   : > { %s4784_s19 = sshll.u32 %s618_s2, 8  ;;  %s4788_s1 = sshll.u32 %s618_s2, 4 }
 0x124   : > { %s9239_s16 = sld [smem:[#allocation50_spill]]  ;;  %s9240_s13 = sld [smem:[#allocation53_spill]] }
 0x125   : > { %s7734_s7 = scalar_lea.vmem [#allocation9], %s4783_s28  ;;  %s7736_s21 = scalar_lea.vmem [#allocation10], %s4784_s19 }
 0x126   : > { %s7738_s5 = scalar_lea.vmem [#allocation11], %s4783_s28  ;;  %s7740_s2 = scalar_lea.vmem [#allocation12], %s4784_s19 }
 0x127   : > { %s7742_s15 = scalar_lea.vmem [#allocation13], %s4784_s19  ;;  %s7744_s17 = scalar_lea.vmem [#allocation14], %s4788_s1 }
 0x128   : > { %p764_p10 = scmp.lt.s32.totalorder %s9238_s11, 2  ;;  %p4792_p8 = scmp.ne.s32.totalorder %s9238_s11, 0 }
 0x129   : > { %v810_v0 = vld [vmem:[#allocation3] sm:$0xff] (!%p4792_p8)  ;;  %v811_v1 = vld [vmem:[#allocation3 + $0x8] sm:$0xff] (!%p4792_p8)  ;;  %v812_v2 = vld [vmem:[#allocation3 + $0x10] sm:$0xff] (!%p4792_p8)  ;;  %vm825_vm0 = vcmask (!%p4792_p8), 523264   ;;  %s9242_s27 = sld [smem:[#allocation47_spill]] (!%p4792_p8) }
 0x12a   : > { %s765_s23 = scalar_select %p764_p10, %s9238_s11, 2 }
 0x12b   : > { %777 = sbr.rel (%p4792_p8) target bundleno = 562 (0x232), region = 112  ;;  %v5825_v3 = vpack.c.bf16 (!%p4792_p8), %v811_v1, %v810_v0  ;;  %v813_v4 = vld [vmem:[#allocation3 + $0x18] sm:$0xff] (!%p4792_p8)  ;;  %v814_v6 = vld [vmem:[#allocation3 + $0x20] sm:$0xff] (!%p4792_p8)  ;;  %v815_v7 = vld [vmem:[#allocation3 + $0x28] sm:$0xff] (!%p4792_p8) }
 0x12c   : > { %s4932_s0 = sshll.u32 %s765_s23, 7  ;;  %s4791_s20 = sshll.u32 %s765_s23, 1  ;;  %v5829_v5 = vpack.c.bf16 (!%p4792_p8), %v813_v4, %v812_v2  ;;  %v5833_v10 = vpack.c.bf16 (!%p4792_p8), %v815_v7, %v814_v6  ;;  %v816_v11 = vld [vmem:[#allocation3 + $0x30] sm:$0xff] (!%p4792_p8)  ;;  %v817_v12 = vld [vmem:[#allocation3 + $0x38] sm:$0xff] (!%p4792_p8)  ;;  %v7881_v46 = vld [vmem:[#allocation6] ss:$0 sm:$0xff] (!%p4792_p8) }
 0x12d   : > { %s7727_s22 = scalar_lea.vmem %s9239_s16, %s4932_s0  ;;  %s7732_s4 = scalar_lea.vmem %s9240_s13, %s4791_s20  ;;  %5826 = vmatprep.subr.bf16.mxu0 (!%p4792_p8), %v5825_v3  ;;  %6457 = vmatprep.subr.bf16.mxu1 (!%p4792_p8), %v5825_v3  ;;  %v5837_v13 = vpack.c.bf16 (!%p4792_p8), %v817_v12, %v816_v11 }
 0x12e   : > { %s9241_s0 = sld [smem:[#allocation46_spill]] (!%p4792_p8)  ;;  %5828 = vmatpush3.bf16.msra.mxu0 (!%p4792_p8), %v5825_v3  ;;  %6461 = vmatpush3.bf16.msra.mxu1 (!%p4792_p8), %v5825_v3 }
 0x12f   : > { %5830 = vmatprep.subr.bf16.mxu0 (!%p4792_p8), %v5829_v5  ;;  %6458 = vmatprep.subr.bf16.mxu1 (!%p4792_p8), %v5829_v5  ;;  %s9243_s16 = smov (!%p4792_p8), %s9242_s27  ;;  %v1179_v44 = vld [vmem:[%s9242_s27] sm:$0xff] (!%p4792_p8) }
 0x130   : > { %v1180_v45 = vld [vmem:[%s9243_s16 + $0x8] sm:$0xff] (!%p4792_p8)  ;;  %1181 = vst [vmem:[#allocation15] sm:$0xff] (!%p4792_p8), %v1179_v44  ;;  %1183 = vst [vmem:[#allocation15 + $0x10] sm:$0xff] (!%p4792_p8), %v1179_v44 }
 0x131   : > { %1182 = vst [vmem:[#allocation15 + $0x8] sm:$0xff] (!%p4792_p8), %v1180_v45  ;;  %1184 = vst [vmem:[#allocation15 + $0x18] sm:$0xff] (!%p4792_p8), %v1180_v45 }
 0x132   : > { %5832 = vmatpush3.bf16.msra.mxu0 %v5829_v5  ;;  %6462 = vmatpush3.bf16.msra.mxu1 %v5829_v5 }
 0x133   : > { %5834 = vmatprep.subr.bf16.mxu0 %v5833_v10  ;;  %6459 = vmatprep.subr.bf16.mxu1 %v5833_v10 }
 0x134   : > { %v778_v8 = vld [vmem:[%s9241_s0] sm:$0xff]  ;;  %v779_v14 = vld [vmem:[%s9241_s0 + $0x8] sm:$0xff]  ;;  %v780_v16 = vld [vmem:[%s9241_s0 + $0x10] sm:$0xff] }
 0x135   : > { %v794_v9 = vld [vmem:[%s9241_s0 + $0x80] sm:$0xff]  ;;  %5289 = vmatprep.mubr.msk.f32.mxu0 %vm825_vm0, %v778_v8  ;;  %v795_v15 = vld [vmem:[%s9241_s0 + $0x88] sm:$0xff]  ;;  %v796_v17 = vld [vmem:[%s9241_s0 + $0x90] sm:$0xff] }
 0x136   : > { %5313 = vmatprep.mubr.msk.f32.mxu1 %vm825_vm0, %v794_v9  ;;  %5836 = vmatpush3.bf16.msra.mxu0 %v5833_v10  ;;  %v781_v18 = vld [vmem:[%s9241_s0 + $0x18] sm:$0xff]  ;;  %v782_v20 = vld [vmem:[%s9241_s0 + $0x20] sm:$0xff]  ;;  %v783_v22 = vld [vmem:[%s9241_s0 + $0x28] sm:$0xff] }
 0x137   : > { %6463 = vmatpush3.bf16.msra.mxu1 %v5833_v10  ;;  %5838 = vmatprep.subr.bf16.mxu0 %v5837_v13  ;;  %v797_v19 = vld [vmem:[%s9241_s0 + $0x98] sm:$0xff]  ;;  %v798_v21 = vld [vmem:[%s9241_s0 + $0xa0] sm:$0xff]  ;;  %v799_v23 = vld [vmem:[%s9241_s0 + $0xa8] sm:$0xff] }
 0x138   : > { %6460 = vmatprep.subr.bf16.mxu1 %v5837_v13  ;;  %v784_v24 = vld [vmem:[%s9241_s0 + $0x30] sm:$0xff]  ;;  %v785_v26 = vld [vmem:[%s9241_s0 + $0x38] sm:$0xff]  ;;  %v786_v28 = vld [vmem:[%s9241_s0 + $0x40] sm:$0xff] }
 0x139   : > { %v800_v25 = vld [vmem:[%s9241_s0 + $0xb0] sm:$0xff]  ;;  %v801_v27 = vld [vmem:[%s9241_s0 + $0xb8] sm:$0xff]  ;;  %v802_v29 = vld [vmem:[%s9241_s0 + $0xc0] sm:$0xff] }
 0x13a   : > { %5840 = vmatpush3.bf16.msra.mxu0 %v5837_v13  ;;  %v787_v30 = vld [vmem:[%s9241_s0 + $0x48] sm:$0xff]  ;;  %v788_v32 = vld [vmem:[%s9241_s0 + $0x50] sm:$0xff]  ;;  %v789_v34 = vld [vmem:[%s9241_s0 + $0x58] sm:$0xff] }
 0x13b   : > { %6464 = vmatpush3.bf16.msra.mxu1 %v5837_v13  ;;  %v803_v31 = vld [vmem:[%s9241_s0 + $0xc8] sm:$0xff]  ;;  %v804_v33 = vld [vmem:[%s9241_s0 + $0xd0] sm:$0xff]  ;;  %v805_v35 = vld [vmem:[%s9241_s0 + $0xd8] sm:$0xff] }
 0x13c   : > { %v790_v36 = vld [vmem:[%s9241_s0 + $0x60] sm:$0xff]  ;;  %v791_v38 = vld [vmem:[%s9241_s0 + $0x68] sm:$0xff]  ;;  %v792_v40 = vld [vmem:[%s9241_s0 + $0x70] sm:$0xff] }
 0x13d   : > { %5290 = vmatmul.mubr.msk.f32.vlgmr.msra.gmra.mrb[0].mxu0 %vm825_vm0, %v779_v14  ;;  %v806_v37 = vld [vmem:[%s9241_s0 + $0xe0] sm:$0xff]  ;;  %v807_v39 = vld [vmem:[%s9241_s0 + $0xe8] sm:$0xff]  ;;  %v808_v41 = vld [vmem:[%s9241_s0 + $0xf0] sm:$0xff] }
 0x13e   : > { %5314 = vmatmul.mubr.msk.f32.vlgmr.msra.gmra.mrb[0].mxu1 %vm825_vm0, %v795_v15  ;;  %5292 = vmatprep.mubr.msk.f32.mxu0 %vm825_vm0, %v780_v16  ;;  %v793_v42 = vld [vmem:[%s9241_s0 + $0x78] sm:$0xff] }
 0x13f   : > { %5316 = vmatprep.mubr.msk.f32.mxu1 %vm825_vm0, %v796_v17  ;;  %v809_v43 = vld [vmem:[%s9241_s0 + $0xf8] sm:$0xff] }
 0x141   : > { %5293 = vmatmul.mubr.msk.f32.gmra.mrb[2].mxu0 %vm825_vm0, %v781_v18 }
 0x142   : > { %5317 = vmatmul.mubr.msk.f32.gmra.mrb[2].mxu1 %vm825_vm0, %v797_v19  ;;  %5295 = vmatprep.mubr.msk.f32.mxu0 %vm825_vm0, %v782_v20 }
 0x143   : > { %5319 = vmatprep.mubr.msk.f32.mxu1 %vm825_vm0, %v798_v21 }
 0x145   : > { %5296 = vmatmul.mubr.msk.f32.gmra.mrb[4].mxu0 %vm825_vm0, %v783_v22 }
 0x146   : > { %5320 = vmatmul.mubr.msk.f32.gmra.mrb[4].mxu1 %vm825_vm0, %v799_v23  ;;  %5298 = vmatprep.mubr.msk.f32.mxu0 %vm825_vm0, %v784_v24 }
 0x147   : > { %5322 = vmatprep.mubr.msk.f32.mxu1 %vm825_vm0, %v800_v25 }
 0x149   : > { %5299 = vmatmul.mubr.msk.f32.gmra.mrb[6].mxu0 %vm825_vm0, %v785_v26 }
 0x14a   : > { %5323 = vmatmul.mubr.msk.f32.gmra.mrb[6].mxu1 %vm825_vm0, %v801_v27  ;;  %5301 = vmatprep.mubr.msk.f32.mxu0 %vm825_vm0, %v786_v28 }
 0x14b   : > { %5325 = vmatprep.mubr.msk.f32.mxu1 %vm825_vm0, %v802_v29 }
 0x14d   : > { %5302 = vmatmul.mubr.msk.f32.gmra.mrb[8].mxu0 %vm825_vm0, %v787_v30 }
 0x14e   : > { %5326 = vmatmul.mubr.msk.f32.gmra.mrb[8].mxu1 %vm825_vm0, %v803_v31  ;;  %5304 = vmatprep.mubr.msk.f32.mxu0 %vm825_vm0, %v788_v32 }
 0x14f   : > { %5328 = vmatprep.mubr.msk.f32.mxu1 %vm825_vm0, %v804_v33 }
 0x151   : > { %5305 = vmatmul.mubr.msk.f32.gmra.mrb[10].mxu0 %vm825_vm0, %v789_v34 }
 0x152   : > { %5329 = vmatmul.mubr.msk.f32.gmra.mrb[10].mxu1 %vm825_vm0, %v805_v35  ;;  %5307 = vmatprep.mubr.msk.f32.mxu0 %vm825_vm0, %v790_v36 }
 0x153   : > { %5331 = vmatprep.mubr.msk.f32.mxu1 %vm825_vm0, %v806_v37 }
 0x155   : > { %5308 = vmatmul.mubr.msk.f32.gmra.mrb[12].mxu0 %vm825_vm0, %v791_v38 }
 0x156   : > { %5332 = vmatmul.mubr.msk.f32.gmra.mrb[12].mxu1 %vm825_vm0, %v807_v39  ;;  %5310 = vmatprep.mubr.msk.f32.mxu0 %vm825_vm0, %v792_v40 }
 0x157   : > { %5334 = vmatprep.mubr.msk.f32.mxu1 %vm825_vm0, %v808_v41 }
 0x159   : > { %5311 = vmatmul.mubr.msk.f32.gmra.mrb[14].mxu0 %vm825_vm0, %v793_v42 }
 0x15a   : > { %5335 = vmatmul.mubr.msk.f32.gmra.mrb[14].mxu1 %vm825_vm0, %v809_v43 }
 0x210   : > { %v5291_v47 = vpop.f32.mrb[0].mxu0 }
 0x211   : > { %v5315_v48 = vpop.f32.mrb[0].mxu1  ;;  %v994_v49 = vadd.f32 %v5291_v47, %v7881_v46  ;;  %v988_v51 = vpop.f32.mrb[1].mxu0 }
 0x212   : > { %v1074_v50 = vadd.f32 %v5315_v48, %v7881_v46  ;;  %v1068_v52 = vpop.f32.mrb[1].mxu1  ;;  %v989_v53 = vadd.f32 %v7881_v46, %v988_v51 }
 0x213   : > { %v1069_v54 = vadd.f32 %v7881_v46, %v1068_v52  ;;  %1148 = vst [vmem:[#allocation2 + $0x8] sm:$0xff] %v994_v49 }
 0x214   : > { %1164 = vst [vmem:[#allocation2 + $0x88] sm:$0xff] %v1074_v50  ;;  %1147 = vst [vmem:[#allocation2] sm:$0xff] %v989_v53  ;;  %v5294_v55 = vpop.f32.mrb[2].mxu0 }
 0x215   : > { %1163 = vst [vmem:[#allocation2 + $0x80] sm:$0xff] %v1069_v54  ;;  %v5318_v56 = vpop.f32.mrb[2].mxu1  ;;  %v1004_v57 = vadd.f32 %v5294_v55, %v7881_v46  ;;  %v998_v59 = vpop.f32.mrb[3].mxu0 }
 0x216   : > { %v1084_v58 = vadd.f32 %v5318_v56, %v7881_v46  ;;  %v1078_v60 = vpop.f32.mrb[3].mxu1  ;;  %v999_v61 = vadd.f32 %v7881_v46, %v998_v59 }
 0x217   : > { %v1079_v62 = vadd.f32 %v7881_v46, %v1078_v60  ;;  %1150 = vst [vmem:[#allocation2 + $0x18] sm:$0xff] %v1004_v57 }
 0x218   : > { %1166 = vst [vmem:[#allocation2 + $0x98] sm:$0xff] %v1084_v58  ;;  %1149 = vst [vmem:[#allocation2 + $0x10] sm:$0xff] %v999_v61  ;;  %v5297_v63 = vpop.f32.mrb[4].mxu0 }
 0x219   : > { %1165 = vst [vmem:[#allocation2 + $0x90] sm:$0xff] %v1079_v62  ;;  %v5321_v0 = vpop.f32.mrb[4].mxu1  ;;  %v1014_v1 = vadd.f32 %v5297_v63, %v7881_v46  ;;  %v1008_v3 = vpop.f32.mrb[5].mxu0 }
 0x21a   : > { %v1094_v2 = vadd.f32 %v5321_v0, %v7881_v46  ;;  %v1088_v4 = vpop.f32.mrb[5].mxu1  ;;  %v1009_v5 = vadd.f32 %v7881_v46, %v1008_v3 }
 0x21b   : > { %v1089_v6 = vadd.f32 %v7881_v46, %v1088_v4  ;;  %1152 = vst [vmem:[#allocation2 + $0x28] sm:$0xff] %v1014_v1 }
 0x21c   : > { %1168 = vst [vmem:[#allocation2 + $0xa8] sm:$0xff] %v1094_v2  ;;  %1151 = vst [vmem:[#allocation2 + $0x20] sm:$0xff] %v1009_v5  ;;  %v5300_v7 = vpop.f32.mrb[6].mxu0 }
 0x21d   : > { %1167 = vst [vmem:[#allocation2 + $0xa0] sm:$0xff] %v1089_v6  ;;  %v5324_v8 = vpop.f32.mrb[6].mxu1  ;;  %v1024_v9 = vadd.f32 %v5300_v7, %v7881_v46  ;;  %v1018_v11 = vpop.f32.mrb[7].mxu0 }
 0x21e   : > { %v1104_v10 = vadd.f32 %v5324_v8, %v7881_v46  ;;  %v1098_v12 = vpop.f32.mrb[7].mxu1  ;;  %v1019_v13 = vadd.f32 %v7881_v46, %v1018_v11 }
 0x21f   : > { %v1099_v14 = vadd.f32 %v7881_v46, %v1098_v12  ;;  %1154 = vst [vmem:[#allocation2 + $0x38] sm:$0xff] %v1024_v9 }
 0x220   : > { %1170 = vst [vmem:[#allocation2 + $0xb8] sm:$0xff] %v1104_v10  ;;  %1153 = vst [vmem:[#allocation2 + $0x30] sm:$0xff] %v1019_v13  ;;  %v5303_v15 = vpop.f32.mrb[8].mxu0 }
 0x221   : > { %1169 = vst [vmem:[#allocation2 + $0xb0] sm:$0xff] %v1099_v14  ;;  %v5327_v16 = vpop.f32.mrb[8].mxu1  ;;  %v1034_v17 = vadd.f32 %v5303_v15, %v7881_v46  ;;  %v1028_v19 = vpop.f32.mrb[9].mxu0 }
 0x222   : > { %v1114_v18 = vadd.f32 %v5327_v16, %v7881_v46  ;;  %v1108_v20 = vpop.f32.mrb[9].mxu1  ;;  %v1029_v21 = vadd.f32 %v7881_v46, %v1028_v19 }
 0x223   : > { %v1109_v22 = vadd.f32 %v7881_v46, %v1108_v20  ;;  %1156 = vst [vmem:[#allocation2 + $0x48] sm:$0xff] %v1034_v17 }
 0x224   : > { %1172 = vst [vmem:[#allocation2 + $0xc8] sm:$0xff] %v1114_v18  ;;  %1155 = vst [vmem:[#allocation2 + $0x40] sm:$0xff] %v1029_v21  ;;  %v5306_v23 = vpop.f32.mrb[10].mxu0 }
 0x225   : > { %1171 = vst [vmem:[#allocation2 + $0xc0] sm:$0xff] %v1109_v22  ;;  %v5330_v24 = vpop.f32.mrb[10].mxu1  ;;  %v1044_v25 = vadd.f32 %v5306_v23, %v7881_v46  ;;  %v1038_v27 = vpop.f32.mrb[11].mxu0 }
 0x226   : > { %v1124_v26 = vadd.f32 %v5330_v24, %v7881_v46  ;;  %v1118_v28 = vpop.f32.mrb[11].mxu1  ;;  %v1039_v29 = vadd.f32 %v7881_v46, %v1038_v27 }
 0x227   : > { %v1119_v30 = vadd.f32 %v7881_v46, %v1118_v28  ;;  %1158 = vst [vmem:[#allocation2 + $0x58] sm:$0xff] %v1044_v25 }
 0x228   : > { %1174 = vst [vmem:[#allocation2 + $0xd8] sm:$0xff] %v1124_v26  ;;  %1157 = vst [vmem:[#allocation2 + $0x50] sm:$0xff] %v1039_v29  ;;  %v5309_v31 = vpop.f32.mrb[12].mxu0 }
 0x229   : > { %1173 = vst [vmem:[#allocation2 + $0xd0] sm:$0xff] %v1119_v30  ;;  %v5333_v32 = vpop.f32.mrb[12].mxu1  ;;  %v1054_v33 = vadd.f32 %v5309_v31, %v7881_v46  ;;  %v1048_v35 = vpop.f32.mrb[13].mxu0 }
 0x22a   : > { %v1134_v34 = vadd.f32 %v5333_v32, %v7881_v46  ;;  %v1128_v36 = vpop.f32.mrb[13].mxu1  ;;  %v1049_v37 = vadd.f32 %v7881_v46, %v1048_v35 }
 0x22b   : > { %v1129_v38 = vadd.f32 %v7881_v46, %v1128_v36  ;;  %1160 = vst [vmem:[#allocation2 + $0x68] sm:$0xff] %v1054_v33 }
 0x22c   : > { %1176 = vst [vmem:[#allocation2 + $0xe8] sm:$0xff] %v1134_v34  ;;  %1159 = vst [vmem:[#allocation2 + $0x60] sm:$0xff] %v1049_v37  ;;  %v5312_v39 = vpop.f32.mrb[14].mxu0 }
 0x22d   : > { %1175 = vst [vmem:[#allocation2 + $0xe0] sm:$0xff] %v1129_v38  ;;  %v5336_v40 = vpop.f32.mrb[14].mxu1  ;;  %v1064_v41 = vadd.f32 %v5312_v39, %v7881_v46  ;;  %v1058_v43 = vpop.f32.mrb[15].mxu0 }
 0x22e   : > { %v1144_v42 = vadd.f32 %v5336_v40, %v7881_v46  ;;  %v1138_v44 = vpop.f32.mrb[15].mxu1  ;;  %v1059_v45 = vadd.f32 %v7881_v46, %v1058_v43 }
 0x22f   : > { %v1139_v47 = vadd.f32 %v7881_v46, %v1138_v44  ;;  %1162 = vst [vmem:[#allocation2 + $0x78] sm:$0xff] %v1064_v41 }
 0x230   : > { %1178 = vst [vmem:[#allocation2 + $0xf8] sm:$0xff] %v1144_v42  ;;  %1161 = vst [vmem:[#allocation2 + $0x70] sm:$0xff] %v1059_v45 }
 0x231   : > { %1177 = vst [vmem:[#allocation2 + $0xf0] sm:$0xff] %v1139_v47 }
 0x232 PF: > { %v1192_v48 = vld [vmem:[%s7716_s18 + $0x8] sm:$0xff]  ;;  %v1195_v49 = vld [vmem:[%s7716_s18 + $0x20] sm:$0xff]  ;;  %v1194_v46 = vld [vmem:[%s7716_s18 + $0x18] sm:$0xff]  ;;  %v9171_v54 = vmov 0.0   ;;  %vm1481_vm1 = vcmask 523264   ;;  %vm1814_vm3 = vcmask 130048  }
 0x233   : > { %v1191_v50 = vld [vmem:[%s7716_s18] sm:$0xff]  ;;  %v5841_v51 = vpack.c.bf16 %v1195_v49, %v1192_v48  ;;  %v1198_v52 = vld [vmem:[%s7716_s18 + $0x38] sm:$0xff]  ;;  %v1201_v53 = vld [vmem:[%s7716_s18 + $0x50] sm:$0xff]  ;;  %1303 = vmatprep.mubr.f32.mxu0 %v9171_v54  ;;  %p6528_p3 = scmp.eq.s32.totalorder %s7357_s14, 2 }
 0x234   : > { %v5843_v55 = vpack.c.bf16 %v1194_v46, %v1191_v50  ;;  %v5845_v56 = vpack.c.bf16 %v1201_v53, %v1198_v52  ;;  %v1197_v57 = vld [vmem:[%s7716_s18 + $0x30] sm:$0xff]  ;;  %v1200_v58 = vld [vmem:[%s7716_s18 + $0x48] sm:$0xff]  ;;  %v1207_v60 = vld [vmem:[%s7716_s18 + $0x80] sm:$0xff] }
 0x235   : > { %v1204_v59 = vld [vmem:[%s7716_s18 + $0x68] sm:$0xff]  ;;  %5842 = vmatprep.subr.bf16.mxu0 %v5841_v51  ;;  %v5847_v61 = vpack.c.bf16 %v1200_v58, %v1197_v57  ;;  %v1203_v63 = vld [vmem:[%s7716_s18 + $0x60] sm:$0xff]  ;;  %v1206_v0 = vld [vmem:[%s7716_s18 + $0x78] sm:$0xff] }
 0x236   : > { %5844 = vmatpush1.bf16.msra.mxu0 %v5843_v55  ;;  %v5849_v62 = vpack.c.bf16 %v1207_v60, %v1204_v59  ;;  %v1210_v1 = vld [vmem:[%s7716_s18 + $0x98] sm:$0xff]  ;;  %v1213_v2 = vld [vmem:[%s7716_s18 + $0xb0] sm:$0xff]  ;;  %v5851_v3 = vpack.c.bf16 %v1206_v0, %v1203_v63  ;;  %v1212_v6 = vld [vmem:[%s7716_s18 + $0xa8] sm:$0xff] }
 0x237   : > { %5846 = vmatprep.subr.bf16.mxu0 %v5845_v56  ;;  %v5853_v4 = vpack.c.bf16 %v1213_v2, %v1210_v1  ;;  %v1209_v5 = vld [vmem:[%s7716_s18 + $0x90] sm:$0xff]  ;;  %v1216_v7 = vld [vmem:[%s7716_s18 + $0xc8] sm:$0xff]  ;;  %v1219_v8 = vld [vmem:[%s7716_s18 + $0xe0] sm:$0xff] }
 0x238   : > { %v7934_v9 = vld [vmem:[#allocation15] sm:$0xff]  ;;  %v5855_v11 = vpack.c.bf16 %v1212_v6, %v1209_v5  ;;  %v1193_v12 = vld [vmem:[%s7716_s18 + $0x10] sm:$0xff]  ;;  %v1196_v13 = vld [vmem:[%s7716_s18 + $0x28] sm:$0xff]  ;;  %v5857_v15 = vpack.c.bf16 %v1219_v8, %v1216_v7 }
 0x239   : > { %v1215_v10 = vld [vmem:[%s7716_s18 + $0xc0] sm:$0xff]  ;;  %5369 = vmatprep.mubr.f32.mxu1 %v7934_v9  ;;  %v1218_v16 = vld [vmem:[%s7716_s18 + $0xd8] sm:$0xff]  ;;  %v5873_v18 = vpack.c.bf16 %v1196_v13, %v1193_v12  ;;  %v1225_v20 = vld [vmem:[%s7716_s18 + $0x110] sm:$0xff] }
 0x23a   : > { %5848 = vmatpush1.bf16.msra.mxu0 %v5847_v61  ;;  %v1199_v14 = vld [vmem:[%s7716_s18 + $0x40] sm:$0xff]  ;;  %v1222_v17 = vld [vmem:[%s7716_s18 + $0xf8] sm:$0xff]  ;;  %v1205_v22 = vld [vmem:[%s7716_s18 + $0x70] sm:$0xff]  ;;  %v5859_v24 = vpack.c.bf16 %v1218_v16, %v1215_v10  ;;  %v9173_v61 = vlaneseq }
 0x23b   : > { %5850 = vmatprep.subr.bf16.mxu0 %v5849_v62  ;;  %v1202_v19 = vld [vmem:[%s7716_s18 + $0x58] sm:$0xff]  ;;  %v1208_v23 = vld [vmem:[%s7716_s18 + $0x88] sm:$0xff]  ;;  %5874 = vmatprep.subr.bf16.mxu1 %v5873_v18  ;;  %v5861_v25 = vpack.c.bf16 %v1225_v20, %v1222_v17  ;;  %v1221_v26 = vld [vmem:[%s7716_s18 + $0xf0] sm:$0xff] }
 0x23c   : > { %v5877_v21 = vpack.c.bf16 %v1202_v19, %v1199_v14  ;;  %5876 = vmatpush3.bf16.msra.mxu1 %v5873_v18  ;;  %v1224_v27 = vld [vmem:[%s7716_s18 + $0x108] sm:$0xff]  ;;  %v5881_v29 = vpack.c.bf16 %v1208_v23, %v1205_v22  ;;  %v1231_v30 = vld [vmem:[%s7716_s18 + $0x140] sm:$0xff]  ;;  %v1214_v32 = vld [vmem:[%s7716_s18 + $0xb8] sm:$0xff]  ;;  %v7984_v62 = vshrl.u32 %v9173_v61, 7 }
 0x23d   : > { %v1228_v28 = vld [vmem:[%s7716_s18 + $0x128] sm:$0xff]  ;;  %v1211_v31 = vld [vmem:[%s7716_s18 + $0xa0] sm:$0xff]  ;;  %v5863_v33 = vpack.c.bf16 %v1224_v27, %v1221_v26  ;;  %v1230_v36 = vld [vmem:[%s7716_s18 + $0x138] sm:$0xff] }
 0x23e   : > { %5852 = vmatpush1.bf16.msra.mxu0 %v5851_v3  ;;  %5878 = vmatprep.subr.bf16.mxu1 %v5877_v21  ;;  %v5865_v34 = vpack.c.bf16 %v1231_v30, %v1228_v28  ;;  %v1227_v35 = vld [vmem:[%s7716_s18 + $0x120] sm:$0xff]  ;;  %v1234_v37 = vld [vmem:[%s7716_s18 + $0x158] sm:$0xff]  ;;  %v5885_v38 = vpack.c.bf16 %v1214_v32, %v1211_v31  ;;  %v1237_v39 = vld [vmem:[%s7716_s18 + $0x170] sm:$0xff]  ;;  %v7987_v63 = vsub.s32 0, %v7984_v62  ;;  %v7995_v2 = vsub.s32 1, %v7984_v62 }
 0x23f   : > { %5854 = vmatprep.subr.bf16.mxu0 %v5853_v4  ;;  %v1217_v40 = vld [vmem:[%s7716_s18 + $0xd0] sm:$0xff]  ;;  %v1220_v41 = vld [vmem:[%s7716_s18 + $0xe8] sm:$0xff]  ;;  %v5867_v42 = vpack.c.bf16 %v1230_v36, %v1227_v35  ;;  %v5869_v43 = vpack.c.bf16 %v1237_v39, %v1234_v37  ;;  %v1223_v48 = vld [vmem:[%s7716_s18 + $0x100] sm:$0xff]  ;;  %v9174_v30 = vsub.s32 2, %v7984_v62 }
 0x240   : > { %5880 = vmatpush3.bf16.msra.mxu1 %v5877_v21  ;;  %v1233_v44 = vld [vmem:[%s7716_s18 + $0x150] sm:$0xff]  ;;  %v1236_v45 = vld [vmem:[%s7716_s18 + $0x168] sm:$0xff]  ;;  %v5889_v47 = vpack.c.bf16 %v1220_v41, %v1217_v40  ;;  %v1226_v49 = vld [vmem:[%s7716_s18 + $0x118] sm:$0xff]  ;;  %9244 = vst [vmem:[#allocation25_spill] sm:$0xff] %v7987_v63 }
 0x241   : > { %5882 = vmatprep.subr.bf16.mxu1 %v5881_v29  ;;  %v5871_v50 = vpack.c.bf16 %v1236_v45, %v1233_v44  ;;  %v5893_v51 = vpack.c.bf16 %v1226_v49, %v1223_v48  ;;  %v1229_v46 = vld [vmem:[%s7716_s18 + $0x130] sm:$0xff]  ;;  %v1232_v52 = vld [vmem:[%s7716_s18 + $0x148] sm:$0xff]  ;;  %v1235_v55 = vld [vmem:[%s7716_s18 + $0x160] sm:$0xff]  ;;  %9245 = vst [vmem:[#allocation26_spill] sm:$0xff] %v7995_v2 }
 0x242   : > { %5856 = vmatpush1.bf16.msra.mxu0 %v5855_v11  ;;  %v5897_v53 = vpack.c.bf16 %v1232_v52, %v1229_v46  ;;  %v1238_v56 = vld [vmem:[%s7716_s18 + $0x178] sm:$0xff]  ;;  %v7969_v57 = vld [vmem:[#allocation15 + $0x8] sm:$0xff]  ;;  %v7973_v59 = vld [vmem:[#allocation15 + $0x10] sm:$0xff]  ;;  %s7254_s18 = smov 64  }
 0x243   : > { %5858 = vmatprep.subr.bf16.mxu0 %v5857_v15  ;;  %v5901_v58 = vpack.c.bf16 %v1238_v56, %v1235_v55  ;;  %v7977_v60 = vld [vmem:[#allocation15 + $0x18] sm:$0xff]  ;;  %v7990_v0 = vld [vmem:[%s7744_s17] sm:$0xff]  ;;  %vm8002_vm2 = vmpackc.low %vm1481_vm1, %vm1481_vm1  ;;  %v9301_v15 = vlaneseq }
 0x244   : > { %5884 = vmatpush3.bf16.msra.mxu1 %v5881_v29  ;;  %v1416_v1 = vrot.slane %v7990_v0, %v7987_v63  ;;  %v1428_v6 = vrot.slane %v7990_v0, %v7995_v2 }
 0x245   : > { %5886 = vmatprep.subr.bf16.mxu1 %v5885_v38 }
 0x246   : > { %5860 = vmatpush1.bf16.msra.mxu0 %v5859_v24 }
 0x247   : > { %5862 = vmatprep.subr.bf16.mxu0 %v5861_v25 }
 0x248   : > { %5888 = vmatpush3.bf16.msra.mxu1 %v5885_v38 }
 0x249   : > { %5890 = vmatprep.subr.bf16.mxu1 %v5889_v47 }
 0x24a   : > { %5864 = vmatpush1.bf16.msra.mxu0 %v5863_v33  ;;  %v1436_v33 = vrot.slane %v7990_v0, %v9174_v30 }
 0x24b   : > { %5866 = vmatprep.subr.bf16.mxu0 %v5865_v34 }
 0x24c   : > { %5892 = vmatpush3.bf16.msra.mxu1 %v5889_v47 }
 0x24d   : > { %5894 = vmatprep.subr.bf16.mxu1 %v5893_v51 }
 0x24e   : > { %5868 = vmatpush1.bf16.msra.mxu0 %v5867_v42 }
 0x24f   : > { %5870 = vmatprep.subr.bf16.mxu0 %v5869_v43 }
 0x250   : > { %5896 = vmatpush3.bf16.msra.mxu1 %v5893_v51 }
 0x251   : > { %5898 = vmatprep.subr.bf16.mxu1 %v5897_v53 }
 0x252   : > { %5872 = vmatpush1.bf16.msra.mxu0 %v5871_v50 }
 0x254   : > { %5900 = vmatpush3.bf16.msra.mxu1 %v5897_v53 }
 0x255   : > { %1304 = vmatmul.mubr.f32.vlgmr.msra.gmra.mrb[0].mxu0 %v7934_v9  ;;  %5902 = vmatprep.subr.bf16.mxu1 %v5901_v58 }
 0x256   : > { %1309 = vmatprep.mubr.f32.mxu0 %v9171_v54 }
 0x258   : > { %5904 = vmatpush3.bf16.msra.mxu1 %v5901_v58 }
 0x259   : > { %1310 = vmatmul.mubr.f32.gmra.mrb[2].mxu0 %v7969_v57 }
 0x25a   : > { %1315 = vmatprep.mubr.f32.mxu0 %v9171_v54 }
 0x25b   : > { %5370 = vmatmul.mubr.f32.vlgmr.msra.gmra.mrb[0].mxu1 %v7969_v57 }
 0x25c   : > { %5372 = vmatprep.mubr.f32.mxu1 %v7973_v59 }
 0x25d   : > { %1316 = vmatmul.mubr.f32.gmra.mrb[4].mxu0 %v7973_v59 }
 0x25e   : > { %1321 = vmatprep.mubr.f32.mxu0 %v9171_v54 }
 0x25f   : > { %5373 = vmatmul.mubr.f32.gmra.mrb[2].mxu1 %v7977_v60 }
 0x261   : > { %1322 = vmatmul.mubr.f32.gmra.mrb[6].mxu0 %v7977_v60 }
 0x328   : > { %v1305_v3 = vpop.f32.mrb[0].mxu0 }
 0x329   : > { %v1417_v4 = vadd.f32 %v1416_v1, %v1305_v3  ;;  %v1307_v5 = vpop.f32.mrb[1].mxu0 }
 0x32a   : > { %v1429_v12 = vadd.f32 %v1428_v6, %v1307_v5 }
 0x32b   : > { %v1421_v7 = vmul.f32 0.125, %v1417_v4 }
 0x32c   : > { %v1311_v8 = vpop.f32.mrb[2].mxu0 }
 0x32d   : > { %v1418_v10 = vadd.f32 %v1416_v1, %v1311_v8  ;;  %v1313_v11 = vpop.f32.mrb[3].mxu0  ;;  %5379 = vmatprep.mubr.msk.f32.mxu1 %vm1481_vm1, %v1421_v7 }
 0x32e   : > { %v1430_v13 = vadd.f32 %v1428_v6, %v1313_v11  ;;  %v5371_v29 = vpop.f32.mrb[0].mxu1 }
 0x32f   : > { %v1422_v14 = vmul.f32 0.125, %v1418_v10  ;;  %v1394_v32 = vpop.f32.mrb[1].mxu1  ;;  %v1438_v36 = vadd.f32 %v5371_v29, %v1436_v33 }
 0x330   : > { %v5905_v16 = vpack.c.bf16 %v1430_v13, %v1429_v12  ;;  %v6591_v17 = vpack.i.bf16 %v1430_v13, %v1429_v12  ;;  %v1317_v18 = vpop.f32.mrb[4].mxu0  ;;  %v1437_v37 = vadd.f32 %v1436_v33, %v1394_v32 }
 0x331   : > { %1447 = vrot.lane.b32.xlu1 %v1422_v14, %s7254_s18  ;;  %v1319_v19 = vpop.f32.mrb[5].mxu0  ;;  %v1419_v20 = vadd.f32 %v1416_v1, %v1317_v18 }
 0x332   : > { %6592 = vrot.lane.b32.xlu0 %v6591_v17, %s7254_s18  ;;  %5907 = vmatprep.subr.msk.bf16.mxu1 %vm8002_vm2, %v5905_v16  ;;  %v1431_v21 = vadd.f32 %v1428_v6, %v1319_v19  ;;  %v5374_v34 = vpop.f32.mrb[2].mxu1  ;;  %v6601_v40 = vpack.i.bf16 %v1438_v36, %v1437_v37  ;;  %v5929_v41 = vpack.c.bf16 %v1438_v36, %v1437_v37 }
 0x333   : > { %5910 = vmatpush3.bf16.xpose.msk.msra.mxu1 %vm8002_vm2, %v5905_v16  ;;  %v1423_v26 = vmul.f32 0.125, %v1419_v20  ;;  %v1404_v35 = vpop.f32.mrb[3].mxu1  ;;  %v8025_v38 = vadd.f32 %v5374_v34, %v1436_v33 }
 0x334   : > { %v1323_v22 = vpop.f32.mrb[6].mxu0  ;;  %v8027_v39 = vadd.f32 %v1436_v33, %v1404_v35 }
 0x335   : > { %v1325_v23 = vpop.f32.mrb[7].mxu0  ;;  %v1420_v24 = vadd.f32 %v1416_v1, %v1323_v22 }
 0x336   : > { %v1432_v25 = vadd.f32 %v1428_v6, %v1325_v23  ;;  %1445 = vrot.lane.b32.xlu0 %v1421_v7, %s7254_s18  ;;  %v6606_v42 = vpack.i.bf16 %v8025_v38, %v8027_v39  ;;  %v5937_v43 = vpack.c.bf16 %v8025_v38, %v8027_v39 }
 0x337   : > { %v1424_v31 = vmul.f32 0.125, %v1420_v24 }
 0x338   : > { %v6596_v27 = vpack.i.bf16 %v1432_v25, %v1431_v21  ;;  %v5917_v28 = vpack.c.bf16 %v1432_v25, %v1431_v21 }
 0x33a   : > { %5380 = vmatmul.mubr.msk.f32.vlgmr.msra.gmra.mrb[4].mxu1 %vm1481_vm1, %v1422_v14  ;;  %6597 = vrot.lane.b32.xlu1 %v6596_v27, %s7254_s18 }
 0x33b   : > { %1449 = vrot.lane.b32.xlu0 %v1423_v26, %s7254_s18  ;;  %5919 = vmatprep.subr.msk.bf16.mxu1 %vm8002_vm2, %v5917_v28 }
 0x33c   : > { %5922 = vmatpush3.bf16.xpose.msk.msra.mxu1 %vm8002_vm2, %v5917_v28  ;;  %5393 = vmatprep.mubr.msk.f32.mxu1 %vm1481_vm1, %v1423_v26 }
 0x33d   : > { %5930 = vmatprep.subr.bf16.mxu1 %v5929_v41 }
 0x33e   : > { %1451 = vrot.lane.b32.xlu1 %v1424_v31, %s7254_s18 }
 0x343   : > { %5394 = vmatmul.mubr.msk.f32.vlgmr.msra.gmra.mrb[6].mxu1 %vm1481_vm1, %v1424_v31 }
 0x344   : > { %5932 = vmatpush3.bf16.msra.mxu1 %v5929_v41 }
 0x3a3   : > { %v1448_v49 = vpop.permute.xlu1 %1447 }
 0x3a4   : > { %v6593_v44 = vpop.permute.xlu0 %6592 }
 0x3a5   : > { %v6595_v45 = vunpack.i.h.bf16 %v6593_v44  ;;  %v6594_v47 = vunpack.i.l.bf16 %v6593_v44 }
 0x3a7   : > { %v5911_v48 = vpack.c.bf16 %v6595_v45, %v6594_v47 }
 0x3a8   : > { %v1446_v50 = vpop.permute.xlu0 %1445 }
 0x3a9   : > { %5913 = vmatprep.subr.msk.bf16.mxu0 %vm8002_vm2, %v5911_v48  ;;  %5386 = vmatprep.mubr.msk.f32.mxu0 %vm1481_vm1, %v1446_v50 }
 0x3aa   : > { %5916 = vmatpush3.bf16.xpose.msk.msra.mxu0 %vm8002_vm2, %v5911_v48 }
 0x3ac   : > { %v6598_v51 = vpop.permute.xlu1 %6597 }
 0x3ad   : > { %v6600_v46 = vunpack.i.h.bf16 %v6598_v51  ;;  %v6599_v52 = vunpack.i.l.bf16 %v6598_v51  ;;  %v1450_v55 = vpop.permute.xlu0 %1449 }
 0x3af   : > { %v5923_v53 = vpack.c.bf16 %v6600_v46, %v6599_v52 }
 0x3b0   : > { %v1452_v56 = vpop.permute.xlu1 %1451 }
 0x3b1   : > { %5387 = vmatmul.mubr.msk.f32.vlgmr.msra.gmra.mrb[8].mxu0 %vm1481_vm1, %v1448_v49  ;;  %5925 = vmatprep.subr.msk.bf16.mxu0 %vm8002_vm2, %v5923_v53 }
 0x3b2   : > { %5928 = vmatpush3.bf16.xpose.msk.msra.mxu0 %vm8002_vm2, %v5923_v53  ;;  %5400 = vmatprep.mubr.msk.f32.mxu0 %vm1481_vm1, %v1450_v55 }
 0x3b3   : > { %5938 = vmatprep.subr.bf16.mxu0 %v5937_v43 }
 0x3b9   : > { %5401 = vmatmul.mubr.msk.f32.vlgmr.msra.gmra.mrb[10].mxu0 %vm1481_vm1, %v1452_v56 }
 0x3ba   : > { %5940 = vmatpush3.bf16.msra.mxu0 %v5937_v43 }
 0x40d   : > { %v5381_v58 = vpop.f32.mrb[4].mxu1 }
 0x40e   : > { %v1556_v1 = vpop.f32.mrb[5].mxu1  ;;  %v1818_v3 = vsel %vm1814_vm3, %v5381_v58, -inf }
 0x40f   : > { %1819 = vmax.xlane.f32.xlu1 %v1818_v3  ;;  %v1815_v4 = vsel %vm1814_vm3, %v1556_v1, -inf }
 0x410   : > { %1816 = vmax.xlane.f32.xlu0 %v1815_v4 }
 0x416   : > { %v8049_v5 = vpop.f32.mrb[6].mxu1 }
 0x417   : > { %v1722_v6 = vpop.f32.mrb[7].mxu1  ;;  %v1830_v31 = vsel %vm1814_vm3, %v8049_v5, -inf }
 0x418   : > { %v1827_v7 = vsel %vm1814_vm3, %v1722_v6, -inf }
 0x420   : > { %6602 = vrot.lane.b32.xlu1 %v6601_v40, %s7254_s18 }
 0x444   : > { %1828 = vmax.xlane.f32.xlu1 %v1827_v7 }
 0x484   : > { %v5388_v8 = vpop.f32.mrb[8].mxu0 }
 0x485   : > { %v1639_v10 = vpop.f32.mrb[9].mxu0  ;;  %v1824_v12 = vsel %vm1814_vm3, %v5388_v8, -inf }
 0x486   : > { %v1821_v11 = vsel %vm1814_vm3, %v1639_v10, -inf }
 0x487   : > { %1822 = vmax.xlane.f32.xlu0 %v1821_v11 }
 0x48b   : > { %1825 = vmax.xlane.f32.xlu0 %v1824_v12 }
 0x48c   : > { %v5402_v13 = vpop.f32.mrb[10].mxu0 }
 0x48d   : > { %v1836_v14 = vsel %vm1814_vm3, %v5402_v13, -inf  ;;  %v1805_v16 = vpop.f32.mrb[11].mxu0 }
 0x48e   : > { %v1833_v17 = vsel %vm1814_vm3, %v1805_v16, -inf }
 0x48f   : > { %1837 = vmax.xlane.f32.xlu0 %v1836_v14 }
 0x493   : > { %1834 = vmax.xlane.f32.xlu0 %v1833_v17 }
 0x49c   : > { %v1820_v18 = vpop.xlane.xlu1 %1819 }
 0x49d   : > { %v1840_v19 = vsub.f32 %v5381_v58, %v1820_v18  ;;  %v1817_v20 = vpop.xlane.xlu0 %1816 }
 0x49e   : > { %v1839_v21 = vsub.f32 %v1556_v1, %v1817_v20 }
 0x49f   : > { %v1849_v22 = vmul.f32 1.442695, %v1840_v19 }
 0x4a0   : > { %v1847_v23 = vmul.f32 1.442695, %v1839_v21  ;;  %v6603_v24 = vpop.permute.xlu1 %6602  ;;  %v2248_v21 = vld [vmem:[%s7727_s22 + $0x8] sm:$0xff] }
 0x4a1   : > { %v6605_v25 = vunpack.i.h.bf16 %v6603_v24  ;;  %v6604_v26 = vunpack.i.l.bf16 %v6603_v24  ;;  %v2250_v24 = vld [vmem:[%s7727_s22 + $0x18] sm:$0xff] }
 0x4a2   : > { %6791 = vpow2.f32 %v1847_v23 }
 0x4a3   : > { %6793 = vpow2.f32 %v1849_v22  ;;  %v5933_v27 = vpack.c.bf16 %v6605_v25, %v6604_v26  ;;  %v2249_v22 = vld [vmem:[%s7727_s22 + $0x10] sm:$0xff]  ;;  %v2251_v26 = vld [vmem:[%s7727_s22 + $0x20] sm:$0xff] }
 0x4a4   : > { %v5949_v25 = vpack.c.bf16 %v2250_v24, %v2249_v22 }
 0x4a5   : > { %5934 = vmatprep.subr.bf16.mxu1 %v5933_v27 }
 0x4a9   : > { %6607 = vrot.lane.b32.xlu0 %v6606_v42, %s7254_s18 }
 0x4ac   : > { %v6792_v28 = vpop.eup %6791 }
 0x4ad   : > { %v6794_v29 = vpop.eup %6793  ;;  %5407 = vmatprep.mubr.msk.f32.mxu1 %vm1814_vm3, %v6792_v28  ;;  %v1863_v4 = vsel %vm1814_vm3, %v6792_v28, 0.0 }
 0x4ae   : > { %5408 = vmatmul.mubr.msk.f32.vlgmr.msra.gmra.mrb[8].mxu1 %vm1814_vm3, %v6794_v29  ;;  %v1866_v32 = vsel %vm1814_vm3, %v6794_v29, 0.0  ;;  %v2253_v29 = vld [vmem:[%s7727_s22 + $0x30] sm:$0xff] }
 0x4af   : > { %5936 = vmatpush3.bf16.msra.mxu1 %v5933_v27  ;;  %v2252_v27 = vld [vmem:[%s7727_s22 + $0x28] sm:$0xff] }
 0x4b0   : > { %v5953_v28 = vpack.c.bf16 %v2252_v27, %v2251_v26 }
 0x4c8   : > { %1831 = vmax.xlane.f32.xlu0 %v1830_v31  ;;  %v2254_v31 = vld [vmem:[%s7727_s22 + $0x38] sm:$0xff] }
 0x4cc   : > { %1867 = vadd.xlane.f32.xlu0 %v1866_v32  ;;  %v5957_v32 = vpack.c.bf16 %v2254_v31, %v2253_v29 }
 0x4d1   : > { %v1829_v33 = vpop.xlane.xlu1 %1828 }
 0x4d2   : > { %v1843_v34 = vsub.f32 %v1722_v6, %v1829_v33  ;;  %v2255_v33 = vld [vmem:[%s7727_s22 + $0x40] sm:$0xff] }
 0x4d4   : > { %v1855_v35 = vmul.f32 1.442695, %v1843_v34  ;;  %v2256_v34 = vld [vmem:[%s7727_s22 + $0x48] sm:$0xff] }
 0x4d6   : > { %6795 = vpow2.f32 %v1855_v35 }
 0x4e0   : > { %v6796_v36 = vpop.eup %6795 }
 0x4e1   : > { %5421 = vmatprep.mubr.msk.f32.mxu0 %vm1814_vm3, %v6796_v36 }
 0x514   : > { %v1823_v37 = vpop.xlane.xlu0 %1822 }
 0x515   : > { %v1841_v38 = vsub.f32 %v1639_v10, %v1823_v37 }
 0x517   : > { %v1851_v39 = vmul.f32 1.442695, %v1841_v38  ;;  %v2257_v38 = vld [vmem:[%s7727_s22 + $0x50] sm:$0xff] }
 0x518   : > { %v1826_v40 = vpop.xlane.xlu0 %1825 }
 0x519   : > { %6797 = vpow2.f32 %v1851_v39  ;;  %v1842_v41 = vsub.f32 %v5388_v8, %v1826_v40  ;;  %v1875_v8 = vsel %vm1814_vm3, %v6796_v36, 0.0  ;;  %v5961_v36 = vpack.c.bf16 %v2256_v34, %v2255_v33  ;;  %v2258_v39 = vld [vmem:[%s7727_s22 + $0x58] sm:$0xff]  ;;  %v2558_v34 = vld [vmem:[%s7736_s21] sm:$0xff] }
 0x51a   : > { %v5965_v40 = vpack.c.bf16 %v2258_v39, %v2257_v38  ;;  %v2561_v33 = vld [vmem:[%s7736_s21 + $0x18] sm:$0xff] }
 0x51b   : > { %v1853_v42 = vmul.f32 1.442695, %v1842_v41  ;;  %v2259_v41 = vld [vmem:[%s7727_s22 + $0x60] sm:$0xff] }
 0x51c   : > { %v1838_v43 = vpop.xlane.xlu0 %1837  ;;  %v2565_v38 = vld [vmem:[%s7736_s21 + $0x38] sm:$0xff] }
 0x51d   : > { %6799 = vpow2.f32 %v1853_v42  ;;  %v1846_v44 = vsub.f32 %v5402_v13, %v1838_v43  ;;  %v2260_v42 = vld [vmem:[%s7727_s22 + $0x68] sm:$0xff] }
 0x51e   : > { %v5969_v43 = vpack.c.bf16 %v2260_v42, %v2259_v41  ;;  %v2562_v41 = vld [vmem:[%s7736_s21 + $0x20] sm:$0xff]  ;;  %v2564_v42 = vld [vmem:[%s7736_s21 + $0x30] sm:$0xff] }
 0x51f   : > { %v1861_v45 = vmul.f32 1.442695, %v1846_v44  ;;  %v2261_v44 = vld [vmem:[%s7727_s22 + $0x70] sm:$0xff] }
 0x520   : > { %v1835_v47 = vpop.xlane.xlu0 %1834 }
 0x521   : > { %6801 = vpow2.f32 %v1861_v45  ;;  %v1845_v48 = vsub.f32 %v1805_v16, %v1835_v47  ;;  %v2262_v45 = vld [vmem:[%s7727_s22 + $0x78] sm:$0xff] }
 0x523   : > { %v6798_v49 = vpop.eup %6797  ;;  %v1859_v50 = vmul.f32 1.442695, %v1845_v48  ;;  %v5973_v48 = vpack.c.bf16 %v2262_v45, %v2261_v44  ;;  %v2569_v44 = vld [vmem:[%s7736_s21 + $0x58] sm:$0xff]  ;;  %v6015_v45 = vpack.c.bf16 %v2564_v42, %v2562_v41 }
 0x524   : > { %5414 = vmatprep.mubr.msk.f32.mxu1 %vm1814_vm3, %v6798_v49  ;;  %v6608_v51 = vpop.permute.xlu0 %6607  ;;  %v1869_v46 = vsel %vm1814_vm3, %v6798_v49, 0.0 }
 0x525   : > { %6803 = vpow2.f32 %v1859_v50  ;;  %v6610_v52 = vunpack.i.h.bf16 %v6608_v51  ;;  %v6609_v53 = vunpack.i.l.bf16 %v6608_v51  ;;  %1870 = vadd.xlane.f32.xlu1 %v1869_v46 }
 0x527   : > { %v6800_v55 = vpop.eup %6799  ;;  %v5941_v56 = vpack.c.bf16 %v6610_v52, %v6609_v53 }
 0x528   : > { %5415 = vmatmul.mubr.msk.f32.vlgmr.msra.gmra.mrb[10].mxu1 %vm1814_vm3, %v6800_v55  ;;  %v1872_v58 = vsel %vm1814_vm3, %v6800_v55, 0.0 }
 0x529   : > { %5942 = vmatprep.subr.bf16.mxu1 %v5941_v56  ;;  %1873 = vadd.xlane.f32.xlu1 %v1872_v58 }
 0x52a   : > { %5944 = vmatpush3.bf16.msra.mxu1 %v5941_v56 }
 0x52b   : > { %v6802_v1 = vpop.eup %6801 }
 0x52c   : > { %v1884_v3 = vsel %vm1814_vm3, %v6802_v1, 0.0 }
 0x52d   : > { %1885 = vadd.xlane.f32.xlu0 %v1884_v3  ;;  %1864 = vadd.xlane.f32.xlu1 %v1863_v4 }
 0x52f   : > { %v6804_v6 = vpop.eup %6803 }
 0x530   : > { %5428 = vmatprep.mubr.msk.f32.mxu1 %vm1814_vm3, %v6804_v6  ;;  %v1881_v7 = vsel %vm1814_vm3, %v6804_v6, 0.0 }
 0x531   : > { %5429 = vmatmul.mubr.msk.f32.vlgmr.msra.gmra.mrb[12].mxu1 %vm1814_vm3, %v6802_v1  ;;  %1882 = vadd.xlane.f32.xlu1 %v1881_v7 }
 0x532   : > { %1876 = vadd.xlane.f32.xlu0 %v1875_v8 }
 0x555   : > { %v1832_v10 = vpop.xlane.xlu0 %1831 }
 0x556   : > { %v1844_v11 = vsub.f32 %v8049_v5, %v1832_v10  ;;  %v2247_v5 = vld [vmem:[%s7727_s22] sm:$0xff]  ;;  %s7255_s22 = smov [#allocation15]  }
 0x557   : > { %v5945_v23 = vpack.c.bf16 %v2248_v21, %v2247_v5 }
 0x558   : > { %v1857_v12 = vmul.f32 1.442695, %v1844_v11 }
 0x559   : > { %5946 = vmatprep.subr.bf16.mxu0 %v5945_v23  ;;  %v1868_v47 = vpop.xlane.xlu0 %1867 }
 0x55a   : > { %6805 = vpow2.f32 %v1857_v12 }
 0x564   : > { %v6806_v13 = vpop.eup %6805 }
 0x565   : > { %5422 = vmatmul.mubr.msk.f32.vlgmr.msra.gmra.mrb[12].mxu0 %vm1814_vm3, %v6806_v13  ;;  %v1878_v14 = vsel %vm1814_vm3, %v6806_v13, 0.0 }
 0x566   : > { %1879 = vadd.xlane.f32.xlu0 %v1878_v14  ;;  %5948 = vmatpush3.bf16.msra.mxu0 %v5945_v23 }
 0x567   : > { %5950 = vmatprep.subr.bf16.mxu0 %v5949_v25 }
 0x56a   : > { %5952 = vmatpush3.bf16.msra.mxu0 %v5949_v25 }
 0x56b   : > { %5954 = vmatprep.subr.bf16.mxu0 %v5953_v28 }
 0x56e   : > { %5956 = vmatpush3.bf16.msra.mxu0 %v5953_v28 }
 0x56f   : > { %5958 = vmatprep.subr.bf16.mxu0 %v5957_v32 }
 0x572   : > { %5960 = vmatpush3.bf16.msra.mxu0 %v5957_v32  ;;  %v2559_v32 = vld [vmem:[%s7736_s21 + $0x8] sm:$0xff] }
 0x573   : > { %5962 = vmatprep.subr.bf16.mxu0 %v5961_v36 }
 0x576   : > { %5964 = vmatpush3.bf16.msra.mxu0 %v5961_v36  ;;  %v2560_v36 = vld [vmem:[%s7736_s21 + $0x10] sm:$0xff] }
 0x577   : > { %5966 = vmatprep.subr.bf16.mxu0 %v5965_v40  ;;  %v6011_v39 = vpack.c.bf16 %v2560_v36, %v2558_v34 }
 0x57a   : > { %5968 = vmatpush3.bf16.msra.mxu0 %v5965_v40 }
 0x57b   : > { %5970 = vmatprep.subr.bf16.mxu0 %v5969_v43 }
 0x57e   : > { %5972 = vmatpush3.bf16.msra.mxu0 %v5969_v43  ;;  %v2567_v43 = vld [vmem:[%s7736_s21 + $0x48] sm:$0xff] }
 0x57f   : > { %5974 = vmatprep.subr.bf16.mxu0 %v5973_v48 }
 0x581   : > { %v8080_v16 = vpop.f32.mrb[8].mxu1 }
 0x582   : > { %v1959_v17 = vpop.f32.mrb[9].mxu1  ;;  %5976 = vmatpush3.bf16.msra.mxu0 %v5973_v48  ;;  %v2566_v48 = vld [vmem:[%s7736_s21 + $0x40] sm:$0xff] }
 0x5b2   : > { %v1871_v18 = vpop.xlane.xlu1 %1870 }
 0x5b6   : > { %v1874_v19 = vpop.xlane.xlu1 %1873 }
 0x5ba   : > { %v1865_v20 = vpop.xlane.xlu1 %1864  ;;  %v1886_v49 = vpop.xlane.xlu0 %1885 }
 0x5bb   : > { %6807 = vrcp.f32 %v1865_v20 }
 0x5bc   : > { %6809 = vrcp.f32 %v1874_v19 }
 0x5bd   : > { %6811 = vrcp.f32 %v1871_v18 }
 0x5be   : > { %v1883_v50 = vpop.xlane.xlu1 %1882  ;;  %6813 = vrcp.f32 %v1886_v49  ;;  %v2568_v49 = vld [vmem:[%s7736_s21 + $0x50] sm:$0xff] }
 0x5bf   : > { %6815 = vrcp.f32 %v1883_v50  ;;  %v1877_v13 = vpop.xlane.xlu0 %1876  ;;  %v2571_v50 = vld [vmem:[%s7736_s21 + $0x68] sm:$0xff] }
 0x5c0   : > { %6817 = vrcp.f32 %v1868_v47  ;;  %v6017_v47 = vpack.c.bf16 %v2569_v44, %v2567_v43 }
 0x5c1   : > { %6819 = vrcp.f32 %v1877_v13  ;;  %v2580_v13 = vld [vmem:[%s7736_s21 + $0xb0] sm:$0xff] }
 0x5c5   : > { %v6808_v35 = vpop.eup %6807 }
 0x5c6   : > { %v2219_v37 = vmul.f32 %v6808_v35, %v1959_v17  ;;  %v6810_v51 = vpop.eup %6809  ;;  %v6009_v35 = vpack.c.bf16 %v2561_v33, %v2559_v32  ;;  %v2421_v32 = vld [vmem:[#allocation2 + $0x20] sm:$0xff]  ;;  %v9170_v33 = vsub.s32 3, %v7984_v62 }
 0x5c7   : > { %v6812_v52 = vpop.eup %6811 }
 0x5c8   : > { %v6814_v1 = vpop.eup %6813  ;;  %6010 = vmatprep.subr.bf16.mxu0 %v6009_v35  ;;  %v2266_v34 = vrot.slane %v7990_v0, %v9170_v33 }
 0x5c9   : > { %v6816_v4 = vpop.eup %6815 }
 0x5ca   : > { %v6818_v17 = vpop.eup %6817 }
 0x5cb   : > { %v2220_v19 = vmul.f32 %v6818_v17, %v8080_v16  ;;  %v6820_v23 = vpop.eup %6819  ;;  %v2585_v17 = vld [vmem:[%s7736_s21 + $0xd8] sm:$0xff] }
 0x5f3   : > { %v1880_v14 = vpop.xlane.xlu0 %1879 }
 0x5f4   : > { %6821 = vrcp.f32 %v1880_v14  ;;  %v2583_v14 = vld [vmem:[%s7736_s21 + $0xc8] sm:$0xff] }
 0x5fb   : > { %v5416_v46 = vpop.f32.mrb[10].mxu1 }
 0x5fc   : > { %v2222_v53 = vmul.f32 %v6810_v51, %v5416_v46  ;;  %v2040_v55 = vpop.f32.mrb[11].mxu1  ;;  %v2573_v51 = vld [vmem:[%s7736_s21 + $0x78] sm:$0xff]  ;;  %v6019_v46 = vpack.c.bf16 %v2568_v49, %v2566_v48  ;;  %v2426_v48 = vld [vmem:[#allocation2 + $0x48] sm:$0xff] }
 0x5fd   : > { %v2221_v56 = vmul.f32 %v6812_v52, %v2040_v55  ;;  %v6021_v52 = vpack.c.bf16 %v2573_v51, %v2571_v50  ;;  %v2572_v55 = vld [vmem:[%s7736_s21 + $0x70] sm:$0xff]  ;;  %v2429_v50 = vld [vmem:[#allocation2 + $0x60] sm:$0xff]  ;;  %v2430_v51 = vld [vmem:[#allocation2 + $0x68] sm:$0xff] }
 0x5fe   : > { %v6822_v24 = vpop.eup %6821  ;;  %v2428_v49 = vld [vmem:[#allocation2 + $0x58] sm:$0xff] }
 0x5ff   : > { %v6611_v58 = vpack.i.bf16 %v2222_v53, %v2221_v56  ;;  %v2570_v53 = vld [vmem:[%s7736_s21 + $0x60] sm:$0xff]  ;;  %v2575_v56 = vld [vmem:[%s7736_s21 + $0x88] sm:$0xff] }
 0x601   : > { %6612 = vrot.lane.b32.xlu1 %v6611_v58, %s7254_s18  ;;  %v2577_v58 = vld [vmem:[%s7736_s21 + $0x98] sm:$0xff] }
 0x604   : > { %v5430_v3 = vpop.f32.mrb[12].mxu1 }
 0x605   : > { %v2226_v6 = vmul.f32 %v6814_v1, %v5430_v3  ;;  %v2202_v7 = vpop.f32.mrb[13].mxu1  ;;  %v6023_v1 = vpack.c.bf16 %v2572_v55, %v2570_v53  ;;  %v6025_v3 = vpack.c.bf16 %v2577_v58, %v2575_v56  ;;  %v2451_v53 = vld [vmem:[%s7734_s7 + $0x10] sm:$0xff]  ;;  %v2452_v55 = vld [vmem:[%s7734_s7 + $0x18] sm:$0xff] }
 0x606   : > { %v2225_v8 = vmul.f32 %v6816_v4, %v2202_v7  ;;  %v2574_v4 = vld [vmem:[%s7736_s21 + $0x80] sm:$0xff]  ;;  %v2579_v7 = vld [vmem:[%s7736_s21 + $0xa8] sm:$0xff] }
 0x607   : > { %v2431_v56 = vld [vmem:[#allocation2 + $0x70] sm:$0xff] }
 0x608   : > { %v6616_v10 = vpack.i.bf16 %v2226_v6, %v2225_v8  ;;  %v2576_v6 = vld [vmem:[%s7736_s21 + $0x90] sm:$0xff]  ;;  %v2581_v8 = vld [vmem:[%s7736_s21 + $0xb8] sm:$0xff] }
 0x60a   : > { %6617 = vrot.lane.b32.xlu0 %v6616_v10, %s7254_s18  ;;  %v6027_v10 = vpack.c.bf16 %v2576_v6, %v2574_v4  ;;  %v2454_v4 = vld [vmem:[%s7734_s7 + $0x28] sm:$0xff]  ;;  %v2432_v6 = vld [vmem:[#allocation2 + $0x78] sm:$0xff] }
 0x638   : > { %v5423_v11 = vpop.f32.mrb[12].mxu0 }
 0x639   : > { %v2121_v12 = vpop.f32.mrb[13].mxu0  ;;  %v2224_v26 = vmul.f32 %v6822_v24, %v5423_v11  ;;  %v6029_v11 = vpack.c.bf16 %v2581_v8, %v2579_v7  ;;  %v2433_v8 = vld [vmem:[#allocation2 + $0x80] sm:$0xff] }
 0x63a   : > { %v2223_v27 = vmul.f32 %v6820_v23, %v2121_v12  ;;  %v2578_v12 = vld [vmem:[%s7736_s21 + $0xa0] sm:$0xff] }
 0x673   : > { %v6613_v18 = vpop.permute.xlu1 %6612 }
 0x674   : > { %v6615_v20 = vunpack.i.h.bf16 %v6613_v18  ;;  %v6614_v5 = vunpack.i.l.bf16 %v6613_v18  ;;  %v6031_v18 = vpack.c.bf16 %v2580_v13, %v2578_v12  ;;  %v2436_v12 = vld [vmem:[#allocation2 + $0x98] sm:$0xff]  ;;  %v2437_v13 = vld [vmem:[#allocation2 + $0xa0] sm:$0xff] }
 0x676   : > { %v2243_v21 = vsel %vm1481_vm1, %v2219_v37, %v6614_v5  ;;  %v2244_v22 = vsel %vm1481_vm1, %v2220_v19, %v6615_v20  ;;  %v2563_v37 = vld [vmem:[%s7736_s21 + $0x28] sm:$0xff]  ;;  %v6033_v19 = vpack.c.bf16 %v2585_v17, %v2583_v14  ;;  %v2582_v20 = vld [vmem:[%s7736_s21 + $0xc0] sm:$0xff]  ;;  %v2584_v5 = vld [vmem:[%s7736_s21 + $0xd0] sm:$0xff] }
 0x677   : > { %5463 = vmatprep.mubr.f32.mxu0 %v2243_v21  ;;  %v6013_v40 = vpack.c.bf16 %v2565_v38, %v2563_v37  ;;  %v2587_v21 = vld [vmem:[%s7736_s21 + $0xe8] sm:$0xff]  ;;  %v6035_v23 = vpack.c.bf16 %v2584_v5, %v2582_v20 }
 0x678   : > { %5464 = vmatmul.mubr.f32.vlgmr.msra.gmra.mrb[14].mxu0 %v2244_v22  ;;  %v2589_v22 = vld [vmem:[%s7736_s21 + $0xf8] sm:$0xff]  ;;  %v2438_v14 = vld [vmem:[#allocation2 + $0xa8] sm:$0xff]  ;;  %v2439_v17 = vld [vmem:[#allocation2 + $0xb0] sm:$0xff] }
 0x679   : > { %6012 = vmatpush1.bf16.msra.mxu0 %v6011_v39  ;;  %v6037_v24 = vpack.c.bf16 %v2589_v22, %v2587_v21  ;;  %v2442_v20 = vld [vmem:[#allocation2 + $0xc8] sm:$0xff]  ;;  %v2443_v5 = vld [vmem:[#allocation2 + $0xd0] sm:$0xff]  ;;  %v2444_v21 = vld [vmem:[#allocation2 + $0xd8] sm:$0xff] }
 0x67a   : > { %6014 = vmatprep.subr.bf16.mxu0 %v6013_v40  ;;  %v2445_v22 = vld [vmem:[#allocation2 + $0xe0] sm:$0xff] }
 0x67c   : > { %v6618_v25 = vpop.permute.xlu0 %6617 }
 0x67d   : > { %v6620_v16 = vunpack.i.h.bf16 %v6618_v25  ;;  %v6619_v28 = vunpack.i.l.bf16 %v6618_v25  ;;  %6016 = vmatpush1.bf16.msra.mxu0 %v6015_v45  ;;  %v2586_v25 = vld [vmem:[%s7736_s21 + $0xe0] sm:$0xff] }
 0x67e   : > { %6018 = vmatprep.subr.bf16.mxu0 %v6017_v47  ;;  %v2422_v45 = vld [vmem:[#allocation2 + $0x28] sm:$0xff]  ;;  %v2424_v47 = vld [vmem:[#allocation2 + $0x38] sm:$0xff] }
 0x67f   : > { %v2245_v29 = vsel %vm1481_vm1, %v2223_v27, %v6619_v28  ;;  %v2246_v31 = vsel %vm1481_vm1, %v2224_v26, %v6620_v16  ;;  %v2588_v26 = vld [vmem:[%s7736_s21 + $0xf0] sm:$0xff]  ;;  %v2417_v16 = vld [vmem:[#allocation2] sm:$0xff]  ;;  %v2418_v28 = vld [vmem:[#allocation2 + $0x8] sm:$0xff] }
 0x680   : > { %5466 = vmatprep.mubr.f32.mxu0 %v2245_v29  ;;  %v6039_v27 = vpack.c.bf16 %v2588_v26, %v2586_v25  ;;  %v2419_v29 = vld [vmem:[#allocation2 + $0x10] sm:$0xff]  ;;  %v2448_v25 = vld [vmem:[#allocation2 + $0xf8] sm:$0xff] }
 0x681   : > { %5467 = vmatmul.mubr.f32.gmra.mrb[16].mxu0 %v2246_v31  ;;  %v2420_v31 = vld [vmem:[#allocation2 + $0x18] sm:$0xff] }
 0x682   : > { %2654 = vmatprep.mubr.f32.mxu0 %v9171_v54  ;;  %6020 = vmatpush1.bf16.msra.mxu0 %v6019_v46  ;;  %v2449_v46 = vld [vmem:[%s7734_s7] sm:$0xff] }
 0x683   : > { %6022 = vmatprep.subr.bf16.mxu0 %v6021_v52  ;;  %v2450_v52 = vld [vmem:[%s7734_s7 + $0x8] sm:$0xff] }
 0x684   : > { %v5977_v58 = vpack.c.bf16 %v2450_v52, %v2449_v46  ;;  %v2464_v46 = vld [vmem:[%s7734_s7 + $0x78] sm:$0xff] }
 0x686   : > { %6024 = vmatpush1.bf16.msra.mxu0 %v6023_v1  ;;  %v5981_v1 = vpack.c.bf16 %v2452_v55, %v2451_v53  ;;  %5978 = vmatprep.subr.bf16.mxu1 %v5977_v58  ;;  %v9168_v53 = vsub.s32 6, %v7984_v62  ;;  %v9169_v55 = vsub.s32 5, %v7984_v62 }
 0x687   : > { %6026 = vmatprep.subr.bf16.mxu0 %v6025_v3  ;;  %v2453_v3 = vld [vmem:[%s7734_s7 + $0x20] sm:$0xff]  ;;  %5980 = vmatpush3.bf16.msra.mxu1 %v5977_v58 }
 0x688   : > { %5982 = vmatprep.subr.bf16.mxu1 %v5981_v1  ;;  %v5985_v7 = vpack.c.bf16 %v2454_v4, %v2453_v3 }
 0x68a   : > { %6028 = vmatpush1.bf16.msra.mxu0 %v6027_v10  ;;  %v2434_v10 = vld [vmem:[#allocation2 + $0x88] sm:$0xff] }
 0x68b   : > { %6030 = vmatprep.subr.bf16.mxu0 %v6029_v11  ;;  %5984 = vmatpush3.bf16.msra.mxu1 %v5981_v1  ;;  %v2435_v11 = vld [vmem:[#allocation2 + $0x90] sm:$0xff] }
 0x68c   : > { %5986 = vmatprep.subr.bf16.mxu1 %v5985_v7 }
 0x68e   : > { %6032 = vmatpush1.bf16.msra.mxu0 %v6031_v18  ;;  %v2440_v18 = vld [vmem:[#allocation2 + $0xb8] sm:$0xff] }
 0x68f   : > { %6034 = vmatprep.subr.bf16.mxu0 %v6033_v19  ;;  %5988 = vmatpush3.bf16.msra.mxu1 %v5985_v7  ;;  %v2441_v19 = vld [vmem:[#allocation2 + $0xc0] sm:$0xff] }
 0x692   : > { %6036 = vmatpush1.bf16.msra.mxu0 %v6035_v23  ;;  %v2446_v23 = vld [vmem:[#allocation2 + $0xe8] sm:$0xff] }
 0x693   : > { %6038 = vmatprep.subr.bf16.mxu0 %v6037_v24  ;;  %v2447_v24 = vld [vmem:[#allocation2 + $0xf0] sm:$0xff] }
 0x696   : > { %6040 = vmatpush1.bf16.msra.mxu0 %v6039_v27 }
 0x699   : > { %2655 = vmatmul.mubr.f32.vlgmr.msra.gmra.mrb[18].mxu0 %v2417_v16 }
 0x69a   : > { %2660 = vmatprep.mubr.f32.mxu0 %v9171_v54 }
 0x69d   : > { %2661 = vmatmul.mubr.f32.gmra.mrb[20].mxu0 %v2418_v28 }
 0x69e   : > { %2666 = vmatprep.mubr.f32.mxu0 %v9171_v54 }
 0x6a1   : > { %2667 = vmatmul.mubr.f32.gmra.mrb[22].mxu0 %v2419_v29 }
 0x6a2   : > { %2672 = vmatprep.mubr.f32.mxu0 %v9171_v54 }
 0x6a5   : > { %2673 = vmatmul.mubr.f32.gmra.mrb[24].mxu0 %v2420_v31 }
 0x6a6   : > { %2678 = vmatprep.mubr.f32.mxu0 %v9171_v54 }
 0x6a9   : > { %2679 = vmatmul.mubr.f32.gmra.mrb[26].mxu0 %v2421_v32 }
 0x6aa   : > { %2684 = vmatprep.mubr.f32.mxu0 %v9171_v54 }
 0x6ad   : > { %2685 = vmatmul.mubr.f32.gmra.mrb[28].mxu0 %v2422_v45  ;;  %v2457_v45 = vld [vmem:[%s7734_s7 + $0x40] sm:$0xff] }
 0x6ae   : > { %2690 = vmatprep.mubr.f32.mxu0 %v9171_v54 }
 0x74b   : > { %v5465_v35 = vpop.f32.mrb[14].mxu0 }
 0x74c   : > { %v2339_v36 = vadd.f32 %v5465_v35, %v2266_v34  ;;  %v2333_v37 = vpop.f32.mrb[15].mxu0 }
 0x74d   : > { %v2334_v38 = vadd.f32 %v2333_v37, %v2266_v34 }
 0x74e   : > { %v8148_v39 = vadd.f32 %v2339_v36, %v7969_v57  ;;  %v2423_v57 = vld [vmem:[#allocation2 + $0x30] sm:$0xff] }
 0x74f   : > { %v8151_v40 = vadd.f32 %v2334_v38, %v7934_v9  ;;  %2691 = vmatmul.mubr.f32.gmra.mrb[30].mxu0 %v2423_v57  ;;  %v2458_v57 = vld [vmem:[%s7734_s7 + $0x48] sm:$0xff] }
 0x750   : > { %2358 = vadd.xlane.f32.xlu0 %v8148_v39  ;;  %2696 = vmatprep.mubr.f32.mxu0 %v9171_v54 }
 0x751   : > { %2356 = vadd.xlane.f32.xlu1 %v8151_v40 }
 0x753   : > { %2697 = vmatmul.mubr.f32.gmra.mrb[32].mxu0 %v2424_v47  ;;  %v5993_v47 = vpack.c.bf16 %v2458_v57, %v2457_v45 }
 0x754   : > { %v5468_v41 = vpop.f32.mrb[16].mxu0  ;;  %2702 = vmatprep.mubr.f32.mxu0 %v9171_v54 }
 0x755   : > { %v2343_v42 = vpop.f32.mrb[17].mxu0  ;;  %v2349_v44 = vadd.f32 %v5468_v41, %v2266_v34 }
 0x756   : > { %v2344_v43 = vadd.f32 %v2343_v42, %v2266_v34 }
 0x757   : > { %v8161_v9 = vadd.f32 %v2349_v44, %v7977_v60  ;;  %v2427_v60 = vld [vmem:[#allocation2 + $0x50] sm:$0xff]  ;;  %v2456_v44 = vld [vmem:[%s7734_s7 + $0x38] sm:$0xff] }
 0x758   : > { %v8156_v0 = vadd.f32 %v2344_v43, %v7973_v59  ;;  %v2425_v59 = vld [vmem:[#allocation2 + $0x40] sm:$0xff]  ;;  %v2455_v43 = vld [vmem:[%s7734_s7 + $0x30] sm:$0xff] }
 0x759   : > { %2703 = vmatmul.mubr.f32.gmra.mrb[34].mxu0 %v2425_v59  ;;  %v2460_v59 = vld [vmem:[%s7734_s7 + $0x58] sm:$0xff] }
 0x75a   : > { %2360 = vadd.xlane.f32.xlu1 %v8156_v0  ;;  %2708 = vmatprep.mubr.f32.mxu0 %v9171_v54 }
 0x75d   : > { %2709 = vmatmul.mubr.f32.gmra.mrb[36].mxu0 %v2426_v48 }
 0x75e   : > { %2362 = vadd.xlane.f32.xlu1 %v8161_v9  ;;  %2714 = vmatprep.mubr.f32.mxu0 %v9171_v54 }
 0x761   : > { %2715 = vmatmul.mubr.f32.gmra.mrb[38].mxu0 %v2427_v60  ;;  %v2461_v60 = vld [vmem:[%s7734_s7 + $0x60] sm:$0xff] }
 0x762   : > { %2720 = vmatprep.mubr.f32.mxu0 %v9171_v54 }
 0x765   : > { %2721 = vmatmul.mubr.f32.gmra.mrb[40].mxu0 %v2428_v49  ;;  %v2462_v49 = vld [vmem:[%s7734_s7 + $0x68] sm:$0xff] }
 0x766   : > { %2726 = vmatprep.mubr.f32.mxu0 %v9171_v54 }
 0x769   : > { %2727 = vmatmul.mubr.f32.gmra.mrb[42].mxu0 %v2429_v50  ;;  %v6001_v50 = vpack.c.bf16 %v2462_v49, %v2461_v60 }
 0x76a   : > { %2732 = vmatprep.mubr.f32.mxu0 %v9171_v54 }
 0x76c   : > { %v2656_v3 = vpop.f32.mrb[18].mxu0 }
 0x76d   : > { %2733 = vmatmul.mubr.f32.gmra.mrb[44].mxu0 %v2430_v51  ;;  %v2463_v51 = vld [vmem:[%s7734_s7 + $0x70] sm:$0xff] }
 0x76e   : > { %2738 = vmatprep.mubr.f32.mxu0 %v9171_v54  ;;  %v6005_v52 = vpack.c.bf16 %v2464_v46, %v2463_v51 }
 0x771   : > { %2739 = vmatmul.mubr.f32.gmra.mrb[46].mxu0 %v2431_v56  ;;  %v8228_v56 = vld [vmem:[%s7744_s17] sm:$0xff] }
 0x772   : > { %2744 = vmatprep.mubr.f32.mxu0 %v9171_v54  ;;  %v8233_v58 = vrot.slane %v8228_v56, %v9168_v53  ;;  %v8238_v1 = vrot.slane %v8228_v56, %v9169_v55 }
 0x774   : > { %v2851_v4 = vadd.f32 %v8238_v1, %v2656_v3 }
 0x775   : > { %2745 = vmatmul.mubr.f32.gmra.mrb[48].mxu0 %v2432_v6  ;;  %v2658_v6 = vpop.f32.mrb[19].mxu0 }
 0x776   : > { %2750 = vmatprep.mubr.f32.mxu0 %v9171_v54  ;;  %v8242_v7 = vadd.f32 %v8233_v58, %v2658_v6 }
 0x779   : > { %2751 = vmatmul.mubr.f32.gmra.mrb[50].mxu0 %v2433_v8  ;;  %v2662_v8 = vpop.f32.mrb[20].mxu0 }
 0x77a   : > { %2756 = vmatprep.mubr.f32.mxu0 %v9171_v54 }
 0x77d   : > { %2757 = vmatmul.mubr.f32.gmra.mrb[52].mxu0 %v2434_v10  ;;  %v2852_v10 = vadd.f32 %v8238_v1, %v2662_v8 }
 0x77e   : > { %2762 = vmatprep.mubr.f32.mxu0 %v9171_v54 }
 0x781   : > { %2763 = vmatmul.mubr.f32.gmra.mrb[54].mxu0 %v2435_v11  ;;  %v2664_v11 = vpop.f32.mrb[21].mxu0 }
 0x782   : > { %2768 = vmatprep.mubr.f32.mxu0 %v9171_v54 }
 0x785   : > { %2769 = vmatmul.mubr.f32.gmra.mrb[56].mxu0 %v2436_v12  ;;  %v8246_v12 = vadd.f32 %v8233_v58, %v2664_v11 }
 0x786   : > { %2774 = vmatprep.mubr.f32.mxu0 %v9171_v54 }
 0x789   : > { %2775 = vmatmul.mubr.f32.gmra.mrb[58].mxu0 %v2437_v13  ;;  %v2668_v13 = vpop.f32.mrb[22].mxu0 }
 0x78a   : > { %2780 = vmatprep.mubr.f32.mxu0 %v9171_v54 }
 0x78d   : > { %2781 = vmatmul.mubr.f32.gmra.mrb[60].mxu0 %v2438_v14  ;;  %v6621_v14 = vpack.i.bf16 %v2852_v10, %v2851_v4 }
 0x78e   : > { %2786 = vmatprep.mubr.f32.mxu0 %v9171_v54 }
 0x791   : > { %2787 = vmatmul.mubr.f32.gmra.mrb[62].mxu0 %v2439_v17  ;;  %v8248_v17 = vpack.c.bf16 %v2852_v10, %v2851_v4 }
 0x792   : > { %2792 = vmatprep.mubr.f32.mxu0 %v9171_v54 }
 0x795   : > { %2793 = vmatmul.mubr.f32.gmra.mrb[64].mxu0 %v2440_v18  ;;  %v2853_v18 = vadd.f32 %v8238_v1, %v2668_v13 }
 0x796   : > { %2798 = vmatprep.mubr.f32.mxu0 %v9171_v54 }
 0x799   : > { %2799 = vmatmul.mubr.f32.gmra.mrb[66].mxu0 %v2441_v19  ;;  %v2670_v19 = vpop.f32.mrb[23].mxu0 }
 0x79a   : > { %2804 = vmatprep.mubr.f32.mxu0 %v9171_v54 }
 0x79d   : > { %2805 = vmatmul.mubr.f32.gmra.mrb[68].mxu0 %v2442_v20 }
 0x79e   : > { %2810 = vmatprep.mubr.f32.mxu0 %v9171_v54 }
 0x7a1   : > { %2811 = vmatmul.mubr.f32.gmra.mrb[70].mxu0 %v2443_v5  ;;  %v8255_v5 = vpack.c.bf16 %v8246_v12, %v8242_v7 }
 0x7a2   : > { %2816 = vmatprep.mubr.f32.mxu0 %v9171_v54 }
 0x7a5   : > { %2817 = vmatmul.mubr.f32.gmra.mrb[72].mxu0 %v2444_v21  ;;  %v8258_v21 = vadd.f32 %v8233_v58, %v2670_v19 }
 0x7a6   : > { %2822 = vmatprep.mubr.f32.mxu0 %v9171_v54 }
 0x7a9   : > { %2823 = vmatmul.mubr.f32.gmra.mrb[74].mxu0 %v2445_v22  ;;  %v2674_v22 = vpop.f32.mrb[24].mxu0 }
 0x7aa   : > { %2828 = vmatprep.mubr.f32.mxu0 %v9171_v54 }
 0x7ad   : > { %2829 = vmatmul.mubr.f32.gmra.mrb[76].mxu0 %v2446_v23  ;;  %v2854_v23 = vadd.f32 %v8238_v1, %v2674_v22 }
 0x7ae   : > { %2834 = vmatprep.mubr.f32.mxu0 %v9171_v54 }
 0x7b1   : > { %2835 = vmatmul.mubr.f32.gmra.mrb[78].mxu0 %v2447_v24  ;;  %v2676_v24 = vpop.f32.mrb[25].mxu0 }
 0x7b2   : > { %2840 = vmatprep.mubr.f32.mxu0 %v9171_v54 }
 0x7b5   : > { %2841 = vmatmul.mubr.f32.gmra.mrb[80].mxu0 %v2448_v25  ;;  %v8266_v25 = vadd.f32 %v8233_v58, %v2676_v24 }
 0x7dd   : > { %v2359_v26 = vpop.xlane.xlu0 %2358 }
 0x7de   : > { %v2366_v27 = vmul.f32 0.0078125, %v2359_v26  ;;  %v2357_v16 = vpop.xlane.xlu1 %2356  ;;  %v2680_v26 = vpop.f32.mrb[26].mxu0 }
 0x7df   : > { %v2365_v28 = vmul.f32 0.0078125, %v2357_v16  ;;  %v8268_v16 = vpack.c.bf16 %v2854_v23, %v2853_v18 }
 0x7e0   : > { %v8196_v29 = vsub.f32 %v8148_v39, %v2366_v27  ;;  %v6626_v27 = vpack.i.bf16 %v2854_v23, %v2853_v18 }
 0x7e1   : > { %v8199_v31 = vsub.f32 %v8151_v40, %v2365_v28  ;;  %v2682_v28 = vpop.f32.mrb[27].mxu0 }
 0x7e2   : > { %v2374_v32 = vmul.f32 %v8196_v29, %v8196_v29 }
 0x7e3   : > { %v2373_v34 = vmul.f32 %v8199_v31, %v8199_v31 }
 0x7e4   : > { %2379 = vadd.xlane.f32.xlu0 %v2374_v32 }
 0x7e5   : > { %2377 = vadd.xlane.f32.xlu1 %v2373_v34  ;;  %v8274_v34 = vpack.c.bf16 %v8266_v25, %v8258_v21 }
 0x7e7   : > { %v2361_v35 = vpop.xlane.xlu1 %2360 }
 0x7e8   : > { %v2367_v36 = vmul.f32 0.0078125, %v2361_v35  ;;  %v2855_v35 = vadd.f32 %v8238_v1, %v2680_v26 }
 0x7ea   : > { %v8206_v37 = vsub.f32 %v8156_v0, %v2367_v36  ;;  %v5989_v0 = vpack.c.bf16 %v2456_v44, %v2455_v43  ;;  %v8279_v36 = vadd.f32 %v8233_v58, %v2682_v28 }
 0x7eb   : > { %v2363_v38 = vpop.xlane.xlu1 %2362 }
 0x7ec   : > { %v2368_v39 = vmul.f32 0.0078125, %v2363_v38  ;;  %v2375_v40 = vmul.f32 %v8206_v37, %v8206_v37  ;;  %5990 = vmatprep.subr.bf16.mxu1 %v5989_v0  ;;  %v2686_v38 = vpop.f32.mrb[28].mxu0 }
 0x7ed   : > { %5992 = vmatpush3.bf16.msra.mxu1 %v5989_v0 }
 0x7ee   : > { %v8211_v41 = vsub.f32 %v8161_v9, %v2368_v39  ;;  %2381 = vadd.xlane.f32.xlu1 %v2375_v40  ;;  %5994 = vmatprep.subr.bf16.mxu1 %v5993_v47  ;;  %v2459_v9 = vld [vmem:[%s7734_s7 + $0x50] sm:$0xff]  ;;  %v2856_v39 = vadd.f32 %v8238_v1, %v2686_v38  ;;  %v2688_v40 = vpop.f32.mrb[29].mxu0 }
 0x7ef   : > { %v5997_v48 = vpack.c.bf16 %v2460_v59, %v2459_v9 }
 0x7f0   : > { %v2376_v42 = vmul.f32 %v8211_v41, %v8211_v41  ;;  %v6631_v43 = vpack.i.bf16 %v2856_v39, %v2855_v35  ;;  %v8285_v44 = vpack.c.bf16 %v2856_v39, %v2855_v35 }
 0x7f1   : > { %5996 = vmatpush3.bf16.msra.mxu1 %v5993_v47 }
 0x7f2   : > { %2383 = vadd.xlane.f32.xlu0 %v2376_v42  ;;  %5998 = vmatprep.subr.bf16.mxu1 %v5997_v48  ;;  %v8283_v42 = vadd.f32 %v8233_v58, %v2688_v40 }
 0x7f4   : > { %v8291_v45 = vpack.c.bf16 %v8283_v42, %v8279_v36 }
 0x7f5   : > { %6000 = vmatpush3.bf16.msra.mxu1 %v5997_v48 }
 0x7f6   : > { %6002 = vmatprep.subr.bf16.mxu1 %v6001_v50 }
 0x7f9   : > { %6004 = vmatpush3.bf16.msra.mxu1 %v6001_v50 }
 0x7fa   : > { %6006 = vmatprep.subr.bf16.mxu1 %v6005_v52 }
 0x7fd   : > { %6008 = vmatpush3.bf16.msra.mxu1 %v6005_v52 }
 0x7fe   : > { %6043 = vmatprep.subr.msk.bf16.mxu1 %vm8002_vm2, %v8248_v17 }
 0x7ff   : > { %6622 = vrot.lane.b32.xlu1 %v6621_v14, %s7254_s18 }
 0x803   : > { %6632 = vrot.lane.b32.xlu1 %v6631_v43, %s7254_s18 }
 0x808   : > { %6627 = vrot.lane.b32.xlu0 %v6626_v27, %s7254_s18 }
 0x822   : > { %v2692_v57 = vpop.f32.mrb[30].mxu0 }
 0x823   : > { %v2694_v47 = vpop.f32.mrb[31].mxu0  ;;  %v2857_v9 = vadd.f32 %v8238_v1, %v2692_v57 }
 0x824   : > { %v8296_v59 = vadd.f32 %v8233_v58, %v2694_v47 }
 0x826   : > { %v2698_v48 = vpop.f32.mrb[32].mxu0 }
 0x827   : > { %v2858_v60 = vadd.f32 %v8238_v1, %v2698_v48  ;;  %v2700_v49 = vpop.f32.mrb[33].mxu0 }
 0x828   : > { %v8300_v50 = vadd.f32 %v8233_v58, %v2700_v49 }
 0x829   : > { %v6636_v51 = vpack.i.bf16 %v2858_v60, %v2857_v9  ;;  %v8302_v46 = vpack.c.bf16 %v2858_v60, %v2857_v9 }
 0x82a   : > { %v8308_v3 = vpack.c.bf16 %v8300_v50, %v8296_v59 }
 0x82b   : > { %6637 = vrot.lane.b32.xlu1 %v6636_v51, %s7254_s18 }
 0x82c   : > { %v2704_v4 = vpop.f32.mrb[34].mxu0 }
 0x82d   : > { %v2706_v6 = vpop.f32.mrb[35].mxu0  ;;  %v2859_v8 = vadd.f32 %v8238_v1, %v2704_v4 }
 0x82e   : > { %v8313_v10 = vadd.f32 %v8233_v58, %v2706_v6 }
 0x830   : > { %v2710_v11 = vpop.f32.mrb[36].mxu0 }
 0x831   : > { %v2860_v13 = vadd.f32 %v8238_v1, %v2710_v11  ;;  %v2712_v14 = vpop.f32.mrb[37].mxu0 }
 0x832   : > { %v8317_v18 = vadd.f32 %v8233_v58, %v2712_v14 }
 0x833   : > { %v6641_v19 = vpack.i.bf16 %v2860_v13, %v2859_v8  ;;  %v8319_v22 = vpack.c.bf16 %v2860_v13, %v2859_v8 }
 0x834   : > { %v8325_v24 = vpack.c.bf16 %v8317_v18, %v8313_v10  ;;  %v2716_v26 = vpop.f32.mrb[38].mxu0 }
 0x835   : > { %v2718_v27 = vpop.f32.mrb[39].mxu0  ;;  %6642 = vrot.lane.b32.xlu0 %v6641_v19, %s7254_s18  ;;  %v2861_v28 = vadd.f32 %v8238_v1, %v2716_v26 }
 0x836   : > { %v8330_v35 = vadd.f32 %v8233_v58, %v2718_v27 }
 0x838   : > { %v2722_v38 = vpop.f32.mrb[40].mxu0 }
 0x839   : > { %v2862_v39 = vadd.f32 %v8238_v1, %v2722_v38  ;;  %v2724_v40 = vpop.f32.mrb[41].mxu0 }
 0x83a   : > { %v8334_v43 = vadd.f32 %v8233_v58, %v2724_v40 }
 0x83b   : > { %v6646_v57 = vpack.i.bf16 %v2862_v39, %v2861_v28  ;;  %v8336_v47 = vpack.c.bf16 %v2862_v39, %v2861_v28 }
 0x83c   : > { %v8342_v48 = vpack.c.bf16 %v8334_v43, %v8330_v35  ;;  %v2728_v60 = vpop.f32.mrb[42].mxu0 }
 0x83d   : > { %v2730_v49 = vpop.f32.mrb[43].mxu0  ;;  %6647 = vrot.lane.b32.xlu1 %v6646_v57, %s7254_s18  ;;  %v2863_v51 = vadd.f32 %v8238_v1, %v2728_v60 }
 0x83e   : > { %v8347_v4 = vadd.f32 %v8233_v58, %v2730_v49 }
 0x840   : > { %v2734_v6 = vpop.f32.mrb[44].mxu0 }
 0x841   : > { %v2864_v8 = vadd.f32 %v8238_v1, %v2734_v6  ;;  %v2736_v11 = vpop.f32.mrb[45].mxu0 }
 0x842   : > { %v8351_v13 = vadd.f32 %v8233_v58, %v2736_v11 }
 0x843   : > { %v6651_v14 = vpack.i.bf16 %v2864_v8, %v2863_v51  ;;  %v8353_v19 = vpack.c.bf16 %v2864_v8, %v2863_v51 }
 0x844   : > { %v8359_v27 = vpack.c.bf16 %v8351_v13, %v8347_v4  ;;  %v2740_v28 = vpop.f32.mrb[46].mxu0 }
 0x845   : > { %v2742_v38 = vpop.f32.mrb[47].mxu0  ;;  %6652 = vrot.lane.b32.xlu0 %v6651_v14, %s7254_s18  ;;  %v2865_v39 = vadd.f32 %v8238_v1, %v2740_v28 }
 0x846   : > { %v8364_v40 = vadd.f32 %v8233_v58, %v2742_v38 }
 0x848   : > { %9248 = vst [vmem:[#allocation27_spill] sm:$0xff] %v8364_v40  ;;  %v2746_v57 = vpop.f32.mrb[48].mxu0 }
 0x849   : > { %v2866_v60 = vadd.f32 %v8238_v1, %v2746_v57  ;;  %v2748_v49 = vpop.f32.mrb[49].mxu0 }
 0x84a   : > { %v8368_v51 = vadd.f32 %v8233_v58, %v2748_v49 }
 0x84b   : > { %v6656_v6 = vpack.i.bf16 %v2866_v60, %v2865_v39  ;;  %v8370_v8 = vpack.c.bf16 %v2866_v60, %v2865_v39 }
 0x84c   : > { %9249 = vst [vmem:[#allocation28_spill] sm:$0xff] %v8368_v51  ;;  %v8376_v14 = vpack.c.bf16 %v8368_v51, %v8364_v40  ;;  %v2752_v28 = vpop.f32.mrb[50].mxu0 }
 0x84d   : > { %v2754_v38 = vpop.f32.mrb[51].mxu0  ;;  %6657 = vrot.lane.b32.xlu1 %v6656_v6, %s7254_s18  ;;  %v2867_v57 = vadd.f32 %v8238_v1, %v2752_v28 }
 0x84e   : > { %9250 = vst [vmem:[#allocation29_spill] sm:$0xff] %v8376_v14  ;;  %v8381_v53 = vadd.f32 %v8233_v58, %v2754_v38 }
 0x850   : > { %9251 = vst [vmem:[#allocation30_spill] sm:$0xff] %v8381_v53  ;;  %v2758_v49 = vpop.f32.mrb[52].mxu0 }
 0x851   : > { %v2868_v39 = vadd.f32 %v8238_v1, %v2758_v49  ;;  %v2760_v60 = vpop.f32.mrb[53].mxu0 }
 0x852   : > { %v8385_v55 = vadd.f32 %v8233_v58, %v2760_v60 }
 0x853   : > { %v6661_v33 = vpack.i.bf16 %v2868_v39, %v2867_v57  ;;  %v6137_v54 = vpack.c.bf16 %v2868_v39, %v2867_v57 }
 0x854   : > { %v8391_v6 = vpack.c.bf16 %v8385_v55, %v8381_v53  ;;  %v2764_v28 = vpop.f32.mrb[54].mxu0 }
 0x855   : > { %6139 = vmatprep.subr.msk.bf16.mxu0 %vm8002_vm2, %v6137_v54  ;;  %v2766_v38 = vpop.f32.mrb[55].mxu0  ;;  %6662 = vrot.lane.b32.xlu0 %v6661_v33, %s7254_s18  ;;  %v8399_v49 = vadd.f32 %v8238_v1, %v2764_v28 }
 0x856   : > { %9252 = vst [vmem:[#allocation31_spill] sm:$0xff] %v8391_v6  ;;  %6142 = vmatpush3.bf16.xpose.msk.msra.mxu0 %vm8002_vm2, %v6137_v54  ;;  %v8402_v57 = vadd.f32 %v8233_v58, %v2766_v38 }
 0x858   : > { %9253 = vst [vmem:[#allocation32_spill] sm:$0xff] %v8402_v57  ;;  %v2770_v39 = vpop.f32.mrb[56].mxu0 }
 0x859   : > { %v8405_v60 = vadd.f32 %v8238_v1, %v2770_v39  ;;  %v2772_v11 = vpop.f32.mrb[57].mxu0 }
 0x85a   : > { %v8408_v61 = vadd.f32 %v8233_v58, %v2772_v11 }
 0x85b   : > { %v6143_v54 = vpack.c.bf16 %v8405_v60, %v8399_v49 }
 0x85c   : > { %9254 = vst [vmem:[#allocation33_spill] sm:$0xff] %v8408_v61  ;;  %v8418_v38 = vpack.c.bf16 %v8408_v61, %v8402_v57  ;;  %v2776_v9 = vpop.f32.mrb[58].mxu0 }
 0x85d   : > { %6145 = vmatprep.subr.msk.bf16.mxu0 %vm8002_vm2, %v6143_v54  ;;  %v2778_v39 = vpop.f32.mrb[59].mxu0  ;;  %v8425_v11 = vadd.f32 %v8238_v1, %v2776_v9 }
 0x85e   : > { %9255 = vst [vmem:[#allocation34_spill] sm:$0xff] %v8418_v38  ;;  %6148 = vmatpush3.bf16.xpose.msk.msra.mxu0 %vm8002_vm2, %v6143_v54  ;;  %v8428_v26 = vadd.f32 %v8233_v58, %v2778_v39 }
 0x860   : > { %9256 = vst [vmem:[#allocation35_spill] sm:$0xff] %v8428_v26  ;;  %v2782_v52 = vpop.f32.mrb[60].mxu0 }
 0x861   : > { %v8431_v28 = vadd.f32 %v8238_v1, %v2782_v52  ;;  %v2784_v23 = vpop.f32.mrb[61].mxu0 }
 0x862   : > { %v8434_v32 = vadd.f32 %v8233_v58, %v2784_v23 }
 0x863   : > { %v6149_v54 = vpack.c.bf16 %v8431_v28, %v8425_v11 }
 0x864   : > { %9257 = vst [vmem:[#allocation36_spill] sm:$0xff] %v8434_v32  ;;  %v8444_v39 = vpack.c.bf16 %v8434_v32, %v8428_v26  ;;  %v2788_v20 = vpop.f32.mrb[62].mxu0 }
 0x865   : > { %6151 = vmatprep.subr.msk.bf16.mxu0 %vm8002_vm2, %v6149_v54  ;;  %v2790_v23 = vpop.f32.mrb[63].mxu0  ;;  %v8451_v63 = vadd.f32 %v8238_v1, %v2788_v20 }
 0x866   : > { %9258 = vst [vmem:[#allocation37_spill] sm:$0xff] %v8444_v39  ;;  %6154 = vmatpush3.bf16.xpose.msk.msra.mxu0 %vm8002_vm2, %v6149_v54  ;;  %v8454_v38 = vadd.f32 %v8233_v58, %v2790_v23 }
 0x868   : > { %9259 = vst [vmem:[#allocation38_spill] sm:$0xff] %v8454_v38  ;;  %v2794_v39 = vpop.f32.mrb[64].mxu0 }
 0x869   : > { %v8457_v57 = vadd.f32 %v8238_v1, %v2794_v39  ;;  %v2796_v61 = vpop.f32.mrb[65].mxu0  ;;  %v1186_v39 = vld [vmem:[%s7744_s17 + $0x8] sm:$0xff] }
 0x86b   : > { %v6155_v20 = vpack.c.bf16 %v8457_v57, %v8451_v63 }
 0x86c   : > { %v2800_v54 = vpop.f32.mrb[66].mxu0 }
 0x86d   : > { %6157 = vmatprep.subr.msk.bf16.mxu0 %vm8002_vm2, %v6155_v20 }
 0x86e   : > { %6160 = vmatpush3.bf16.xpose.msk.msra.mxu0 %vm8002_vm2, %v6155_v20  ;;  %v2404_v20 = vrot.slane %v1186_v39, %v7995_v2 }
 0x871   : > { %v2380_v52 = vpop.xlane.xlu0 %2379 }
 0x872   : > { %v2386_v33 = vmul.f32 0.0078125, %v2380_v52  ;;  %v2378_v30 = vpop.xlane.xlu1 %2377  ;;  %v8460_v52 = vadd.f32 %v8233_v58, %v2796_v61  ;;  %v2802_v61 = vpop.f32.mrb[67].mxu0 }
 0x873   : > { %v2385_v0 = vmul.f32 0.0078125, %v2378_v30  ;;  %v2806_v30 = vpop.f32.mrb[68].mxu0 }
 0x874   : > { %v2390_v9 = vadd.f32 1e-05, %v2386_v33  ;;  %9260 = vst [vmem:[#allocation39_spill] sm:$0xff] %v8460_v52  ;;  %v8481_v33 = vadd.f32 %v8233_v58, %v2802_v61 }
 0x875   : > { %v2389_v6 = vadd.f32 1e-05, %v2385_v0  ;;  %v8470_v0 = vpack.c.bf16 %v8460_v52, %v8454_v38  ;;  %v2808_v38 = vpop.f32.mrb[69].mxu0 }
 0x876   : > { %6823 = vrsqrt.f32 %v2390_v9  ;;  %v8477_v9 = vadd.f32 %v8238_v1, %v2800_v54  ;;  %9262 = vst [vmem:[#allocation41_spill] sm:$0xff] %v8481_v33  ;;  %v8487_v26 = vadd.f32 %v8233_v58, %v2808_v38  ;;  %v2812_v38 = vpop.f32.mrb[70].mxu0 }
 0x877   : > { %6825 = vrsqrt.f32 %v2389_v6  ;;  %9261 = vst [vmem:[#allocation40_spill] sm:$0xff] %v8470_v0  ;;  %v8484_v0 = vadd.f32 %v8238_v1, %v2806_v30  ;;  %v2814_v54 = vpop.f32.mrb[71].mxu0 }
 0x878   : > { %9263 = vst [vmem:[#allocation42_spill] sm:$0xff] %v8487_v26 }
 0x87b   : > { %v2382_v6 = vpop.xlane.xlu1 %2381 }
 0x87c   : > { %v2387_v23 = vmul.f32 0.0078125, %v2382_v6  ;;  %v6161_v6 = vpack.c.bf16 %v8484_v0, %v8477_v9 }
 0x87e   : > { %v2391_v52 = vadd.f32 1e-05, %v2387_v23  ;;  %v8498_v23 = vpack.c.bf16 %v8487_v26, %v8481_v33  ;;  %6163 = vmatprep.subr.msk.bf16.mxu0 %vm8002_vm2, %v6161_v6  ;;  %v8509_v33 = vadd.f32 %v8238_v1, %v2812_v38 }
 0x87f   : > { %v2384_v32 = vpop.xlane.xlu0 %2383  ;;  %6166 = vmatpush3.bf16.xpose.msk.msra.mxu0 %vm8002_vm2, %v6161_v6 }
 0x880   : > { %v6824_v61 = vpop.eup %6823  ;;  %6827 = vrsqrt.f32 %v2391_v52  ;;  %v2388_v14 = vmul.f32 0.0078125, %v2384_v32  ;;  %v9264_v32 = vsub.s32 2, %v7984_v62 }
 0x881   : > { %v6826_v40 = vpop.eup %6825  ;;  %v2398_v2 = vmul.f32 %v6824_v61, %v8196_v29  ;;  %v8512_v29 = vadd.f32 %v8233_v58, %v2814_v54  ;;  %v2818_v61 = vpop.f32.mrb[72].mxu0 }
 0x882   : > { %v2392_v51 = vadd.f32 1e-05, %v2388_v14  ;;  %v2397_v53 = vmul.f32 %v6826_v40, %v8199_v31  ;;  %v2412_v52 = vrot.slane %v1186_v39, %v9264_v32  ;;  %v8515_v14 = vadd.f32 %v8238_v1, %v2818_v61  ;;  %v2820_v31 = vpop.f32.mrb[73].mxu0 }
 0x883   : > { %v2406_v30 = vmul.f32 %v2404_v20, %v2398_v2  ;;  %9265 = vst [vmem:[#allocation43_spill] sm:$0xff] %v8512_v29  ;;  %v8520_v39 = vadd.f32 %v8233_v58, %v2820_v31  ;;  %v2824_v54 = vpop.f32.mrb[74].mxu0 }
 0x884   : > { %6829 = vrsqrt.f32 %v2392_v51  ;;  %v2405_v26 = vmul.f32 %v2404_v20, %v2397_v53  ;;  %v6167_v53 = vpack.c.bf16 %v8515_v14, %v8509_v33  ;;  %v8545_v61 = vadd.f32 %v8238_v1, %v2824_v54 }
 0x885   : > { %v8522_v6 = vadd.f32 %v2412_v52, %v2406_v30  ;;  %v2826_v30 = vpop.f32.mrb[75].mxu0 }
 0x886   : > { %v8517_v40 = vadd.f32 %v2412_v52, %v2405_v26  ;;  %v8533_v26 = vpack.c.bf16 %v8520_v39, %v8512_v29  ;;  %6169 = vmatprep.subr.msk.bf16.mxu0 %vm8002_vm2, %v6167_v53  ;;  %v8551_v31 = vadd.f32 %v8233_v58, %v2826_v30  ;;  %v2830_v51 = vpop.f32.mrb[76].mxu0 }
 0x887   : > { %9267 = vst [vmem:[#allocation45_spill] sm:$0xff] %v8522_v6  ;;  %6172 = vmatpush3.bf16.xpose.msk.msra.mxu0 %vm8002_vm2, %v6167_v53  ;;  %v8554_v53 = vadd.f32 %v8238_v1, %v2830_v51 }
 0x888   : > { %9266 = vst [vmem:[#allocation44_spill] sm:$0xff] %v8517_v40  ;;  %5501 = vmatprep.mubr.f32.mxu1 %v8517_v40  ;;  %v2832_v40 = vpop.f32.mrb[77].mxu0 }
 0x889   : > { %5502 = vmatmul.mubr.f32.vlgmr.msra.gmra.mrb[14].mxu1 %v8522_v6  ;;  %v6173_v30 = vpack.c.bf16 %v8554_v53, %v8545_v61  ;;  %v2836_v29 = vpop.f32.mrb[78].mxu0 }
 0x88a   : > { %v6828_v38 = vpop.eup %6827  ;;  %6046 = vmatpush3.bf16.xpose.msk.msra.mxu1 %vm8002_vm2, %v8248_v17  ;;  %v8557_v17 = vadd.f32 %v8233_v58, %v2832_v40 }
 0x88b   : > { %v2399_v32 = vmul.f32 %v6828_v38, %v8206_v37  ;;  %6049 = vmatprep.subr.msk.bf16.mxu1 %vm8002_vm2, %v8268_v16  ;;  %6175 = vmatprep.subr.msk.bf16.mxu0 %vm8002_vm2, %v6173_v30 }
 0x88c   : > { %v8570_v51 = vpack.c.bf16 %v8557_v17, %v8551_v31 }
 0x88d   : > { %v2407_v2 = vmul.f32 %v2404_v20, %v2399_v32 }
 0x88e   : > { %v6830_v6 = vpop.eup %6829 }
 0x88f   : > { %v8559_v37 = vadd.f32 %v2412_v52, %v2407_v2  ;;  %v2400_v54 = vmul.f32 %v6830_v6, %v8211_v41  ;;  %v2838_v41 = vpop.f32.mrb[79].mxu0  ;;  %6178 = vmatpush3.bf16.xpose.msk.msra.mxu0 %vm8002_vm2, %v6173_v30  ;;  %v8583_v2 = vadd.f32 %v8238_v1, %v2836_v29 }
 0x891   : > { %5504 = vmatprep.mubr.f32.mxu1 %v8559_v37  ;;  %v2408_v40 = vmul.f32 %v2404_v20, %v2400_v54  ;;  %v2842_v20 = vpop.f32.mrb[80].mxu0 }
 0x892   : > { %6052 = vmatpush3.bf16.xpose.msk.msra.mxu1 %vm8002_vm2, %v8268_v16  ;;  %v8590_v54 = vadd.f32 %v8238_v1, %v2842_v20  ;;  %v6623_v1 = vpop.permute.xlu1 %6622  ;;  %v6628_v20 = vpop.permute.xlu0 %6627 }
 0x893   : > { %v8580_v6 = vadd.f32 %v2412_v52, %v2408_v40  ;;  %6055 = vmatprep.subr.msk.bf16.mxu1 %vm8002_vm2, %v8285_v44  ;;  %v2467_v40 = vsub.s32 4, %v7984_v62 }
 0x894   : > { %v6179_v16 = vpack.c.bf16 %v8590_v54, %v8583_v2 }
 0x895   : > { %5505 = vmatmul.mubr.f32.gmra.mrb[16].mxu1 %v8580_v6 }
 0x896   : > { %6181 = vmatprep.subr.msk.bf16.mxu0 %vm8002_vm2, %v6179_v16  ;;  %v6633_v38 = vpop.permute.xlu1 %6632 }
 0x897   : > { %6184 = vmatpush3.bf16.xpose.msk.msra.mxu0 %vm8002_vm2, %v6179_v16 }
 0x898   : > { %6234 = vmatprep.subr.bf16.mxu0 %v8255_v5 }
 0x89a   : > { %6058 = vmatpush3.bf16.xpose.msk.msra.mxu1 %vm8002_vm2, %v8285_v44  ;;  %v8635_v44 = vadd.f32 %v8233_v58, %v2838_v41  ;;  %v2468_v41 = vrot.slane %v8228_v56, %v2467_v40  ;;  %v9268_v56 = vpack.i.bf16 %v8431_v28, %v8425_v11 }
 0x89b   : > { %6061 = vmatprep.subr.msk.bf16.mxu1 %vm8002_vm2, %v8302_v46 }
 0x8a2   : > { %6064 = vmatpush3.bf16.xpose.msk.msra.mxu1 %vm8002_vm2, %v8302_v46  ;;  %v6625_v46 = vunpack.i.h.bf16 %v6623_v1 }
 0x8a3   : > { %6067 = vmatprep.subr.msk.bf16.mxu1 %vm8002_vm2, %v8319_v22 }
 0x8aa   : > { %6070 = vmatpush3.bf16.xpose.msk.msra.mxu1 %vm8002_vm2, %v8319_v22  ;;  %v6624_v22 = vunpack.i.l.bf16 %v6623_v1 }
 0x8ab   : > { %6073 = vmatprep.subr.msk.bf16.mxu1 %vm8002_vm2, %v8336_v47 }
 0x8ac   : > { %v6089_v52 = vpack.c.bf16 %v6625_v46, %v6624_v22  ;;  %v6630_v46 = vunpack.i.h.bf16 %v6628_v20  ;;  %v6629_v22 = vunpack.i.l.bf16 %v6628_v20  ;;  %v6635_v20 = vunpack.i.h.bf16 %v6633_v38 }
 0x8b2   : > { %6076 = vmatpush3.bf16.xpose.msk.msra.mxu1 %vm8002_vm2, %v8336_v47  ;;  %v2844_v47 = vpop.f32.mrb[81].mxu0 }
 0x8b3   : > { %6079 = vmatprep.subr.msk.bf16.mxu1 %vm8002_vm2, %v8353_v19  ;;  %v8638_v29 = vadd.f32 %v8233_v58, %v2844_v47 }
 0x8ba   : > { %6082 = vmatpush3.bf16.xpose.msk.msra.mxu1 %vm8002_vm2, %v8353_v19  ;;  %v6095_v19 = vpack.c.bf16 %v6630_v46, %v6629_v22  ;;  %v9271_v46 = vpack.i.bf16 %v8457_v57, %v8451_v63 }
 0x8bb   : > { %6085 = vmatprep.subr.msk.bf16.mxu1 %vm8002_vm2, %v8370_v8 }
 0x8c2   : > { %6088 = vmatpush3.bf16.xpose.msk.msra.mxu1 %vm8002_vm2, %v8370_v8  ;;  %v8646_v8 = vpack.c.bf16 %v8638_v29, %v8635_v44 }
 0x8c3   : > { %6091 = vmatprep.subr.msk.bf16.mxu1 %vm8002_vm2, %v6089_v52 }
 0x95c   : > { %v5503_v16 = vpop.f32.mrb[14].mxu1 }
 0x95d   : > { %v2541_v58 = vadd.f32 %v5503_v16, %v2468_v41  ;;  %v2535_v1 = vpop.f32.mrb[15].mxu1  ;;  %v6634_v16 = vunpack.i.l.bf16 %v6633_v38  ;;  %v6638_v38 = vpop.permute.xlu1 %6637 }
 0x95e   : > { %v2536_v47 = vadd.f32 %v2535_v1, %v2468_v41  ;;  %v6640_v63 = vunpack.i.h.bf16 %v6638_v38  ;;  %v6639_v57 = vunpack.i.l.bf16 %v6638_v38 }
 0x95f   : > { %v2555_v32 = vmul.f32 0.125, %v2541_v58  ;;  %v6101_v28 = vpack.c.bf16 %v6635_v20, %v6634_v16 }
 0x960   : > { %v2554_v30 = vmul.f32 0.125, %v2536_v47  ;;  %v9291_v47 = vld [vmem:[#allocation33_spill] sm:$0xff] }
 0x961   : > { %2925 = vrot.lane.b32.xlu0 %v2555_v32, %s7254_s18 }
 0x962   : > { %2923 = vrot.lane.b32.xlu1 %v2554_v30, %s7254_s18  ;;  %5539 = vmatprep.mubr.msk.f32.mxu1 %vm1481_vm1, %v2554_v30  ;;  %v9269_v30 = vpack.i.bf16 %v8405_v60, %v8399_v49  ;;  %v9272_v60 = vpack.i.bf16 %v8554_v53, %v8545_v61  ;;  %v6107_v61 = vpack.c.bf16 %v6640_v63, %v6639_v57 }
 0x963   : > { %5540 = vmatmul.mubr.msk.f32.vlgmr.msra.gmra.mrb[18].mxu1 %vm1481_vm1, %v2555_v32 }
 0x964   : > { %6094 = vmatpush3.bf16.xpose.msk.msra.mxu1 %vm8002_vm2, %v6089_v52  ;;  %v9270_v52 = vpack.i.bf16 %v8484_v0, %v8477_v9  ;;  %v9273_v0 = vpack.i.bf16 %v8515_v14, %v8509_v33  ;;  %v9274_v9 = vpack.i.bf16 %v8590_v54, %v8583_v2  ;;  %v6643_v33 = vpop.permute.xlu0 %6642  ;;  %v6648_v2 = vpop.permute.xlu1 %6647  ;;  %v9288_v54 = vld [vmem:[#allocation36_spill] sm:$0xff] }
 0x965   : > { %6672 = vrot.lane.b32.xlu0 %v9268_v56, %s7254_s18  ;;  %6097 = vmatprep.subr.msk.bf16.mxu1 %vm8002_vm2, %v6095_v19  ;;  %v6645_v14 = vunpack.i.h.bf16 %v6643_v33  ;;  %v6644_v53 = vunpack.i.l.bf16 %v6643_v33  ;;  %v9292_v56 = vld [vmem:[#allocation32_spill] sm:$0xff] }
 0x966   : > { %6667 = vrot.lane.b32.xlu1 %v9269_v30, %s7254_s18  ;;  %v9293_v20 = vpack.i.bf16 %v9291_v47, %v9292_v56  ;;  %v9298_v56 = vld [vmem:[#allocation34_spill] sm:$0xff] }
 0x968   : > { %v5506_v58 = vpop.f32.mrb[16].mxu1  ;;  %v6658_v16 = vpop.permute.xlu1 %6657 }
 0x969   : > { %v2551_v32 = vadd.f32 %v5506_v58, %v2468_v41  ;;  %6682 = vrot.lane.b32.xlu0 %v9270_v52, %s7254_s18  ;;  %v2545_v1 = vpop.f32.mrb[17].mxu1  ;;  %v6659_v30 = vunpack.i.l.bf16 %v6658_v16  ;;  %v9294_v58 = vld [vmem:[#allocation39_spill] sm:$0xff] }
 0x96a   : > { %v2546_v11 = vadd.f32 %v2545_v1, %v2468_v41  ;;  %6677 = vrot.lane.b32.xlu1 %v9271_v46, %s7254_s18 }
 0x96b   : > { %v2557_v49 = vmul.f32 0.125, %v2551_v32  ;;  %v9295_v32 = vld [vmem:[#allocation38_spill] sm:$0xff] }
 0x96c   : > { %v2556_v22 = vmul.f32 0.125, %v2546_v11  ;;  %6100 = vmatpush3.bf16.xpose.msk.msra.mxu1 %vm8002_vm2, %v6095_v19  ;;  %v9289_v19 = vld [vmem:[#allocation35_spill] sm:$0xff]  ;;  %v9296_v52 = vpack.i.bf16 %v9294_v58, %v9295_v32 }
 0x96d   : > { %6692 = vrot.lane.b32.xlu0 %v9272_v60, %s7254_s18  ;;  %6103 = vmatprep.subr.msk.bf16.mxu1 %vm8002_vm2, %v6101_v28  ;;  %v9290_v41 = vpack.i.bf16 %v9288_v54, %v9289_v19 }
 0x96e   : > { %6687 = vrot.lane.b32.xlu1 %v9273_v0, %s7254_s18  ;;  %5609 = vmatprep.mubr.msk.f32.mxu0 %vm1481_vm1, %v2556_v22 }
 0x96f   : > { %5610 = vmatmul.mubr.msk.f32.vlgmr.msra.gmra.mrb[82].mxu0 %vm1481_vm1, %v2557_v49 }
 0x970   : > { %6236 = vmatpush3.bf16.msra.mxu0 %v8255_v5  ;;  %v9275_v5 = vpack.i.bf16 %v8246_v12, %v8242_v7  ;;  %v9277_v7 = vpack.i.bf16 %v8266_v25, %v8258_v21  ;;  %v6113_v12 = vpack.c.bf16 %v6645_v14, %v6644_v53  ;;  %v6650_v21 = vunpack.i.h.bf16 %v6648_v2 }
 0x971   : > { %6238 = vmatprep.subr.bf16.mxu0 %v8274_v34  ;;  %2927 = vrot.lane.b32.xlu0 %v2556_v22, %s7254_s18  ;;  %v6649_v25 = vunpack.i.l.bf16 %v6648_v2 }
 0x972   : > { %6697 = vrot.lane.b32.xlu1 %v9274_v9, %s7254_s18 }
 0x974   : > { %6240 = vmatpush3.bf16.msra.mxu0 %v8274_v34  ;;  %6106 = vmatpush3.bf16.xpose.msk.msra.mxu1 %vm8002_vm2, %v6101_v28  ;;  %v9276_v34 = vpack.i.bf16 %v8283_v42, %v8279_v36  ;;  %v9279_v36 = vpack.i.bf16 %v8300_v50, %v8296_v59  ;;  %v9280_v42 = vpack.i.bf16 %v8351_v13, %v8347_v4  ;;  %v6653_v50 = vpop.permute.xlu0 %6652  ;;  %v9284_v13 = vld [vmem:[#allocation28_spill] sm:$0xff] }
 0x975   : > { %6242 = vmatprep.subr.bf16.mxu0 %v8291_v45  ;;  %6702 = vrot.lane.b32.xlu0 %v9275_v5, %s7254_s18  ;;  %v6119_v59 = vpack.c.bf16 %v6650_v21, %v6649_v25  ;;  %v6654_v4 = vunpack.i.l.bf16 %v6653_v50 }
 0x976   : > { %2929 = vrot.lane.b32.xlu1 %v2557_v49, %s7254_s18  ;;  %6109 = vmatprep.subr.msk.bf16.mxu1 %vm8002_vm2, %v6107_v61 }
 0x978   : > { %6244 = vmatpush3.bf16.msra.mxu0 %v8291_v45  ;;  %v9278_v45 = vpack.i.bf16 %v8317_v18, %v8313_v10  ;;  %v9282_v10 = vld [vmem:[#allocation30_spill] sm:$0xff]  ;;  %v6663_v28 = vpop.permute.xlu0 %6662 }
 0x979   : > { %6246 = vmatprep.subr.bf16.mxu0 %v8308_v3  ;;  %6712 = vrot.lane.b32.xlu0 %v9276_v34, %s7254_s18  ;;  %v9283_v18 = vpack.i.bf16 %v8385_v55, %v9282_v10  ;;  %v6665_v11 = vunpack.i.h.bf16 %v6663_v28  ;;  %v6664_v46 = vunpack.i.l.bf16 %v6663_v28 }
 0x97a   : > { %6707 = vrot.lane.b32.xlu1 %v9277_v7, %s7254_s18 }
 0x97b   : > { %v6185_v38 = vpack.c.bf16 %v6665_v11, %v6664_v46 }
 0x97c   : > { %6248 = vmatpush3.bf16.msra.mxu0 %v8308_v3  ;;  %6112 = vmatpush3.bf16.xpose.msk.msra.mxu1 %vm8002_vm2, %v6107_v61  ;;  %v9281_v3 = vpack.i.bf16 %v8334_v43, %v8330_v35  ;;  %v9285_v35 = vld [vmem:[#allocation27_spill] sm:$0xff] }
 0x97d   : > { %6250 = vmatprep.subr.bf16.mxu0 %v8325_v24  ;;  %6722 = vrot.lane.b32.xlu0 %v9278_v45, %s7254_s18  ;;  %v9286_v43 = vpack.i.bf16 %v9284_v13, %v9285_v35 }
 0x97e   : > { %6717 = vrot.lane.b32.xlu1 %v9279_v36, %s7254_s18  ;;  %6115 = vmatprep.subr.msk.bf16.mxu1 %vm8002_vm2, %v6113_v12 }
 0x980   : > { %6252 = vmatpush3.bf16.msra.mxu0 %v8325_v24  ;;  %v6655_v24 = vunpack.i.h.bf16 %v6653_v50 }
 0x981   : > { %6254 = vmatprep.subr.bf16.mxu0 %v8342_v48  ;;  %6732 = vrot.lane.b32.xlu0 %v9280_v42, %s7254_s18 }
 0x982   : > { %6727 = vrot.lane.b32.xlu1 %v9281_v3, %s7254_s18  ;;  %v6125_v55 = vpack.c.bf16 %v6655_v24, %v6654_v4 }
 0x984   : > { %6256 = vmatpush3.bf16.msra.mxu0 %v8342_v48  ;;  %6118 = vmatpush3.bf16.xpose.msk.msra.mxu1 %vm8002_vm2, %v6113_v12  ;;  %v9287_v48 = vld [vmem:[#allocation29_spill] sm:$0xff] }
 0x985   : > { %6258 = vmatprep.subr.bf16.mxu0 %v8359_v27  ;;  %6742 = vrot.lane.b32.xlu0 %v9283_v18, %s7254_s18 }
 0x986   : > { %6737 = vrot.lane.b32.xlu1 %v9286_v43, %s7254_s18  ;;  %6121 = vmatprep.subr.msk.bf16.mxu1 %vm8002_vm2, %v6119_v59 }
 0x988   : > { %6260 = vmatpush3.bf16.msra.mxu0 %v8359_v27  ;;  %v6660_v27 = vunpack.i.h.bf16 %v6658_v16  ;;  %v9300_v16 = vld [vmem:[#allocation40_spill] sm:$0xff] }
 0x989   : > { %6262 = vmatprep.subr.bf16.mxu0 %v9287_v48  ;;  %6752 = vrot.lane.b32.xlu0 %v9290_v41, %s7254_s18 }
 0x98a   : > { %6747 = vrot.lane.b32.xlu1 %v9293_v20, %s7254_s18  ;;  %v6131_v1 = vpack.c.bf16 %v6660_v27, %v6659_v30  ;;  %v9299_v20 = vld [vmem:[#allocation37_spill] sm:$0xff]  ;;  %v8836_v27 = vand.u32 127, %v9301_v15 }
 0x98c   : > { %6264 = vmatpush3.bf16.msra.mxu0 %v9287_v48  ;;  %6124 = vmatpush3.bf16.xpose.msk.msra.mxu1 %vm8002_vm2, %v6119_v59  ;;  %vm3601_vm4 = vcmp.lt.s32.totalorder %v8836_v27, 8 }
 0x98d   : > { %6127 = vmatprep.subr.msk.bf16.mxu1 %vm8002_vm2, %v6125_v55 }
 0x98e   : > { %6757 = vrot.lane.b32.xlu1 %v9296_v52, %s7254_s18 }
 0x994   : > { %6130 = vmatpush3.bf16.xpose.msk.msra.mxu1 %vm8002_vm2, %v6125_v55  ;;  %v9297_v55 = vld [vmem:[#allocation31_spill] sm:$0xff] }
 0x995   : > { %6133 = vmatprep.subr.msk.bf16.mxu1 %vm8002_vm2, %v6131_v1 }
 0x99c   : > { %6136 = vmatpush3.bf16.xpose.msk.msra.mxu1 %vm8002_vm2, %v6131_v1 }
 0x99d   : > { %6187 = vmatprep.subr.msk.bf16.mxu1 %vm8002_vm2, %v6185_v38 }
 0x9d3   : > { %v2926_v22 = vpop.permute.xlu0 %2925 }
 0x9d4   : > { %v2924_v49 = vpop.permute.xlu1 %2923 }
 0x9d5   : > { %5574 = vmatprep.mubr.msk.f32.mxu1 %vm1481_vm1, %v2924_v49 }
 0x9d6   : > { %5575 = vmatmul.mubr.msk.f32.vlgmr.msra.gmra.mrb[20].mxu1 %vm1481_vm1, %v2926_v22 }
 0x9d7   : > { %6190 = vmatpush3.bf16.xpose.msk.msra.mxu1 %vm8002_vm2, %v6185_v38  ;;  %v6673_v60 = vpop.permute.xlu0 %6672 }
 0x9d8   : > { %v6675_v0 = vunpack.i.h.bf16 %v6673_v60  ;;  %v6674_v63 = vunpack.i.l.bf16 %v6673_v60  ;;  %v6668_v57 = vpop.permute.xlu1 %6667 }
 0x9d9   : > { %v6670_v9 = vunpack.i.h.bf16 %v6668_v57  ;;  %v6669_v61 = vunpack.i.l.bf16 %v6668_v57 }
 0x9da   : > { %v6197_v14 = vpack.c.bf16 %v6675_v0, %v6674_v63 }
 0x9db   : > { %v6191_v33 = vpack.c.bf16 %v6670_v9, %v6669_v61  ;;  %v6683_v5 = vpop.permute.xlu0 %6682  ;;  %v9302_v9 = vld [vmem:[#allocation43_spill] sm:$0xff] }
 0x9dc   : > { %v6678_v53 = vpop.permute.xlu1 %6677  ;;  %v6685_v21 = vunpack.i.h.bf16 %v6683_v5  ;;  %v6684_v25 = vunpack.i.l.bf16 %v6683_v5  ;;  %v9303_v61 = vpack.i.bf16 %v8520_v39, %v9302_v9 }
 0x9dd   : > { %6193 = vmatprep.subr.msk.bf16.mxu1 %vm8002_vm2, %v6191_v33  ;;  %v6680_v7 = vunpack.i.h.bf16 %v6678_v53  ;;  %v6679_v12 = vunpack.i.l.bf16 %v6678_v53  ;;  %v9305_v53 = vld [vmem:[#allocation41_spill] sm:$0xff] }
 0x9de   : > { %v6209_v50 = vpack.c.bf16 %v6685_v21, %v6684_v25 }
 0x9df   : > { %6196 = vmatpush3.bf16.xpose.msk.msra.mxu1 %vm8002_vm2, %v6191_v33  ;;  %v6693_v34 = vpop.permute.xlu0 %6692  ;;  %v6203_v45 = vpack.c.bf16 %v6680_v7, %v6679_v12 }
 0x9e0   : > { %6199 = vmatprep.subr.msk.bf16.mxu1 %vm8002_vm2, %v6197_v14  ;;  %v6688_v10 = vpop.permute.xlu1 %6687  ;;  %v6695_v13 = vunpack.i.h.bf16 %v6693_v34  ;;  %v6694_v35 = vunpack.i.l.bf16 %v6693_v34 }
 0x9e1   : > { %v6690_v18 = vunpack.i.h.bf16 %v6688_v10  ;;  %v6689_v24 = vunpack.i.l.bf16 %v6688_v10 }
 0x9e2   : > { %v6221_v43 = vpack.c.bf16 %v6695_v13, %v6694_v35 }
 0x9e3   : > { %v2928_v2 = vpop.permute.xlu0 %2927  ;;  %v6215_v4 = vpack.c.bf16 %v6690_v18, %v6689_v24 }
 0x9e4   : > { %5644 = vmatprep.mubr.msk.f32.mxu1 %vm1481_vm1, %v2928_v2  ;;  %v6698_v48 = vpop.permute.xlu1 %6697 }
 0x9e5   : > { %v6700_v54 = vunpack.i.h.bf16 %v6698_v48  ;;  %v6699_v19 = vunpack.i.l.bf16 %v6698_v48 }
 0x9e7   : > { %6202 = vmatpush3.bf16.xpose.msk.msra.mxu1 %vm8002_vm2, %v6197_v14  ;;  %v6703_v36 = vpop.permute.xlu0 %6702  ;;  %v6227_v41 = vpack.c.bf16 %v6700_v54, %v6699_v19  ;;  %v9304_v14 = vld [vmem:[#allocation42_spill] sm:$0xff] }
 0x9e8   : > { %v6705_v42 = vunpack.i.h.bf16 %v6703_v36  ;;  %v6704_v3 = vunpack.i.l.bf16 %v6703_v36  ;;  %6205 = vmatprep.subr.msk.bf16.mxu1 %vm8002_vm2, %v6203_v45  ;;  %v2930_v47 = vpop.permute.xlu1 %2929  ;;  %v9306_v34 = vpack.i.bf16 %v9304_v14, %v9305_v53 }
 0x9ea   : > { %v8798_v59 = vpack.c.bf16 %v6705_v42, %v6704_v3 }
 0x9ec   : > { %6266 = vmatprep.subr.bf16.mxu0 %v8798_v59  ;;  %v6708_v52 = vpop.permute.xlu1 %6707 }
 0x9ed   : > { %v6710_v25 = vunpack.i.h.bf16 %v6708_v52  ;;  %v6709_v39 = vunpack.i.l.bf16 %v6708_v52 }
 0x9ef   : > { %6208 = vmatpush3.bf16.xpose.msk.msra.mxu1 %vm8002_vm2, %v6203_v45  ;;  %v6269_v18 = vpack.c.bf16 %v6710_v25, %v6709_v39 }
 0x9f0   : > { %6211 = vmatprep.subr.msk.bf16.mxu1 %vm8002_vm2, %v6209_v50  ;;  %v6718_v1 = vpop.permute.xlu1 %6717 }
 0x9f1   : > { %v6719_v13 = vunpack.i.l.bf16 %v6718_v1 }
 0x9f4   : > { %v6728_v22 = vpop.permute.xlu1 %6727 }
 0x9f5   : > { %v6730_v19 = vunpack.i.h.bf16 %v6728_v22 }
 0x9f7   : > { %6214 = vmatpush3.bf16.xpose.msk.msra.mxu1 %vm8002_vm2, %v6209_v50 }
 0x9f8   : > { %6217 = vmatprep.subr.msk.bf16.mxu1 %vm8002_vm2, %v6215_v4  ;;  %v6738_v60 = vpop.permute.xlu1 %6737 }
 0x9fc   : > { %v8858_v63 = vpop.permute.xlu1 %6747 }
 0x9ff   : > { %6220 = vmatpush3.bf16.xpose.msk.msra.mxu1 %vm8002_vm2, %v6215_v4  ;;  %v6720_v4 = vunpack.i.h.bf16 %v6718_v1 }
 0xa00   : > { %6223 = vmatprep.subr.msk.bf16.mxu1 %vm8002_vm2, %v6221_v43  ;;  %v8864_v33 = vpop.permute.xlu1 %6757 }
 0xa01   : > { %v6277_v48 = vpack.c.bf16 %v6720_v4, %v6719_v13  ;;  %v6760_v14 = vunpack.i.h.bf16 %v8864_v33  ;;  %v6759_v53 = vunpack.i.l.bf16 %v8864_v33 }
 0xa07   : > { %6226 = vmatpush3.bf16.xpose.msk.msra.mxu1 %vm8002_vm2, %v6221_v43 }
 0xa08   : > { %6229 = vmatprep.subr.msk.bf16.mxu1 %vm8002_vm2, %v6227_v41 }
 0xa0f   : > { %6232 = vmatpush3.bf16.xpose.msk.msra.mxu1 %vm8002_vm2, %v6227_v41  ;;  %v6729_v41 = vunpack.i.l.bf16 %v6728_v22 }
 0xa10   : > { %6298 = vmatprep.subr.bf16.mxu1 %v9297_v55 }
 0xa16   : > { %5645 = vmatmul.mubr.msk.f32.vlgmr.msra.gmra.mrb[22].mxu1 %vm1481_vm1, %v2930_v47 }
 0xa17   : > { %6300 = vmatpush3.bf16.msra.mxu1 %v9297_v55 }
 0xa18   : > { %6302 = vmatprep.subr.bf16.mxu1 %v9298_v56 }
 0xa1b   : > { %6304 = vmatpush3.bf16.msra.mxu1 %v9298_v56  ;;  %v6285_v56 = vpack.c.bf16 %v6730_v19, %v6729_v41 }
 0xa1c   : > { %6306 = vmatprep.subr.bf16.mxu1 %v9299_v20 }
 0xa1f   : > { %6308 = vmatpush3.bf16.msra.mxu1 %v9299_v20 }
 0xa20   : > { %6310 = vmatprep.subr.bf16.mxu1 %v9300_v16 }
 0xa23   : > { %6312 = vmatpush3.bf16.msra.mxu1 %v9300_v16 }
 0xa24   : > { %6314 = vmatprep.subr.bf16.mxu1 %v8498_v23 }
 0xa27   : > { %6316 = vmatpush3.bf16.msra.mxu1 %v8498_v23 }
 0xa28   : > { %6318 = vmatprep.subr.bf16.mxu1 %v8533_v26 }
 0xa2b   : > { %6320 = vmatpush3.bf16.msra.mxu1 %v8533_v26 }
 0xa2c   : > { %6322 = vmatprep.subr.bf16.mxu1 %v8570_v51 }
 0xa2f   : > { %6324 = vmatpush3.bf16.msra.mxu1 %v8570_v51 }
 0xa30   : > { %6326 = vmatprep.subr.bf16.mxu1 %v8646_v8 }
 0xa33   : > { %6328 = vmatpush3.bf16.msra.mxu1 %v8646_v8  ;;  %v6713_v8 = vpop.permute.xlu0 %6712 }
 0xa34   : > { %v6715_v50 = vunpack.i.h.bf16 %v6713_v8  ;;  %v6714_v10 = vunpack.i.l.bf16 %v6713_v8  ;;  %v9307_v8 = vpack.i.bf16 %v8638_v29, %v8635_v44 }
 0xa36   : > { %v5541_v30 = vpop.f32.mrb[18].mxu1  ;;  %v6273_v24 = vpack.c.bf16 %v6715_v50, %v6714_v10 }
 0xa37   : > { %v3257_v58 = vpop.f32.mrb[19].mxu1  ;;  %v3605_v23 = vsel %vm3601_vm4, %v5541_v30, -1e+30  ;;  %v6723_v49 = vpop.permute.xlu0 %6722  ;;  %v6740_v30 = vunpack.i.h.bf16 %v6738_v60 }
 0xa38   : > { %3614 = vmax.xlane.f32.xlu1 %v3605_v23  ;;  %v3604_v26 = vsel %vm3601_vm4, %v3257_v58, -1e+30  ;;  %v6725_v35 = vunpack.i.h.bf16 %v6723_v49  ;;  %v6724_v43 = vunpack.i.l.bf16 %v6723_v49  ;;  %v6739_v58 = vunpack.i.l.bf16 %v6738_v60 }
 0xa39   : > { %3612 = vmax.xlane.f32.xlu0 %v3604_v26 }
 0xa3a   : > { %v6281_v54 = vpack.c.bf16 %v6725_v35, %v6724_v43  ;;  %v6293_v1 = vpack.c.bf16 %v6740_v30, %v6739_v58 }
 0xa3b   : > { %v6733_v0 = vpop.permute.xlu0 %6732 }
 0xa3c   : > { %v6735_v55 = vunpack.i.h.bf16 %v6733_v0  ;;  %v6734_v47 = vunpack.i.l.bf16 %v6733_v0 }
 0xa3e   : > { %v6289_v15 = vpack.c.bf16 %v6735_v55, %v6734_v47  ;;  %v9309_v47 = vmov 0.0  }
 0xa3f   : > { %v6743_v57 = vpop.permute.xlu0 %6742 }
 0xa40   : > { %v6744_v52 = vunpack.i.l.bf16 %v6743_v57 }
 0xa42   : > { %v8844_v51 = vpop.f32.mrb[82].mxu0 }
 0xa43   : > { %v8846_v32 = vpop.f32.mrb[83].mxu0  ;;  %v8866_v5 = vpop.permute.xlu0 %6752  ;;  %v8900_v22 = vsel %vm3601_vm4, %v8844_v51, -1e+30  ;;  %v6750_v51 = vunpack.i.h.bf16 %v8858_v63 }
 0xa44   : > { %v8906_v49 = vsel %vm3601_vm4, %v8846_v32, -1e+30  ;;  %v6755_v32 = vunpack.i.h.bf16 %v8866_v5 }
 0xaa9   : > { %v5576_v28 = vpop.f32.mrb[20].mxu1 }
 0xaaa   : > { %v3368_v11 = vpop.f32.mrb[21].mxu1  ;;  %v8850_v46 = vsel %vm3601_vm4, %v5576_v28, -1e+30 }
 0xaab   : > { %3618 = vmax.xlane.f32.xlu1 %v8850_v46  ;;  %v8855_v38 = vsel %vm3601_vm4, %v3368_v11, -1e+30  ;;  %v9308_v11 = vpack.i.bf16 %v8557_v17, %v8551_v31 }
 0xaac   : > { %3616 = vmax.xlane.f32.xlu0 %v8855_v38 }
 0xabc   : > { %6767 = vrot.lane.b32.xlu1 %v9303_v61, %s7254_s18  ;;  %v6754_v61 = vunpack.i.l.bf16 %v8866_v5 }
 0xac2   : > { %6762 = vrot.lane.b32.xlu0 %v9306_v34, %s7254_s18 }
 0xac5   : > { %v3615_v7 = vpop.xlane.xlu1 %3614 }
 0xac6   : > { %v3629_v12 = vsub.f32 %v3605_v23, %v3615_v7  ;;  %v3613_v2 = vpop.xlane.xlu0 %3612 }
 0xac7   : > { %v3628_v45 = vsub.f32 %v3604_v26, %v3613_v2  ;;  %v6745_v26 = vunpack.i.h.bf16 %v6743_v57  ;;  %v6749_v57 = vunpack.i.l.bf16 %v8858_v63  ;;  %v6341_v63 = vpack.c.bf16 %v6760_v14, %v6759_v53  ;;  %v4018_v53 = vld [vmem:[%s7738_s5 + $0x70] sm:$0xff] }
 0xac8   : > { %v3638_v36 = vmul.f32 1.442695, %v3629_v12 }
 0xac9   : > { %v3636_v21 = vmul.f32 1.442695, %v3628_v45  ;;  %v6329_v28 = vpack.c.bf16 %v6745_v26, %v6744_v52  ;;  %v4004_v26 = vld [vmem:[%s7738_s5] sm:$0xff]  ;;  %v4005_v52 = vld [vmem:[%s7738_s5 + $0x8] sm:$0xff] }
 0xacb   : > { %6831 = vpow2.f32 %v3636_v21 }
 0xacc   : > { %6833 = vpow2.f32 %v3638_v36 }
 0xad5   : > { %v8872_v42 = vpop.eup %6831 }
 0xad6   : > { %v8874_v3 = vpop.eup %6833  ;;  %5679 = vmatprep.mubr.f32.mxu0 %v8872_v42 }
 0xad7   : > { %5680 = vmatmul.mubr.f32.vlgmr.msra.gmra.mrb[84].mxu0 %v8874_v3 }
 0xad8   : > { %6268 = vmatpush3.bf16.msra.mxu0 %v8798_v59 }
 0xad9   : > { %6270 = vmatprep.subr.bf16.mxu0 %v6269_v18 }
 0xadc   : > { %6272 = vmatpush3.bf16.msra.mxu0 %v6269_v18 }
 0xadd   : > { %6274 = vmatprep.subr.bf16.mxu0 %v6273_v24 }
 0xae0   : > { %6276 = vmatpush3.bf16.msra.mxu0 %v6273_v24 }
 0xae1   : > { %6278 = vmatprep.subr.bf16.mxu0 %v6277_v48 }
 0xae4   : > { %6280 = vmatpush3.bf16.msra.mxu0 %v6277_v48 }
 0xae5   : > { %6282 = vmatprep.subr.bf16.mxu0 %v6281_v54 }
 0xae8   : > { %6284 = vmatpush3.bf16.msra.mxu0 %v6281_v54 }
 0xae9   : > { %v5646_v59 = vpop.f32.mrb[22].mxu1  ;;  %6286 = vmatprep.subr.bf16.mxu0 %v6285_v56 }
 0xaea   : > { %v3590_v20 = vpop.f32.mrb[23].mxu1  ;;  %v8881_v16 = vsel %vm3601_vm4, %v5646_v59, -1e+30 }
 0xaeb   : > { %3626 = vmax.xlane.f32.xlu1 %v8881_v16  ;;  %v8886_v23 = vsel %vm3601_vm4, %v3590_v20, -1e+30 }
 0xaec   : > { %6288 = vmatpush3.bf16.msra.mxu0 %v6285_v56  ;;  %3624 = vmax.xlane.f32.xlu0 %v8886_v23 }
 0xaed   : > { %6290 = vmatprep.subr.bf16.mxu0 %v6289_v15 }
 0xaf0   : > { %6292 = vmatpush3.bf16.msra.mxu0 %v6289_v15 }
 0xaf1   : > { %6294 = vmatprep.subr.bf16.mxu0 %v6293_v1 }
 0xaf4   : > { %6296 = vmatpush3.bf16.msra.mxu0 %v6293_v1  ;;  %v4006_v1 = vld [vmem:[%s7738_s5 + $0x10] sm:$0xff] }
 0xaf5   : > { %6330 = vmatprep.subr.bf16.mxu0 %v6329_v28 }
 0xafc   : > { %6777 = vrot.lane.b32.xlu1 %v9307_v8, %s7254_s18  ;;  %v4007_v8 = vld [vmem:[%s7738_s5 + $0x18] sm:$0xff] }
 0xb02   : > { %6772 = vrot.lane.b32.xlu0 %v9308_v11, %s7254_s18  ;;  %v6365_v11 = vpack.c.bf16 %v4007_v8, %v4006_v1 }
 0xb20   : > { %3622 = vmax.xlane.f32.xlu1 %v8900_v22 }
 0xb21   : > { %3620 = vmax.xlane.f32.xlu0 %v8906_v49 }
 0xb38   : > { %v3619_v44 = vpop.xlane.xlu1 %3618 }
 0xb39   : > { %v3631_v29 = vsub.f32 %v8850_v46, %v3619_v44  ;;  %v3617_v60 = vpop.xlane.xlu0 %3616  ;;  %v6333_v46 = vpack.c.bf16 %v6750_v51, %v6749_v57  ;;  %v4014_v57 = vld [vmem:[%s7738_s5 + $0x50] sm:$0xff] }
 0xb3a   : > { %v3630_v31 = vsub.f32 %v8855_v38, %v3617_v60  ;;  %v6337_v38 = vpack.c.bf16 %v6755_v32, %v6754_v61  ;;  %v4011_v60 = vld [vmem:[%s7738_s5 + $0x38] sm:$0xff] }
 0xb3b   : > { %v3642_v17 = vmul.f32 1.442695, %v3631_v29  ;;  %v4010_v29 = vld [vmem:[%s7738_s5 + $0x30] sm:$0xff] }
 0xb3c   : > { %v3640_v0 = vmul.f32 1.442695, %v3630_v31  ;;  %v6768_v2 = vpop.permute.xlu1 %6767  ;;  %v6373_v31 = vpack.c.bf16 %v4011_v60, %v4010_v29 }
 0xb3d   : > { %v6763_v34 = vpop.permute.xlu0 %6762  ;;  %v6770_v5 = vunpack.i.h.bf16 %v6768_v2  ;;  %v6769_v45 = vunpack.i.l.bf16 %v6768_v2 }
 0xb3e   : > { %6835 = vpow2.f32 %v3640_v0  ;;  %v6765_v7 = vunpack.i.h.bf16 %v6763_v34  ;;  %v6764_v12 = vunpack.i.l.bf16 %v6763_v34  ;;  %v4013_v0 = vld [vmem:[%s7738_s5 + $0x48] sm:$0xff]  ;;  %v4019_v34 = vld [vmem:[%s7738_s5 + $0x78] sm:$0xff] }
 0xb3f   : > { %6837 = vpow2.f32 %v3642_v17  ;;  %v6349_v21 = vpack.c.bf16 %v6770_v5, %v6769_v45  ;;  %v4012_v17 = vld [vmem:[%s7738_s5 + $0x40] sm:$0xff] }
 0xb40   : > { %v6345_v36 = vpack.c.bf16 %v6765_v7, %v6764_v12  ;;  %v6377_v51 = vpack.c.bf16 %v4013_v0, %v4012_v17 }
 0xb48   : > { %v6836_v9 = vpop.eup %6835 }
 0xb49   : > { %v6838_v27 = vpop.eup %6837  ;;  %5714 = vmatprep.mubr.f32.mxu0 %v6836_v9  ;;  %3656 = vadd.xlane.f32.xlu0 %v6836_v9  ;;  %v4015_v9 = vld [vmem:[%s7738_s5 + $0x58] sm:$0xff] }
 0xb4a   : > { %5715 = vmatmul.mubr.f32.vlgmr.msra.gmra.mrb[86].mxu0 %v6838_v27 }
 0xb4b   : > { %6332 = vmatpush3.bf16.msra.mxu0 %v6329_v28  ;;  %v6361_v28 = vpack.c.bf16 %v4005_v52, %v4004_v26 }
 0xb4c   : > { %6334 = vmatprep.subr.bf16.mxu0 %v6333_v46 }
 0xb4d   : > { %3658 = vadd.xlane.f32.xlu0 %v6838_v27  ;;  %6362 = vmatprep.subr.bf16.mxu1 %v6361_v28  ;;  %v6381_v27 = vpack.c.bf16 %v4015_v9, %v4014_v57  ;;  %v9311_v9 = vld [vmem:[#allocation44_spill] sm:$0xff] }
 0xb4f   : > { %6336 = vmatpush3.bf16.msra.mxu0 %v6333_v46  ;;  %v4016_v46 = vld [vmem:[%s7738_s5 + $0x60] sm:$0xff] }
 0xb50   : > { %6338 = vmatprep.subr.bf16.mxu0 %v6337_v38 }
 0xb53   : > { %6340 = vmatpush3.bf16.msra.mxu0 %v6337_v38  ;;  %v4017_v38 = vld [vmem:[%s7738_s5 + $0x68] sm:$0xff] }
 0xb54   : > { %6342 = vmatprep.subr.bf16.mxu0 %v6341_v63  ;;  %v6385_v14 = vpack.c.bf16 %v4017_v38, %v4016_v46 }
 0xb57   : > { %6344 = vmatpush3.bf16.msra.mxu0 %v6341_v63  ;;  %v6389_v63 = vpack.c.bf16 %v4019_v34, %v4018_v53  ;;  %v4174_v34 = vld [vmem:[%s7740_s2 + $0x8] sm:$0xff] }
 0xb58   : > { %6346 = vmatprep.subr.bf16.mxu0 %v6345_v36 }
 0xb5b   : > { %6348 = vmatpush3.bf16.msra.mxu0 %v6345_v36 }
 0xb5c   : > { %6350 = vmatprep.subr.bf16.mxu0 %v6349_v21 }
 0xb5f   : > { %6352 = vmatpush3.bf16.msra.mxu0 %v6349_v21 }
 0xb78   : > { %v3627_v25 = vpop.xlane.xlu1 %3626 }
 0xb79   : > { %v3635_v33 = vsub.f32 %v8881_v16, %v3627_v25  ;;  %v3625_v39 = vpop.xlane.xlu0 %3624 }
 0xb7a   : > { %v3634_v50 = vsub.f32 %v8886_v23, %v3625_v39 }
 0xb7b   : > { %v3650_v10 = vmul.f32 1.442695, %v3635_v33 }
 0xb7c   : > { %v3648_v18 = vmul.f32 1.442695, %v3634_v50  ;;  %v6778_v24 = vpop.permute.xlu1 %6777 }
 0xb7d   : > { %6839 = vpow2.f32 %v3650_v10  ;;  %v6780_v4 = vunpack.i.h.bf16 %v6778_v24  ;;  %v6773_v13 = vpop.permute.xlu0 %6772  ;;  %v6779_v35 = vunpack.i.l.bf16 %v6778_v24 }
 0xb7e   : > { %6841 = vpow2.f32 %v3648_v18  ;;  %v6775_v43 = vunpack.i.h.bf16 %v6773_v13  ;;  %v6774_v48 = vunpack.i.l.bf16 %v6773_v13 }
 0xb7f   : > { %v6357_v19 = vpack.c.bf16 %v6780_v4, %v6779_v35 }
 0xb80   : > { %v6353_v54 = vpack.c.bf16 %v6775_v43, %v6774_v48 }
 0xb82   : > { %6354 = vmatprep.subr.bf16.mxu0 %v6353_v54 }
 0xb83   : > { %6356 = vmatpush3.bf16.msra.mxu0 %v6353_v54 }
 0xb84   : > { %6358 = vmatprep.subr.bf16.mxu0 %v6357_v19 }
 0xb87   : > { %v6840_v41 = vpop.eup %6839  ;;  %6360 = vmatpush3.bf16.msra.mxu0 %v6357_v19 }
 0xb88   : > { %v6842_v55 = vpop.eup %6841  ;;  %3666 = vadd.xlane.f32.xlu0 %v6840_v41 }
 0xb89   : > { %3664 = vadd.xlane.f32.xlu1 %v6842_v55  ;;  %5784 = vmatprep.mubr.f32.mxu0 %v6842_v55 }
 0xb8a   : > { %5785 = vmatmul.mubr.f32.vlgmr.msra.gmra.mrb[88].mxu0 %v6840_v41 }
 0xb8b   : > { %4281 = vmatprep.mubr.f32.mxu0 %v9309_v47 }
 0xb8c   : > { %3654 = vadd.xlane.f32.xlu0 %v8874_v3 }
 0xb8d   : > { %3652 = vadd.xlane.f32.xlu1 %v8872_v42 }
 0xbaa   : > { %v8922_v56 = vpop.f32.mrb[84].mxu0 }
 0xbab   : > { %v8924_v59 = vpop.f32.mrb[85].mxu0 }
 0xbad   : > { %v3623_v20 = vpop.xlane.xlu1 %3622 }
 0xbae   : > { %v3633_v16 = vsub.f32 %v8900_v22, %v3623_v20  ;;  %v3621_v15 = vpop.xlane.xlu0 %3620  ;;  %v4008_v22 = vld [vmem:[%s7738_s5 + $0x20] sm:$0xff] }
 0xbaf   : > { %v3632_v30 = vsub.f32 %v8906_v49, %v3621_v15  ;;  %v4009_v49 = vld [vmem:[%s7738_s5 + $0x28] sm:$0xff] }
 0xbb0   : > { %v3646_v58 = vmul.f32 1.442695, %v3633_v16  ;;  %v6369_v44 = vpack.c.bf16 %v4009_v49, %v4008_v22  ;;  %v4022_v49 = vsub.s32 7, %v7984_v62 }
 0xbb1   : > { %v3644_v23 = vmul.f32 1.442695, %v3632_v30 }
 0xbb2   : > { %6843 = vpow2.f32 %v3646_v58 }
 0xbb3   : > { %6845 = vpow2.f32 %v3644_v23 }
 0xbbc   : > { %v6844_v42 = vpop.eup %6843 }
 0xbbd   : > { %v6846_v3 = vpop.eup %6845  ;;  %3662 = vadd.xlane.f32.xlu0 %v6844_v42 }
 0xbbe   : > { %3660 = vadd.xlane.f32.xlu1 %v6846_v3  ;;  %5749 = vmatprep.mubr.f32.mxu1 %v6846_v3 }
 0xbbf   : > { %5750 = vmatmul.mubr.f32.vlgmr.msra.gmra.mrb[24].mxu1 %v6844_v42 }
 0xbc0   : > { %6364 = vmatpush3.bf16.msra.mxu1 %v6361_v28 }
 0xbc1   : > { %6366 = vmatprep.subr.bf16.mxu1 %v6365_v11 }
 0xbc4   : > { %6368 = vmatpush3.bf16.msra.mxu1 %v6365_v11 }
 0xbc5   : > { %6370 = vmatprep.subr.bf16.mxu1 %v6369_v44 }
 0xbc8   : > { %6372 = vmatpush3.bf16.msra.mxu1 %v6369_v44  ;;  %v6880_v44 = vld [vmem:[%s7744_s17] sm:$0xff] }
 0xbc9   : > { %6374 = vmatprep.subr.bf16.mxu1 %v6373_v31  ;;  %v4023_v29 = vrot.slane %v6880_v44, %v4022_v49  ;;  %v4200_v49 = vld [vmem:[%s7740_s2 + $0xd8] sm:$0xff] }
 0xbcc   : > { %6376 = vmatpush3.bf16.msra.mxu1 %v6373_v31 }
 0xbcd   : > { %6378 = vmatprep.subr.bf16.mxu1 %v6377_v51 }
 0xbd0   : > { %6380 = vmatpush3.bf16.msra.mxu1 %v6377_v51  ;;  %v9310_v51 = vld [vmem:[#allocation45_spill] sm:$0xff] }
 0xbd1   : > { %6382 = vmatprep.subr.bf16.mxu1 %v6381_v27 }
 0xbd4   : > { %6384 = vmatpush3.bf16.msra.mxu1 %v6381_v27 }
 0xbd5   : > { %6386 = vmatprep.subr.bf16.mxu1 %v6385_v14 }
 0xbd6   : > { %v3657_v32 = vpop.xlane.xlu0 %3656 }
 0xbd8   : > { %6388 = vmatpush3.bf16.msra.mxu1 %v6385_v14 }
 0xbd9   : > { %6390 = vmatprep.subr.bf16.mxu1 %v6389_v63 }
 0xbda   : > { %v3659_v61 = vpop.xlane.xlu0 %3658 }
 0xbdb   : > { %6847 = vrcp.f32 %v3659_v61 }
 0xbdc   : > { %6849 = vrcp.f32 %v3657_v32  ;;  %6392 = vmatpush3.bf16.msra.mxu1 %v6389_v63  ;;  %v4176_v63 = vld [vmem:[%s7740_s2 + $0x18] sm:$0xff] }
 0xbe5   : > { %v6848_v7 = vpop.eup %6847 }
 0xbe6   : > { %v6850_v2 = vpop.eup %6849 }
 0xc15   : > { %v3667_v25 = vpop.xlane.xlu0 %3666 }
 0xc16   : > { %v3665_v33 = vpop.xlane.xlu1 %3664  ;;  %6851 = vrcp.f32 %v3667_v25  ;;  %v4179_v25 = vld [vmem:[%s7740_s2 + $0x30] sm:$0xff] }
 0xc17   : > { %6853 = vrcp.f32 %v3665_v33  ;;  %v4184_v33 = vld [vmem:[%s7740_s2 + $0x58] sm:$0xff] }
 0xc19   : > { %v3655_v35 = vpop.xlane.xlu0 %3654 }
 0xc1a   : > { %v3653_v43 = vpop.xlane.xlu1 %3652  ;;  %6855 = vrcp.f32 %v3655_v35 }
 0xc1b   : > { %6857 = vrcp.f32 %v3653_v43 }
 0xc1d   : > { %v5716_v12 = vpop.f32.mrb[86].mxu0 }
 0xc1e   : > { %v3979_v5 = vmul.f32 %v6848_v7, %v5716_v12  ;;  %v3809_v45 = vpop.f32.mrb[87].mxu0  ;;  %v4173_v7 = vld [vmem:[%s7740_s2] sm:$0xff]  ;;  %v6393_v12 = vpack.c.bf16 %v4176_v63, %v4174_v34 }
 0xc1f   : > { %v3978_v36 = vmul.f32 %v6850_v2, %v3809_v45  ;;  %v4175_v2 = vld [vmem:[%s7740_s2 + $0x10] sm:$0xff]  ;;  %v4180_v45 = vld [vmem:[%s7740_s2 + $0x38] sm:$0xff] }
 0xc20   : > { %v6852_v39 = vpop.eup %6851  ;;  %6394 = vmatprep.subr.bf16.mxu0 %v6393_v12 }
 0xc21   : > { %v6781_v21 = vpack.i.bf16 %v3979_v5, %v3978_v36  ;;  %v6854_v10 = vpop.eup %6853  ;;  %v4178_v5 = vld [vmem:[%s7740_s2 + $0x28] sm:$0xff]  ;;  %v6395_v36 = vpack.c.bf16 %v4175_v2, %v4173_v7 }
 0xc23   : > { %6782 = vrot.lane.b32.xlu1 %v6781_v21, %s7254_s18  ;;  %v4177_v21 = vld [vmem:[%s7740_s2 + $0x20] sm:$0xff]  ;;  %6396 = vmatpush1.bf16.msra.mxu0 %v6395_v36 }
 0xc24   : > { %v6856_v54 = vpop.eup %6855  ;;  %v4314_v36 = vld [vmem:[%s7742_s15] sm:$0xff] }
 0xc25   : > { %v6858_v41 = vpop.eup %6857  ;;  %v3977_v58 = vmul.f32 %v6856_v54, %v8922_v56 }
 0xc26   : > { %v3976_v30 = vmul.f32 %v6858_v41, %v8924_v59 }
 0xc4a   : > { %v3663_v3 = vpop.xlane.xlu0 %3662 }
 0xc4b   : > { %v3661_v48 = vpop.xlane.xlu1 %3660  ;;  %6859 = vrcp.f32 %v3663_v3 }
 0xc4c   : > { %6861 = vrcp.f32 %v3661_v48 }
 0xc55   : > { %v6860_v26 = vpop.eup %6859 }
 0xc56   : > { %v6862_v52 = vpop.eup %6861 }
 0xc5d   : > { %v5786_v50 = vpop.f32.mrb[88].mxu0 }
 0xc5e   : > { %v3983_v18 = vmul.f32 %v6852_v39, %v5786_v50  ;;  %v3959_v24 = vpop.f32.mrb[89].mxu0  ;;  %v6399_v39 = vpack.c.bf16 %v4179_v25, %v4177_v21  ;;  %v4333_v21 = vld [vmem:[%s7742_s15 + $0x98] sm:$0xff] }
 0xc5f   : > { %v3982_v4 = vmul.f32 %v6854_v10, %v3959_v24  ;;  %v4181_v10 = vld [vmem:[%s7740_s2 + $0x40] sm:$0xff] }
 0xc61   : > { %v6786_v13 = vpack.i.bf16 %v3983_v18, %v3982_v4  ;;  %v4183_v18 = vld [vmem:[%s7740_s2 + $0x50] sm:$0xff] }
 0xc62   : > { %v6403_v24 = vpack.c.bf16 %v4183_v18, %v4181_v10  ;;  %v4335_v10 = vld [vmem:[%s7742_s15 + $0xa8] sm:$0xff] }
 0xc63   : > { %6787 = vrot.lane.b32.xlu0 %v6786_v13, %s7254_s18 }
 0xc92   : > { %v5751_v19 = vpop.f32.mrb[24].mxu1 }
 0xc93   : > { %v3884_v55 = vpop.f32.mrb[25].mxu1  ;;  %v3981_v28 = vmul.f32 %v6860_v26, %v5751_v19  ;;  %v4189_v26 = vld [vmem:[%s7740_s2 + $0x80] sm:$0xff] }
 0xc94   : > { %v3980_v8 = vmul.f32 %v6862_v52, %v3884_v55  ;;  %v4186_v55 = vld [vmem:[%s7740_s2 + $0x68] sm:$0xff]  ;;  %v4191_v52 = vld [vmem:[%s7740_s2 + $0x90] sm:$0xff] }
 0xc95   : > { %v6783_v20 = vpop.permute.xlu1 %6782 }
 0xc96   : > { %v6785_v16 = vunpack.i.h.bf16 %v6783_v20  ;;  %v6784_v15 = vunpack.i.l.bf16 %v6783_v20  ;;  %v4188_v20 = vld [vmem:[%s7740_s2 + $0x78] sm:$0xff] }
 0xc98   : > { %v4000_v23 = vsel %vm1481_vm1, %v3976_v30, %v6784_v15  ;;  %v4001_v42 = vsel %vm1481_vm1, %v3977_v58, %v6785_v16  ;;  %v6405_v16 = vpack.c.bf16 %v4188_v20, %v4186_v55  ;;  %v4185_v15 = vld [vmem:[%s7740_s2 + $0x60] sm:$0xff]  ;;  %v4187_v30 = vld [vmem:[%s7740_s2 + $0x70] sm:$0xff]  ;;  %v4321_v20 = vld [vmem:[%s7742_s15 + $0x38] sm:$0xff] }
 0xc99   : > { %5819 = vmatprep.mubr.f32.mxu1 %v4000_v23  ;;  %v6407_v58 = vpack.c.bf16 %v4187_v30, %v4185_v15  ;;  %v4190_v23 = vld [vmem:[%s7740_s2 + $0x88] sm:$0xff]  ;;  %v4320_v55 = vld [vmem:[%s7742_s15 + $0x30] sm:$0xff] }
 0xc9a   : > { %5820 = vmatmul.mubr.f32.vlgmr.msra.gmra.mrb[26].mxu1 %v4001_v42  ;;  %v4192_v42 = vld [vmem:[%s7740_s2 + $0x98] sm:$0xff]  ;;  %v4339_v15 = vld [vmem:[%s7742_s15 + $0xc8] sm:$0xff]  ;;  %v6439_v30 = vpack.c.bf16 %v4321_v20, %v4320_v55 }
 0xc9b   : > { %v6409_v3 = vpack.c.bf16 %v4192_v42, %v4190_v23  ;;  %v4322_v23 = vld [vmem:[%s7742_s15 + $0x40] sm:$0xff]  ;;  %v4323_v42 = vld [vmem:[%s7742_s15 + $0x48] sm:$0xff] }
 0xcd5   : > { %v6788_v1 = vpop.permute.xlu0 %6787 }
 0xcd6   : > { %v6790_v11 = vunpack.i.h.bf16 %v6788_v1  ;;  %v6789_v22 = vunpack.i.l.bf16 %v6788_v1  ;;  %v4194_v1 = vld [vmem:[%s7740_s2 + $0xa8] sm:$0xff] }
 0xcd8   : > { %v4002_v59 = vsel %vm1481_vm1, %v3980_v8, %v6789_v22  ;;  %v4003_v56 = vsel %vm1481_vm1, %v3981_v28, %v6790_v11  ;;  %v6411_v28 = vpack.c.bf16 %v4191_v52, %v4189_v26  ;;  %v4196_v8 = vld [vmem:[%s7740_s2 + $0xb8] sm:$0xff]  ;;  %v4193_v11 = vld [vmem:[%s7740_s2 + $0xa0] sm:$0xff]  ;;  %v4195_v22 = vld [vmem:[%s7740_s2 + $0xb0] sm:$0xff]  ;;  %v6443_v52 = vpack.c.bf16 %v4323_v42, %v4322_v23 }
 0xcd9   : > { %5822 = vmatprep.mubr.f32.mxu1 %v4002_v59  ;;  %v6413_v59 = vpack.c.bf16 %v4196_v8, %v4194_v1  ;;  %v6415_v44 = vpack.c.bf16 %v4195_v22, %v4193_v11  ;;  %v4341_v26 = vld [vmem:[%s7742_s15 + $0xd8] sm:$0xff]  ;;  %v4342_v11 = vld [vmem:[%s7742_s15 + $0xe0] sm:$0xff]  ;;  %v4343_v22 = vld [vmem:[%s7742_s15 + $0xe8] sm:$0xff] }
 0xcda   : > { %5823 = vmatmul.mubr.f32.gmra.mrb[28].mxu1 %v4003_v56  ;;  %v4198_v56 = vld [vmem:[%s7740_s2 + $0xc8] sm:$0xff]  ;;  %v4325_v8 = vld [vmem:[%s7742_s15 + $0x58] sm:$0xff] }
 0xd6d   : > { %v5821_v60 = vpop.f32.mrb[26].mxu1 }
 0xd6e   : > { %v4096_v31 = vadd.f32 %v5821_v60, %v4023_v29  ;;  %v4090_v17 = vpop.f32.mrb[27].mxu1  ;;  %v4197_v60 = vld [vmem:[%s7740_s2 + $0xc0] sm:$0xff] }
 0xd6f   : > { %v4091_v0 = vadd.f32 %v4090_v17, %v4023_v29  ;;  %v4202_v17 = vld [vmem:[%s7740_s2 + $0xe8] sm:$0xff] }
 0xd70   : > { %v4110_v57 = vadd.f32 %v4096_v31, %v9310_v51  ;;  %v4199_v31 = vld [vmem:[%s7740_s2 + $0xd0] sm:$0xff] }
 0xd71   : > { %v4109_v27 = vadd.f32 %v4091_v0, %v9311_v9  ;;  %v4204_v0 = vld [vmem:[%s7740_s2 + $0xf8] sm:$0xff]  ;;  %v6419_v51 = vpack.c.bf16 %v4199_v31, %v4197_v60  ;;  %v4201_v9 = vld [vmem:[%s7740_s2 + $0xe0] sm:$0xff] }
 0xd72   : > { %4115 = vadd.xlane.f32.xlu0 %v4110_v57 }
 0xd73   : > { %4113 = vadd.xlane.f32.xlu1 %v4109_v27 }
 0xdad   : > { %v5824_v32 = vpop.f32.mrb[28].mxu1 }
 0xdae   : > { %v4106_v61 = vadd.f32 %v5824_v32, %v4023_v29  ;;  %v4100_v46 = vpop.f32.mrb[29].mxu1 }
 0xdaf   : > { %v4101_v38 = vadd.f32 %v4100_v46, %v4023_v29  ;;  %v6417_v29 = vpack.c.bf16 %v4200_v49, %v4198_v56  ;;  %v6449_v56 = vpack.c.bf16 %v4343_v22, %v4342_v11 }
 0xdb0   : > { %v8957_v14 = vadd.f32 %v4106_v61, %v8580_v6  ;;  %v6397_v6 = vpack.c.bf16 %v4180_v45, %v4178_v5  ;;  %v4330_v5 = vld [vmem:[%s7742_s15 + $0x80] sm:$0xff]  ;;  %v4331_v45 = vld [vmem:[%s7742_s15 + $0x88] sm:$0xff] }
 0xdb1   : > { %v8960_v53 = vadd.f32 %v4101_v38, %v8559_v37  ;;  %v4182_v37 = vld [vmem:[%s7740_s2 + $0x48] sm:$0xff] }
 0xdb2   : > { %4119 = vadd.xlane.f32.xlu0 %v8957_v14  ;;  %6398 = vmatprep.subr.bf16.mxu0 %v6397_v6  ;;  %v6401_v50 = vpack.c.bf16 %v4184_v33, %v4182_v37  ;;  %v4315_v6 = vld [vmem:[%s7742_s15 + $0x8] sm:$0xff]  ;;  %v4316_v33 = vld [vmem:[%s7742_s15 + $0x10] sm:$0xff] }
 0xdb3   : > { %4117 = vadd.xlane.f32.xlu1 %v8960_v53  ;;  %6400 = vmatpush1.bf16.msra.mxu0 %v6399_v39  ;;  %v6427_v25 = vpack.c.bf16 %v4315_v6, %v4314_v36  ;;  %v4317_v39 = vld [vmem:[%s7742_s15 + $0x18] sm:$0xff] }
 0xdb4   : > { %6402 = vmatprep.subr.bf16.mxu0 %v6401_v50  ;;  %v4334_v50 = vld [vmem:[%s7742_s15 + $0xa0] sm:$0xff]  ;;  %v6431_v18 = vpack.c.bf16 %v4317_v39, %v4316_v33 }
 0xdb7   : > { %6404 = vmatpush1.bf16.msra.mxu0 %v6403_v24  ;;  %v6433_v24 = vpack.c.bf16 %v4335_v10, %v4334_v50  ;;  %v4326_v50 = vld [vmem:[%s7742_s15 + $0x60] sm:$0xff]  ;;  %v4327_v10 = vld [vmem:[%s7742_s15 + $0x68] sm:$0xff] }
 0xdb8   : > { %6406 = vmatprep.subr.bf16.mxu0 %v6405_v16  ;;  %v4338_v16 = vld [vmem:[%s7742_s15 + $0xc0] sm:$0xff] }
 0xdbb   : > { %6408 = vmatpush1.bf16.msra.mxu0 %v6407_v58  ;;  %v6441_v58 = vpack.c.bf16 %v4339_v15, %v4338_v16 }
 0xdbc   : > { %6410 = vmatprep.subr.bf16.mxu0 %v6409_v3  ;;  %v4340_v3 = vld [vmem:[%s7742_s15 + $0xd0] sm:$0xff] }
 0xdbd   : > { %v6445_v1 = vpack.c.bf16 %v4341_v26, %v4340_v3 }
 0xdbf   : > { %6412 = vmatpush1.bf16.msra.mxu0 %v6411_v28  ;;  %v4324_v28 = vld [vmem:[%s7742_s15 + $0x50] sm:$0xff] }
 0xdc0   : > { %6414 = vmatprep.subr.bf16.mxu0 %v6413_v59  ;;  %v6447_v59 = vpack.c.bf16 %v4325_v8, %v4324_v28 }
 0xdc3   : > { %6416 = vmatpush1.bf16.msra.mxu0 %v6415_v44 }
 0xdc4   : > { %6418 = vmatprep.subr.bf16.mxu0 %v6417_v29 }
 0xdc7   : > { %6420 = vmatpush1.bf16.msra.mxu0 %v6419_v51  ;;  %v9041_v51 = vld [vmem:[%s7744_s17 + $0x8] sm:$0xff] }
 0xdff   : > { %v4116_v4 = vpop.xlane.xlu0 %4115 }
 0xe00   : > { %v4122_v13 = vmul.f32 0.0078125, %v4116_v4  ;;  %v4114_v35 = vpop.xlane.xlu1 %4113  ;;  %v4318_v4 = vld [vmem:[%s7742_s15 + $0x20] sm:$0xff] }
 0xe01   : > { %v4121_v43 = vmul.f32 0.0078125, %v4114_v35  ;;  %v4336_v35 = vld [vmem:[%s7742_s15 + $0xb0] sm:$0xff] }
 0xe02   : > { %v8976_v48 = vsub.f32 %v4110_v57, %v4122_v13  ;;  %v6421_v57 = vpack.c.bf16 %v4204_v0, %v4202_v17  ;;  %v4319_v13 = vld [vmem:[%s7742_s15 + $0x28] sm:$0xff] }
 0xe03   : > { %v8978_v54 = vsub.f32 %v4109_v27, %v4121_v43  ;;  %v4203_v27 = vld [vmem:[%s7740_s2 + $0xf0] sm:$0xff]  ;;  %v4337_v43 = vld [vmem:[%s7742_s15 + $0xb8] sm:$0xff] }
 0xe04   : > { %v4130_v19 = vmul.f32 %v8976_v48, %v8976_v48  ;;  %v6423_v32 = vpack.c.bf16 %v4203_v27, %v4201_v9  ;;  %6422 = vmatprep.subr.bf16.mxu0 %v6421_v57  ;;  %v9312_v57 = vsub.s32 3, %v7984_v62 }
 0xe05   : > { %v4129_v41 = vmul.f32 %v8978_v54, %v8978_v54 }
 0xe06   : > { %4135 = vadd.xlane.f32.xlu0 %v4130_v19  ;;  %6424 = vmatpush1.bf16.msra.mxu0 %v6423_v32  ;;  %v6435_v19 = vpack.c.bf16 %v4319_v13, %v4318_v4  ;;  %v4160_v9 = vrot.slane %v9041_v51, %v9312_v57  ;;  %v4168_v32 = vrot.slane %v9041_v51, %v2467_v40  ;;  %v4328_v4 = vld [vmem:[%s7742_s15 + $0x70] sm:$0xff]  ;;  %v4329_v13 = vld [vmem:[%s7742_s15 + $0x78] sm:$0xff] }
 0xe07   : > { %4133 = vadd.xlane.f32.xlu1 %v4129_v41  ;;  %v6437_v41 = vpack.c.bf16 %v4337_v43, %v4336_v35  ;;  %v6455_v35 = vpack.c.bf16 %v4329_v13, %v4328_v4  ;;  %v4205_v43 = vld [vmem:[%s7732_s4] sm:$0x3]  ;;  %s4513_s4 = sshll.u32 %s7255_s22, 4  ;;  %s4514_s4 = int_to_ptr.vmem [resolvable:$true] %s4513_s4 }
 0xe08   : > { %s7148_s7 = scalar_lea.vmem %s4514_s4, 512  ;;  %p7155_p1 = scmp.lt.s32.totalorder %s4514_s4, %s4514_s4 }
 0xe09   : > { %p7149_p5 = scmp.ne.s32.totalorder %s4514_s4, %s7148_s7  ;;  %p7156_p11 = scmp.lt.s32.totalorder %s7148_s7, %s7148_s7 }
 0xe0b   : > { %p7150_p12 = pnand %p7149_p5, %p6528_p3  ;;  %p7157_p13 = por %p7156_p11, %p7155_p1 }
 0xe0d   : > { %p7151_p6 = pneg %p7150_p12 }
 0xe0f   : > { %p7158_p4 = pnand %p7157_p13, %p7151_p6 }
 0xe3f   : > { %v4120_v61 = vpop.xlane.xlu0 %4119 }
 0xe40   : > { %v4124_v46 = vmul.f32 0.0078125, %v4120_v61  ;;  %v4118_v38 = vpop.xlane.xlu1 %4117 }
 0xe41   : > { %v4123_v34 = vmul.f32 0.0078125, %v4118_v38 }
 0xe42   : > { %v9005_v63 = vsub.f32 %v8957_v14, %v4124_v46  ;;  %v6425_v14 = vpack.c.bf16 %v4331_v45, %v4330_v5 }
 0xe43   : > { %v9008_v7 = vsub.f32 %v8960_v53, %v4123_v34  ;;  %v4332_v53 = vld [vmem:[%s7742_s15 + $0x90] sm:$0xff] }
 0xe44   : > { %v4132_v12 = vmul.f32 %v9005_v63, %v9005_v63  ;;  %v6429_v37 = vpack.c.bf16 %v4333_v21, %v4332_v53  ;;  %6426 = vmatprep.subr.bf16.mxu1 %v6425_v14 }
 0xe45   : > { %v4131_v2 = vmul.f32 %v9008_v7, %v9008_v7  ;;  %6428 = vmatpush3.bf16.msra.mxu1 %v6427_v25 }
 0xe46   : > { %4139 = vadd.xlane.f32.xlu0 %v4132_v12  ;;  %6430 = vmatprep.subr.bf16.mxu1 %v6429_v37 }
 0xe47   : > { %4137 = vadd.xlane.f32.xlu1 %v4131_v2 }
 0xe49   : > { %6432 = vmatpush3.bf16.msra.mxu1 %v6431_v18  ;;  %v4344_v18 = vld [vmem:[%s7742_s15 + $0xf0] sm:$0xff] }
 0xe4a   : > { %6434 = vmatprep.subr.bf16.mxu1 %v6433_v24 }
 0xe4d   : > { %6436 = vmatpush3.bf16.msra.mxu1 %v6435_v19  ;;  %v9313_v19 = vld [vmem:[#allocation25_spill] sm:$0xff] }
 0xe4e   : > { %6438 = vmatprep.subr.bf16.mxu1 %v6437_v41  ;;  %v4210_v41 = vrot.slane %v4205_v43, %v9313_v19 }
 0xe51   : > { %6440 = vmatpush3.bf16.msra.mxu1 %v6439_v30 }
 0xe52   : > { %6442 = vmatprep.subr.bf16.mxu1 %v6441_v58 }
 0xe55   : > { %6444 = vmatpush3.bf16.msra.mxu1 %v6443_v52 }
 0xe56   : > { %6446 = vmatprep.subr.bf16.mxu1 %v6445_v1 }
 0xe59   : > { %6448 = vmatpush3.bf16.msra.mxu1 %v6447_v59 }
 0xe5a   : > { %6450 = vmatprep.subr.bf16.mxu1 %v6449_v56 }
 0xe93   : > { %v4136_v49 = vpop.xlane.xlu0 %4135 }
 0xe94   : > { %v4142_v44 = vmul.f32 0.0078125, %v4136_v49  ;;  %v4134_v29 = vpop.xlane.xlu1 %4133 }
 0xe95   : > { %v4141_v60 = vmul.f32 0.0078125, %v4134_v29 }
 0xe96   : > { %v4146_v31 = vadd.f32 1e-05, %v4142_v44 }
 0xe97   : > { %v4145_v17 = vadd.f32 1e-05, %v4141_v60 }
 0xe98   : > { %6863 = vrsqrt.f32 %v4146_v31 }
 0xe99   : > { %6865 = vrsqrt.f32 %v4145_v17 }
 0xea2   : > { %v6864_v0 = vpop.eup %6863 }
 0xea3   : > { %v6866_v27 = vpop.eup %6865  ;;  %v4154_v46 = vmul.f32 %v6864_v0, %v8976_v48 }
 0xea4   : > { %v4153_v61 = vmul.f32 %v6866_v27, %v8978_v54 }
 0xea5   : > { %v4162_v12 = vmul.f32 %v4160_v9, %v4154_v46 }
 0xea6   : > { %v4161_v38 = vmul.f32 %v4160_v9, %v4153_v61 }
 0xea7   : > { %v9055_v2 = vadd.f32 %v4168_v32, %v4162_v12 }
 0xea8   : > { %v9051_v34 = vadd.f32 %v4168_v32, %v4161_v38 }
 0xeaa   : > { %4282 = vmatmul.mubr.f32.vlgmr.msra.gmra.mrb[90].mxu0 %v9051_v34 }
 0xeab   : > { %4287 = vmatprep.mubr.f32.mxu0 %v9309_v47 }
 0xeae   : > { %4288 = vmatmul.mubr.f32.gmra.mrb[92].mxu0 %v9055_v2 }
 0xeaf   : > { %4293 = vmatprep.mubr.f32.mxu0 %v9309_v47 }
 0xed3   : > { %v4140_v5 = vpop.xlane.xlu0 %4139 }
 0xed4   : > { %v4144_v40 = vmul.f32 0.0078125, %v4140_v5  ;;  %v4138_v45 = vpop.xlane.xlu1 %4137 }
 0xed5   : > { %v4143_v54 = vmul.f32 0.0078125, %v4138_v45 }
 0xed6   : > { %v4148_v48 = vadd.f32 1e-05, %v4144_v40 }
 0xed7   : > { %v4147_v36 = vadd.f32 1e-05, %v4143_v54 }
 0xed8   : > { %6867 = vrsqrt.f32 %v4148_v48 }
 0xed9   : > { %6869 = vrsqrt.f32 %v4147_v36 }
 0xee2   : > { %v6868_v14 = vpop.eup %6867 }
 0xee3   : > { %v6870_v6 = vpop.eup %6869  ;;  %v4156_v21 = vmul.f32 %v6868_v14, %v9005_v63  ;;  %v4345_v63 = vld [vmem:[%s7742_s15 + $0xf8] sm:$0xff] }
 0xee4   : > { %v4155_v53 = vmul.f32 %v6870_v6, %v9008_v7  ;;  %v6451_v7 = vpack.c.bf16 %v4327_v10, %v4326_v50  ;;  %v6453_v24 = vpack.c.bf16 %v4345_v63, %v4344_v18 }
 0xee5   : > { %v4164_v33 = vmul.f32 %v4160_v9, %v4156_v21 }
 0xee6   : > { %v4163_v25 = vmul.f32 %v4160_v9, %v4155_v53  ;;  %6452 = vmatpush3.bf16.msra.mxu1 %v6451_v7  ;;  %v4349_v9 = vrot.slane %v9041_v51, %v9313_v19 }
 0xee7   : > { %v9065_v39 = vadd.f32 %v4168_v32, %v4164_v33  ;;  %6454 = vmatprep.subr.bf16.mxu1 %v6453_v24 }
 0xee8   : > { %v9061_v37 = vadd.f32 %v4168_v32, %v4163_v25 }
 0xeea   : > { %4294 = vmatmul.mubr.f32.gmra.mrb[94].mxu0 %v9061_v37  ;;  %6456 = vmatpush3.bf16.msra.mxu1 %v6455_v35 }
 0xeeb   : > { %4299 = vmatprep.mubr.f32.mxu0 %v9309_v47  ;;  %v9314_v47 = vld [vmem:[#allocation26_spill] sm:$0xff] }
 0xeec   : > { %v4214_v55 = vrot.slane %v4205_v43, %v9314_v47 }
 0xeee   : > { %4300 = vmatmul.mubr.f32.gmra.mrb[96].mxu0 %v9065_v39 }
 0xf7d   : > { %v4283_v20 = vpop.f32.mrb[90].mxu0 }
 0xf7e   : > { %v4284_v16 = vadd.f32 %v4283_v20, %v4210_v41  ;;  %v4285_v15 = vpop.f32.mrb[91].mxu0 }
 0xf7f   : > { %v4286_v30 = vadd.f32 %v4285_v15, %v4214_v55 }
 0xf80   : > { %v4306_v42 = vmax.f32 %v4284_v16, 0.0 }
 0xf81   : > { %v4307_v58 = vmax.f32 %v4286_v30, 0.0  ;;  %v4289_v23 = vpop.f32.mrb[92].mxu0 }
 0xf82   : > { %v4290_v3 = vadd.f32 %v4289_v23, %v4210_v41  ;;  %v4291_v26 = vpop.f32.mrb[93].mxu0  ;;  %v9315_v23 = vsub.s32 5, %v7984_v62 }
 0xf83   : > { %v4292_v52 = vadd.f32 %v4291_v26, %v4214_v55  ;;  %4414 = vmatprep.mubr.f32.mxu1 %v4307_v58  ;;  %v9316_v26 = vsub.s32 6, %v7984_v62 }
 0xf84   : > { %4415 = vmatmul.mubr.f32.vlgmr.msra.gmra.mrb[30].mxu1 %v4306_v42  ;;  %v4308_v28 = vmax.f32 %v4290_v3, 0.0  ;;  %v4486_v42 = vrot.slane %v9041_v51, %v9315_v23 }
 0xf85   : > { %v4309_v1 = vmax.f32 %v4292_v52, 0.0  ;;  %v4494_v52 = vrot.slane %v9041_v51, %v9316_v26 }
 0xf87   : > { %4419 = vmatprep.mubr.f32.mxu1 %v4309_v1 }
 0xf88   : > { %4420 = vmatmul.mubr.f32.gmra.mrb[32].mxu1 %v4308_v28 }
 0xfbd   : > { %v4295_v8 = vpop.f32.mrb[94].mxu0 }
 0xfbe   : > { %v4296_v11 = vadd.f32 %v4295_v8, %v4210_v41  ;;  %v4297_v22 = vpop.f32.mrb[95].mxu0 }
 0xfbf   : > { %v4298_v59 = vadd.f32 %v4297_v22, %v4214_v55 }
 0xfc0   : > { %v4310_v44 = vmax.f32 %v4296_v11, 0.0 }
 0xfc1   : > { %v4311_v56 = vmax.f32 %v4298_v59, 0.0  ;;  %v4301_v49 = vpop.f32.mrb[96].mxu0 }
 0xfc2   : > { %v4302_v29 = vadd.f32 %v4301_v49, %v4210_v41  ;;  %v4303_v60 = vpop.f32.mrb[97].mxu0 }
 0xfc3   : > { %v4304_v31 = vadd.f32 %v4303_v60, %v4214_v55  ;;  %4424 = vmatprep.mubr.f32.mxu1 %v4311_v56 }
 0xfc4   : > { %4425 = vmatmul.mubr.f32.gmra.mrb[34].mxu1 %v4310_v44  ;;  %v4312_v0 = vmax.f32 %v4302_v29, 0.0 }
 0xfc5   : > { %v4313_v17 = vmax.f32 %v4304_v31, 0.0 }
 0xfc7   : > { %4429 = vmatprep.mubr.f32.mxu1 %v4313_v17 }
 0xfc8   : > { %4430 = vmatmul.mubr.f32.gmra.mrb[36].mxu1 %v4312_v0 }
0x1057   : > { %v5261_v57 = vpop.f32.mrb[30].mxu1 }
0x1058   : > { %v5262_v27 = vpop.f32.mrb[31].mxu1 }
0x1059   : > { %v5263_v32 = vadd.f32 %v5262_v27, %v5261_v57 }
0x105b   : > { %v4417_v61 = vadd.f32 %v5263_v32, %v4349_v9  ;;  %v5264_v46 = vpop.f32.mrb[32].mxu1 }
0x105c   : > { %v5265_v38 = vpop.f32.mrb[33].mxu1 }
0x105d   : > { %v5266_v12 = vadd.f32 %v5265_v38, %v5264_v46  ;;  %v4435_v5 = vadd.f32 %v4417_v61, %v9051_v34 }
0x105f   : > { %v4422_v40 = vadd.f32 %v5266_v12, %v4349_v9  ;;  %4439 = vadd.xlane.f32.xlu1 %v4435_v5 }
0x1061   : > { %v4436_v45 = vadd.f32 %v4422_v40, %v9055_v2 }
0x1063   : > { %4441 = vadd.xlane.f32.xlu0 %v4436_v45 }
0x1097   : > { %v5267_v54 = vpop.f32.mrb[34].mxu1 }
0x1098   : > { %v5268_v48 = vpop.f32.mrb[35].mxu1 }
0x1099   : > { %v5269_v36 = vadd.f32 %v5268_v48, %v5267_v54 }
0x109b   : > { %v4427_v14 = vadd.f32 %v5269_v36, %v4349_v9  ;;  %v5270_v6 = vpop.f32.mrb[36].mxu1 }
0x109c   : > { %v5271_v53 = vpop.f32.mrb[37].mxu1 }
0x109d   : > { %v5272_v21 = vadd.f32 %v5271_v53, %v5270_v6  ;;  %v4437_v25 = vadd.f32 %v4427_v14, %v9061_v37 }
0x109f   : > { %v4432_v33 = vadd.f32 %v5272_v21, %v4349_v9  ;;  %4443 = vadd.xlane.f32.xlu1 %v4437_v25 }
0x10a1   : > { %v4438_v50 = vadd.f32 %v4432_v33, %v9065_v39 }
0x10a3   : > { %4445 = vadd.xlane.f32.xlu0 %v4438_v50 }
0x10ec   : > { %v4440_v34 = vpop.xlane.xlu1 %4439 }
0x10ed   : > { %v4447_v10 = vmul.f32 0.0078125, %v4440_v34 }
0x10ef   : > { %v4451_v7 = vsub.f32 %v4435_v5, %v4447_v10 }
0x10f0   : > { %v4442_v18 = vpop.xlane.xlu0 %4441 }
0x10f1   : > { %v4448_v2 = vmul.f32 0.0078125, %v4442_v18  ;;  %v4455_v63 = vmul.f32 %v4451_v7, %v4451_v7 }
0x10f3   : > { %v4452_v24 = vsub.f32 %v4436_v45, %v4448_v2  ;;  %4459 = vadd.xlane.f32.xlu1 %v4455_v63 }
0x10f5   : > { %v4456_v4 = vmul.f32 %v4452_v24, %v4452_v24 }
0x10f7   : > { %4461 = vadd.xlane.f32.xlu0 %v4456_v4 }
0x112c   : > { %v4444_v13 = vpop.xlane.xlu1 %4443 }
0x112d   : > { %v4449_v35 = vmul.f32 0.0078125, %v4444_v13 }
0x112f   : > { %v4453_v43 = vsub.f32 %v4437_v25, %v4449_v35 }
0x1130   : > { %v4446_v19 = vpop.xlane.xlu0 %4445 }
0x1131   : > { %v4450_v37 = vmul.f32 0.0078125, %v4446_v19  ;;  %v4457_v41 = vmul.f32 %v4453_v43, %v4453_v43 }
0x1133   : > { %v4454_v47 = vsub.f32 %v4438_v50, %v4450_v37  ;;  %4463 = vadd.xlane.f32.xlu1 %v4457_v41 }
0x1135   : > { %v4458_v39 = vmul.f32 %v4454_v47, %v4454_v47 }
0x1137   : > { %4465 = vadd.xlane.f32.xlu0 %v4458_v39 }
0x1180   : > { %v4460_v55 = vpop.xlane.xlu1 %4459 }
0x1181   : > { %v4467_v20 = vmul.f32 0.0078125, %v4460_v55 }
0x1183   : > { %v4471_v16 = vadd.f32 1e-05, %v4467_v20 }
0x1184   : > { %v4462_v15 = vpop.xlane.xlu0 %4461 }
0x1185   : > { %6871 = vrsqrt.f32 %v4471_v16  ;;  %v4468_v30 = vmul.f32 0.0078125, %v4462_v15 }
0x1187   : > { %v4472_v58 = vadd.f32 1e-05, %v4468_v30 }
0x1189   : > { %6873 = vrsqrt.f32 %v4472_v58 }
0x118f   : > { %v6872_v3 = vpop.eup %6871 }
0x1190   : > { %v4479_v1 = vmul.f32 %v6872_v3, %v4451_v7 }
0x1192   : > { %v4487_v28 = vmul.f32 %v4486_v42, %v4479_v1 }
0x1193   : > { %v6874_v8 = vpop.eup %6873 }
0x1194   : > { %v4495_v11 = vadd.f32 %v4494_v52, %v4487_v28  ;;  %v4480_v22 = vmul.f32 %v6874_v8, %v4452_v24 }
0x1196   : > { %4499 = vst [vmem:[#allocation15] sm:$0xff] %v4495_v11  ;;  %v4488_v59 = vmul.f32 %v4486_v42, %v4480_v22 }
0x1198   : > { %v4496_v56 = vadd.f32 %v4494_v52, %v4488_v59 }
0x119a   : > { %4500 = vst [vmem:[#allocation15 + $0x8] sm:$0xff] %v4496_v56 }
0x11c0   : > { %v4464_v49 = vpop.xlane.xlu1 %4463 }
0x11c1   : > { %v4469_v44 = vmul.f32 0.0078125, %v4464_v49 }
0x11c3   : > { %v4473_v29 = vadd.f32 1e-05, %v4469_v44 }
0x11c4   : > { %v4466_v60 = vpop.xlane.xlu0 %4465 }
0x11c5   : > { %6875 = vrsqrt.f32 %v4473_v29  ;;  %v4470_v31 = vmul.f32 0.0078125, %v4466_v60 }
0x11c7   : > { %v4474_v17 = vadd.f32 1e-05, %v4470_v31 }
0x11c9   : > { %6877 = vrsqrt.f32 %v4474_v17 }
0x11cf   : > { %v6876_v62 = vpop.eup %6875 }
0x11d0   : > { %v4481_v51 = vmul.f32 %v6876_v62, %v4453_v43 }
0x11d2   : > { %v4489_v0 = vmul.f32 %v4486_v42, %v4481_v51 }
0x11d3   : > { %v6878_v57 = vpop.eup %6877 }
0x11d4   : > { %v4497_v9 = vadd.f32 %v4494_v52, %v4489_v0  ;;  %v4482_v27 = vmul.f32 %v6878_v57, %v4454_v47 }
0x11d6   : > { %4501 = vst [vmem:[#allocation15 + $0x10] sm:$0xff] %v4497_v9  ;;  %v4490_v32 = vmul.f32 %v4486_v42, %v4482_v27 }
0x11d8   : > { %v4498_v61 = vadd.f32 %v4494_v52, %v4490_v32 }
0x11da   : > { %4502 = vst [vmem:[#allocation15 + $0x18] sm:$0xff] %v4498_v61 }
0x11db   : > { %7161 = shalt.err (!%p7158_p4)
}
0x11dc   : > { %s9317_s2 = sld [smem:[#allocation54_spill]] }
0x11e2   : > { %s7162_s15 = scalar_lea.hbm %s9317_s2, 512 }
0x11e3   : > { %p7163_p0 = scmp.ne.s32.totalorder %s9317_s2, %s7162_s15  ;;  %p7168_p7 = scmp.lt.u32.totalorder %s7162_s15, %s9317_s2 }
0x11e5   : > { %p7164_p9 = pnand %p7163_p0, %p6528_p3 }
0x11e7   : > { %p7165_p2 = pneg %p7164_p9 }
0x11e9   : > { %p7170_p10 = pnand %p7168_p7, %p7165_p2 }
0x11eb   : > { %7173 = shalt.err (!%p7170_p10)
}
0x11ec   : > { %s7256_s23 = smov 128   ;;  %s7257_s19 = smov 8  }
0x11ed   : > { %6491 = dma.vmem_to_hbm [thread:$0]  (%p6528_p3), %s4514_s4, 512, %s9317_s2, [#allocation5], %s7256_s23, %s7256_s23, %s7257_s19  }
0x11ee   : > { %7211 = dma.done.wait (%p6528_p3), [#allocation5], 512  }
0x11ef   : > { %7213 = vsyncadd (%p6528_p3), [#allocation5], 4294966784 }
0x11f0 PF: > { %s26_s30 = sadd.s32 1, %s7236_s30   ;;  %s9318_s20 = sld [smem:[#allocation20_spill]] }
0x11f1   : > { %p23_p8 = scmp.ge.s32.totalorder %s26_s30, 5   ;;  %s9319_s27 = sld [smem:[#allocation24_spill]] }
0x11f2   : > { %s9320_s6 = sld [smem:[#allocation23_spill]]  ;;  %s9321_s25 = smov %s7220_s26 }
0x11f3   : > { %s9323_s28 = smov %s7232_s29  ;;  %25 = sbr.rel (!%p23_p8) target bundleno = 15 (0xf), region = 196 }
0x11f6   : > { %s9322_s26 = smov %s9318_s20 }
0x11f8   : > { %s9324_s29 = smov %s9320_s6 }
0x11fa   :  { %4529 = vsyncpa [#allocation4], 1 }
0x11fb   :  { %4531 = vsyncpa [#allocation4 + $0x1], 1 }
0x11fc   :  { %4532 = vsyncpa [#allocation7], 1 }
0x11fd   :  { %4533 = vsyncpa [#allocation5], 1 }
0x11fe   :  { %4535 = vsyncpa [#allocation5 + $0x1], 1 }

// kernel: tpu_custom_call.1
= control target key start
LH: loop header
LB: loop body
LE: loop exit
PB: predicated region body
PF: predicated region fallthrough
CT: control target
= control target key end

     0   :  { %s9130_s0 = inlined_call_operand.vmem [shape: f32[2,128,64], index: 0, kind: input, shape index: {}]   ;;  %s9131_s1 = inlined_call_operand.vmem [shape: f32[1,16,128], index: 1, kind: input, shape index: {}]   ;;  %s9132_s2 = inlined_call_operand.hbm [shape: f32[64,128], index: 2, kind: input, shape index: {}]   ;;  %s9133_s3 = inlined_call_operand.hbm [shape: f32[1,128], index: 3, kind: input, shape index: {}]   ;;  %s9134_s4 = inlined_call_operand.hbm [shape: f32[3,128,384], index: 4, kind: input, shape index: {}]   ;;  %s9135_s5 = inlined_call_operand.vmem [shape: f32[3,128,128], index: 5, kind: input, shape index: {}]   ;;  %s9136_s6 = inlined_call_operand.hbm [shape: f32[3,128,128], index: 6, kind: input, shape index: {}]   ;;  %s9137_s7 = inlined_call_operand.hbm [shape: f32[3,128,256], index: 7, kind: input, shape index: {}]   ;;  %s9138_s8 = inlined_call_operand.hbm [shape: f32[3,128,128], index: 8, kind: input, shape index: {}]   ;;  %s9139_s9 = inlined_call_operand.hbm [shape: f32[3,128,256], index: 9, kind: input, shape index: {}]   ;;  %s9140_s10 = inlined_call_operand.hbm [shape: f32[3,256,128], index: 10, kind: input, shape index: {}]   ;;  %s9141_s11 = inlined_call_operand.vmem [shape: f32[3,1,256], index: 11, kind: input, shape index: {}]   ;;  %s9142_s12 = inlined_call_operand.hbm [shape: f32[3,16,128], index: 12, kind: input, shape index: {}]   ;;  %s9143_s13 = inlined_call_operand.hbm [shape: f32[2,16,128], index: 13, kind: output, shape index: {}]  }
   0x1   :  { %9197 = sst [smem:[#allocation46_spill]] %s9130_s0 }
   0x2   :  { %9198 = sst [smem:[#allocation47_spill]] %s9131_s1 }
   0x3   :  { %9199 = sst [smem:[#allocation48_spill]] %s9132_s2 }
   0x4   :  { %9200 = sst [smem:[#allocation49_spill]] %s9134_s4 }
   0x5   :  { %9201 = sst [smem:[#allocation50_spill]] %s9135_s5 }
   0x6   :  { %9202 = sst [smem:[#allocation51_spill]] %s9136_s6 }
   0x7   :  { %9203 = sst [smem:[#allocation52_spill]] %s9137_s7 }
   0x8   :  { %9204 = sst [smem:[#allocation53_spill]] %s9141_s11 }
   0x9   :  { %9205 = sst [smem:[#allocation54_spill]] %s9143_s13 }
   0xa   :  { %18 = vsyncpa [#allocation4], 0 }
   0xb   :  { %19 = vsyncpa [#allocation7], 0 }
   0xc   :  { %20 = vsyncpa [#allocation5], 0  ;;  %s7328_s25 = smov 0   ;;  %s7330_s26 = smov 0  }
   0xd   :  { %s7332_s27 = smov 0   ;;  %s7334_s28 = smov 0  }
   0xe   :  { %s7336_s29 = smov 0   ;;  %s7338_s30 = smov 0  }
   0xf LB: > { %9206 = sst [smem:[#allocation20_spill]] %s7224_s27  ;;  %s7357_s14 = sadd.s32 4294967295, %s7236_s30   ;;  %s7236_s30 = sphi %s7338_s30, %s26_s30   ;;  %s7232_s29 = sphi %s7336_s29, %s9324_s29   ;;  %s7228_s28 = sphi %s7334_s28, %s9323_s28   ;;  %s7224_s27 = sphi %s7332_s27, %s9319_s27   ;;  %s7220_s26 = sphi %s7330_s26, %s9322_s26   ;;  %s7216_s25 = sphi %s7328_s25, %s9321_s25  }
  0x10   : > { %9207 = sst [smem:[#allocation21_spill]] %s7228_s28  ;;  %p141_p0 = scmp.ne.s32.totalorder %s7224_s27, %s7220_s26 }
  0x11   : > { %p142_p1 = scmp.eq.s32.totalorder %s7236_s30, 0  ;;  %p147_p2 = scmp.ne.s32.totalorder %s7220_s26, %s7216_s25 }
  0x12   : > { %p9147_p3 = scmp.eq.s32.totalorder %s7357_s14, 0  ;;  %p4756_p5 = scmp.ge.s32.totalorder %s7236_s30, 1 }
  0x13   : > { %p143_p4 = por %p142_p1, %p141_p0  ;;  %p392_p7 = scmp.lt.s32.totalorder %s7236_s30, 4 }
  0x14   : > { %p7368_p6 = por %p9147_p3, %p147_p2  ;;  %s7238_s18 = smov [#allocation3]  }
  0x15   : > { %p7373_p8 = pnand %p4756_p5, %p392_p7  ;;  %s417_s19 = sshll.u32 %s7238_s18, 4  ;;  %s418_s19 = int_to_ptr.vmem [resolvable:$true] %s417_s19 }
  0x16   : > { %s9208_s16 = scalar_select %p7368_p6, 1, 0 }
  0x17   : > { %s9210_s17 = scalar_select %p7373_p8, 1, 0 }
  0x18   : > { %9209 = sst [smem:[#allocation22_spill]] %s9208_s16  ;;  %p6494_p9 = pneg %p7373_p8 }
  0x19   : > { %p6525_p10 = scmp.lt.s32.totalorder %s7236_s30, 3  ;;  %s35_s22 = sadd.s32 1, %s7232_s29 }
  0x1a   : > { %p7382_p11 = pnand %p6494_p9, %p9147_p3  ;;  %s9213_s2 = sld [smem:[#allocation48_spill]] }
  0x1b   : > { %p7386_p12 = pnand %p6525_p10, %p143_p4 }
  0x1c   : > { %s9211_s20 = scalar_select %p7382_p11, 1, 0 }
  0x1d   : > { %s9212_s21 = scalar_select %p7386_p12, 1, 0 }
  0x1e   : > { %p9158_p0 = pneg %p7382_p11 }
  0x20   : > { %s6882_s25 = scalar_lea.hbm %s9213_s2, 1024 }
  0x21   : > { %p6883_p13 = scmp.ne.s32.totalorder %s9213_s2, %s6882_s25  ;;  %p6889_p4 = scmp.lt.u32.totalorder %s6882_s25, %s9213_s2 }
  0x23   : > { %p6885_p1 = pnand %p9158_p0, %p6883_p13 }
  0x25   : > { %p6886_p2 = pneg %p6885_p1 }
  0x27   : > { %p6891_p5 = pnand %p6889_p4, %p6886_p2 }
  0x29   : > { %6894 = shalt.err (!%p6891_p5)
}
  0x2a   : > { %s6895_s0 = scalar_lea.vmem %s418_s19, 1024  ;;  %p6903_p3 = scmp.lt.s32.totalorder %s418_s19, %s418_s19 }
  0x2b   : > { %p6896_p7 = scmp.ne.s32.totalorder %s418_s19, %s6895_s0  ;;  %p6904_p6 = scmp.lt.s32.totalorder %s6895_s0, %s6895_s0 }
  0x2d   : > { %p6898_p9 = pnand %p6896_p7, %p9158_p0  ;;  %p6905_p8 = por %p6904_p6, %p6903_p3 }
  0x2f   : > { %p6899_p10 = pneg %p6898_p9 }
  0x31   : > { %p6906_p12 = pnand %p6905_p8, %p6899_p10 }
  0x33   : > { %6909 = shalt.err (!%p6906_p12)
}
  0x34   : > { %s9154_s15 = smov 128   ;;  %s9156_s1 = smov 8  }
  0x35   : > { %6497 = dma.hbm_to_vmem [thread:$0]  (!%p7382_p11), %s9213_s2, 1024, %s418_s19, [#allocation4], %s9154_s15, %s9154_s15, %s9156_s1  }
  0x36   : > { %p36_p3 = scmp.ge.s32.totalorder %s35_s22, 3  ;;  %s442_s0 = sand.u32 1, %s7236_s30  }
  0x37   : > { %s7418_s24 = sand.u32 1, %s7224_s27   ;;  %s6466_s11 = smul.u32 6144, %s7232_s29 }
  0x38   : > { %s9326_s22 = smov (%p36_p3, %s35_s22), 0  ;;  %s6465_s25 = smul.u32 384, %s7418_s24 }
  0x39   : > { %9214 = sst [smem:[#allocation23_spill]] %s9326_s22  ;;  %s131_s18 = ssub.s32 %s7232_s29, %s9326_s22 }
  0x3a   : > { %p132_p6 = scmp.eq.s32.totalorder %s131_s18, 0  ;;  %s9215_s4 = sld [smem:[#allocation49_spill]] }
  0x3b   : > { %s446_s19 = scalar_lea.vmem [#allocation8], %s6465_s25  ;;  %s9216_s23 = sadd.s32 1, %s7224_s27 }
  0x3c   : > { %s453_s13 = sshll.u32 %s446_s19, 4  ;;  %s9162_s1 = sshll.u32 %s7418_s24, 7  ;;  %s7436_s13 = int_to_ptr.vmem [resolvable:$true] %s453_s13 }
  0x3d   : > { %s7434_s15 = scalar_select %p132_p6, %s7224_s27, %s9216_s23  }
  0x3e   : > { %s7439_s2 = scalar_lea.sflag [#allocation4], %s442_s0  ;;  %p9218_p12 = scmp.ne.s32.totalorder %s9212_s21, 0 }
  0x3f   : > { %9217 = sst [smem:[#allocation24_spill]] %s7434_s15 }
  0x40   : > { %s7429_s16 = scalar_lea.hbm %s9215_s4, %s6466_s11  ;;  %p7445_p13 = pneg %p9218_p12 }
  0x41   : > { %s6910_s18 = scalar_lea.hbm %s7429_s16, 6144  ;;  %s6915_s25 = scalar_lea.hbm %s9215_s4, 18432 }
  0x42   : > { %p6911_p8 = scmp.ne.s32.totalorder %s7429_s16, %s6910_s18  ;;  %p6916_p4 = scmp.lt.u32.totalorder %s7429_s16, %s9215_s4 }
  0x43   : > { %s9219_s5 = scalar_select %p7445_p13, 1, 0 }
  0x44   : > { %p6913_p1 = pnand %p7445_p13, %p6911_p8  ;;  %p6917_p5 = scmp.lt.u32.totalorder %s6915_s25, %s6910_s18 }
  0x45   : > { %p6919_p9 = scmp.lt.u32.totalorder %s6910_s18, %s7429_s16 }
  0x46   : > { %p6914_p2 = pneg %p6913_p1  ;;  %p6918_p7 = por %p6917_p5, %p6916_p4 }
  0x48   : > { %p6920_p10 = por %p6919_p9, %p6918_p7 }
  0x4a   : > { %p6921_p3 = pnand %p6920_p10, %p6914_p2 }
  0x4c   : > { %6924 = shalt.err (!%p6921_p3)
}
  0x4d   : > { %s6925_s0 = scalar_lea.vmem %s7436_s13, 6144  ;;  %s7241_s11 = smov [#allocation8]  }
  0x4e   : > { %p6926_p6 = scmp.ne.s32.totalorder %s7436_s13, %s6925_s0  ;;  %s6930_s28 = sshll.u32 %s7241_s11, 4  ;;  %s6931_s28 = int_to_ptr.vmem [resolvable:$false] %s6930_s28 }
  0x4f   : > { %s6932_s19 = scalar_lea.vmem %s6931_s28, 12288  ;;  %p6933_p0 = scmp.lt.s32.totalorder %s7436_s13, %s6931_s28 }
  0x50   : > { %p6928_p8 = pnand %p6926_p6, %p7445_p13  ;;  %p6934_p11 = scmp.lt.s32.totalorder %s6932_s19, %s6925_s0 }
  0x52   : > { %p6929_p1 = pneg %p6928_p8  ;;  %p6935_p4 = por %p6934_p11, %p6933_p0 }
  0x54   : > { %p6936_p5 = pnand %p6935_p4, %p6929_p1 }
  0x56   : > { %6939 = shalt.err (!%p6936_p5)
}
  0x57   : > { %s7242_s18 = smov 384   ;;  %s7243_s25 = smov 24  }
  0x58   : > { %6504 = dma.hbm_to_vmem [thread:$0]  (!%p9218_p12), %s7429_s16, 6144, %s7436_s13, %s7439_s2, %s7242_s18, %s7242_s18, %s7243_s25  }
  0x59   : > { %s9163_s23 = sshll.u32 %s7232_s29, 11  ;;  %s9220_s6 = sld [smem:[#allocation51_spill]] }
  0x5a   : > { %s475_s19 = scalar_lea.vmem [#allocation9], %s9162_s1  ;;  %s7482_s22 = sshll.u32 %s7418_s24, 8 }
  0x5b   : > { %s482_s4 = sshll.u32 %s475_s19, 4  ;;  %s7479_s4 = int_to_ptr.vmem [resolvable:$true] %s482_s4 }
  0x5f   : > { %s7475_s28 = scalar_lea.hbm %s9220_s6, %s9163_s23  ;;  %s6945_s18 = scalar_lea.hbm %s9220_s6, 6144 }
  0x60   : > { %s6940_s15 = scalar_lea.hbm %s7475_s28, 2048  ;;  %p6946_p7 = scmp.lt.u32.totalorder %s7475_s28, %s9220_s6 }
  0x61   : > { %p6941_p11 = scmp.ne.s32.totalorder %s7475_s28, %s6940_s15  ;;  %p6947_p9 = scmp.lt.u32.totalorder %s6945_s18, %s6940_s15 }
  0x62   : > { %p6949_p3 = scmp.lt.u32.totalorder %s6940_s15, %s7475_s28 }
  0x63   : > { %p6943_p0 = pnand %p6941_p11, %p7445_p13  ;;  %p6948_p10 = por %p6947_p9, %p6946_p7 }
  0x65   : > { %p6944_p2 = pneg %p6943_p0  ;;  %p6950_p6 = por %p6949_p3, %p6948_p10 }
  0x67   : > { %p6951_p8 = pnand %p6950_p6, %p6944_p2 }
  0x69   : > { %6954 = shalt.err (!%p6951_p8)
}
  0x6a   : > { %s6955_s0 = scalar_lea.vmem %s7479_s4, 2048  ;;  %s7244_s19 = smov [#allocation9]  }
  0x6b   : > { %p6956_p1 = scmp.ne.s32.totalorder %s7479_s4, %s6955_s0  ;;  %s6960_s16 = sshll.u32 %s7244_s19, 4  ;;  %s6961_s16 = int_to_ptr.vmem [resolvable:$false] %s6960_s16 }
  0x6c   : > { %s6962_s13 = scalar_lea.vmem %s6961_s16, 4096  ;;  %p6963_p11 = scmp.lt.s32.totalorder %s7479_s4, %s6961_s16 }
  0x6d   : > { %p6958_p4 = pnand %p6956_p1, %p7445_p13  ;;  %p6964_p0 = scmp.lt.s32.totalorder %s6962_s13, %s6955_s0 }
  0x6f   : > { %p6959_p5 = pneg %p6958_p4  ;;  %p6965_p7 = por %p6964_p0, %p6963_p11 }
  0x71   : > { %p6966_p9 = pnand %p6965_p7, %p6959_p5 }
  0x73   : > { %6969 = shalt.err (!%p6966_p9)
}
  0x74   : > { %s9221_s15 = smov 8   ;;  %s9222_s18 = smov 128  }
  0x75   : > { %6507 = dma.hbm_to_vmem [thread:$0]  (!%p9218_p12), %s7475_s28, 2048, %s7479_s4, %s7439_s2, %s9222_s18, %s9222_s18, %s9221_s15  }
  0x76   : > { %s7510_s25 = sshll.u32 %s7232_s29, 12  ;;  %s9223_s7 = sld [smem:[#allocation52_spill]] }
  0x77   : > { %s496_s16 = scalar_lea.vmem [#allocation10], %s7482_s22 }
  0x78   : > { %s503_s13 = sshll.u32 %s496_s16, 4  ;;  %s7519_s13 = int_to_ptr.vmem [resolvable:$true] %s503_s13 }
  0x7c   : > { %s7516_s19 = scalar_lea.hbm %s9223_s7, %s7510_s25  ;;  %s6975_s23 = scalar_lea.hbm %s9223_s7, 12288 }
  0x7d   : > { %s6970_s1 = scalar_lea.hbm %s7516_s19, 4096  ;;  %p6976_p6 = scmp.lt.u32.totalorder %s7516_s19, %s9223_s7 }
  0x7e   : > { %p6971_p2 = scmp.ne.s32.totalorder %s7516_s19, %s6970_s1  ;;  %p6977_p8 = scmp.lt.u32.totalorder %s6975_s23, %s6970_s1 }
  0x7f   : > { %p6979_p4 = scmp.lt.u32.totalorder %s6970_s1, %s7516_s19 }
  0x80   : > { %p6973_p10 = pnand %p6971_p2, %p7445_p13  ;;  %p6978_p1 = por %p6977_p8, %p6976_p6 }
  0x82   : > { %p6974_p3 = pneg %p6973_p10  ;;  %p6980_p5 = por %p6979_p4, %p6978_p1 }
  0x84   : > { %p6981_p11 = pnand %p6980_p5, %p6974_p3 }
  0x86   : > { %6984 = shalt.err (!%p6981_p11)
}
  0x87   : > { %s6985_s16 = scalar_lea.vmem %s7519_s13, 4096  ;;  %s7245_s4 = smov [#allocation10]  }
  0x88   : > { %p6986_p0 = scmp.ne.s32.totalorder %s7519_s13, %s6985_s16  ;;  %s6990_s28 = sshll.u32 %s7245_s4, 4  ;;  %s6991_s28 = int_to_ptr.vmem [resolvable:$false] %s6990_s28 }
  0x89   : > { %s6992_s11 = scalar_lea.vmem %s6991_s28, 8192  ;;  %p6993_p2 = scmp.lt.s32.totalorder %s7519_s13, %s6991_s28 }
  0x8a   : > { %p6988_p7 = pnand %p6986_p0, %p7445_p13  ;;  %p6994_p10 = scmp.lt.s32.totalorder %s6992_s11, %s6985_s16 }
  0x8c   : > { %p6989_p9 = pneg %p6988_p7  ;;  %p6995_p6 = por %p6994_p10, %p6993_p2 }
  0x8e   : > { %p6996_p8 = pnand %p6995_p6, %p6989_p9 }
  0x90   : > { %6999 = shalt.err (!%p6996_p8)
}
  0x91   : > { %s7246_s1 = smov 256   ;;  %s7247_s23 = smov 16  }
  0x92   : > { %6510 = dma.hbm_to_vmem [thread:$0]  (!%p9218_p12), %s7516_s19, 4096, %s7519_s13, %s7439_s2, %s7246_s1, %s7246_s1, %s7247_s23  }
  0x93   : > { %s9224_s0 = sshll.u32 %s7232_s29, 11  ;;  %s9225_s11 = sshll.u32 %s7418_s24, 7 }
  0x94   : > { %s7551_s28 = scalar_lea.hbm %s9138_s8, %s9224_s0  ;;  %s517_s6 = scalar_lea.vmem [#allocation11], %s9225_s11 }
  0x95   : > { %s524_s7 = sshll.u32 %s517_s6, 4  ;;  %s7000_s27 = scalar_lea.hbm %s7551_s28, 2048  ;;  %s7555_s7 = int_to_ptr.vmem [resolvable:$true] %s524_s7 }
  0x96   : > { %p7001_p3 = scmp.ne.s32.totalorder %s7551_s28, %s7000_s27  ;;  %s7005_s4 = scalar_lea.hbm %s9138_s8, 6144 }
  0x97   : > { %p7006_p5 = scmp.lt.u32.totalorder %s7551_s28, %s9138_s8  ;;  %p7007_p11 = scmp.lt.u32.totalorder %s7005_s4, %s7000_s27 }
  0x98   : > { %p7003_p1 = pnand %p7001_p3, %p7445_p13  ;;  %p7009_p7 = scmp.lt.u32.totalorder %s7000_s27, %s7551_s28 }
  0x99   : > { %p7008_p0 = por %p7007_p11, %p7006_p5 }
  0x9a   : > { %p7004_p4 = pneg %p7003_p1 }
  0x9b   : > { %p7010_p9 = por %p7009_p7, %p7008_p0 }
  0x9d   : > { %p7011_p2 = pnand %p7010_p9, %p7004_p4 }
  0x9f   : > { %7014 = shalt.err (!%p7011_p2)
}
  0xa0   : > { %s7015_s6 = scalar_lea.vmem %s7555_s7, 2048  ;;  %s7248_s11 = smov [#allocation11]  }
  0xa1   : > { %p7016_p10 = scmp.ne.s32.totalorder %s7555_s7, %s7015_s6  ;;  %s7020_s19 = sshll.u32 %s7248_s11, 4  ;;  %s7021_s19 = int_to_ptr.vmem [resolvable:$false] %s7020_s19 }
  0xa2   : > { %s7022_s13 = scalar_lea.vmem %s7021_s19, 4096  ;;  %p7023_p3 = scmp.lt.s32.totalorder %s7555_s7, %s7021_s19 }
  0xa3   : > { %p7018_p6 = pnand %p7016_p10, %p7445_p13  ;;  %p7024_p1 = scmp.lt.s32.totalorder %s7022_s13, %s7015_s6 }
  0xa5   : > { %p7019_p8 = pneg %p7018_p6  ;;  %p7025_p5 = por %p7024_p1, %p7023_p3 }
  0xa7   : > { %p7026_p11 = pnand %p7025_p5, %p7019_p8 }
  0xa9   : > { %7029 = shalt.err (!%p7026_p11)
}
  0xaa   : > { %6513 = dma.hbm_to_vmem [thread:$0]  (!%p9218_p12), %s7551_s28, 2048, %s7555_s7, %s7439_s2, %s9222_s18, %s9222_s18, %s9221_s15  }
  0xab   : > { %s7586_s0 = scalar_lea.hbm %s9139_s9, %s7510_s25  ;;  %s538_s16 = scalar_lea.vmem [#allocation12], %s7482_s22 }
  0xac   : > { %s545_s6 = sshll.u32 %s538_s16, 4  ;;  %s7030_s11 = scalar_lea.hbm %s7586_s0, 4096  ;;  %s7589_s6 = int_to_ptr.vmem [resolvable:$true] %s545_s6 }
  0xad   : > { %p7031_p4 = scmp.ne.s32.totalorder %s7586_s0, %s7030_s11  ;;  %s7035_s28 = scalar_lea.hbm %s9139_s9, 12288 }
  0xae   : > { %p7036_p9 = scmp.lt.u32.totalorder %s7586_s0, %s9139_s9  ;;  %p7037_p2 = scmp.lt.u32.totalorder %s7035_s28, %s7030_s11 }
  0xaf   : > { %p7033_p0 = pnand %p7031_p4, %p7445_p13  ;;  %p7039_p6 = scmp.lt.u32.totalorder %s7030_s11, %s7586_s0 }
  0xb0   : > { %p7038_p10 = por %p7037_p2, %p7036_p9 }
  0xb1   : > { %p7034_p7 = pneg %p7033_p0 }
  0xb2   : > { %p7040_p8 = por %p7039_p6, %p7038_p10 }
  0xb4   : > { %p7041_p3 = pnand %p7040_p8, %p7034_p7 }
  0xb6   : > { %7044 = shalt.err (!%p7041_p3)
}
  0xb7   : > { %s7045_s4 = scalar_lea.vmem %s7589_s6, 4096  ;;  %s7249_s16 = smov [#allocation12]  }
  0xb8   : > { %p7046_p1 = scmp.ne.s32.totalorder %s7589_s6, %s7045_s4  ;;  %s7050_s19 = sshll.u32 %s7249_s16, 4  ;;  %s7051_s19 = int_to_ptr.vmem [resolvable:$false] %s7050_s19 }
  0xb9   : > { %s7052_s7 = scalar_lea.vmem %s7051_s19, 8192  ;;  %p7053_p4 = scmp.lt.s32.totalorder %s7589_s6, %s7051_s19 }
  0xba   : > { %p7048_p5 = pnand %p7046_p1, %p7445_p13  ;;  %p7054_p0 = scmp.lt.s32.totalorder %s7052_s7, %s7045_s4 }
  0xbc   : > { %p7049_p11 = pneg %p7048_p5  ;;  %p7055_p9 = por %p7054_p0, %p7053_p4 }
  0xbe   : > { %p7056_p2 = pnand %p7055_p9, %p7049_p11 }
  0xc0   : > { %7059 = shalt.err (!%p7056_p2)
}
  0xc1   : > { %6516 = dma.hbm_to_vmem [thread:$0]  (!%p9218_p12), %s7586_s0, 4096, %s7589_s6, %s7439_s2, %s7246_s1, %s7246_s1, %s7247_s23  }
  0xc2   : > { %s7620_s13 = scalar_lea.hbm %s9140_s10, %s7510_s25  ;;  %s559_s27 = scalar_lea.vmem [#allocation13], %s7482_s22 }
  0xc3   : > { %s566_s4 = sshll.u32 %s559_s27, 4  ;;  %s7060_s16 = scalar_lea.hbm %s7620_s13, 4096  ;;  %s7623_s4 = int_to_ptr.vmem [resolvable:$true] %s566_s4 }
  0xc4   : > { %p7061_p7 = scmp.ne.s32.totalorder %s7620_s13, %s7060_s16  ;;  %s7065_s23 = scalar_lea.hbm %s9140_s10, 12288 }
  0xc5   : > { %p7066_p8 = scmp.lt.u32.totalorder %s7620_s13, %s9140_s10  ;;  %p7067_p3 = scmp.lt.u32.totalorder %s7065_s23, %s7060_s16 }
  0xc6   : > { %p7063_p10 = pnand %p7061_p7, %p7445_p13  ;;  %p7069_p5 = scmp.lt.u32.totalorder %s7060_s16, %s7620_s13 }
  0xc7   : > { %p7068_p1 = por %p7067_p3, %p7066_p8 }
  0xc8   : > { %p7064_p6 = pneg %p7063_p10 }
  0xc9   : > { %p7070_p11 = por %p7069_p5, %p7068_p1 }
  0xcb   : > { %p7071_p4 = pnand %p7070_p11, %p7064_p6 }
  0xcd   : > { %7074 = shalt.err (!%p7071_p4)
}
  0xce   : > { %s7075_s22 = scalar_lea.vmem %s7623_s4, 4096  ;;  %s7250_s6 = smov [#allocation13]  }
  0xcf   : > { %p7076_p0 = scmp.ne.s32.totalorder %s7623_s4, %s7075_s22  ;;  %s7080_s7 = sshll.u32 %s7250_s6, 4  ;;  %s7081_s7 = int_to_ptr.vmem [resolvable:$false] %s7080_s7 }
  0xd0   : > { %s7082_s11 = scalar_lea.vmem %s7081_s7, 8192  ;;  %p7083_p7 = scmp.lt.s32.totalorder %s7623_s4, %s7081_s7 }
  0xd1   : > { %p7078_p9 = pnand %p7076_p0, %p7445_p13  ;;  %p7084_p10 = scmp.lt.s32.totalorder %s7082_s11, %s7075_s22 }
  0xd3   : > { %p7079_p2 = pneg %p7078_p9  ;;  %p7085_p8 = por %p7084_p10, %p7083_p7 }
  0xd5   : > { %p7086_p3 = pnand %p7085_p8, %p7079_p2 }
  0xd7   : > { %7089 = shalt.err (!%p7086_p3)
}
  0xd8   : > { %6519 = dma.hbm_to_vmem [thread:$0]  (!%p9218_p12), %s7620_s13, 4096, %s7623_s4, %s7439_s2, %s9222_s18, %s9222_s18, %s9221_s15  }
  0xd9   : > { %s7251_s28 = smov [#allocation6]   ;;  %s4777_s16 = sshll.u32 %s7418_s24, 4 }
  0xda   : > { %s431_s27 = sshll.u32 %s7251_s28, 4  ;;  %s7090_s23 = scalar_lea.hbm %s9133_s3, 16  ;;  %s432_s27 = int_to_ptr.vmem [resolvable:$true] %s431_s27 }
  0xdb   : > { %p7091_p6 = scmp.ne.s32.totalorder %s9133_s3, %s7090_s23  ;;  %p9226_p1 = scmp.ne.s32.totalorder %s9211_s20, 0 }
  0xdc   : > { %p7097_p0 = scmp.lt.u32.totalorder %s7090_s23, %s9133_s3 }
  0xdd   : > { %p9227_p5 = pneg %p9226_p1 }
  0xdf   : > { %p7093_p11 = pnand %p7091_p6, %p9227_p5 }
  0xe1   : > { %p7094_p4 = pneg %p7093_p11 }
  0xe3   : > { %p7099_p9 = pnand %p7097_p0, %p7094_p4 }
  0xe5   : > { %7102 = shalt.err (!%p7099_p9)
}
  0xe6   : > { %s7103_s24 = scalar_lea.vmem %s432_s27, 16  ;;  %p9228_p7 = pmov %p9227_p5 }
  0xe7   : > { %p7104_p2 = scmp.ne.s32.totalorder %s432_s27, %s7103_s24  ;;  %s7110_s13 = scalar_lea.vmem %s432_s27, 32 }
  0xe8   : > { %p7111_p3 = scmp.lt.s32.totalorder %s432_s27, %s432_s27  ;;  %p7112_p12 = scmp.lt.s32.totalorder %s7110_s13, %s7103_s24 }
  0xe9   : > { %p7106_p10 = pnand %p7104_p2, %p9228_p7 }
  0xea   : > { %p7113_p13 = por %p7112_p12, %p7111_p3 }
  0xeb   : > { %p7107_p8 = pneg %p7106_p10 }
  0xed   : > { %p7114_p5 = pnand %p7113_p13, %p7107_p8 }
  0xef   : > { %7117 = shalt.err (!%p7114_p5)
}
  0xf0   : > { %6500 = dma.hbm_to_vmem [thread:$0]  (!%p9226_p1), %s9133_s3, 16, %s432_s27, [#allocation7]  }
  0xf1   : > { %s4931_s11 = sshll.u32 %s7232_s29, 8  ;;  %s587_s28 = scalar_lea.vmem [#allocation14], %s4777_s16 }
  0xf2   : > { %s594_s19 = sshll.u32 %s587_s28, 4  ;;  %s7675_s0 = scalar_lea.hbm %s9142_s12, %s4931_s11  ;;  %s7677_s19 = int_to_ptr.vmem [resolvable:$true] %s594_s19 }
  0xf3   : > { %s7118_s20 = scalar_lea.hbm %s7675_s0, 256  ;;  %p9229_p13 = scmp.ne.s32.totalorder %s9219_s5, 0 }
  0xf4   : > { %p7119_p12 = scmp.ne.s32.totalorder %s7675_s0, %s7118_s20  ;;  %s7123_s16 = scalar_lea.hbm %s9142_s12, 768 }
  0xf5   : > { %p7124_p1 = scmp.lt.u32.totalorder %s7675_s0, %s9142_s12  ;;  %p7125_p4 = scmp.lt.u32.totalorder %s7123_s16, %s7118_s20 }
  0xf6   : > { %p7121_p6 = pnand %p7119_p12, %p9229_p13  ;;  %p7127_p9 = scmp.lt.u32.totalorder %s7118_s20, %s7675_s0 }
  0xf7   : > { %p7126_p0 = por %p7125_p4, %p7124_p1 }
  0xf8   : > { %p7122_p11 = pneg %p7121_p6 }
  0xf9   : > { %p7128_p2 = por %p7127_p9, %p7126_p0 }
  0xfb   : > { %p7129_p7 = pnand %p7128_p2, %p7122_p11 }
  0xfd   : > { %7132 = shalt.err (!%p7129_p7)
}
  0xfe   : > { %s7133_s24 = scalar_lea.vmem %s7677_s19, 256  ;;  %s7252_s13 = smov [#allocation14]  }
  0xff   : > { %p7134_p10 = scmp.ne.s32.totalorder %s7677_s19, %s7133_s24  ;;  %s7138_s4 = sshll.u32 %s7252_s13, 4  ;;  %s7139_s4 = int_to_ptr.vmem [resolvable:$false] %s7138_s4 }
 0x100   : > { %s7140_s7 = scalar_lea.vmem %s7139_s4, 512  ;;  %p7141_p5 = scmp.lt.s32.totalorder %s7677_s19, %s7139_s4 }
 0x101   : > { %p7136_p8 = pnand %p7134_p10, %p9229_p13  ;;  %p7142_p12 = scmp.lt.s32.totalorder %s7140_s7, %s7133_s24 }
 0x103   : > { %p7137_p3 = pneg %p7136_p8  ;;  %p7143_p6 = por %p7142_p12, %p7141_p5 }
 0x105   : > { %p7144_p1 = pnand %p7143_p6, %p7137_p3 }
 0x107   : > { %7147 = shalt.err (!%p7144_p1)
}
 0x108   : > { %p9230_p11 = scmp.ne.s32.totalorder %s9212_s21, 0  ;;  %p9231_p13 = scmp.ne.s32.totalorder %s9210_s17, 0 }
 0x10a   : > { %6522 = dma.hbm_to_vmem [thread:$0]  (!%p9230_p11), %s7675_s0, 256, %s7677_s19, %s7439_s2, %s9222_s18, %s9222_s18, %s9221_s15  }
 0x10b   : > { %606 = sbr.rel (%p9231_p13) target bundleno = 4592 (0x11f0), region = 72 }
 0x112   : > { %p9232_p4 = scmp.eq.s32.totalorder %s7357_s14, 0 }
 0x114   : > { %7199 = dma.done.wait (%p9232_p4), [#allocation4], 1024   ;;  %p9233_p0 = pmov %p9232_p4 }
 0x116   : > { %7201 = vsyncadd (%p9233_p0), [#allocation4], 4294966272  ;;  %p9234_p9 = pmov %p9233_p0 }
 0x117   : > { %p9235_p2 = pmov %p9233_p0 }
 0x118   : > { %7203 = dma.done.wait (%p9234_p9), [#allocation7], 16  }
 0x119   : > { %7205 = vsyncadd (%p9235_p2), [#allocation7], 4294967280  ;;  %s9236_s21 = sld [smem:[#allocation22_spill]]  ;;  %s616_s5 = sand.u32 1, %s7357_s14  }
 0x11a   : > { %s618_s2 = sand.u32 1, %s7220_s26   ;;  %s617_s17 = scalar_lea.sflag [#allocation4], %s616_s5 }
 0x11b   : > { %s6467_s15 = smul.u32 384, %s618_s2 }
 0x11d   : > { %s7716_s18 = scalar_lea.vmem [#allocation8], %s6467_s15 }
 0x11f   : > { %p9237_p7 = scmp.ne.s32.totalorder %s9236_s21, 0 }
 0x121   : > { %7207 = dma.done.wait (%p9237_p7), %s617_s17, 22784  }
 0x122   : > { %7209 = vsyncadd (%p9237_p7), %s617_s17, 4294944512  ;;  %s9238_s11 = sld [smem:[#allocation21_spill]]  ;;  %s4783_s28 = sshll.u32 %s618_s2, 7 }
 0x123   : > { %s4784_s19 = sshll.u32 %s618_s2, 8  ;;  %s4788_s1 = sshll.u32 %s618_s2, 4 }
 0x124   : > { %s9239_s16 = sld [smem:[#allocation50_spill]]  ;;  %s9240_s13 = sld [smem:[#allocation53_spill]] }
 0x125   : > { %s7734_s7 = scalar_lea.vmem [#allocation9], %s4783_s28  ;;  %s7736_s21 = scalar_lea.vmem [#allocation10], %s4784_s19 }
 0x126   : > { %s7738_s5 = scalar_lea.vmem [#allocation11], %s4783_s28  ;;  %s7740_s2 = scalar_lea.vmem [#allocation12], %s4784_s19 }
 0x127   : > { %s7742_s15 = scalar_lea.vmem [#allocation13], %s4784_s19  ;;  %s7744_s17 = scalar_lea.vmem [#allocation14], %s4788_s1 }
 0x128   : > { %p764_p10 = scmp.lt.s32.totalorder %s9238_s11, 2  ;;  %p4792_p8 = scmp.ne.s32.totalorder %s9238_s11, 0 }
 0x129   : > { %v810_v0 = vld [vmem:[#allocation3] sm:$0xff] (!%p4792_p8)  ;;  %v811_v1 = vld [vmem:[#allocation3 + $0x8] sm:$0xff] (!%p4792_p8)  ;;  %v812_v2 = vld [vmem:[#allocation3 + $0x10] sm:$0xff] (!%p4792_p8)  ;;  %vm825_vm0 = vcmask (!%p4792_p8), 523264   ;;  %s9242_s27 = sld [smem:[#allocation47_spill]] (!%p4792_p8) }
 0x12a   : > { %s765_s23 = scalar_select %p764_p10, %s9238_s11, 2 }
 0x12b   : > { %777 = sbr.rel (%p4792_p8) target bundleno = 562 (0x232), region = 112  ;;  %v5825_v3 = vpack.c.bf16 (!%p4792_p8), %v811_v1, %v810_v0  ;;  %v813_v4 = vld [vmem:[#allocation3 + $0x18] sm:$0xff] (!%p4792_p8)  ;;  %v814_v6 = vld [vmem:[#allocation3 + $0x20] sm:$0xff] (!%p4792_p8)  ;;  %v815_v7 = vld [vmem:[#allocation3 + $0x28] sm:$0xff] (!%p4792_p8) }
 0x12c   : > { %s4932_s0 = sshll.u32 %s765_s23, 7  ;;  %s4791_s20 = sshll.u32 %s765_s23, 1  ;;  %v5829_v5 = vpack.c.bf16 (!%p4792_p8), %v813_v4, %v812_v2  ;;  %v5833_v10 = vpack.c.bf16 (!%p4792_p8), %v815_v7, %v814_v6  ;;  %v816_v11 = vld [vmem:[#allocation3 + $0x30] sm:$0xff] (!%p4792_p8)  ;;  %v817_v12 = vld [vmem:[#allocation3 + $0x38] sm:$0xff] (!%p4792_p8)  ;;  %v7881_v46 = vld [vmem:[#allocation6] ss:$0 sm:$0xff] (!%p4792_p8) }
 0x12d   : > { %s7727_s22 = scalar_lea.vmem %s9239_s16, %s4932_s0  ;;  %s7732_s4 = scalar_lea.vmem %s9240_s13, %s4791_s20  ;;  %5826 = vmatprep.subr.bf16.mxu0 (!%p4792_p8), %v5825_v3  ;;  %6457 = vmatprep.subr.bf16.mxu1 (!%p4792_p8), %v5825_v3  ;;  %v5837_v13 = vpack.c.bf16 (!%p4792_p8), %v817_v12, %v816_v11 }
 0x12e   : > { %s9241_s0 = sld [smem:[#allocation46_spill]] (!%p4792_p8)  ;;  %5828 = vmatpush3.bf16.msra.mxu0 (!%p4792_p8), %v5825_v3  ;;  %6461 = vmatpush3.bf16.msra.mxu1 (!%p4792_p8), %v5825_v3 }
 0x12f   : > { %5830 = vmatprep.subr.bf16.mxu0 (!%p4792_p8), %v5829_v5  ;;  %6458 = vmatprep.subr.bf16.mxu1 (!%p4792_p8), %v5829_v5  ;;  %s9243_s16 = smov (!%p4792_p8), %s9242_s27  ;;  %v1179_v44 = vld [vmem:[%s9242_s27] sm:$0xff] (!%p4792_p8) }
 0x130   : > { %v1180_v45 = vld [vmem:[%s9243_s16 + $0x8] sm:$0xff] (!%p4792_p8)  ;;  %1181 = vst [vmem:[#allocation15] sm:$0xff] (!%p4792_p8), %v1179_v44  ;;  %1183 = vst [vmem:[#allocation15 + $0x10] sm:$0xff] (!%p4792_p8), %v1179_v44 }
 0x131   : > { %1182 = vst [vmem:[#allocation15 + $0x8] sm:$0xff] (!%p4792_p8), %v1180_v45  ;;  %1184 = vst [vmem:[#allocation15 + $0x18] sm:$0xff] (!%p4792_p8), %v1180_v45 }
 0x132   : > { %5832 = vmatpush3.bf16.msra.mxu0 %v5829_v5  ;;  %6462 = vmatpush3.bf16.msra.mxu1 %v5829_v5 }
 0x133   : > { %5834 = vmatprep.subr.bf16.mxu0 %v5833_v10  ;;  %6459 = vmatprep.subr.bf16.mxu1 %v5833_v10 }
 0x134   : > { %v778_v8 = vld [vmem:[%s9241_s0] sm:$0xff]  ;;  %v779_v14 = vld [vmem:[%s9241_s0 + $0x8] sm:$0xff]  ;;  %v780_v16 = vld [vmem:[%s9241_s0 + $0x10] sm:$0xff] }
 0x135   : > { %v794_v9 = vld [vmem:[%s9241_s0 + $0x80] sm:$0xff]  ;;  %5289 = vmatprep.mubr.msk.f32.mxu0 %vm825_vm0, %v778_v8  ;;  %v795_v15 = vld [vmem:[%s9241_s0 + $0x88] sm:$0xff]  ;;  %v796_v17 = vld [vmem:[%s9241_s0 + $0x90] sm:$0xff] }
 0x136   : > { %5313 = vmatprep.mubr.msk.f32.mxu1 %vm825_vm0, %v794_v9  ;;  %5836 = vmatpush3.bf16.msra.mxu0 %v5833_v10  ;;  %v781_v18 = vld [vmem:[%s9241_s0 + $0x18] sm:$0xff]  ;;  %v782_v20 = vld [vmem:[%s9241_s0 + $0x20] sm:$0xff]  ;;  %v783_v22 = vld [vmem:[%s9241_s0 + $0x28] sm:$0xff] }
 0x137   : > { %6463 = vmatpush3.bf16.msra.mxu1 %v5833_v10  ;;  %5838 = vmatprep.subr.bf16.mxu0 %v5837_v13  ;;  %v797_v19 = vld [vmem:[%s9241_s0 + $0x98] sm:$0xff]  ;;  %v798_v21 = vld [vmem:[%s9241_s0 + $0xa0] sm:$0xff]  ;;  %v799_v23 = vld [vmem:[%s9241_s0 + $0xa8] sm:$0xff] }
 0x138   : > { %6460 = vmatprep.subr.bf16.mxu1 %v5837_v13  ;;  %v784_v24 = vld [vmem:[%s9241_s0 + $0x30] sm:$0xff]  ;;  %v785_v26 = vld [vmem:[%s9241_s0 + $0x38] sm:$0xff]  ;;  %v786_v28 = vld [vmem:[%s9241_s0 + $0x40] sm:$0xff] }
 0x139   : > { %v800_v25 = vld [vmem:[%s9241_s0 + $0xb0] sm:$0xff]  ;;  %v801_v27 = vld [vmem:[%s9241_s0 + $0xb8] sm:$0xff]  ;;  %v802_v29 = vld [vmem:[%s9241_s0 + $0xc0] sm:$0xff] }
 0x13a   : > { %5840 = vmatpush3.bf16.msra.mxu0 %v5837_v13  ;;  %v787_v30 = vld [vmem:[%s9241_s0 + $0x48] sm:$0xff]  ;;  %v788_v32 = vld [vmem:[%s9241_s0 + $0x50] sm:$0xff]  ;;  %v789_v34 = vld [vmem:[%s9241_s0 + $0x58] sm:$0xff] }
 0x13b   : > { %6464 = vmatpush3.bf16.msra.mxu1 %v5837_v13  ;;  %v803_v31 = vld [vmem:[%s9241_s0 + $0xc8] sm:$0xff]  ;;  %v804_v33 = vld [vmem:[%s9241_s0 + $0xd0] sm:$0xff]  ;;  %v805_v35 = vld [vmem:[%s9241_s0 + $0xd8] sm:$0xff] }
 0x13c   : > { %v790_v36 = vld [vmem:[%s9241_s0 + $0x60] sm:$0xff]  ;;  %v791_v38 = vld [vmem:[%s9241_s0 + $0x68] sm:$0xff]  ;;  %v792_v40 = vld [vmem:[%s9241_s0 + $0x70] sm:$0xff] }
 0x13d   : > { %5290 = vmatmul.mubr.msk.f32.vlgmr.msra.gmra.mrb[0].mxu0 %vm825_vm0, %v779_v14  ;;  %v806_v37 = vld [vmem:[%s9241_s0 + $0xe0] sm:$0xff]  ;;  %v807_v39 = vld [vmem:[%s9241_s0 + $0xe8] sm:$0xff]  ;;  %v808_v41 = vld [vmem:[%s9241_s0 + $0xf0] sm:$0xff] }
 0x13e   : > { %5314 = vmatmul.mubr.msk.f32.vlgmr.msra.gmra.mrb[0].mxu1 %vm825_vm0, %v795_v15  ;;  %5292 = vmatprep.mubr.msk.f32.mxu0 %vm825_vm0, %v780_v16  ;;  %v793_v42 = vld [vmem:[%s9241_s0 + $0x78] sm:$0xff] }
 0x13f   : > { %5316 = vmatprep.mubr.msk.f32.mxu1 %vm825_vm0, %v796_v17  ;;  %v809_v43 = vld [vmem:[%s9241_s0 + $0xf8] sm:$0xff] }
 0x141   : > { %5293 = vmatmul.mubr.msk.f32.gmra.mrb[2].mxu0 %vm825_vm0, %v781_v18 }
 0x142   : > { %5317 = vmatmul.mubr.msk.f32.gmra.mrb[2].mxu1 %vm825_vm0, %v797_v19  ;;  %5295 = vmatprep.mubr.msk.f32.mxu0 %vm825_vm0, %v782_v20 }
 0x143   : > { %5319 = vmatprep.mubr.msk.f32.mxu1 %vm825_vm0, %v798_v21 }
 0x145   : > { %5296 = vmatmul.mubr.msk.f32.gmra.mrb[4].mxu0 %vm825_vm0, %v783_v22 }
 0x146   : > { %5320 = vmatmul.mubr.msk.f32.gmra.mrb[4].mxu1 %vm825_vm0, %v799_v23  ;;  %5298 = vmatprep.mubr.msk.f32.mxu0 %vm825_vm0, %v784_v24 }
 0x147   : > { %5322 = vmatprep.mubr.msk.f32.mxu1 %vm825_vm0, %v800_v25 }
 0x149   : > { %5299 = vmatmul.mubr.msk.f32.gmra.mrb[6].mxu0 %vm825_vm0, %v785_v26 }
 0x14a   : > { %5323 = vmatmul.mubr.msk.f32.gmra.mrb[6].mxu1 %vm825_vm0, %v801_v27  ;;  %5301 = vmatprep.mubr.msk.f32.mxu0 %vm825_vm0, %v786_v28 }
 0x14b   : > { %5325 = vmatprep.mubr.msk.f32.mxu1 %vm825_vm0, %v802_v29 }
 0x14d   : > { %5302 = vmatmul.mubr.msk.f32.gmra.mrb[8].mxu0 %vm825_vm0, %v787_v30 }
 0x14e   : > { %5326 = vmatmul.mubr.msk.f32.gmra.mrb[8].mxu1 %vm825_vm0, %v803_v31  ;;  %5304 = vmatprep.mubr.msk.f32.mxu0 %vm825_vm0, %v788_v32 }
 0x14f   : > { %5328 = vmatprep.mubr.msk.f32.mxu1 %vm825_vm0, %v804_v33 }
 0x151   : > { %5305 = vmatmul.mubr.msk.f32.gmra.mrb[10].mxu0 %vm825_vm0, %v789_v34 }
 0x152   : > { %5329 = vmatmul.mubr.msk.f32.gmra.mrb[10].mxu1 %vm825_vm0, %v805_v35  ;;  %5307 = vmatprep.mubr.msk.f32.mxu0 %vm825_vm0, %v790_v36 }
 0x153   : > { %5331 = vmatprep.mubr.msk.f32.mxu1 %vm825_vm0, %v806_v37 }
 0x155   : > { %5308 = vmatmul.mubr.msk.f32.gmra.mrb[12].mxu0 %vm825_vm0, %v791_v38 }
 0x156   : > { %5332 = vmatmul.mubr.msk.f32.gmra.mrb[12].mxu1 %vm825_vm0, %v807_v39  ;;  %5310 = vmatprep.mubr.msk.f32.mxu0 %vm825_vm0, %v792_v40 }
 0x157   : > { %5334 = vmatprep.mubr.msk.f32.mxu1 %vm825_vm0, %v808_v41 }
 0x159   : > { %5311 = vmatmul.mubr.msk.f32.gmra.mrb[14].mxu0 %vm825_vm0, %v793_v42 }
 0x15a   : > { %5335 = vmatmul.mubr.msk.f32.gmra.mrb[14].mxu1 %vm825_vm0, %v809_v43 }
 0x210   : > { %v5291_v47 = vpop.f32.mrb[0].mxu0 }
 0x211   : > { %v5315_v48 = vpop.f32.mrb[0].mxu1  ;;  %v994_v49 = vadd.f32 %v5291_v47, %v7881_v46  ;;  %v988_v51 = vpop.f32.mrb[1].mxu0 }
 0x212   : > { %v1074_v50 = vadd.f32 %v5315_v48, %v7881_v46  ;;  %v1068_v52 = vpop.f32.mrb[1].mxu1  ;;  %v989_v53 = vadd.f32 %v7881_v46, %v988_v51 }
 0x213   : > { %v1069_v54 = vadd.f32 %v7881_v46, %v1068_v52  ;;  %1148 = vst [vmem:[#allocation2 + $0x8] sm:$0xff] %v994_v49 }
 0x214   : > { %1164 = vst [vmem:[#allocation2 + $0x88] sm:$0xff] %v1074_v50  ;;  %1147 = vst [vmem:[#allocation2] sm:$0xff] %v989_v53  ;;  %v5294_v55 = vpop.f32.mrb[2].mxu0 }
 0x215   : > { %1163 = vst [vmem:[#allocation2 + $0x80] sm:$0xff] %v1069_v54  ;;  %v5318_v56 = vpop.f32.mrb[2].mxu1  ;;  %v1004_v57 = vadd.f32 %v5294_v55, %v7881_v46  ;;  %v998_v59 = vpop.f32.mrb[3].mxu0 }
 0x216   : > { %v1084_v58 = vadd.f32 %v5318_v56, %v7881_v46  ;;  %v1078_v60 = vpop.f32.mrb[3].mxu1  ;;  %v999_v61 = vadd.f32 %v7881_v46, %v998_v59 }
 0x217   : > { %v1079_v62 = vadd.f32 %v7881_v46, %v1078_v60  ;;  %1150 = vst [vmem:[#allocation2 + $0x18] sm:$0xff] %v1004_v57 }
 0x218   : > { %1166 = vst [vmem:[#allocation2 + $0x98] sm:$0xff] %v1084_v58  ;;  %1149 = vst [vmem:[#allocation2 + $0x10] sm:$0xff] %v999_v61  ;;  %v5297_v63 = vpop.f32.mrb[4].mxu0 }
 0x219   : > { %1165 = vst [vmem:[#allocation2 + $0x90] sm:$0xff] %v1079_v62  ;;  %v5321_v0 = vpop.f32.mrb[4].mxu1  ;;  %v1014_v1 = vadd.f32 %v5297_v63, %v7881_v46  ;;  %v1008_v3 = vpop.f32.mrb[5].mxu0 }
 0x21a   : > { %v1094_v2 = vadd.f32 %v5321_v0, %v7881_v46  ;;  %v1088_v4 = vpop.f32.mrb[5].mxu1  ;;  %v1009_v5 = vadd.f32 %v7881_v46, %v1008_v3 }
 0x21b   : > { %v1089_v6 = vadd.f32 %v7881_v46, %v1088_v4  ;;  %1152 = vst [vmem:[#allocation2 + $0x28] sm:$0xff] %v1014_v1 }
 0x21c   : > { %1168 = vst [vmem:[#allocation2 + $0xa8] sm:$0xff] %v1094_v2  ;;  %1151 = vst [vmem:[#allocation2 + $0x20] sm:$0xff] %v1009_v5  ;;  %v5300_v7 = vpop.f32.mrb[6].mxu0 }
 0x21d   : > { %1167 = vst [vmem:[#allocation2 + $0xa0] sm:$0xff] %v1089_v6  ;;  %v5324_v8 = vpop.f32.mrb[6].mxu1  ;;  %v1024_v9 = vadd.f32 %v5300_v7, %v7881_v46  ;;  %v1018_v11 = vpop.f32.mrb[7].mxu0 }
 0x21e   : > { %v1104_v10 = vadd.f32 %v5324_v8, %v7881_v46  ;;  %v1098_v12 = vpop.f32.mrb[7].mxu1  ;;  %v1019_v13 = vadd.f32 %v7881_v46, %v1018_v11 }
 0x21f   : > { %v1099_v14 = vadd.f32 %v7881_v46, %v1098_v12  ;;  %1154 = vst [vmem:[#allocation2 + $0x38] sm:$0xff] %v1024_v9 }
 0x220   : > { %1170 = vst [vmem:[#allocation2 + $0xb8] sm:$0xff] %v1104_v10  ;;  %1153 = vst [vmem:[#allocation2 + $0x30] sm:$0xff] %v1019_v13  ;;  %v5303_v15 = vpop.f32.mrb[8].mxu0 }
 0x221   : > { %1169 = vst [vmem:[#allocation2 + $0xb0] sm:$0xff] %v1099_v14  ;;  %v5327_v16 = vpop.f32.mrb[8].mxu1  ;;  %v1034_v17 = vadd.f32 %v5303_v15, %v7881_v46  ;;  %v1028_v19 = vpop.f32.mrb[9].mxu0 }
 0x222   : > { %v1114_v18 = vadd.f32 %v5327_v16, %v7881_v46  ;;  %v1108_v20 = vpop.f32.mrb[9].mxu1  ;;  %v1029_v21 = vadd.f32 %v7881_v46, %v1028_v19 }
 0x223   : > { %v1109_v22 = vadd.f32 %v7881_v46, %v1108_v20  ;;  %1156 = vst [vmem:[#allocation2 + $0x48] sm:$0xff] %v1034_v17 }
 0x224   : > { %1172 = vst [vmem:[#allocation2 + $0xc8] sm:$0xff] %v1114_v18  ;;  %1155 = vst [vmem:[#allocation2 + $0x40] sm:$0xff] %v1029_v21  ;;  %v5306_v23 = vpop.f32.mrb[10].mxu0 }
 0x225   : > { %1171 = vst [vmem:[#allocation2 + $0xc0] sm:$0xff] %v1109_v22  ;;  %v5330_v24 = vpop.f32.mrb[10].mxu1  ;;  %v1044_v25 = vadd.f32 %v5306_v23, %v7881_v46  ;;  %v1038_v27 = vpop.f32.mrb[11].mxu0 }
 0x226   : > { %v1124_v26 = vadd.f32 %v5330_v24, %v7881_v46  ;;  %v1118_v28 = vpop.f32.mrb[11].mxu1  ;;  %v1039_v29 = vadd.f32 %v7881_v46, %v1038_v27 }
 0x227   : > { %v1119_v30 = vadd.f32 %v7881_v46, %v1118_v28  ;;  %1158 = vst [vmem:[#allocation2 + $0x58] sm:$0xff] %v1044_v25 }
 0x228   : > { %1174 = vst [vmem:[#allocation2 + $0xd8] sm:$0xff] %v1124_v26  ;;  %1157 = vst [vmem:[#allocation2 + $0x50] sm:$0xff] %v1039_v29  ;;  %v5309_v31 = vpop.f32.mrb[12].mxu0 }
 0x229   : > { %1173 = vst [vmem:[#allocation2 + $0xd0] sm:$0xff] %v1119_v30  ;;  %v5333_v32 = vpop.f32.mrb[12].mxu1  ;;  %v1054_v33 = vadd.f32 %v5309_v31, %v7881_v46  ;;  %v1048_v35 = vpop.f32.mrb[13].mxu0 }
 0x22a   : > { %v1134_v34 = vadd.f32 %v5333_v32, %v7881_v46  ;;  %v1128_v36 = vpop.f32.mrb[13].mxu1  ;;  %v1049_v37 = vadd.f32 %v7881_v46, %v1048_v35 }
 0x22b   : > { %v1129_v38 = vadd.f32 %v7881_v46, %v1128_v36  ;;  %1160 = vst [vmem:[#allocation2 + $0x68] sm:$0xff] %v1054_v33 }
 0x22c   : > { %1176 = vst [vmem:[#allocation2 + $0xe8] sm:$0xff] %v1134_v34  ;;  %1159 = vst [vmem:[#allocation2 + $0x60] sm:$0xff] %v1049_v37  ;;  %v5312_v39 = vpop.f32.mrb[14].mxu0 }
 0x22d   : > { %1175 = vst [vmem:[#allocation2 + $0xe0] sm:$0xff] %v1129_v38  ;;  %v5336_v40 = vpop.f32.mrb[14].mxu1  ;;  %v1064_v41 = vadd.f32 %v5312_v39, %v7881_v46  ;;  %v1058_v43 = vpop.f32.mrb[15].mxu0 }
 0x22e   : > { %v1144_v42 = vadd.f32 %v5336_v40, %v7881_v46  ;;  %v1138_v44 = vpop.f32.mrb[15].mxu1  ;;  %v1059_v45 = vadd.f32 %v7881_v46, %v1058_v43 }
 0x22f   : > { %v1139_v47 = vadd.f32 %v7881_v46, %v1138_v44  ;;  %1162 = vst [vmem:[#allocation2 + $0x78] sm:$0xff] %v1064_v41 }
 0x230   : > { %1178 = vst [vmem:[#allocation2 + $0xf8] sm:$0xff] %v1144_v42  ;;  %1161 = vst [vmem:[#allocation2 + $0x70] sm:$0xff] %v1059_v45 }
 0x231   : > { %1177 = vst [vmem:[#allocation2 + $0xf0] sm:$0xff] %v1139_v47 }
 0x232 PF: > { %v1192_v48 = vld [vmem:[%s7716_s18 + $0x8] sm:$0xff]  ;;  %v1195_v49 = vld [vmem:[%s7716_s18 + $0x20] sm:$0xff]  ;;  %v1194_v46 = vld [vmem:[%s7716_s18 + $0x18] sm:$0xff]  ;;  %v9171_v54 = vmov 0.0   ;;  %vm1481_vm1 = vcmask 523264   ;;  %vm1814_vm3 = vcmask 130048  }
 0x233   : > { %v1191_v50 = vld [vmem:[%s7716_s18] sm:$0xff]  ;;  %v5841_v51 = vpack.c.bf16 %v1195_v49, %v1192_v48  ;;  %v1198_v52 = vld [vmem:[%s7716_s18 + $0x38] sm:$0xff]  ;;  %v1201_v53 = vld [vmem:[%s7716_s18 + $0x50] sm:$0xff]  ;;  %1303 = vmatprep.mubr.f32.mxu0 %v9171_v54  ;;  %p6528_p3 = scmp.eq.s32.totalorder %s7357_s14, 2 }
 0x234   : > { %v5843_v55 = vpack.c.bf16 %v1194_v46, %v1191_v50  ;;  %v5845_v56 = vpack.c.bf16 %v1201_v53, %v1198_v52  ;;  %v1197_v57 = vld [vmem:[%s7716_s18 + $0x30] sm:$0xff]  ;;  %v1200_v58 = vld [vmem:[%s7716_s18 + $0x48] sm:$0xff]  ;;  %v1207_v60 = vld [vmem:[%s7716_s18 + $0x80] sm:$0xff] }
 0x235   : > { %v1204_v59 = vld [vmem:[%s7716_s18 + $0x68] sm:$0xff]  ;;  %5842 = vmatprep.subr.bf16.mxu0 %v5841_v51  ;;  %v5847_v61 = vpack.c.bf16 %v1200_v58, %v1197_v57  ;;  %v1203_v63 = vld [vmem:[%s7716_s18 + $0x60] sm:$0xff]  ;;  %v1206_v0 = vld [vmem:[%s7716_s18 + $0x78] sm:$0xff] }
 0x236   : > { %5844 = vmatpush1.bf16.msra.mxu0 %v5843_v55  ;;  %v5849_v62 = vpack.c.bf16 %v1207_v60, %v1204_v59  ;;  %v1210_v1 = vld [vmem:[%s7716_s18 + $0x98] sm:$0xff]  ;;  %v1213_v2 = vld [vmem:[%s7716_s18 + $0xb0] sm:$0xff]  ;;  %v5851_v3 = vpack.c.bf16 %v1206_v0, %v1203_v63  ;;  %v1212_v6 = vld [vmem:[%s7716_s18 + $0xa8] sm:$0xff] }
 0x237   : > { %5846 = vmatprep.subr.bf16.mxu0 %v5845_v56  ;;  %v5853_v4 = vpack.c.bf16 %v1213_v2, %v1210_v1  ;;  %v1209_v5 = vld [vmem:[%s7716_s18 + $0x90] sm:$0xff]  ;;  %v1216_v7 = vld [vmem:[%s7716_s18 + $0xc8] sm:$0xff]  ;;  %v1219_v8 = vld [vmem:[%s7716_s18 + $0xe0] sm:$0xff] }
 0x238   : > { %v7934_v9 = vld [vmem:[#allocation15] sm:$0xff]  ;;  %v5855_v11 = vpack.c.bf16 %v1212_v6, %v1209_v5  ;;  %v1193_v12 = vld [vmem:[%s7716_s18 + $0x10] sm:$0xff]  ;;  %v1196_v13 = vld [vmem:[%s7716_s18 + $0x28] sm:$0xff]  ;;  %v5857_v15 = vpack.c.bf16 %v1219_v8, %v1216_v7 }
 0x239   : > { %v1215_v10 = vld [vmem:[%s7716_s18 + $0xc0] sm:$0xff]  ;;  %5369 = vmatprep.mubr.f32.mxu1 %v7934_v9  ;;  %v1218_v16 = vld [vmem:[%s7716_s18 + $0xd8] sm:$0xff]  ;;  %v5873_v18 = vpack.c.bf16 %v1196_v13, %v1193_v12  ;;  %v1225_v20 = vld [vmem:[%s7716_s18 + $0x110] sm:$0xff] }
 0x23a   : > { %5848 = vmatpush1.bf16.msra.mxu0 %v5847_v61  ;;  %v1199_v14 = vld [vmem:[%s7716_s18 + $0x40] sm:$0xff]  ;;  %v1222_v17 = vld [vmem:[%s7716_s18 + $0xf8] sm:$0xff]  ;;  %v1205_v22 = vld [vmem:[%s7716_s18 + $0x70] sm:$0xff]  ;;  %v5859_v24 = vpack.c.bf16 %v1218_v16, %v1215_v10  ;;  %v9173_v61 = vlaneseq }
 0x23b   : > { %5850 = vmatprep.subr.bf16.mxu0 %v5849_v62  ;;  %v1202_v19 = vld [vmem:[%s7716_s18 + $0x58] sm:$0xff]  ;;  %v1208_v23 = vld [vmem:[%s7716_s18 + $0x88] sm:$0xff]  ;;  %5874 = vmatprep.subr.bf16.mxu1 %v5873_v18  ;;  %v5861_v25 = vpack.c.bf16 %v1225_v20, %v1222_v17  ;;  %v1221_v26 = vld [vmem:[%s7716_s18 + $0xf0] sm:$0xff] }
 0x23c   : > { %v5877_v21 = vpack.c.bf16 %v1202_v19, %v1199_v14  ;;  %5876 = vmatpush3.bf16.msra.mxu1 %v5873_v18  ;;  %v1224_v27 = vld [vmem:[%s7716_s18 + $0x108] sm:$0xff]  ;;  %v5881_v29 = vpack.c.bf16 %v1208_v23, %v1205_v22  ;;  %v1231_v30 = vld [vmem:[%s7716_s18 + $0x140] sm:$0xff]  ;;  %v1214_v32 = vld [vmem:[%s7716_s18 + $0xb8] sm:$0xff]  ;;  %v7984_v62 = vshrl.u32 %v9173_v61, 7 }
 0x23d   : > { %v1228_v28 = vld [vmem:[%s7716_s18 + $0x128] sm:$0xff]  ;;  %v1211_v31 = vld [vmem:[%s7716_s18 + $0xa0] sm:$0xff]  ;;  %v5863_v33 = vpack.c.bf16 %v1224_v27, %v1221_v26  ;;  %v1230_v36 = vld [vmem:[%s7716_s18 + $0x138] sm:$0xff] }
 0x23e   : > { %5852 = vmatpush1.bf16.msra.mxu0 %v5851_v3  ;;  %5878 = vmatprep.subr.bf16.mxu1 %v5877_v21  ;;  %v5865_v34 = vpack.c.bf16 %v1231_v30, %v1228_v28  ;;  %v1227_v35 = vld [vmem:[%s7716_s18 + $0x120] sm:$0xff]  ;;  %v1234_v37 = vld [vmem:[%s7716_s18 + $0x158] sm:$0xff]  ;;  %v5885_v38 = vpack.c.bf16 %v1214_v32, %v1211_v31  ;;  %v1237_v39 = vld [vmem:[%s7716_s18 + $0x170] sm:$0xff]  ;;  %v7987_v63 = vsub.s32 0, %v7984_v62  ;;  %v7995_v2 = vsub.s32 1, %v7984_v62 }
 0x23f   : > { %5854 = vmatprep.subr.bf16.mxu0 %v5853_v4  ;;  %v1217_v40 = vld [vmem:[%s7716_s18 + $0xd0] sm:$0xff]  ;;  %v1220_v41 = vld [vmem:[%s7716_s18 + $0xe8] sm:$0xff]  ;;  %v5867_v42 = vpack.c.bf16 %v1230_v36, %v1227_v35  ;;  %v5869_v43 = vpack.c.bf16 %v1237_v39, %v1234_v37  ;;  %v1223_v48 = vld [vmem:[%s7716_s18 + $0x100] sm:$0xff]  ;;  %v9174_v30 = vsub.s32 2, %v7984_v62 }
 0x240   : > { %5880 = vmatpush3.bf16.msra.mxu1 %v5877_v21  ;;  %v1233_v44 = vld [vmem:[%s7716_s18 + $0x150] sm:$0xff]  ;;  %v1236_v45 = vld [vmem:[%s7716_s18 + $0x168] sm:$0xff]  ;;  %v5889_v47 = vpack.c.bf16 %v1220_v41, %v1217_v40  ;;  %v1226_v49 = vld [vmem:[%s7716_s18 + $0x118] sm:$0xff]  ;;  %9244 = vst [vmem:[#allocation25_spill] sm:$0xff] %v7987_v63 }
 0x241   : > { %5882 = vmatprep.subr.bf16.mxu1 %v5881_v29  ;;  %v5871_v50 = vpack.c.bf16 %v1236_v45, %v1233_v44  ;;  %v5893_v51 = vpack.c.bf16 %v1226_v49, %v1223_v48  ;;  %v1229_v46 = vld [vmem:[%s7716_s18 + $0x130] sm:$0xff]  ;;  %v1232_v52 = vld [vmem:[%s7716_s18 + $0x148] sm:$0xff]  ;;  %v1235_v55 = vld [vmem:[%s7716_s18 + $0x160] sm:$0xff]  ;;  %9245 = vst [vmem:[#allocation26_spill] sm:$0xff] %v7995_v2 }
 0x242   : > { %5856 = vmatpush1.bf16.msra.mxu0 %v5855_v11  ;;  %v5897_v53 = vpack.c.bf16 %v1232_v52, %v1229_v46  ;;  %v1238_v56 = vld [vmem:[%s7716_s18 + $0x178] sm:$0xff]  ;;  %v7969_v57 = vld [vmem:[#allocation15 + $0x8] sm:$0xff]  ;;  %v7973_v59 = vld [vmem:[#allocation15 + $0x10] sm:$0xff]  ;;  %s7254_s18 = smov 64  }
 0x243   : > { %5858 = vmatprep.subr.bf16.mxu0 %v5857_v15  ;;  %v5901_v58 = vpack.c.bf16 %v1238_v56, %v1235_v55  ;;  %v7977_v60 = vld [vmem:[#allocation15 + $0x18] sm:$0xff]  ;;  %v7990_v0 = vld [vmem:[%s7744_s17] sm:$0xff]  ;;  %vm8002_vm2 = vmpackc.low %vm1481_vm1, %vm1481_vm1  ;;  %v9301_v15 = vlaneseq }
 0x244   : > { %5884 = vmatpush3.bf16.msra.mxu1 %v5881_v29  ;;  %v1416_v1 = vrot.slane %v7990_v0, %v7987_v63  ;;  %v1428_v6 = vrot.slane %v7990_v0, %v7995_v2 }
 0x245   : > { %5886 = vmatprep.subr.bf16.mxu1 %v5885_v38 }
 0x246   : > { %5860 = vmatpush1.bf16.msra.mxu0 %v5859_v24 }
 0x247   : > { %5862 = vmatprep.subr.bf16.mxu0 %v5861_v25 }
 0x248   : > { %5888 = vmatpush3.bf16.msra.mxu1 %v5885_v38 }
 0x249   : > { %5890 = vmatprep.subr.bf16.mxu1 %v5889_v47 }
 0x24a   : > { %5864 = vmatpush1.bf16.msra.mxu0 %v5863_v33  ;;  %v1436_v33 = vrot.slane %v7990_v0, %v9174_v30 }
 0x24b   : > { %5866 = vmatprep.subr.bf16.mxu0 %v5865_v34 }
 0x24c   : > { %5892 = vmatpush3.bf16.msra.mxu1 %v5889_v47 }
 0x24d   : > { %5894 = vmatprep.subr.bf16.mxu1 %v5893_v51 }
 0x24e   : > { %5868 = vmatpush1.bf16.msra.mxu0 %v5867_v42 }
 0x24f   : > { %5870 = vmatprep.subr.bf16.mxu0 %v5869_v43 }
 0x250   : > { %5896 = vmatpush3.bf16.msra.mxu1 %v5893_v51 }
 0x251   : > { %5898 = vmatprep.subr.bf16.mxu1 %v5897_v53 }
 0x252   : > { %5872 = vmatpush1.bf16.msra.mxu0 %v5871_v50 }
 0x254   : > { %5900 = vmatpush3.bf16.msra.mxu1 %v5897_v53 }
 0x255   : > { %1304 = vmatmul.mubr.f32.vlgmr.msra.gmra.mrb[0].mxu0 %v7934_v9  ;;  %5902 = vmatprep.subr.bf16.mxu1 %v5901_v58 }
 0x256   : > { %1309 = vmatprep.mubr.f32.mxu0 %v9171_v54 }
 0x258   : > { %5904 = vmatpush3.bf16.msra.mxu1 %v5901_v58 }
 0x259   : > { %1310 = vmatmul.mubr.f32.gmra.mrb[2].mxu0 %v7969_v57 }
 0x25a   : > { %1315 = vmatprep.mubr.f32.mxu0 %v9171_v54 }
 0x25b   : > { %5370 = vmatmul.mubr.f32.vlgmr.msra.gmra.mrb[0].mxu1 %v7969_v57 }
 0x25c   : > { %5372 = vmatprep.mubr.f32.mxu1 %v7973_v59 }
 0x25d   : > { %1316 = vmatmul.mubr.f32.gmra.mrb[4].mxu0 %v7973_v59 }
 0x25e   : > { %1321 = vmatprep.mubr.f32.mxu0 %v9171_v54 }
 0x25f   : > { %5373 = vmatmul.mubr.f32.gmra.mrb[2].mxu1 %v7977_v60 }
 0x261   : > { %1322 = vmatmul.mubr.f32.gmra.mrb[6].mxu0 %v7977_v60 }
 0x328   : > { %v1305_v3 = vpop.f32.mrb[0].mxu0 }
 0x329   : > { %v1417_v4 = vadd.f32 %v1416_v1, %v1305_v3  ;;  %v1307_v5 = vpop.f32.mrb[1].mxu0 }
 0x32a   : > { %v1429_v12 = vadd.f32 %v1428_v6, %v1307_v5 }
 0x32b   : > { %v1421_v7 = vmul.f32 0.125, %v1417_v4 }
 0x32c   : > { %v1311_v8 = vpop.f32.mrb[2].mxu0 }
 0x32d   : > { %v1418_v10 = vadd.f32 %v1416_v1, %v1311_v8  ;;  %v1313_v11 = vpop.f32.mrb[3].mxu0  ;;  %5379 = vmatprep.mubr.msk.f32.mxu1 %vm1481_vm1, %v1421_v7 }
 0x32e   : > { %v1430_v13 = vadd.f32 %v1428_v6, %v1313_v11  ;;  %v5371_v29 = vpop.f32.mrb[0].mxu1 }
 0x32f   : > { %v1422_v14 = vmul.f32 0.125, %v1418_v10  ;;  %v1394_v32 = vpop.f32.mrb[1].mxu1  ;;  %v1438_v36 = vadd.f32 %v5371_v29, %v1436_v33 }
 0x330   : > { %v5905_v16 = vpack.c.bf16 %v1430_v13, %v1429_v12  ;;  %v6591_v17 = vpack.i.bf16 %v1430_v13, %v1429_v12  ;;  %v1317_v18 = vpop.f32.mrb[4].mxu0  ;;  %v1437_v37 = vadd.f32 %v1436_v33, %v1394_v32 }
 0x331   : > { %1447 = vrot.lane.b32.xlu1 %v1422_v14, %s7254_s18  ;;  %v1319_v19 = vpop.f32.mrb[5].mxu0  ;;  %v1419_v20 = vadd.f32 %v1416_v1, %v1317_v18 }
 0x332   : > { %6592 = vrot.lane.b32.xlu0 %v6591_v17, %s7254_s18  ;;  %5907 = vmatprep.subr.msk.bf16.mxu1 %vm8002_vm2, %v5905_v16  ;;  %v1431_v21 = vadd.f32 %v1428_v6, %v1319_v19  ;;  %v5374_v34 = vpop.f32.mrb[2].mxu1  ;;  %v6601_v40 = vpack.i.bf16 %v1438_v36, %v1437_v37  ;;  %v5929_v41 = vpack.c.bf16 %v1438_v36, %v1437_v37 }
 0x333   : > { %5910 = vmatpush3.bf16.xpose.msk.msra.mxu1 %vm8002_vm2, %v5905_v16  ;;  %v1423_v26 = vmul.f32 0.125, %v1419_v20  ;;  %v1404_v35 = vpop.f32.mrb[3].mxu1  ;;  %v8025_v38 = vadd.f32 %v5374_v34, %v1436_v33 }
 0x334   : > { %v1323_v22 = vpop.f32.mrb[6].mxu0  ;;  %v8027_v39 = vadd.f32 %v1436_v33, %v1404_v35 }
 0x335   : > { %v1325_v23 = vpop.f32.mrb[7].mxu0  ;;  %v1420_v24 = vadd.f32 %v1416_v1, %v1323_v22 }
 0x336   : > { %v1432_v25 = vadd.f32 %v1428_v6, %v1325_v23  ;;  %1445 = vrot.lane.b32.xlu0 %v1421_v7, %s7254_s18  ;;  %v6606_v42 = vpack.i.bf16 %v8025_v38, %v8027_v39  ;;  %v5937_v43 = vpack.c.bf16 %v8025_v38, %v8027_v39 }
 0x337   : > { %v1424_v31 = vmul.f32 0.125, %v1420_v24 }
 0x338   : > { %v6596_v27 = vpack.i.bf16 %v1432_v25, %v1431_v21  ;;  %v5917_v28 = vpack.c.bf16 %v1432_v25, %v1431_v21 }
 0x33a   : > { %5380 = vmatmul.mubr.msk.f32.vlgmr.msra.gmra.mrb[4].mxu1 %vm1481_vm1, %v1422_v14  ;;  %6597 = vrot.lane.b32.xlu1 %v6596_v27, %s7254_s18 }
 0x33b   : > { %1449 = vrot.lane.b32.xlu0 %v1423_v26, %s7254_s18  ;;  %5919 = vmatprep.subr.msk.bf16.mxu1 %vm8002_vm2, %v5917_v28 }
 0x33c   : > { %5922 = vmatpush3.bf16.xpose.msk.msra.mxu1 %vm8002_vm2, %v5917_v28  ;;  %5393 = vmatprep.mubr.msk.f32.mxu1 %vm1481_vm1, %v1423_v26 }
 0x33d   : > { %5930 = vmatprep.subr.bf16.mxu1 %v5929_v41 }
 0x33e   : > { %1451 = vrot.lane.b32.xlu1 %v1424_v31, %s7254_s18 }
 0x343   : > { %5394 = vmatmul.mubr.msk.f32.vlgmr.msra.gmra.mrb[6].mxu1 %vm1481_vm1, %v1424_v31 }
 0x344   : > { %5932 = vmatpush3.bf16.msra.mxu1 %v5929_v41 }
 0x3a3   : > { %v1448_v49 = vpop.permute.xlu1 %1447 }
 0x3a4   : > { %v6593_v44 = vpop.permute.xlu0 %6592 }
 0x3a5   : > { %v6595_v45 = vunpack.i.h.bf16 %v6593_v44  ;;  %v6594_v47 = vunpack.i.l.bf16 %v6593_v44 }
 0x3a7   : > { %v5911_v48 = vpack.c.bf16 %v6595_v45, %v6594_v47 }
 0x3a8   : > { %v1446_v50 = vpop.permute.xlu0 %1445 }
 0x3a9   : > { %5913 = vmatprep.subr.msk.bf16.mxu0 %vm8002_vm2, %v5911_v48  ;;  %5386 = vmatprep.mubr.msk.f32.mxu0 %vm1481_vm1, %v1446_v50 }
 0x3aa   : > { %5916 = vmatpush3.bf16.xpose.msk.msra.mxu0 %vm8002_vm2, %v5911_v48 }
 0x3ac   : > { %v6598_v51 = vpop.permute.xlu1 %6597 }
 0x3ad   : > { %v6600_v46 = vunpack.i.h.bf16 %v6598_v51  ;;  %v6599_v52 = vunpack.i.l.bf16 %v6598_v51  ;;  %v1450_v55 = vpop.permute.xlu0 %1449 }
 0x3af   : > { %v5923_v53 = vpack.c.bf16 %v6600_v46, %v6599_v52 }
 0x3b0   : > { %v1452_v56 = vpop.permute.xlu1 %1451 }
 0x3b1   : > { %5387 = vmatmul.mubr.msk.f32.vlgmr.msra.gmra.mrb[8].mxu0 %vm1481_vm1, %v1448_v49  ;;  %5925 = vmatprep.subr.msk.bf16.mxu0 %vm8002_vm2, %v5923_v53 }
 0x3b2   : > { %5928 = vmatpush3.bf16.xpose.msk.msra.mxu0 %vm8002_vm2, %v5923_v53  ;;  %5400 = vmatprep.mubr.msk.f32.mxu0 %vm1481_vm1, %v1450_v55 }
 0x3b3   : > { %5938 = vmatprep.subr.bf16.mxu0 %v5937_v43 }
 0x3b9   : > { %5401 = vmatmul.mubr.msk.f32.vlgmr.msra.gmra.mrb[10].mxu0 %vm1481_vm1, %v1452_v56 }
 0x3ba   : > { %5940 = vmatpush3.bf16.msra.mxu0 %v5937_v43 }
 0x40d   : > { %v5381_v58 = vpop.f32.mrb[4].mxu1 }
 0x40e   : > { %v1556_v1 = vpop.f32.mrb[5].mxu1  ;;  %v1818_v3 = vsel %vm1814_vm3, %v5381_v58, -inf }
 0x40f   : > { %1819 = vmax.xlane.f32.xlu1 %v1818_v3  ;;  %v1815_v4 = vsel %vm1814_vm3, %v1556_v1, -inf }
 0x410   : > { %1816 = vmax.xlane.f32.xlu0 %v1815_v4 }
 0x416   : > { %v8049_v5 = vpop.f32.mrb[6].mxu1 }
 0x417   : > { %v1722_v6 = vpop.f32.mrb[7].mxu1  ;;  %v1830_v31 = vsel %vm1814_vm3, %v8049_v5, -inf }
 0x418   : > { %v1827_v7 = vsel %vm1814_vm3, %v1722_v6, -inf }
 0x420   : > { %6602 = vrot.lane.b32.xlu1 %v6601_v40, %s7254_s18 }
 0x444   : > { %1828 = vmax.xlane.f32.xlu1 %v1827_v7 }
 0x484   : > { %v5388_v8 = vpop.f32.mrb[8].mxu0 }
 0x485   : > { %v1639_v10 = vpop.f32.mrb[9].mxu0  ;;  %v1824_v12 = vsel %vm1814_vm3, %v5388_v8, -inf }
 0x486   : > { %v1821_v11 = vsel %vm1814_vm3, %v1639_v10, -inf }
 0x487   : > { %1822 = vmax.xlane.f32.xlu0 %v1821_v11 }
 0x48b   : > { %1825 = vmax.xlane.f32.xlu0 %v1824_v12 }
 0x48c   : > { %v5402_v13 = vpop.f32.mrb[10].mxu0 }
 0x48d   : > { %v1836_v14 = vsel %vm1814_vm3, %v5402_v13, -inf  ;;  %v1805_v16 = vpop.f32.mrb[11].mxu0 }
 0x48e   : > { %v1833_v17 = vsel %vm1814_vm3, %v1805_v16, -inf }
 0x48f   : > { %1837 = vmax.xlane.f32.xlu0 %v1836_v14 }
 0x493   : > { %1834 = vmax.xlane.f32.xlu0 %v1833_v17 }
 0x49c   : > { %v1820_v18 = vpop.xlane.xlu1 %1819 }
 0x49d   : > { %v1840_v19 = vsub.f32 %v5381_v58, %v1820_v18  ;;  %v1817_v20 = vpop.xlane.xlu0 %1816 }
 0x49e   : > { %v1839_v21 = vsub.f32 %v1556_v1, %v1817_v20 }
 0x49f   : > { %v1849_v22 = vmul.f32 1.442695, %v1840_v19 }
 0x4a0   : > { %v1847_v23 = vmul.f32 1.442695, %v1839_v21  ;;  %v6603_v24 = vpop.permute.xlu1 %6602  ;;  %v2248_v21 = vld [vmem:[%s7727_s22 + $0x8] sm:$0xff] }
 0x4a1   : > { %v6605_v25 = vunpack.i.h.bf16 %v6603_v24  ;;  %v6604_v26 = vunpack.i.l.bf16 %v6603_v24  ;;  %v2250_v24 = vld [vmem:[%s7727_s22 + $0x18] sm:$0xff] }
 0x4a2   : > { %6791 = vpow2.f32 %v1847_v23 }
 0x4a3   : > { %6793 = vpow2.f32 %v1849_v22  ;;  %v5933_v27 = vpack.c.bf16 %v6605_v25, %v6604_v26  ;;  %v2249_v22 = vld [vmem:[%s7727_s22 + $0x10] sm:$0xff]  ;;  %v2251_v26 = vld [vmem:[%s7727_s22 + $0x20] sm:$0xff] }
 0x4a4   : > { %v5949_v25 = vpack.c.bf16 %v2250_v24, %v2249_v22 }
 0x4a5   : > { %5934 = vmatprep.subr.bf16.mxu1 %v5933_v27 }
 0x4a9   : > { %6607 = vrot.lane.b32.xlu0 %v6606_v42, %s7254_s18 }
 0x4ac   : > { %v6792_v28 = vpop.eup %6791 }
 0x4ad   : > { %v6794_v29 = vpop.eup %6793  ;;  %5407 = vmatprep.mubr.msk.f32.mxu1 %vm1814_vm3, %v6792_v28  ;;  %v1863_v4 = vsel %vm1814_vm3, %v6792_v28, 0.0 }
 0x4ae   : > { %5408 = vmatmul.mubr.msk.f32.vlgmr.msra.gmra.mrb[8].mxu1 %vm1814_vm3, %v6794_v29  ;;  %v1866_v32 = vsel %vm1814_vm3, %v6794_v29, 0.0  ;;  %v2253_v29 = vld [vmem:[%s7727_s22 + $0x30] sm:$0xff] }
 0x4af   : > { %5936 = vmatpush3.bf16.msra.mxu1 %v5933_v27  ;;  %v2252_v27 = vld [vmem:[%s7727_s22 + $0x28] sm:$0xff] }
 0x4b0   : > { %v5953_v28 = vpack.c.bf16 %v2252_v27, %v2251_v26 }
 0x4c8   : > { %1831 = vmax.xlane.f32.xlu0 %v1830_v31  ;;  %v2254_v31 = vld [vmem:[%s7727_s22 + $0x38] sm:$0xff] }
 0x4cc   : > { %1867 = vadd.xlane.f32.xlu0 %v1866_v32  ;;  %v5957_v32 = vpack.c.bf16 %v2254_v31, %v2253_v29 }
 0x4d1   : > { %v1829_v33 = vpop.xlane.xlu1 %1828 }
 0x4d2   : > { %v1843_v34 = vsub.f32 %v1722_v6, %v1829_v33  ;;  %v2255_v33 = vld [vmem:[%s7727_s22 + $0x40] sm:$0xff] }
 0x4d4   : > { %v1855_v35 = vmul.f32 1.442695, %v1843_v34  ;;  %v2256_v34 = vld [vmem:[%s7727_s22 + $0x48] sm:$0xff] }
 0x4d6   : > { %6795 = vpow2.f32 %v1855_v35 }
 0x4e0   : > { %v6796_v36 = vpop.eup %6795 }
 0x4e1   : > { %5421 = vmatprep.mubr.msk.f32.mxu0 %vm1814_vm3, %v6796_v36 }
 0x514   : > { %v1823_v37 = vpop.xlane.xlu0 %1822 }
 0x515   : > { %v1841_v38 = vsub.f32 %v1639_v10, %v1823_v37 }
 0x517   : > { %v1851_v39 = vmul.f32 1.442695, %v1841_v38  ;;  %v2257_v38 = vld [vmem:[%s7727_s22 + $0x50] sm:$0xff] }
 0x518   : > { %v1826_v40 = vpop.xlane.xlu0 %1825 }
 0x519   : > { %6797 = vpow2.f32 %v1851_v39  ;;  %v1842_v41 = vsub.f32 %v5388_v8, %v1826_v40  ;;  %v1875_v8 = vsel %vm1814_vm3, %v6796_v36, 0.0  ;;  %v5961_v36 = vpack.c.bf16 %v2256_v34, %v2255_v33  ;;  %v2258_v39 = vld [vmem:[%s7727_s22 + $0x58] sm:$0xff]  ;;  %v2558_v34 = vld [vmem:[%s7736_s21] sm:$0xff] }
 0x51a   : > { %v5965_v40 = vpack.c.bf16 %v2258_v39, %v2257_v38  ;;  %v2561_v33 = vld [vmem:[%s7736_s21 + $0x18] sm:$0xff] }
 0x51b   : > { %v1853_v42 = vmul.f32 1.442695, %v1842_v41  ;;  %v2259_v41 = vld [vmem:[%s7727_s22 + $0x60] sm:$0xff] }
 0x51c   : > { %v1838_v43 = vpop.xlane.xlu0 %1837  ;;  %v2565_v38 = vld [vmem:[%s7736_s21 + $0x38] sm:$0xff] }
 0x51d   : > { %6799 = vpow2.f32 %v1853_v42  ;;  %v1846_v44 = vsub.f32 %v5402_v13, %v1838_v43  ;;  %v2260_v42 = vld [vmem:[%s7727_s22 + $0x68] sm:$0xff] }
 0x51e   : > { %v5969_v43 = vpack.c.bf16 %v2260_v42, %v2259_v41  ;;  %v2562_v41 = vld [vmem:[%s7736_s21 + $0x20] sm:$0xff]  ;;  %v2564_v42 = vld [vmem:[%s7736_s21 + $0x30] sm:$0xff] }
 0x51f   : > { %v1861_v45 = vmul.f32 1.442695, %v1846_v44  ;;  %v2261_v44 = vld [vmem:[%s7727_s22 + $0x70] sm:$0xff] }
 0x520   : > { %v1835_v47 = vpop.xlane.xlu0 %1834 }
 0x521   : > { %6801 = vpow2.f32 %v1861_v45  ;;  %v1845_v48 = vsub.f32 %v1805_v16, %v1835_v47  ;;  %v2262_v45 = vld [vmem:[%s7727_s22 + $0x78] sm:$0xff] }
 0x523   : > { %v6798_v49 = vpop.eup %6797  ;;  %v1859_v50 = vmul.f32 1.442695, %v1845_v48  ;;  %v5973_v48 = vpack.c.bf16 %v2262_v45, %v2261_v44  ;;  %v2569_v44 = vld [vmem:[%s7736_s21 + $0x58] sm:$0xff]  ;;  %v6015_v45 = vpack.c.bf16 %v2564_v42, %v2562_v41 }
 0x524   : > { %5414 = vmatprep.mubr.msk.f32.mxu1 %vm1814_vm3, %v6798_v49  ;;  %v6608_v51 = vpop.permute.xlu0 %6607  ;;  %v1869_v46 = vsel %vm1814_vm3, %v6798_v49, 0.0 }
 0x525   : > { %6803 = vpow2.f32 %v1859_v50  ;;  %v6610_v52 = vunpack.i.h.bf16 %v6608_v51  ;;  %v6609_v53 = vunpack.i.l.bf16 %v6608_v51  ;;  %1870 = vadd.xlane.f32.xlu1 %v1869_v46 }
 0x527   : > { %v6800_v55 = vpop.eup %6799  ;;  %v5941_v56 = vpack.c.bf16 %v6610_v52, %v6609_v53 }
 0x528   : > { %5415 = vmatmul.mubr.msk.f32.vlgmr.msra.gmra.mrb[10].mxu1 %vm1814_vm3, %v6800_v55  ;;  %v1872_v58 = vsel %vm1814_vm3, %v6800_v55, 0.0 }
 0x529   : > { %5942 = vmatprep.subr.bf16.mxu1 %v5941_v56  ;;  %1873 = vadd.xlane.f32.xlu1 %v1872_v58 }
 0x52a   : > { %5944 = vmatpush3.bf16.msra.mxu1 %v5941_v56 }
 0x52b   : > { %v6802_v1 = vpop.eup %6801 }
 0x52c   : > { %v1884_v3 = vsel %vm1814_vm3, %v6802_v1, 0.0 }
 0x52d   : > { %1885 = vadd.xlane.f32.xlu0 %v1884_v3  ;;  %1864 = vadd.xlane.f32.xlu1 %v1863_v4 }
 0x52f   : > { %v6804_v6 = vpop.eup %6803 }
 0x530   : > { %5428 = vmatprep.mubr.msk.f32.mxu1 %vm1814_vm3, %v6804_v6  ;;  %v1881_v7 = vsel %vm1814_vm3, %v6804_v6, 0.0 }
 0x531   : > { %5429 = vmatmul.mubr.msk.f32.vlgmr.msra.gmra.mrb[12].mxu1 %vm1814_vm3, %v6802_v1  ;;  %1882 = vadd.xlane.f32.xlu1 %v1881_v7 }
 0x532   : > { %1876 = vadd.xlane.f32.xlu0 %v1875_v8 }
 0x555   : > { %v1832_v10 = vpop.xlane.xlu0 %1831 }
 0x556   : > { %v1844_v11 = vsub.f32 %v8049_v5, %v1832_v10  ;;  %v2247_v5 = vld [vmem:[%s7727_s22] sm:$0xff]  ;;  %s7255_s22 = smov [#allocation15]  }
 0x557   : > { %v5945_v23 = vpack.c.bf16 %v2248_v21, %v2247_v5 }
 0x558   : > { %v1857_v12 = vmul.f32 1.442695, %v1844_v11 }
 0x559   : > { %5946 = vmatprep.subr.bf16.mxu0 %v5945_v23  ;;  %v1868_v47 = vpop.xlane.xlu0 %1867 }
 0x55a   : > { %6805 = vpow2.f32 %v1857_v12 }
 0x564   : > { %v6806_v13 = vpop.eup %6805 }
 0x565   : > { %5422 = vmatmul.mubr.msk.f32.vlgmr.msra.gmra.mrb[12].mxu0 %vm1814_vm3, %v6806_v13  ;;  %v1878_v14 = vsel %vm1814_vm3, %v6806_v13, 0.0 }
 0x566   : > { %1879 = vadd.xlane.f32.xlu0 %v1878_v14  ;;  %5948 = vmatpush3.bf16.msra.mxu0 %v5945_v23 }
 0x567   : > { %5950 = vmatprep.subr.bf16.mxu0 %v5949_v25 }
 0x56a   : > { %5952 = vmatpush3.bf16.msra.mxu0 %v5949_v25 }
 0x56b   : > { %5954 = vmatprep.subr.bf16.mxu0 %v5953_v28 }
 0x56e   : > { %5956 = vmatpush3.bf16.msra.mxu0 %v5953_v28 }
 0x56f   : > { %5958 = vmatprep.subr.bf16.mxu0 %v5957_v32 }
 0x572   : > { %5960 = vmatpush3.bf16.msra.mxu0 %v5957_v32  ;;  %v2559_v32 = vld [vmem:[%s7736_s21 + $0x8] sm:$0xff] }
 0x573   : > { %5962 = vmatprep.subr.bf16.mxu0 %v5961_v36 }
 0x576   : > { %5964 = vmatpush3.bf16.msra.mxu0 %v5961_v36  ;;  %v2560_v36 = vld [vmem:[%s7736_s21 + $0x10] sm:$0xff] }
 0x577   : > { %5966 = vmatprep.subr.bf16.mxu0 %v5965_v40  ;;  %v6011_v39 = vpack.c.bf16 %v2560_v36, %v2558_v34 }
 0x57a   : > { %5968 = vmatpush3.bf16.msra.mxu0 %v5965_v40 }
 0x57b   : > { %5970 = vmatprep.subr.bf16.mxu0 %v5969_v43 }
 0x57e   : > { %5972 = vmatpush3.bf16.msra.mxu0 %v5969_v43  ;;  %v2567_v43 = vld [vmem:[%s7736_s21 + $0x48] sm:$0xff] }
 0x57f   : > { %5974 = vmatprep.subr.bf16.mxu0 %v5973_v48 }
 0x581   : > { %v8080_v16 = vpop.f32.mrb[8].mxu1 }
 0x582   : > { %v1959_v17 = vpop.f32.mrb[9].mxu1  ;;  %5976 = vmatpush3.bf16.msra.mxu0 %v5973_v48  ;;  %v2566_v48 = vld [vmem:[%s7736_s21 + $0x40] sm:$0xff] }
 0x5b2   : > { %v1871_v18 = vpop.xlane.xlu1 %1870 }
 0x5b6   : > { %v1874_v19 = vpop.xlane.xlu1 %1873 }
 0x5ba   : > { %v1865_v20 = vpop.xlane.xlu1 %1864  ;;  %v1886_v49 = vpop.xlane.xlu0 %1885 }
 0x5bb   : > { %6807 = vrcp.f32 %v1865_v20 }
 0x5bc   : > { %6809 = vrcp.f32 %v1874_v19 }
 0x5bd   : > { %6811 = vrcp.f32 %v1871_v18 }
 0x5be   : > { %v1883_v50 = vpop.xlane.xlu1 %1882  ;;  %6813 = vrcp.f32 %v1886_v49  ;;  %v2568_v49 = vld [vmem:[%s7736_s21 + $0x50] sm:$0xff] }
 0x5bf   : > { %6815 = vrcp.f32 %v1883_v50  ;;  %v1877_v13 = vpop.xlane.xlu0 %1876  ;;  %v2571_v50 = vld [vmem:[%s7736_s21 + $0x68] sm:$0xff] }
 0x5c0   : > { %6817 = vrcp.f32 %v1868_v47  ;;  %v6017_v47 = vpack.c.bf16 %v2569_v44, %v2567_v43 }
 0x5c1   : > { %6819 = vrcp.f32 %v1877_v13  ;;  %v2580_v13 = vld [vmem:[%s7736_s21 + $0xb0] sm:$0xff] }
 0x5c5   : > { %v6808_v35 = vpop.eup %6807 }
 0x5c6   : > { %v2219_v37 = vmul.f32 %v6808_v35, %v1959_v17  ;;  %v6810_v51 = vpop.eup %6809  ;;  %v6009_v35 = vpack.c.bf16 %v2561_v33, %v2559_v32  ;;  %v2421_v32 = vld [vmem:[#allocation2 + $0x20] sm:$0xff]  ;;  %v9170_v33 = vsub.s32 3, %v7984_v62 }
 0x5c7   : > { %v6812_v52 = vpop.eup %6811 }
 0x5c8   : > { %v6814_v1 = vpop.eup %6813  ;;  %6010 = vmatprep.subr.bf16.mxu0 %v6009_v35  ;;  %v2266_v34 = vrot.slane %v7990_v0, %v9170_v33 }
 0x5c9   : > { %v6816_v4 = vpop.eup %6815 }
 0x5ca   : > { %v6818_v17 = vpop.eup %6817 }
 0x5cb   : > { %v2220_v19 = vmul.f32 %v6818_v17, %v8080_v16  ;;  %v6820_v23 = vpop.eup %6819  ;;  %v2585_v17 = vld [vmem:[%s7736_s21 + $0xd8] sm:$0xff] }
 0x5f3   : > { %v1880_v14 = vpop.xlane.xlu0 %1879 }
 0x5f4   : > { %6821 = vrcp.f32 %v1880_v14  ;;  %v2583_v14 = vld [vmem:[%s7736_s21 + $0xc8] sm:$0xff] }
 0x5fb   : > { %v5416_v46 = vpop.f32.mrb[10].mxu1 }
 0x5fc   : > { %v2222_v53 = vmul.f32 %v6810_v51, %v5416_v46  ;;  %v2040_v55 = vpop.f32.mrb[11].mxu1  ;;  %v2573_v51 = vld [vmem:[%s7736_s21 + $0x78] sm:$0xff]  ;;  %v6019_v46 = vpack.c.bf16 %v2568_v49, %v2566_v48  ;;  %v2426_v48 = vld [vmem:[#allocation2 + $0x48] sm:$0xff] }
 0x5fd   : > { %v2221_v56 = vmul.f32 %v6812_v52, %v2040_v55  ;;  %v6021_v52 = vpack.c.bf16 %v2573_v51, %v2571_v50  ;;  %v2572_v55 = vld [vmem:[%s7736_s21 + $0x70] sm:$0xff]  ;;  %v2429_v50 = vld [vmem:[#allocation2 + $0x60] sm:$0xff]  ;;  %v2430_v51 = vld [vmem:[#allocation2 + $0x68] sm:$0xff] }
 0x5fe   : > { %v6822_v24 = vpop.eup %6821  ;;  %v2428_v49 = vld [vmem:[#allocation2 + $0x58] sm:$0xff] }
 0x5ff   : > { %v6611_v58 = vpack.i.bf16 %v2222_v53, %v2221_v56  ;;  %v2570_v53 = vld [vmem:[%s7736_s21 + $0x60] sm:$0xff]  ;;  %v2575_v56 = vld [vmem:[%s7736_s21 + $0x88] sm:$0xff] }
 0x601   : > { %6612 = vrot.lane.b32.xlu1 %v6611_v58, %s7254_s18  ;;  %v2577_v58 = vld [vmem:[%s7736_s21 + $0x98] sm:$0xff] }
 0x604   : > { %v5430_v3 = vpop.f32.mrb[12].mxu1 }
 0x605   : > { %v2226_v6 = vmul.f32 %v6814_v1, %v5430_v3  ;;  %v2202_v7 = vpop.f32.mrb[13].mxu1  ;;  %v6023_v1 = vpack.c.bf16 %v2572_v55, %v2570_v53  ;;  %v6025_v3 = vpack.c.bf16 %v2577_v58, %v2575_v56  ;;  %v2451_v53 = vld [vmem:[%s7734_s7 + $0x10] sm:$0xff]  ;;  %v2452_v55 = vld [vmem:[%s7734_s7 + $0x18] sm:$0xff] }
 0x606   : > { %v2225_v8 = vmul.f32 %v6816_v4, %v2202_v7  ;;  %v2574_v4 = vld [vmem:[%s7736_s21 + $0x80] sm:$0xff]  ;;  %v2579_v7 = vld [vmem:[%s7736_s21 + $0xa8] sm:$0xff] }
 0x607   : > { %v2431_v56 = vld [vmem:[#allocation2 + $0x70] sm:$0xff] }
 0x608   : > { %v6616_v10 = vpack.i.bf16 %v2226_v6, %v2225_v8  ;;  %v2576_v6 = vld [vmem:[%s7736_s21 + $0x90] sm:$0xff]  ;;  %v2581_v8 = vld [vmem:[%s7736_s21 + $0xb8] sm:$0xff] }
 0x60a   : > { %6617 = vrot.lane.b32.xlu0 %v6616_v10, %s7254_s18  ;;  %v6027_v10 = vpack.c.bf16 %v2576_v6, %v2574_v4  ;;  %v2454_v4 = vld [vmem:[%s7734_s7 + $0x28] sm:$0xff]  ;;  %v2432_v6 = vld [vmem:[#allocation2 + $0x78] sm:$0xff] }
 0x638   : > { %v5423_v11 = vpop.f32.mrb[12].mxu0 }
 0x639   : > { %v2121_v12 = vpop.f32.mrb[13].mxu0  ;;  %v2224_v26 = vmul.f32 %v6822_v24, %v5423_v11  ;;  %v6029_v11 = vpack.c.bf16 %v2581_v8, %v2579_v7  ;;  %v2433_v8 = vld [vmem:[#allocation2 + $0x80] sm:$0xff] }
 0x63a   : > { %v2223_v27 = vmul.f32 %v6820_v23, %v2121_v12  ;;  %v2578_v12 = vld [vmem:[%s7736_s21 + $0xa0] sm:$0xff] }
 0x673   : > { %v6613_v18 = vpop.permute.xlu1 %6612 }
 0x674   : > { %v6615_v20 = vunpack.i.h.bf16 %v6613_v18  ;;  %v6614_v5 = vunpack.i.l.bf16 %v6613_v18  ;;  %v6031_v18 = vpack.c.bf16 %v2580_v13, %v2578_v12  ;;  %v2436_v12 = vld [vmem:[#allocation2 + $0x98] sm:$0xff]  ;;  %v2437_v13 = vld [vmem:[#allocation2 + $0xa0] sm:$0xff] }
 0x676   : > { %v2243_v21 = vsel %vm1481_vm1, %v2219_v37, %v6614_v5  ;;  %v2244_v22 = vsel %vm1481_vm1, %v2220_v19, %v6615_v20  ;;  %v2563_v37 = vld [vmem:[%s7736_s21 + $0x28] sm:$0xff]  ;;  %v6033_v19 = vpack.c.bf16 %v2585_v17, %v2583_v14  ;;  %v2582_v20 = vld [vmem:[%s7736_s21 + $0xc0] sm:$0xff]  ;;  %v2584_v5 = vld [vmem:[%s7736_s21 + $0xd0] sm:$0xff] }
 0x677   : > { %5463 = vmatprep.mubr.f32.mxu0 %v2243_v21  ;;  %v6013_v40 = vpack.c.bf16 %v2565_v38, %v2563_v37  ;;  %v2587_v21 = vld [vmem:[%s7736_s21 + $0xe8] sm:$0xff]  ;;  %v6035_v23 = vpack.c.bf16 %v2584_v5, %v2582_v20 }
 0x678   : > { %5464 = vmatmul.mubr.f32.vlgmr.msra.gmra.mrb[14].mxu0 %v2244_v22  ;;  %v2589_v22 = vld [vmem:[%s7736_s21 + $0xf8] sm:$0xff]  ;;  %v2438_v14 = vld [vmem:[#allocation2 + $0xa8] sm:$0xff]  ;;  %v2439_v17 = vld [vmem:[#allocation2 + $0xb0] sm:$0xff] }
 0x679   : > { %6012 = vmatpush1.bf16.msra.mxu0 %v6011_v39  ;;  %v6037_v24 = vpack.c.bf16 %v2589_v22, %v2587_v21  ;;  %v2442_v20 = vld [vmem:[#allocation2 + $0xc8] sm:$0xff]  ;;  %v2443_v5 = vld [vmem:[#allocation2 + $0xd0] sm:$0xff]  ;;  %v2444_v21 = vld [vmem:[#allocation2 + $0xd8] sm:$0xff] }
 0x67a   : > { %6014 = vmatprep.subr.bf16.mxu0 %v6013_v40  ;;  %v2445_v22 = vld [vmem:[#allocation2 + $0xe0] sm:$0xff] }
 0x67c   : > { %v6618_v25 = vpop.permute.xlu0 %6617 }
 0x67d   : > { %v6620_v16 = vunpack.i.h.bf16 %v6618_v25  ;;  %v6619_v28 = vunpack.i.l.bf16 %v6618_v25  ;;  %6016 = vmatpush1.bf16.msra.mxu0 %v6015_v45  ;;  %v2586_v25 = vld [vmem:[%s7736_s21 + $0xe0] sm:$0xff] }
 0x67e   : > { %6018 = vmatprep.subr.bf16.mxu0 %v6017_v47  ;;  %v2422_v45 = vld [vmem:[#allocation2 + $0x28] sm:$0xff]  ;;  %v2424_v47 = vld [vmem:[#allocation2 + $0x38] sm:$0xff] }
 0x67f   : > { %v2245_v29 = vsel %vm1481_vm1, %v2223_v27, %v6619_v28  ;;  %v2246_v31 = vsel %vm1481_vm1, %v2224_v26, %v6620_v16  ;;  %v2588_v26 = vld [vmem:[%s7736_s21 + $0xf0] sm:$0xff]  ;;  %v2417_v16 = vld [vmem:[#allocation2] sm:$0xff]  ;;  %v2418_v28 = vld [vmem:[#allocation2 + $0x8] sm:$0xff] }
 0x680   : > { %5466 = vmatprep.mubr.f32.mxu0 %v2245_v29  ;;  %v6039_v27 = vpack.c.bf16 %v2588_v26, %v2586_v25  ;;  %v2419_v29 = vld [vmem:[#allocation2 + $0x10] sm:$0xff]  ;;  %v2448_v25 = vld [vmem:[#allocation2 + $0xf8] sm:$0xff] }
 0x681   : > { %5467 = vmatmul.mubr.f32.gmra.mrb[16].mxu0 %v2246_v31  ;;  %v2420_v31 = vld [vmem:[#allocation2 + $0x18] sm:$0xff] }
 0x682   : > { %2654 = vmatprep.mubr.f32.mxu0 %v9171_v54  ;;  %6020 = vmatpush1.bf16.msra.mxu0 %v6019_v46  ;;  %v2449_v46 = vld [vmem:[%s7734_s7] sm:$0xff] }
 0x683   : > { %6022 = vmatprep.subr.bf16.mxu0 %v6021_v52  ;;  %v2450_v52 = vld [vmem:[%s7734_s7 + $0x8] sm:$0xff] }
 0x684   : > { %v5977_v58 = vpack.c.bf16 %v2450_v52, %v2449_v46  ;;  %v2464_v46 = vld [vmem:[%s7734_s7 + $0x78] sm:$0xff] }
 0x686   : > { %6024 = vmatpush1.bf16.msra.mxu0 %v6023_v1  ;;  %v5981_v1 = vpack.c.bf16 %v2452_v55, %v2451_v53  ;;  %5978 = vmatprep.subr.bf16.mxu1 %v5977_v58  ;;  %v9168_v53 = vsub.s32 6, %v7984_v62  ;;  %v9169_v55 = vsub.s32 5, %v7984_v62 }
 0x687   : > { %6026 = vmatprep.subr.bf16.mxu0 %v6025_v3  ;;  %v2453_v3 = vld [vmem:[%s7734_s7 + $0x20] sm:$0xff]  ;;  %5980 = vmatpush3.bf16.msra.mxu1 %v5977_v58 }
 0x688   : > { %5982 = vmatprep.subr.bf16.mxu1 %v5981_v1  ;;  %v5985_v7 = vpack.c.bf16 %v2454_v4, %v2453_v3 }
 0x68a   : > { %6028 = vmatpush1.bf16.msra.mxu0 %v6027_v10  ;;  %v2434_v10 = vld [vmem:[#allocation2 + $0x88] sm:$0xff] }
 0x68b   : > { %6030 = vmatprep.subr.bf16.mxu0 %v6029_v11  ;;  %5984 = vmatpush3.bf16.msra.mxu1 %v5981_v1  ;;  %v2435_v11 = vld [vmem:[#allocation2 + $0x90] sm:$0xff] }
 0x68c   : > { %5986 = vmatprep.subr.bf16.mxu1 %v5985_v7 }
 0x68e   : > { %6032 = vmatpush1.bf16.msra.mxu0 %v6031_v18  ;;  %v2440_v18 = vld [vmem:[#allocation2 + $0xb8] sm:$0xff] }
 0x68f   : > { %6034 = vmatprep.subr.bf16.mxu0 %v6033_v19  ;;  %5988 = vmatpush3.bf16.msra.mxu1 %v5985_v7  ;;  %v2441_v19 = vld [vmem:[#allocation2 + $0xc0] sm:$0xff] }
 0x692   : > { %6036 = vmatpush1.bf16.msra.mxu0 %v6035_v23  ;;  %v2446_v23 = vld [vmem:[#allocation2 + $0xe8] sm:$0xff] }
 0x693   : > { %6038 = vmatprep.subr.bf16.mxu0 %v6037_v24  ;;  %v2447_v24 = vld [vmem:[#allocation2 + $0xf0] sm:$0xff] }
 0x696   : > { %6040 = vmatpush1.bf16.msra.mxu0 %v6039_v27 }
 0x699   : > { %2655 = vmatmul.mubr.f32.vlgmr.msra.gmra.mrb[18].mxu0 %v2417_v16 }
 0x69a   : > { %2660 = vmatprep.mubr.f32.mxu0 %v9171_v54 }
 0x69d   : > { %2661 = vmatmul.mubr.f32.gmra.mrb[20].mxu0 %v2418_v28 }
 0x69e   : > { %2666 = vmatprep.mubr.f32.mxu0 %v9171_v54 }
 0x6a1   : > { %2667 = vmatmul.mubr.f32.gmra.mrb[22].mxu0 %v2419_v29 }
 0x6a2   : > { %2672 = vmatprep.mubr.f32.mxu0 %v9171_v54 }
 0x6a5   : > { %2673 = vmatmul.mubr.f32.gmra.mrb[24].mxu0 %v2420_v31 }
 0x6a6   : > { %2678 = vmatprep.mubr.f32.mxu0 %v9171_v54 }
 0x6a9   : > { %2679 = vmatmul.mubr.f32.gmra.mrb[26].mxu0 %v2421_v32 }
 0x6aa   : > { %2684 = vmatprep.mubr.f32.mxu0 %v9171_v54 }
 0x6ad   : > { %2685 = vmatmul.mubr.f32.gmra.mrb[28].mxu0 %v2422_v45  ;;  %v2457_v45 = vld [vmem:[%s7734_s7 + $0x40] sm:$0xff] }
 0x6ae   : > { %2690 = vmatprep.mubr.f32.mxu0 %v9171_v54 }
 0x74b   : > { %v5465_v35 = vpop.f32.mrb[14].mxu0 }
 0x74c   : > { %v2339_v36 = vadd.f32 %v5465_v35, %v2266_v34  ;;  %v2333_v37 = vpop.f32.mrb[15].mxu0 }
 0x74d   : > { %v2334_v38 = vadd.f32 %v2333_v37, %v2266_v34 }
 0x74e   : > { %v8148_v39 = vadd.f32 %v2339_v36, %v7969_v57  ;;  %v2423_v57 = vld [vmem:[#allocation2 + $0x30] sm:$0xff] }
 0x74f   : > { %v8151_v40 = vadd.f32 %v2334_v38, %v7934_v9  ;;  %2691 = vmatmul.mubr.f32.gmra.mrb[30].mxu0 %v2423_v57  ;;  %v2458_v57 = vld [vmem:[%s7734_s7 + $0x48] sm:$0xff] }
 0x750   : > { %2358 = vadd.xlane.f32.xlu0 %v8148_v39  ;;  %2696 = vmatprep.mubr.f32.mxu0 %v9171_v54 }
 0x751   : > { %2356 = vadd.xlane.f32.xlu1 %v8151_v40 }
 0x753   : > { %2697 = vmatmul.mubr.f32.gmra.mrb[32].mxu0 %v2424_v47  ;;  %v5993_v47 = vpack.c.bf16 %v2458_v57, %v2457_v45 }
 0x754   : > { %v5468_v41 = vpop.f32.mrb[16].mxu0  ;;  %2702 = vmatprep.mubr.f32.mxu0 %v9171_v54 }
 0x755   : > { %v2343_v42 = vpop.f32.mrb[17].mxu0  ;;  %v2349_v44 = vadd.f32 %v5468_v41, %v2266_v34 }
 0x756   : > { %v2344_v43 = vadd.f32 %v2343_v42, %v2266_v34 }
 0x757   : > { %v8161_v9 = vadd.f32 %v2349_v44, %v7977_v60  ;;  %v2427_v60 = vld [vmem:[#allocation2 + $0x50] sm:$0xff]  ;;  %v2456_v44 = vld [vmem:[%s7734_s7 + $0x38] sm:$0xff] }
 0x758   : > { %v8156_v0 = vadd.f32 %v2344_v43, %v7973_v59  ;;  %v2425_v59 = vld [vmem:[#allocation2 + $0x40] sm:$0xff]  ;;  %v2455_v43 = vld [vmem:[%s7734_s7 + $0x30] sm:$0xff] }
 0x759   : > { %2703 = vmatmul.mubr.f32.gmra.mrb[34].mxu0 %v2425_v59  ;;  %v2460_v59 = vld [vmem:[%s7734_s7 + $0x58] sm:$0xff] }
 0x75a   : > { %2360 = vadd.xlane.f32.xlu1 %v8156_v0  ;;  %2708 = vmatprep.mubr.f32.mxu0 %v9171_v54 }
 0x75d   : > { %2709 = vmatmul.mubr.f32.gmra.mrb[36].mxu0 %v2426_v48 }
 0x75e   : > { %2362 = vadd.xlane.f32.xlu1 %v8161_v9  ;;  %2714 = vmatprep.mubr.f32.mxu0 %v9171_v54 }
 0x761   : > { %2715 = vmatmul.mubr.f32.gmra.mrb[38].mxu0 %v2427_v60  ;;  %v2461_v60 = vld [vmem:[%s7734_s7 + $0x60] sm:$0xff] }
 0x762   : > { %2720 = vmatprep.mubr.f32.mxu0 %v9171_v54 }
 0x765   : > { %2721 = vmatmul.mubr.f32.gmra.mrb[40].mxu0 %v2428_v49  ;;  %v2462_v49 = vld [vmem:[%s7734_s7 + $0x68] sm:$0xff] }
 0x766   : > { %2726 = vmatprep.mubr.f32.mxu0 %v9171_v54 }
 0x769   : > { %2727 = vmatmul.mubr.f32.gmra.mrb[42].mxu0 %v2429_v50  ;;  %v6001_v50 = vpack.c.bf16 %v2462_v49, %v2461_v60 }
 0x76a   : > { %2732 = vmatprep.mubr.f32.mxu0 %v9171_v54 }
 0x76c   : > { %v2656_v3 = vpop.f32.mrb[18].mxu0 }
 0x76d   : > { %2733 = vmatmul.mubr.f32.gmra.mrb[44].mxu0 %v2430_v51  ;;  %v2463_v51 = vld [vmem:[%s7734_s7 + $0x70] sm:$0xff] }
 0x76e   : > { %2738 = vmatprep.mubr.f32.mxu0 %v9171_v54  ;;  %v6005_v52 = vpack.c.bf16 %v2464_v46, %v2463_v51 }
 0x771   : > { %2739 = vmatmul.mubr.f32.gmra.mrb[46].mxu0 %v2431_v56  ;;  %v8228_v56 = vld [vmem:[%s7744_s17] sm:$0xff] }
 0x772   : > { %2744 = vmatprep.mubr.f32.mxu0 %v9171_v54  ;;  %v8233_v58 = vrot.slane %v8228_v56, %v9168_v53  ;;  %v8238_v1 = vrot.slane %v8228_v56, %v9169_v55 }
 0x774   : > { %v2851_v4 = vadd.f32 %v8238_v1, %v2656_v3 }
 0x775   : > { %2745 = vmatmul.mubr.f32.gmra.mrb[48].mxu0 %v2432_v6  ;;  %v2658_v6 = vpop.f32.mrb[19].mxu0 }
 0x776   : > { %2750 = vmatprep.mubr.f32.mxu0 %v9171_v54  ;;  %v8242_v7 = vadd.f32 %v8233_v58, %v2658_v6 }
 0x779   : > { %2751 = vmatmul.mubr.f32.gmra.mrb[50].mxu0 %v2433_v8  ;;  %v2662_v8 = vpop.f32.mrb[20].mxu0 }
 0x77a   : > { %2756 = vmatprep.mubr.f32.mxu0 %v9171_v54 }
 0x77d   : > { %2757 = vmatmul.mubr.f32.gmra.mrb[52].mxu0 %v2434_v10  ;;  %v2852_v10 = vadd.f32 %v8238_v1, %v2662_v8 }
 0x77e   : > { %2762 = vmatprep.mubr.f32.mxu0 %v9171_v54 }
 0x781   : > { %2763 = vmatmul.mubr.f32.gmra.mrb[54].mxu0 %v2435_v11  ;;  %v2664_v11 = vpop.f32.mrb[21].mxu0 }
 0x782   : > { %2768 = vmatprep.mubr.f32.mxu0 %v9171_v54 }
 0x785   : > { %2769 = vmatmul.mubr.f32.gmra.mrb[56].mxu0 %v2436_v12  ;;  %v8246_v12 = vadd.f32 %v8233_v58, %v2664_v11 }
 0x786   : > { %2774 = vmatprep.mubr.f32.mxu0 %v9171_v54 }
 0x789   : > { %2775 = vmatmul.mubr.f32.gmra.mrb[58].mxu0 %v2437_v13  ;;  %v2668_v13 = vpop.f32.mrb[22].mxu0 }
 0x78a   : > { %2780 = vmatprep.mubr.f32.mxu0 %v9171_v54 }
 0x78d   : > { %2781 = vmatmul.mubr.f32.gmra.mrb[60].mxu0 %v2438_v14  ;;  %v6621_v14 = vpack.i.bf16 %v2852_v10, %v2851_v4 }
 0x78e   : > { %2786 = vmatprep.mubr.f32.mxu0 %v9171_v54 }
 0x791   : > { %2787 = vmatmul.mubr.f32.gmra.mrb[62].mxu0 %v2439_v17  ;;  %v8248_v17 = vpack.c.bf16 %v2852_v10, %v2851_v4 }
 0x792   : > { %2792 = vmatprep.mubr.f32.mxu0 %v9171_v54 }
 0x795   : > { %2793 = vmatmul.mubr.f32.gmra.mrb[64].mxu0 %v2440_v18  ;;  %v2853_v18 = vadd.f32 %v8238_v1, %v2668_v13 }
 0x796   : > { %2798 = vmatprep.mubr.f32.mxu0 %v9171_v54 }
 0x799   : > { %2799 = vmatmul.mubr.f32.gmra.mrb[66].mxu0 %v2441_v19  ;;  %v2670_v19 = vpop.f32.mrb[23].mxu0 }
 0x79a   : > { %2804 = vmatprep.mubr.f32.mxu0 %v9171_v54 }
 0x79d   : > { %2805 = vmatmul.mubr.f32.gmra.mrb[68].mxu0 %v2442_v20 }
 0x79e   : > { %2810 = vmatprep.mubr.f32.mxu0 %v9171_v54 }
 0x7a1   : > { %2811 = vmatmul.mubr.f32.gmra.mrb[70].mxu0 %v2443_v5  ;;  %v8255_v5 = vpack.c.bf16 %v8246_v12, %v8242_v7 }
 0x7a2   : > { %2816 = vmatprep.mubr.f32.mxu0 %v9171_v54 }
 0x7a5   : > { %2817 = vmatmul.mubr.f32.gmra.mrb[72].mxu0 %v2444_v21  ;;  %v8258_v21 = vadd.f32 %v8233_v58, %v2670_v19 }
 0x7a6   : > { %2822 = vmatprep.mubr.f32.mxu0 %v9171_v54 }
 0x7a9   : > { %2823 = vmatmul.mubr.f32.gmra.mrb[74].mxu0 %v2445_v22  ;;  %v2674_v22 = vpop.f32.mrb[24].mxu0 }
 0x7aa   : > { %2828 = vmatprep.mubr.f32.mxu0 %v9171_v54 }
 0x7ad   : > { %2829 = vmatmul.mubr.f32.gmra.mrb[76].mxu0 %v2446_v23  ;;  %v2854_v23 = vadd.f32 %v8238_v1, %v2674_v22 }
 0x7ae   : > { %2834 = vmatprep.mubr.f32.mxu0 %v9171_v54 }
 0x7b1   : > { %2835 = vmatmul.mubr.f32.gmra.mrb[78].mxu0 %v2447_v24  ;;  %v2676_v24 = vpop.f32.mrb[25].mxu0 }
 0x7b2   : > { %2840 = vmatprep.mubr.f32.mxu0 %v9171_v54 }
 0x7b5   : > { %2841 = vmatmul.mubr.f32.gmra.mrb[80].mxu0 %v2448_v25  ;;  %v8266_v25 = vadd.f32 %v8233_v58, %v2676_v24 }
 0x7dd   : > { %v2359_v26 = vpop.xlane.xlu0 %2358 }
 0x7de   : > { %v2366_v27 = vmul.f32 0.0078125, %v2359_v26  ;;  %v2357_v16 = vpop.xlane.xlu1 %2356  ;;  %v2680_v26 = vpop.f32.mrb[26].mxu0 }
 0x7df   : > { %v2365_v28 = vmul.f32 0.0078125, %v2357_v16  ;;  %v8268_v16 = vpack.c.bf16 %v2854_v23, %v2853_v18 }
 0x7e0   : > { %v8196_v29 = vsub.f32 %v8148_v39, %v2366_v27  ;;  %v6626_v27 = vpack.i.bf16 %v2854_v23, %v2853_v18 }
 0x7e1   : > { %v8199_v31 = vsub.f32 %v8151_v40, %v2365_v28  ;;  %v2682_v28 = vpop.f32.mrb[27].mxu0 }
 0x7e2   : > { %v2374_v32 = vmul.f32 %v8196_v29, %v8196_v29 }
 0x7e3   : > { %v2373_v34 = vmul.f32 %v8199_v31, %v8199_v31 }
 0x7e4   : > { %2379 = vadd.xlane.f32.xlu0 %v2374_v32 }
 0x7e5   : > { %2377 = vadd.xlane.f32.xlu1 %v2373_v34  ;;  %v8274_v34 = vpack.c.bf16 %v8266_v25, %v8258_v21 }
 0x7e7   : > { %v2361_v35 = vpop.xlane.xlu1 %2360 }
 0x7e8   : > { %v2367_v36 = vmul.f32 0.0078125, %v2361_v35  ;;  %v2855_v35 = vadd.f32 %v8238_v1, %v2680_v26 }
 0x7ea   : > { %v8206_v37 = vsub.f32 %v8156_v0, %v2367_v36  ;;  %v5989_v0 = vpack.c.bf16 %v2456_v44, %v2455_v43  ;;  %v8279_v36 = vadd.f32 %v8233_v58, %v2682_v28 }
 0x7eb   : > { %v2363_v38 = vpop.xlane.xlu1 %2362 }
 0x7ec   : > { %v2368_v39 = vmul.f32 0.0078125, %v2363_v38  ;;  %v2375_v40 = vmul.f32 %v8206_v37, %v8206_v37  ;;  %5990 = vmatprep.subr.bf16.mxu1 %v5989_v0  ;;  %v2686_v38 = vpop.f32.mrb[28].mxu0 }
 0x7ed   : > { %5992 = vmatpush3.bf16.msra.mxu1 %v5989_v0 }
 0x7ee   : > { %v8211_v41 = vsub.f32 %v8161_v9, %v2368_v39  ;;  %2381 = vadd.xlane.f32.xlu1 %v2375_v40  ;;  %5994 = vmatprep.subr.bf16.mxu1 %v5993_v47  ;;  %v2459_v9 = vld [vmem:[%s7734_s7 + $0x50] sm:$0xff]  ;;  %v2856_v39 = vadd.f32 %v8238_v1, %v2686_v38  ;;  %v2688_v40 = vpop.f32.mrb[29].mxu0 }
 0x7ef   : > { %v5997_v48 = vpack.c.bf16 %v2460_v59, %v2459_v9 }
 0x7f0   : > { %v2376_v42 = vmul.f32 %v8211_v41, %v8211_v41  ;;  %v6631_v43 = vpack.i.bf16 %v2856_v39, %v2855_v35  ;;  %v8285_v44 = vpack.c.bf16 %v2856_v39, %v2855_v35 }
 0x7f1   : > { %5996 = vmatpush3.bf16.msra.mxu1 %v5993_v47 }
 0x7f2   : > { %2383 = vadd.xlane.f32.xlu0 %v2376_v42  ;;  %5998 = vmatprep.subr.bf16.mxu1 %v5997_v48  ;;  %v8283_v42 = vadd.f32 %v8233_v58, %v2688_v40 }
 0x7f4   : > { %v8291_v45 = vpack.c.bf16 %v8283_v42, %v8279_v36 }
 0x7f5   : > { %6000 = vmatpush3.bf16.msra.mxu1 %v5997_v48 }
 0x7f6   : > { %6002 = vmatprep.subr.bf16.mxu1 %v6001_v50 }
 0x7f9   : > { %6004 = vmatpush3.bf16.msra.mxu1 %v6001_v50 }
 0x7fa   : > { %6006 = vmatprep.subr.bf16.mxu1 %v6005_v52 }
 0x7fd   : > { %6008 = vmatpush3.bf16.msra.mxu1 %v6005_v52 }
 0x7fe   : > { %6043 = vmatprep.subr.msk.bf16.mxu1 %vm8002_vm2, %v8248_v17 }
 0x7ff   : > { %6622 = vrot.lane.b32.xlu1 %v6621_v14, %s7254_s18 }
 0x803   : > { %6632 = vrot.lane.b32.xlu1 %v6631_v43, %s7254_s18 }
 0x808   : > { %6627 = vrot.lane.b32.xlu0 %v6626_v27, %s7254_s18 }
 0x822   : > { %v2692_v57 = vpop.f32.mrb[30].mxu0 }
 0x823   : > { %v2694_v47 = vpop.f32.mrb[31].mxu0  ;;  %v2857_v9 = vadd.f32 %v8238_v1, %v2692_v57 }
 0x824   : > { %v8296_v59 = vadd.f32 %v8233_v58, %v2694_v47 }
 0x826   : > { %v2698_v48 = vpop.f32.mrb[32].mxu0 }
 0x827   : > { %v2858_v60 = vadd.f32 %v8238_v1, %v2698_v48  ;;  %v2700_v49 = vpop.f32.mrb[33].mxu0 }
 0x828   : > { %v8300_v50 = vadd.f32 %v8233_v58, %v2700_v49 }
 0x829   : > { %v6636_v51 = vpack.i.bf16 %v2858_v60, %v2857_v9  ;;  %v8302_v46 = vpack.c.bf16 %v2858_v60, %v2857_v9 }
 0x82a   : > { %v8308_v3 = vpack.c.bf16 %v8300_v50, %v8296_v59 }
 0x82b   : > { %6637 = vrot.lane.b32.xlu1 %v6636_v51, %s7254_s18 }
 0x82c   : > { %v2704_v4 = vpop.f32.mrb[34].mxu0 }
 0x82d   : > { %v2706_v6 = vpop.f32.mrb[35].mxu0  ;;  %v2859_v8 = vadd.f32 %v8238_v1, %v2704_v4 }
 0x82e   : > { %v8313_v10 = vadd.f32 %v8233_v58, %v2706_v6 }
 0x830   : > { %v2710_v11 = vpop.f32.mrb[36].mxu0 }
 0x831   : > { %v2860_v13 = vadd.f32 %v8238_v1, %v2710_v11  ;;  %v2712_v14 = vpop.f32.mrb[37].mxu0 }
 0x832   : > { %v8317_v18 = vadd.f32 %v8233_v58, %v2712_v14 }
 0x833   : > { %v6641_v19 = vpack.i.bf16 %v2860_v13, %v2859_v8  ;;  %v8319_v22 = vpack.c.bf16 %v2860_v13, %v2859_v8 }
 0x834   : > { %v8325_v24 = vpack.c.bf16 %v8317_v18, %v8313_v10  ;;  %v2716_v26 = vpop.f32.mrb[38].mxu0 }
 0x835   : > { %v2718_v27 = vpop.f32.mrb[39].mxu0  ;;  %6642 = vrot.lane.b32.xlu0 %v6641_v19, %s7254_s18  ;;  %v2861_v28 = vadd.f32 %v8238_v1, %v2716_v26 }
 0x836   : > { %v8330_v35 = vadd.f32 %v8233_v58, %v2718_v27 }
 0x838   : > { %v2722_v38 = vpop.f32.mrb[40].mxu0 }
 0x839   : > { %v2862_v39 = vadd.f32 %v8238_v1, %v2722_v38  ;;  %v2724_v40 = vpop.f32.mrb[41].mxu0 }
 0x83a   : > { %v8334_v43 = vadd.f32 %v8233_v58, %v2724_v40 }
 0x83b   : > { %v6646_v57 = vpack.i.bf16 %v2862_v39, %v2861_v28  ;;  %v8336_v47 = vpack.c.bf16 %v2862_v39, %v2861_v28 }
 0x83c   : > { %v8342_v48 = vpack.c.bf16 %v8334_v43, %v8330_v35  ;;  %v2728_v60 = vpop.f32.mrb[42].mxu0 }
 0x83d   : > { %v2730_v49 = vpop.f32.mrb[43].mxu0  ;;  %6647 = vrot.lane.b32.xlu1 %v6646_v57, %s7254_s18  ;;  %v2863_v51 = vadd.f32 %v8238_v1, %v2728_v60 }
 0x83e   : > { %v8347_v4 = vadd.f32 %v8233_v58, %v2730_v49 }
 0x840   : > { %v2734_v6 = vpop.f32.mrb[44].mxu0 }
 0x841   : > { %v2864_v8 = vadd.f32 %v8238_v1, %v2734_v6  ;;  %v2736_v11 = vpop.f32.mrb[45].mxu0 }
 0x842   : > { %v8351_v13 = vadd.f32 %v8233_v58, %v2736_v11 }
 0x843   : > { %v6651_v14 = vpack.i.bf16 %v2864_v8, %v2863_v51  ;;  %v8353_v19 = vpack.c.bf16 %v2864_v8, %v2863_v51 }
 0x844   : > { %v8359_v27 = vpack.c.bf16 %v8351_v13, %v8347_v4  ;;  %v2740_v28 = vpop.f32.mrb[46].mxu0 }
 0x845   : > { %v2742_v38 = vpop.f32.mrb[47].mxu0  ;;  %6652 = vrot.lane.b32.xlu0 %v6651_v14, %s7254_s18  ;;  %v2865_v39 = vadd.f32 %v8238_v1, %v2740_v28 }
 0x846   : > { %v8364_v40 = vadd.f32 %v8233_v58, %v2742_v38 }
 0x848   : > { %9248 = vst [vmem:[#allocation27_spill] sm:$0xff] %v8364_v40  ;;  %v2746_v57 = vpop.f32.mrb[48].mxu0 }
 0x849   : > { %v2866_v60 = vadd.f32 %v8238_v1, %v2746_v57  ;;  %v2748_v49 = vpop.f32.mrb[49].mxu0 }
 0x84a   : > { %v8368_v51 = vadd.f32 %v8233_v58, %v2748_v49 }
 0x84b   : > { %v6656_v6 = vpack.i.bf16 %v2866_v60, %v2865_v39  ;;  %v8370_v8 = vpack.c.bf16 %v2866_v60, %v2865_v39 }
 0x84c   : > { %9249 = vst [vmem:[#allocation28_spill] sm:$0xff] %v8368_v51  ;;  %v8376_v14 = vpack.c.bf16 %v8368_v51, %v8364_v40  ;;  %v2752_v28 = vpop.f32.mrb[50].mxu0 }
 0x84d   : > { %v2754_v38 = vpop.f32.mrb[51].mxu0  ;;  %6657 = vrot.lane.b32.xlu1 %v6656_v6, %s7254_s18  ;;  %v2867_v57 = vadd.f32 %v8238_v1, %v2752_v28 }
 0x84e   : > { %9250 = vst [vmem:[#allocation29_spill] sm:$0xff] %v8376_v14  ;;  %v8381_v53 = vadd.f32 %v8233_v58, %v2754_v38 }
 0x850   : > { %9251 = vst [vmem:[#allocation30_spill] sm:$0xff] %v8381_v53  ;;  %v2758_v49 = vpop.f32.mrb[52].mxu0 }
 0x851   : > { %v2868_v39 = vadd.f32 %v8238_v1, %v2758_v49  ;;  %v2760_v60 = vpop.f32.mrb[53].mxu0 }
 0x852   : > { %v8385_v55 = vadd.f32 %v8233_v58, %v2760_v60 }
 0x853   : > { %v6661_v33 = vpack.i.bf16 %v2868_v39, %v2867_v57  ;;  %v6137_v54 = vpack.c.bf16 %v2868_v39, %v2867_v57 }
 0x854   : > { %v8391_v6 = vpack.c.bf16 %v8385_v55, %v8381_v53  ;;  %v2764_v28 = vpop.f32.mrb[54].mxu0 }
 0x855   : > { %6139 = vmatprep.subr.msk.bf16.mxu0 %vm8002_vm2, %v6137_v54  ;;  %v2766_v38 = vpop.f32.mrb[55].mxu0  ;;  %6662 = vrot.lane.b32.xlu0 %v6661_v33, %s7254_s18  ;;  %v8399_v49 = vadd.f32 %v8238_v1, %v2764_v28 }
 0x856   : > { %9252 = vst [vmem:[#allocation31_spill] sm:$0xff] %v8391_v6  ;;  %6142 = vmatpush3.bf16.xpose.msk.msra.mxu0 %vm8002_vm2, %v6137_v54  ;;  %v8402_v57 = vadd.f32 %v8233_v58, %v2766_v38 }
 0x858   : > { %9253 = vst [vmem:[#allocation32_spill] sm:$0xff] %v8402_v57  ;;  %v2770_v39 = vpop.f32.mrb[56].mxu0 }
 0x859   : > { %v8405_v60 = vadd.f32 %v8238_v1, %v2770_v39  ;;  %v2772_v11 = vpop.f32.mrb[57].mxu0 }
 0x85a   : > { %v8408_v61 = vadd.f32 %v8233_v58, %v2772_v11 }
 0x85b   : > { %v6143_v54 = vpack.c.bf16 %v8405_v60, %v8399_v49 }
 0x85c   : > { %9254 = vst [vmem:[#allocation33_spill] sm:$0xff] %v8408_v61  ;;  %v8418_v38 = vpack.c.bf16 %v8408_v61, %v8402_v57  ;;  %v2776_v9 = vpop.f32.mrb[58].mxu0 }
 0x85d   : > { %6145 = vmatprep.subr.msk.bf16.mxu0 %vm8002_vm2, %v6143_v54  ;;  %v2778_v39 = vpop.f32.mrb[59].mxu0  ;;  %v8425_v11 = vadd.f32 %v8238_v1, %v2776_v9 }
 0x85e   : > { %9255 = vst [vmem:[#allocation34_spill] sm:$0xff] %v8418_v38  ;;  %6148 = vmatpush3.bf16.xpose.msk.msra.mxu0 %vm8002_vm2, %v6143_v54  ;;  %v8428_v26 = vadd.f32 %v8233_v58, %v2778_v39 }
 0x860   : > { %9256 = vst [vmem:[#allocation35_spill] sm:$0xff] %v8428_v26  ;;  %v2782_v52 = vpop.f32.mrb[60].mxu0 }
 0x861   : > { %v8431_v28 = vadd.f32 %v8238_v1, %v2782_v52  ;;  %v2784_v23 = vpop.f32.mrb[61].mxu0 }
 0x862   : > { %v8434_v32 = vadd.f32 %v8233_v58, %v2784_v23 }
 0x863   : > { %v6149_v54 = vpack.c.bf16 %v8431_v28, %v8425_v11 }
 0x864   : > { %9257 = vst [vmem:[#allocation36_spill] sm:$0xff] %v8434_v32  ;;  %v8444_v39 = vpack.c.bf16 %v8434_v32, %v8428_v26  ;;  %v2788_v20 = vpop.f32.mrb[62].mxu0 }
 0x865   : > { %6151 = vmatprep.subr.msk.bf16.mxu0 %vm8002_vm2, %v6149_v54  ;;  %v2790_v23 = vpop.f32.mrb[63].mxu0  ;;  %v8451_v63 = vadd.f32 %v8238_v1, %v2788_v20 }
 0x866   : > { %9258 = vst [vmem:[#allocation37_spill] sm:$0xff] %v8444_v39  ;;  %6154 = vmatpush3.bf16.xpose.msk.msra.mxu0 %vm8002_vm2, %v6149_v54  ;;  %v8454_v38 = vadd.f32 %v8233_v58, %v2790_v23 }
 0x868   : > { %9259 = vst [vmem:[#allocation38_spill] sm:$0xff] %v8454_v38  ;;  %v2794_v39 = vpop.f32.mrb[64].mxu0 }
 0x869   : > { %v8457_v57 = vadd.f32 %v8238_v1, %v2794_v39  ;;  %v2796_v61 = vpop.f32.mrb[65].mxu0  ;;  %v1186_v39 = vld [vmem:[%s7744_s17 + $0x8] sm:$0xff] }
 0x86b   : > { %v6155_v20 = vpack.c.bf16 %v8457_v57, %v8451_v63 }
 0x86c   : > { %v2800_v54 = vpop.f32.mrb[66].mxu0 }
 0x86d   : > { %6157 = vmatprep.subr.msk.bf16.mxu0 %vm8002_vm2, %v6155_v20 }
 0x86e   : > { %6160 = vmatpush3.bf16.xpose.msk.msra.mxu0 %vm8002_vm2, %v6155_v20  ;;  %v2404_v20 = vrot.slane %v1186_v39, %v7995_v2 }
 0x871   : > { %v2380_v52 = vpop.xlane.xlu0 %2379 }
 0x872   : > { %v2386_v33 = vmul.f32 0.0078125, %v2380_v52  ;;  %v2378_v30 = vpop.xlane.xlu1 %2377  ;;  %v8460_v52 = vadd.f32 %v8233_v58, %v2796_v61  ;;  %v2802_v61 = vpop.f32.mrb[67].mxu0 }
 0x873   : > { %v2385_v0 = vmul.f32 0.0078125, %v2378_v30  ;;  %v2806_v30 = vpop.f32.mrb[68].mxu0 }
 0x874   : > { %v2390_v9 = vadd.f32 1e-05, %v2386_v33  ;;  %9260 = vst [vmem:[#allocation39_spill] sm:$0xff] %v8460_v52  ;;  %v8481_v33 = vadd.f32 %v8233_v58, %v2802_v61 }
 0x875   : > { %v2389_v6 = vadd.f32 1e-05, %v2385_v0  ;;  %v8470_v0 = vpack.c.bf16 %v8460_v52, %v8454_v38  ;;  %v2808_v38 = vpop.f32.mrb[69].mxu0 }
 0x876   : > { %6823 = vrsqrt.f32 %v2390_v9  ;;  %v8477_v9 = vadd.f32 %v8238_v1, %v2800_v54  ;;  %9262 = vst [vmem:[#allocation41_spill] sm:$0xff] %v8481_v33  ;;  %v8487_v26 = vadd.f32 %v8233_v58, %v2808_v38  ;;  %v2812_v38 = vpop.f32.mrb[70].mxu0 }
 0x877   : > { %6825 = vrsqrt.f32 %v2389_v6  ;;  %9261 = vst [vmem:[#allocation40_spill] sm:$0xff] %v8470_v0  ;;  %v8484_v0 = vadd.f32 %v8238_v1, %v2806_v30  ;;  %v2814_v54 = vpop.f32.mrb[71].mxu0 }
 0x878   : > { %9263 = vst [vmem:[#allocation42_spill] sm:$0xff] %v8487_v26 }
 0x87b   : > { %v2382_v6 = vpop.xlane.xlu1 %2381 }
 0x87c   : > { %v2387_v23 = vmul.f32 0.0078125, %v2382_v6  ;;  %v6161_v6 = vpack.c.bf16 %v8484_v0, %v8477_v9 }
 0x87e   : > { %v2391_v52 = vadd.f32 1e-05, %v2387_v23  ;;  %v8498_v23 = vpack.c.bf16 %v8487_v26, %v8481_v33  ;;  %6163 = vmatprep.subr.msk.bf16.mxu0 %vm8002_vm2, %v6161_v6  ;;  %v8509_v33 = vadd.f32 %v8238_v1, %v2812_v38 }
 0x87f   : > { %v2384_v32 = vpop.xlane.xlu0 %2383  ;;  %6166 = vmatpush3.bf16.xpose.msk.msra.mxu0 %vm8002_vm2, %v6161_v6 }
 0x880   : > { %v6824_v61 = vpop.eup %6823  ;;  %6827 = vrsqrt.f32 %v2391_v52  ;;  %v2388_v14 = vmul.f32 0.0078125, %v2384_v32  ;;  %v9264_v32 = vsub.s32 2, %v7984_v62 }
 0x881   : > { %v6826_v40 = vpop.eup %6825  ;;  %v2398_v2 = vmul.f32 %v6824_v61, %v8196_v29  ;;  %v8512_v29 = vadd.f32 %v8233_v58, %v2814_v54  ;;  %v2818_v61 = vpop.f32.mrb[72].mxu0 }
 0x882   : > { %v2392_v51 = vadd.f32 1e-05, %v2388_v14  ;;  %v2397_v53 = vmul.f32 %v6826_v40, %v8199_v31  ;;  %v2412_v52 = vrot.slane %v1186_v39, %v9264_v32  ;;  %v8515_v14 = vadd.f32 %v8238_v1, %v2818_v61  ;;  %v2820_v31 = vpop.f32.mrb[73].mxu0 }
 0x883   : > { %v2406_v30 = vmul.f32 %v2404_v20, %v2398_v2  ;;  %9265 = vst [vmem:[#allocation43_spill] sm:$0xff] %v8512_v29  ;;  %v8520_v39 = vadd.f32 %v8233_v58, %v2820_v31  ;;  %v2824_v54 = vpop.f32.mrb[74].mxu0 }
 0x884   : > { %6829 = vrsqrt.f32 %v2392_v51  ;;  %v2405_v26 = vmul.f32 %v2404_v20, %v2397_v53  ;;  %v6167_v53 = vpack.c.bf16 %v8515_v14, %v8509_v33  ;;  %v8545_v61 = vadd.f32 %v8238_v1, %v2824_v54 }
 0x885   : > { %v8522_v6 = vadd.f32 %v2412_v52, %v2406_v30  ;;  %v2826_v30 = vpop.f32.mrb[75].mxu0 }
 0x886   : > { %v8517_v40 = vadd.f32 %v2412_v52, %v2405_v26  ;;  %v8533_v26 = vpack.c.bf16 %v8520_v39, %v8512_v29  ;;  %6169 = vmatprep.subr.msk.bf16.mxu0 %vm8002_vm2, %v6167_v53  ;;  %v8551_v31 = vadd.f32 %v8233_v58, %v2826_v30  ;;  %v2830_v51 = vpop.f32.mrb[76].mxu0 }
 0x887   : > { %9267 = vst [vmem:[#allocation45_spill] sm:$0xff] %v8522_v6  ;;  %6172 = vmatpush3.bf16.xpose.msk.msra.mxu0 %vm8002_vm2, %v6167_v53  ;;  %v8554_v53 = vadd.f32 %v8238_v1, %v2830_v51 }
 0x888   : > { %9266 = vst [vmem:[#allocation44_spill] sm:$0xff] %v8517_v40  ;;  %5501 = vmatprep.mubr.f32.mxu1 %v8517_v40  ;;  %v2832_v40 = vpop.f32.mrb[77].mxu0 }
 0x889   : > { %5502 = vmatmul.mubr.f32.vlgmr.msra.gmra.mrb[14].mxu1 %v8522_v6  ;;  %v6173_v30 = vpack.c.bf16 %v8554_v53, %v8545_v61  ;;  %v2836_v29 = vpop.f32.mrb[78].mxu0 }
 0x88a   : > { %v6828_v38 = vpop.eup %6827  ;;  %6046 = vmatpush3.bf16.xpose.msk.msra.mxu1 %vm8002_vm2, %v8248_v17  ;;  %v8557_v17 = vadd.f32 %v8233_v58, %v2832_v40 }
 0x88b   : > { %v2399_v32 = vmul.f32 %v6828_v38, %v8206_v37  ;;  %6049 = vmatprep.subr.msk.bf16.mxu1 %vm8002_vm2, %v8268_v16  ;;  %6175 = vmatprep.subr.msk.bf16.mxu0 %vm8002_vm2, %v6173_v30 }
 0x88c   : > { %v8570_v51 = vpack.c.bf16 %v8557_v17, %v8551_v31 }
 0x88d   : > { %v2407_v2 = vmul.f32 %v2404_v20, %v2399_v32 }
 0x88e   : > { %v6830_v6 = vpop.eup %6829 }
 0x88f   : > { %v8559_v37 = vadd.f32 %v2412_v52, %v2407_v2  ;;  %v2400_v54 = vmul.f32 %v6830_v6, %v8211_v41  ;;  %v2838_v41 = vpop.f32.mrb[79].mxu0  ;;  %6178 = vmatpush3.bf16.xpose.msk.msra.mxu0 %vm8002_vm2, %v6173_v30  ;;  %v8583_v2 = vadd.f32 %v8238_v1, %v2836_v29 }
 0x891   : > { %5504 = vmatprep.mubr.f32.mxu1 %v8559_v37  ;;  %v2408_v40 = vmul.f32 %v2404_v20, %v2400_v54  ;;  %v2842_v20 = vpop.f32.mrb[80].mxu0 }
 0x892   : > { %6052 = vmatpush3.bf16.xpose.msk.msra.mxu1 %vm8002_vm2, %v8268_v16  ;;  %v8590_v54 = vadd.f32 %v8238_v1, %v2842_v20  ;;  %v6623_v1 = vpop.permute.xlu1 %6622  ;;  %v6628_v20 = vpop.permute.xlu0 %6627 }
 0x893   : > { %v8580_v6 = vadd.f32 %v2412_v52, %v2408_v40  ;;  %6055 = vmatprep.subr.msk.bf16.mxu1 %vm8002_vm2, %v8285_v44  ;;  %v2467_v40 = vsub.s32 4, %v7984_v62 }
 0x894   : > { %v6179_v16 = vpack.c.bf16 %v8590_v54, %v8583_v2 }
 0x895   : > { %5505 = vmatmul.mubr.f32.gmra.mrb[16].mxu1 %v8580_v6 }
 0x896   : > { %6181 = vmatprep.subr.msk.bf16.mxu0 %vm8002_vm2, %v6179_v16  ;;  %v6633_v38 = vpop.permute.xlu1 %6632 }
 0x897   : > { %6184 = vmatpush3.bf16.xpose.msk.msra.mxu0 %vm8002_vm2, %v6179_v16 }
 0x898   : > { %6234 = vmatprep.subr.bf16.mxu0 %v8255_v5 }
 0x89a   : > { %6058 = vmatpush3.bf16.xpose.msk.msra.mxu1 %vm8002_vm2, %v8285_v44  ;;  %v8635_v44 = vadd.f32 %v8233_v58, %v2838_v41  ;;  %v2468_v41 = vrot.slane %v8228_v56, %v2467_v40  ;;  %v9268_v56 = vpack.i.bf16 %v8431_v28, %v8425_v11 }
 0x89b   : > { %6061 = vmatprep.subr.msk.bf16.mxu1 %vm8002_vm2, %v8302_v46 }
 0x8a2   : > { %6064 = vmatpush3.bf16.xpose.msk.msra.mxu1 %vm8002_vm2, %v8302_v46  ;;  %v6625_v46 = vunpack.i.h.bf16 %v6623_v1 }
 0x8a3   : > { %6067 = vmatprep.subr.msk.bf16.mxu1 %vm8002_vm2, %v8319_v22 }
 0x8aa   : > { %6070 = vmatpush3.bf16.xpose.msk.msra.mxu1 %vm8002_vm2, %v8319_v22  ;;  %v6624_v22 = vunpack.i.l.bf16 %v6623_v1 }
 0x8ab   : > { %6073 = vmatprep.subr.msk.bf16.mxu1 %vm8002_vm2, %v8336_v47 }
 0x8ac   : > { %v6089_v52 = vpack.c.bf16 %v6625_v46, %v6624_v22  ;;  %v6630_v46 = vunpack.i.h.bf16 %v6628_v20  ;;  %v6629_v22 = vunpack.i.l.bf16 %v6628_v20  ;;  %v6635_v20 = vunpack.i.h.bf16 %v6633_v38 }
 0x8b2   : > { %6076 = vmatpush3.bf16.xpose.msk.msra.mxu1 %vm8002_vm2, %v8336_v47  ;;  %v2844_v47 = vpop.f32.mrb[81].mxu0 }
 0x8b3   : > { %6079 = vmatprep.subr.msk.bf16.mxu1 %vm8002_vm2, %v8353_v19  ;;  %v8638_v29 = vadd.f32 %v8233_v58, %v2844_v47 }
 0x8ba   : > { %6082 = vmatpush3.bf16.xpose.msk.msra.mxu1 %vm8002_vm2, %v8353_v19  ;;  %v6095_v19 = vpack.c.bf16 %v6630_v46, %v6629_v22  ;;  %v9271_v46 = vpack.i.bf16 %v8457_v57, %v8451_v63 }
 0x8bb   : > { %6085 = vmatprep.subr.msk.bf16.mxu1 %vm8002_vm2, %v8370_v8 }
 0x8c2   : > { %6088 = vmatpush3.bf16.xpose.msk.msra.mxu1 %vm8002_vm2, %v8370_v8  ;;  %v8646_v8 = vpack.c.bf16 %v8638_v29, %v8635_v44 }
 0x8c3   : > { %6091 = vmatprep.subr.msk.bf16.mxu1 %vm8002_vm2, %v6089_v52 }
 0x95c   : > { %v5503_v16 = vpop.f32.mrb[14].mxu1 }
 0x95d   : > { %v2541_v58 = vadd.f32 %v5503_v16, %v2468_v41  ;;  %v2535_v1 = vpop.f32.mrb[15].mxu1  ;;  %v6634_v16 = vunpack.i.l.bf16 %v6633_v38  ;;  %v6638_v38 = vpop.permute.xlu1 %6637 }
 0x95e   : > { %v2536_v47 = vadd.f32 %v2535_v1, %v2468_v41  ;;  %v6640_v63 = vunpack.i.h.bf16 %v6638_v38  ;;  %v6639_v57 = vunpack.i.l.bf16 %v6638_v38 }
 0x95f   : > { %v2555_v32 = vmul.f32 0.125, %v2541_v58  ;;  %v6101_v28 = vpack.c.bf16 %v6635_v20, %v6634_v16 }
 0x960   : > { %v2554_v30 = vmul.f32 0.125, %v2536_v47  ;;  %v9291_v47 = vld [vmem:[#allocation33_spill] sm:$0xff] }
 0x961   : > { %2925 = vrot.lane.b32.xlu0 %v2555_v32, %s7254_s18 }
 0x962   : > { %2923 = vrot.lane.b32.xlu1 %v2554_v30, %s7254_s18  ;;  %5539 = vmatprep.mubr.msk.f32.mxu1 %vm1481_vm1, %v2554_v30  ;;  %v9269_v30 = vpack.i.bf16 %v8405_v60, %v8399_v49  ;;  %v9272_v60 = vpack.i.bf16 %v8554_v53, %v8545_v61  ;;  %v6107_v61 = vpack.c.bf16 %v6640_v63, %v6639_v57 }
 0x963   : > { %5540 = vmatmul.mubr.msk.f32.vlgmr.msra.gmra.mrb[18].mxu1 %vm1481_vm1, %v2555_v32 }
 0x964   : > { %6094 = vmatpush3.bf16.xpose.msk.msra.mxu1 %vm8002_vm2, %v6089_v52  ;;  %v9270_v52 = vpack.i.bf16 %v8484_v0, %v8477_v9  ;;  %v9273_v0 = vpack.i.bf16 %v8515_v14, %v8509_v33  ;;  %v9274_v9 = vpack.i.bf16 %v8590_v54, %v8583_v2  ;;  %v6643_v33 = vpop.permute.xlu0 %6642  ;;  %v6648_v2 = vpop.permute.xlu1 %6647  ;;  %v9288_v54 = vld [vmem:[#allocation36_spill] sm:$0xff] }
 0x965   : > { %6672 = vrot.lane.b32.xlu0 %v9268_v56, %s7254_s18  ;;  %6097 = vmatprep.subr.msk.bf16.mxu1 %vm8002_vm2, %v6095_v19  ;;  %v6645_v14 = vunpack.i.h.bf16 %v6643_v33  ;;  %v6644_v53 = vunpack.i.l.bf16 %v6643_v33  ;;  %v9292_v56 = vld [vmem:[#allocation32_spill] sm:$0xff] }
 0x966   : > { %6667 = vrot.lane.b32.xlu1 %v9269_v30, %s7254_s18  ;;  %v9293_v20 = vpack.i.bf16 %v9291_v47, %v9292_v56  ;;  %v9298_v56 = vld [vmem:[#allocation34_spill] sm:$0xff] }
 0x968   : > { %v5506_v58 = vpop.f32.mrb[16].mxu1  ;;  %v6658_v16 = vpop.permute.xlu1 %6657 }
 0x969   : > { %v2551_v32 = vadd.f32 %v5506_v58, %v2468_v41  ;;  %6682 = vrot.lane.b32.xlu0 %v9270_v52, %s7254_s18  ;;  %v2545_v1 = vpop.f32.mrb[17].mxu1  ;;  %v6659_v30 = vunpack.i.l.bf16 %v6658_v16  ;;  %v9294_v58 = vld [vmem:[#allocation39_spill] sm:$0xff] }
 0x96a   : > { %v2546_v11 = vadd.f32 %v2545_v1, %v2468_v41  ;;  %6677 = vrot.lane.b32.xlu1 %v9271_v46, %s7254_s18 }
 0x96b   : > { %v2557_v49 = vmul.f32 0.125, %v2551_v32  ;;  %v9295_v32 = vld [vmem:[#allocation38_spill] sm:$0xff] }
 0x96c   : > { %v2556_v22 = vmul.f32 0.125, %v2546_v11  ;;  %6100 = vmatpush3.bf16.xpose.msk.msra.mxu1 %vm8002_vm2, %v6095_v19  ;;  %v9289_v19 = vld [vmem:[#allocation35_spill] sm:$0xff]  ;;  %v9296_v52 = vpack.i.bf16 %v9294_v58, %v9295_v32 }
 0x96d   : > { %6692 = vrot.lane.b32.xlu0 %v9272_v60, %s7254_s18  ;;  %6103 = vmatprep.subr.msk.bf16.mxu1 %vm8002_vm2, %v6101_v28  ;;  %v9290_v41 = vpack.i.bf16 %v9288_v54, %v9289_v19 }
 0x96e   : > { %6687 = vrot.lane.b32.xlu1 %v9273_v0, %s7254_s18  ;;  %5609 = vmatprep.mubr.msk.f32.mxu0 %vm1481_vm1, %v2556_v22 }
 0x96f   : > { %5610 = vmatmul.mubr.msk.f32.vlgmr.msra.gmra.mrb[82].mxu0 %vm1481_vm1, %v2557_v49 }
 0x970   : > { %6236 = vmatpush3.bf16.msra.mxu0 %v8255_v5  ;;  %v9275_v5 = vpack.i.bf16 %v8246_v12, %v8242_v7  ;;  %v9277_v7 = vpack.i.bf16 %v8266_v25, %v8258_v21  ;;  %v6113_v12 = vpack.c.bf16 %v6645_v14, %v6644_v53  ;;  %v6650_v21 = vunpack.i.h.bf16 %v6648_v2 }
 0x971   : > { %6238 = vmatprep.subr.bf16.mxu0 %v8274_v34  ;;  %2927 = vrot.lane.b32.xlu0 %v2556_v22, %s7254_s18  ;;  %v6649_v25 = vunpack.i.l.bf16 %v6648_v2 }
 0x972   : > { %6697 = vrot.lane.b32.xlu1 %v9274_v9, %s7254_s18 }
 0x974   : > { %6240 = vmatpush3.bf16.msra.mxu0 %v8274_v34  ;;  %6106 = vmatpush3.bf16.xpose.msk.msra.mxu1 %vm8002_vm2, %v6101_v28  ;;  %v9276_v34 = vpack.i.bf16 %v8283_v42, %v8279_v36  ;;  %v9279_v36 = vpack.i.bf16 %v8300_v50, %v8296_v59  ;;  %v9280_v42 = vpack.i.bf16 %v8351_v13, %v8347_v4  ;;  %v6653_v50 = vpop.permute.xlu0 %6652  ;;  %v9284_v13 = vld [vmem:[#allocation28_spill] sm:$0xff] }
 0x975   : > { %6242 = vmatprep.subr.bf16.mxu0 %v8291_v45  ;;  %6702 = vrot.lane.b32.xlu0 %v9275_v5, %s7254_s18  ;;  %v6119_v59 = vpack.c.bf16 %v6650_v21, %v6649_v25  ;;  %v6654_v4 = vunpack.i.l.bf16 %v6653_v50 }
 0x976   : > { %2929 = vrot.lane.b32.xlu1 %v2557_v49, %s7254_s18  ;;  %6109 = vmatprep.subr.msk.bf16.mxu1 %vm8002_vm2, %v6107_v61 }
 0x978   : > { %6244 = vmatpush3.bf16.msra.mxu0 %v8291_v45  ;;  %v9278_v45 = vpack.i.bf16 %v8317_v18, %v8313_v10  ;;  %v9282_v10 = vld [vmem:[#allocation30_spill] sm:$0xff]  ;;  %v6663_v28 = vpop.permute.xlu0 %6662 }
 0x979   : > { %6246 = vmatprep.subr.bf16.mxu0 %v8308_v3  ;;  %6712 = vrot.lane.b32.xlu0 %v9276_v34, %s7254_s18  ;;  %v9283_v18 = vpack.i.bf16 %v8385_v55, %v9282_v10  ;;  %v6665_v11 = vunpack.i.h.bf16 %v6663_v28  ;;  %v6664_v46 = vunpack.i.l.bf16 %v6663_v28 }
 0x97a   : > { %6707 = vrot.lane.b32.xlu1 %v9277_v7, %s7254_s18 }
 0x97b   : > { %v6185_v38 = vpack.c.bf16 %v6665_v11, %v6664_v46 }
 0x97c   : > { %6248 = vmatpush3.bf16.msra.mxu0 %v8308_v3  ;;  %6112 = vmatpush3.bf16.xpose.msk.msra.mxu1 %vm8002_vm2, %v6107_v61  ;;  %v9281_v3 = vpack.i.bf16 %v8334_v43, %v8330_v35  ;;  %v9285_v35 = vld [vmem:[#allocation27_spill] sm:$0xff] }
 0x97d   : > { %6250 = vmatprep.subr.bf16.mxu0 %v8325_v24  ;;  %6722 = vrot.lane.b32.xlu0 %v9278_v45, %s7254_s18  ;;  %v9286_v43 = vpack.i.bf16 %v9284_v13, %v9285_v35 }
 0x97e   : > { %6717 = vrot.lane.b32.xlu1 %v9279_v36, %s7254_s18  ;;  %6115 = vmatprep.subr.msk.bf16.mxu1 %vm8002_vm2, %v6113_v12 }
 0x980   : > { %6252 = vmatpush3.bf16.msra.mxu0 %v8325_v24  ;;  %v6655_v24 = vunpack.i.h.bf16 %v6653_v50 }
 0x981   : > { %6254 = vmatprep.subr.bf16.mxu0 %v8342_v48  ;;  %6732 = vrot.lane.b32.xlu0 %v9280_v42, %s7254_s18 }
 0x982   : > { %6727 = vrot.lane.b32.xlu1 %v9281_v3, %s7254_s18  ;;  %v6125_v55 = vpack.c.bf16 %v6655_v24, %v6654_v4 }
 0x984   : > { %6256 = vmatpush3.bf16.msra.mxu0 %v8342_v48  ;;  %6118 = vmatpush3.bf16.xpose.msk.msra.mxu1 %vm8002_vm2, %v6113_v12  ;;  %v9287_v48 = vld [vmem:[#allocation29_spill] sm:$0xff] }
 0x985   : > { %6258 = vmatprep.subr.bf16.mxu0 %v8359_v27  ;;  %6742 = vrot.lane.b32.xlu0 %v9283_v18, %s7254_s18 }
 0x986   : > { %6737 = vrot.lane.b32.xlu1 %v9286_v43, %s7254_s18  ;;  %6121 = vmatprep.subr.msk.bf16.mxu1 %vm8002_vm2, %v6119_v59 }
 0x988   : > { %6260 = vmatpush3.bf16.msra.mxu0 %v8359_v27  ;;  %v6660_v27 = vunpack.i.h.bf16 %v6658_v16  ;;  %v9300_v16 = vld [vmem:[#allocation40_spill] sm:$0xff] }
 0x989   : > { %6262 = vmatprep.subr.bf16.mxu0 %v9287_v48  ;;  %6752 = vrot.lane.b32.xlu0 %v9290_v41, %s7254_s18 }
 0x98a   : > { %6747 = vrot.lane.b32.xlu1 %v9293_v20, %s7254_s18  ;;  %v6131_v1 = vpack.c.bf16 %v6660_v27, %v6659_v30  ;;  %v9299_v20 = vld [vmem:[#allocation37_spill] sm:$0xff]  ;;  %v8836_v27 = vand.u32 127, %v9301_v15 }
 0x98c   : > { %6264 = vmatpush3.bf16.msra.mxu0 %v9287_v48  ;;  %6124 = vmatpush3.bf16.xpose.msk.msra.mxu1 %vm8002_vm2, %v6119_v59  ;;  %vm3601_vm4 = vcmp.lt.s32.totalorder %v8836_v27, 8 }
 0x98d   : > { %6127 = vmatprep.subr.msk.bf16.mxu1 %vm8002_vm2, %v6125_v55 }
 0x98e   : > { %6757 = vrot.lane.b32.xlu1 %v9296_v52, %s7254_s18 }
 0x994   : > { %6130 = vmatpush3.bf16.xpose.msk.msra.mxu1 %vm8002_vm2, %v6125_v55  ;;  %v9297_v55 = vld [vmem:[#allocation31_spill] sm:$0xff] }
 0x995   : > { %6133 = vmatprep.subr.msk.bf16.mxu1 %vm8002_vm2, %v6131_v1 }
 0x99c   : > { %6136 = vmatpush3.bf16.xpose.msk.msra.mxu1 %vm8002_vm2, %v6131_v1 }
 0x99d   : > { %6187 = vmatprep.subr.msk.bf16.mxu1 %vm8002_vm2, %v6185_v38 }
 0x9d3   : > { %v2926_v22 = vpop.permute.xlu0 %2925 }
 0x9d4   : > { %v2924_v49 = vpop.permute.xlu1 %2923 }
 0x9d5   : > { %5574 = vmatprep.mubr.msk.f32.mxu1 %vm1481_vm1, %v2924_v49 }
 0x9d6   : > { %5575 = vmatmul.mubr.msk.f32.vlgmr.msra.gmra.mrb[20].mxu1 %vm1481_vm1, %v2926_v22 }
 0x9d7   : > { %6190 = vmatpush3.bf16.xpose.msk.msra.mxu1 %vm8002_vm2, %v6185_v38  ;;  %v6673_v60 = vpop.permute.xlu0 %6672 }
 0x9d8   : > { %v6675_v0 = vunpack.i.h.bf16 %v6673_v60  ;;  %v6674_v63 = vunpack.i.l.bf16 %v6673_v60  ;;  %v6668_v57 = vpop.permute.xlu1 %6667 }
 0x9d9   : > { %v6670_v9 = vunpack.i.h.bf16 %v6668_v57  ;;  %v6669_v61 = vunpack.i.l.bf16 %v6668_v57 }
 0x9da   : > { %v6197_v14 = vpack.c.bf16 %v6675_v0, %v6674_v63 }
 0x9db   : > { %v6191_v33 = vpack.c.bf16 %v6670_v9, %v6669_v61  ;;  %v6683_v5 = vpop.permute.xlu0 %6682  ;;  %v9302_v9 = vld [vmem:[#allocation43_spill] sm:$0xff] }
 0x9dc   : > { %v6678_v53 = vpop.permute.xlu1 %6677  ;;  %v6685_v21 = vunpack.i.h.bf16 %v6683_v5  ;;  %v6684_v25 = vunpack.i.l.bf16 %v6683_v5  ;;  %v9303_v61 = vpack.i.bf16 %v8520_v39, %v9302_v9 }
 0x9dd   : > { %6193 = vmatprep.subr.msk.bf16.mxu1 %vm8002_vm2, %v6191_v33  ;;  %v6680_v7 = vunpack.i.h.bf16 %v6678_v53  ;;  %v6679_v12 = vunpack.i.l.bf16 %v6678_v53  ;;  %v9305_v53 = vld [vmem:[#allocation41_spill] sm:$0xff] }
 0x9de   : > { %v6209_v50 = vpack.c.bf16 %v6685_v21, %v6684_v25 }
 0x9df   : > { %6196 = vmatpush3.bf16.xpose.msk.msra.mxu1 %vm8002_vm2, %v6191_v33  ;;  %v6693_v34 = vpop.permute.xlu0 %6692  ;;  %v6203_v45 = vpack.c.bf16 %v6680_v7, %v6679_v12 }
 0x9e0   : > { %6199 = vmatprep.subr.msk.bf16.mxu1 %vm8002_vm2, %v6197_v14  ;;  %v6688_v10 = vpop.permute.xlu1 %6687  ;;  %v6695_v13 = vunpack.i.h.bf16 %v6693_v34  ;;  %v6694_v35 = vunpack.i.l.bf16 %v6693_v34 }
 0x9e1   : > { %v6690_v18 = vunpack.i.h.bf16 %v6688_v10  ;;  %v6689_v24 = vunpack.i.l.bf16 %v6688_v10 }
 0x9e2   : > { %v6221_v43 = vpack.c.bf16 %v6695_v13, %v6694_v35 }
 0x9e3   : > { %v2928_v2 = vpop.permute.xlu0 %2927  ;;  %v6215_v4 = vpack.c.bf16 %v6690_v18, %v6689_v24 }
 0x9e4   : > { %5644 = vmatprep.mubr.msk.f32.mxu1 %vm1481_vm1, %v2928_v2  ;;  %v6698_v48 = vpop.permute.xlu1 %6697 }
 0x9e5   : > { %v6700_v54 = vunpack.i.h.bf16 %v6698_v48  ;;  %v6699_v19 = vunpack.i.l.bf16 %v6698_v48 }
 0x9e7   : > { %6202 = vmatpush3.bf16.xpose.msk.msra.mxu1 %vm8002_vm2, %v6197_v14  ;;  %v6703_v36 = vpop.permute.xlu0 %6702  ;;  %v6227_v41 = vpack.c.bf16 %v6700_v54, %v6699_v19  ;;  %v9304_v14 = vld [vmem:[#allocation42_spill] sm:$0xff] }
 0x9e8   : > { %v6705_v42 = vunpack.i.h.bf16 %v6703_v36  ;;  %v6704_v3 = vunpack.i.l.bf16 %v6703_v36  ;;  %6205 = vmatprep.subr.msk.bf16.mxu1 %vm8002_vm2, %v6203_v45  ;;  %v2930_v47 = vpop.permute.xlu1 %2929  ;;  %v9306_v34 = vpack.i.bf16 %v9304_v14, %v9305_v53 }
 0x9ea   : > { %v8798_v59 = vpack.c.bf16 %v6705_v42, %v6704_v3 }
 0x9ec   : > { %6266 = vmatprep.subr.bf16.mxu0 %v8798_v59  ;;  %v6708_v52 = vpop.permute.xlu1 %6707 }
 0x9ed   : > { %v6710_v25 = vunpack.i.h.bf16 %v6708_v52  ;;  %v6709_v39 = vunpack.i.l.bf16 %v6708_v52 }
 0x9ef   : > { %6208 = vmatpush3.bf16.xpose.msk.msra.mxu1 %vm8002_vm2, %v6203_v45  ;;  %v6269_v18 = vpack.c.bf16 %v6710_v25, %v6709_v39 }
 0x9f0   : > { %6211 = vmatprep.subr.msk.bf16.mxu1 %vm8002_vm2, %v6209_v50  ;;  %v6718_v1 = vpop.permute.xlu1 %6717 }
 0x9f1   : > { %v6719_v13 = vunpack.i.l.bf16 %v6718_v1 }
 0x9f4   : > { %v6728_v22 = vpop.permute.xlu1 %6727 }
 0x9f5   : > { %v6730_v19 = vunpack.i.h.bf16 %v6728_v22 }
 0x9f7   : > { %6214 = vmatpush3.bf16.xpose.msk.msra.mxu1 %vm8002_vm2, %v6209_v50 }
 0x9f8   : > { %6217 = vmatprep.subr.msk.bf16.mxu1 %vm8002_vm2, %v6215_v4  ;;  %v6738_v60 = vpop.permute.xlu1 %6737 }
 0x9fc   : > { %v8858_v63 = vpop.permute.xlu1 %6747 }
 0x9ff   : > { %6220 = vmatpush3.bf16.xpose.msk.msra.mxu1 %vm8002_vm2, %v6215_v4  ;;  %v6720_v4 = vunpack.i.h.bf16 %v6718_v1 }
 0xa00   : > { %6223 = vmatprep.subr.msk.bf16.mxu1 %vm8002_vm2, %v6221_v43  ;;  %v8864_v33 = vpop.permute.xlu1 %6757 }
 0xa01   : > { %v6277_v48 = vpack.c.bf16 %v6720_v4, %v6719_v13  ;;  %v6760_v14 = vunpack.i.h.bf16 %v8864_v33  ;;  %v6759_v53 = vunpack.i.l.bf16 %v8864_v33 }
 0xa07   : > { %6226 = vmatpush3.bf16.xpose.msk.msra.mxu1 %vm8002_vm2, %v6221_v43 }
 0xa08   : > { %6229 = vmatprep.subr.msk.bf16.mxu1 %vm8002_vm2, %v6227_v41 }
 0xa0f   : > { %6232 = vmatpush3.bf16.xpose.msk.msra.mxu1 %vm8002_vm2, %v6227_v41  ;;  %v6729_v41 = vunpack.i.l.bf16 %v6728_v22 }
 0xa10   : > { %6298 = vmatprep.subr.bf16.mxu1 %v9297_v55 }
 0xa16   : > { %5645 = vmatmul.mubr.msk.f32.vlgmr.msra.gmra.mrb[22].mxu1 %vm1481_vm1, %v2930_v47 }
 0xa17   : > { %6300 = vmatpush3.bf16.msra.mxu1 %v9297_v55 }
 0xa18   : > { %6302 = vmatprep.subr.bf16.mxu1 %v9298_v56 }
 0xa1b   : > { %6304 = vmatpush3.bf16.msra.mxu1 %v9298_v56  ;;  %v6285_v56 = vpack.c.bf16 %v6730_v19, %v6729_v41 }
 0xa1c   : > { %6306 = vmatprep.subr.bf16.mxu1 %v9299_v20 }
 0xa1f   : > { %6308 = vmatpush3.bf16.msra.mxu1 %v9299_v20 }
 0xa20   : > { %6310 = vmatprep.subr.bf16.mxu1 %v9300_v16 }
 0xa23   : > { %6312 = vmatpush3.bf16.msra.mxu1 %v9300_v16 }
 0xa24   : > { %6314 = vmatprep.subr.bf16.mxu1 %v8498_v23 }
 0xa27   : > { %6316 = vmatpush3.bf16.msra.mxu1 %v8498_v23 }
 0xa28   : > { %6318 = vmatprep.subr.bf16.mxu1 %v8533_v26 }
 0xa2b   : > { %6320 = vmatpush3.bf16.msra.mxu1 %v8533_v26 }
 0xa2c   : > { %6322 = vmatprep.subr.bf16.mxu1 %v8570_v51 }
 0xa2f   : > { %6324 = vmatpush3.bf16.msra.mxu1 %v8570_v51 }
 0xa30   : > { %6326 = vmatprep.subr.bf16.mxu1 %v8646_v8 }
 0xa33   : > { %6328 = vmatpush3.bf16.msra.mxu1 %v8646_v8  ;;  %v6713_v8 = vpop.permute.xlu0 %6712 }
 0xa34   : > { %v6715_v50 = vunpack.i.h.bf16 %v6713_v8  ;;  %v6714_v10 = vunpack.i.l.bf16 %v6713_v8  ;;  %v9307_v8 = vpack.i.bf16 %v8638_v29, %v8635_v44 }
 0xa36   : > { %v5541_v30 = vpop.f32.mrb[18].mxu1  ;;  %v6273_v24 = vpack.c.bf16 %v6715_v50, %v6714_v10 }
 0xa37   : > { %v3257_v58 = vpop.f32.mrb[19].mxu1  ;;  %v3605_v23 = vsel %vm3601_vm4, %v5541_v30, -1e+30  ;;  %v6723_v49 = vpop.permute.xlu0 %6722  ;;  %v6740_v30 = vunpack.i.h.bf16 %v6738_v60 }
 0xa38   : > { %3614 = vmax.xlane.f32.xlu1 %v3605_v23  ;;  %v3604_v26 = vsel %vm3601_vm4, %v3257_v58, -1e+30  ;;  %v6725_v35 = vunpack.i.h.bf16 %v6723_v49  ;;  %v6724_v43 = vunpack.i.l.bf16 %v6723_v49  ;;  %v6739_v58 = vunpack.i.l.bf16 %v6738_v60 }
 0xa39   : > { %3612 = vmax.xlane.f32.xlu0 %v3604_v26 }
 0xa3a   : > { %v6281_v54 = vpack.c.bf16 %v6725_v35, %v6724_v43  ;;  %v6293_v1 = vpack.c.bf16 %v6740_v30, %v6739_v58 }
 0xa3b   : > { %v6733_v0 = vpop.permute.xlu0 %6732 }
 0xa3c   : > { %v6735_v55 = vunpack.i.h.bf16 %v6733_v0  ;;  %v6734_v47 = vunpack.i.l.bf16 %v6733_v0 }
 0xa3e   : > { %v6289_v15 = vpack.c.bf16 %v6735_v55, %v6734_v47  ;;  %v9309_v47 = vmov 0.0  }
 0xa3f   : > { %v6743_v57 = vpop.permute.xlu0 %6742 }
 0xa40   : > { %v6744_v52 = vunpack.i.l.bf16 %v6743_v57 }
 0xa42   : > { %v8844_v51 = vpop.f32.mrb[82].mxu0 }
 0xa43   : > { %v8846_v32 = vpop.f32.mrb[83].mxu0  ;;  %v8866_v5 = vpop.permute.xlu0 %6752  ;;  %v8900_v22 = vsel %vm3601_vm4, %v8844_v51, -1e+30  ;;  %v6750_v51 = vunpack.i.h.bf16 %v8858_v63 }
 0xa44   : > { %v8906_v49 = vsel %vm3601_vm4, %v8846_v32, -1e+30  ;;  %v6755_v32 = vunpack.i.h.bf16 %v8866_v5 }
 0xaa9   : > { %v5576_v28 = vpop.f32.mrb[20].mxu1 }
 0xaaa   : > { %v3368_v11 = vpop.f32.mrb[21].mxu1  ;;  %v8850_v46 = vsel %vm3601_vm4, %v5576_v28, -1e+30 }
 0xaab   : > { %3618 = vmax.xlane.f32.xlu1 %v8850_v46  ;;  %v8855_v38 = vsel %vm3601_vm4, %v3368_v11, -1e+30  ;;  %v9308_v11 = vpack.i.bf16 %v8557_v17, %v8551_v31 }
 0xaac   : > { %3616 = vmax.xlane.f32.xlu0 %v8855_v38 }
 0xabc   : > { %6767 = vrot.lane.b32.xlu1 %v9303_v61, %s7254_s18  ;;  %v6754_v61 = vunpack.i.l.bf16 %v8866_v5 }
 0xac2   : > { %6762 = vrot.lane.b32.xlu0 %v9306_v34, %s7254_s18 }
 0xac5   : > { %v3615_v7 = vpop.xlane.xlu1 %3614 }
 0xac6   : > { %v3629_v12 = vsub.f32 %v3605_v23, %v3615_v7  ;;  %v3613_v2 = vpop.xlane.xlu0 %3612 }
 0xac7   : > { %v3628_v45 = vsub.f32 %v3604_v26, %v3613_v2  ;;  %v6745_v26 = vunpack.i.h.bf16 %v6743_v57  ;;  %v6749_v57 = vunpack.i.l.bf16 %v8858_v63  ;;  %v6341_v63 = vpack.c.bf16 %v6760_v14, %v6759_v53  ;;  %v4018_v53 = vld [vmem:[%s7738_s5 + $0x70] sm:$0xff] }
 0xac8   : > { %v3638_v36 = vmul.f32 1.442695, %v3629_v12 }
 0xac9   : > { %v3636_v21 = vmul.f32 1.442695, %v3628_v45  ;;  %v6329_v28 = vpack.c.bf16 %v6745_v26, %v6744_v52  ;;  %v4004_v26 = vld [vmem:[%s7738_s5] sm:$0xff]  ;;  %v4005_v52 = vld [vmem:[%s7738_s5 + $0x8] sm:$0xff] }
 0xacb   : > { %6831 = vpow2.f32 %v3636_v21 }
 0xacc   : > { %6833 = vpow2.f32 %v3638_v36 }
 0xad5   : > { %v8872_v42 = vpop.eup %6831 }
 0xad6   : > { %v8874_v3 = vpop.eup %6833  ;;  %5679 = vmatprep.mubr.f32.mxu0 %v8872_v42 }
 0xad7   : > { %5680 = vmatmul.mubr.f32.vlgmr.msra.gmra.mrb[84].mxu0 %v8874_v3 }
 0xad8   : > { %6268 = vmatpush3.bf16.msra.mxu0 %v8798_v59 }
 0xad9   : > { %6270 = vmatprep.subr.bf16.mxu0 %v6269_v18 }
 0xadc   : > { %6272 = vmatpush3.bf16.msra.mxu0 %v6269_v18 }
 0xadd   : > { %6274 = vmatprep.subr.bf16.mxu0 %v6273_v24 }
 0xae0   : > { %6276 = vmatpush3.bf16.msra.mxu0 %v6273_v24 }
 0xae1   : > { %6278 = vmatprep.subr.bf16.mxu0 %v6277_v48 }
 0xae4   : > { %6280 = vmatpush3.bf16.msra.mxu0 %v6277_v48 }
 0xae5   : > { %6282 = vmatprep.subr.bf16.mxu0 %v6281_v54 }
 0xae8   : > { %6284 = vmatpush3.bf16.msra.mxu0 %v6281_v54 }
 0xae9   : > { %v5646_v59 = vpop.f32.mrb[22].mxu1  ;;  %6286 = vmatprep.subr.bf16.mxu0 %v6285_v56 }
 0xaea   : > { %v3590_v20 = vpop.f32.mrb[23].mxu1  ;;  %v8881_v16 = vsel %vm3601_vm4, %v5646_v59, -1e+30 }
 0xaeb   : > { %3626 = vmax.xlane.f32.xlu1 %v8881_v16  ;;  %v8886_v23 = vsel %vm3601_vm4, %v3590_v20, -1e+30 }
 0xaec   : > { %6288 = vmatpush3.bf16.msra.mxu0 %v6285_v56  ;;  %3624 = vmax.xlane.f32.xlu0 %v8886_v23 }
 0xaed   : > { %6290 = vmatprep.subr.bf16.mxu0 %v6289_v15 }
 0xaf0   : > { %6292 = vmatpush3.bf16.msra.mxu0 %v6289_v15 }
 0xaf1   : > { %6294 = vmatprep.subr.bf16.mxu0 %v6293_v1 }
 0xaf4   : > { %6296 = vmatpush3.bf16.msra.mxu0 %v6293_v1  ;;  %v4006_v1 = vld [vmem:[%s7738_s5 + $0x10] sm:$0xff] }
 0xaf5   : > { %6330 = vmatprep.subr.bf16.mxu0 %v6329_v28 }
 0xafc   : > { %6777 = vrot.lane.b32.xlu1 %v9307_v8, %s7254_s18  ;;  %v4007_v8 = vld [vmem:[%s7738_s5 + $0x18] sm:$0xff] }
 0xb02   : > { %6772 = vrot.lane.b32.xlu0 %v9308_v11, %s7254_s18  ;;  %v6365_v11 = vpack.c.bf16 %v4007_v8, %v4006_v1 }
 0xb20   : > { %3622 = vmax.xlane.f32.xlu1 %v8900_v22 }
 0xb21   : > { %3620 = vmax.xlane.f32.xlu0 %v8906_v49 }
 0xb38   : > { %v3619_v44 = vpop.xlane.xlu1 %3618 }
 0xb39   : > { %v3631_v29 = vsub.f32 %v8850_v46, %v3619_v44  ;;  %v3617_v60 = vpop.xlane.xlu0 %3616  ;;  %v6333_v46 = vpack.c.bf16 %v6750_v51, %v6749_v57  ;;  %v4014_v57 = vld [vmem:[%s7738_s5 + $0x50] sm:$0xff] }
 0xb3a   : > { %v3630_v31 = vsub.f32 %v8855_v38, %v3617_v60  ;;  %v6337_v38 = vpack.c.bf16 %v6755_v32, %v6754_v61  ;;  %v4011_v60 = vld [vmem:[%s7738_s5 + $0x38] sm:$0xff] }
 0xb3b   : > { %v3642_v17 = vmul.f32 1.442695, %v3631_v29  ;;  %v4010_v29 = vld [vmem:[%s7738_s5 + $0x30] sm:$0xff] }
 0xb3c   : > { %v3640_v0 = vmul.f32 1.442695, %v3630_v31  ;;  %v6768_v2 = vpop.permute.xlu1 %6767  ;;  %v6373_v31 = vpack.c.bf16 %v4011_v60, %v4010_v29 }
 0xb3d   : > { %v6763_v34 = vpop.permute.xlu0 %6762  ;;  %v6770_v5 = vunpack.i.h.bf16 %v6768_v2  ;;  %v6769_v45 = vunpack.i.l.bf16 %v6768_v2 }
 0xb3e   : > { %6835 = vpow2.f32 %v3640_v0  ;;  %v6765_v7 = vunpack.i.h.bf16 %v6763_v34  ;;  %v6764_v12 = vunpack.i.l.bf16 %v6763_v34  ;;  %v4013_v0 = vld [vmem:[%s7738_s5 + $0x48] sm:$0xff]  ;;  %v4019_v34 = vld [vmem:[%s7738_s5 + $0x78] sm:$0xff] }
 0xb3f   : > { %6837 = vpow2.f32 %v3642_v17  ;;  %v6349_v21 = vpack.c.bf16 %v6770_v5, %v6769_v45  ;;  %v4012_v17 = vld [vmem:[%s7738_s5 + $0x40] sm:$0xff] }
 0xb40   : > { %v6345_v36 = vpack.c.bf16 %v6765_v7, %v6764_v12  ;;  %v6377_v51 = vpack.c.bf16 %v4013_v0, %v4012_v17 }
 0xb48   : > { %v6836_v9 = vpop.eup %6835 }
 0xb49   : > { %v6838_v27 = vpop.eup %6837  ;;  %5714 = vmatprep.mubr.f32.mxu0 %v6836_v9  ;;  %3656 = vadd.xlane.f32.xlu0 %v6836_v9  ;;  %v4015_v9 = vld [vmem:[%s7738_s5 + $0x58] sm:$0xff] }
 0xb4a   : > { %5715 = vmatmul.mubr.f32.vlgmr.msra.gmra.mrb[86].mxu0 %v6838_v27 }
 0xb4b   : > { %6332 = vmatpush3.bf16.msra.mxu0 %v6329_v28  ;;  %v6361_v28 = vpack.c.bf16 %v4005_v52, %v4004_v26 }
 0xb4c   : > { %6334 = vmatprep.subr.bf16.mxu0 %v6333_v46 }
 0xb4d   : > { %3658 = vadd.xlane.f32.xlu0 %v6838_v27  ;;  %6362 = vmatprep.subr.bf16.mxu1 %v6361_v28  ;;  %v6381_v27 = vpack.c.bf16 %v4015_v9, %v4014_v57  ;;  %v9311_v9 = vld [vmem:[#allocation44_spill] sm:$0xff] }
 0xb4f   : > { %6336 = vmatpush3.bf16.msra.mxu0 %v6333_v46  ;;  %v4016_v46 = vld [vmem:[%s7738_s5 + $0x60] sm:$0xff] }
 0xb50   : > { %6338 = vmatprep.subr.bf16.mxu0 %v6337_v38 }
 0xb53   : > { %6340 = vmatpush3.bf16.msra.mxu0 %v6337_v38  ;;  %v4017_v38 = vld [vmem:[%s7738_s5 + $0x68] sm:$0xff] }
 0xb54   : > { %6342 = vmatprep.subr.bf16.mxu0 %v6341_v63  ;;  %v6385_v14 = vpack.c.bf16 %v4017_v38, %v4016_v46 }
 0xb57   : > { %6344 = vmatpush3.bf16.msra.mxu0 %v6341_v63  ;;  %v6389_v63 = vpack.c.bf16 %v4019_v34, %v4018_v53  ;;  %v4174_v34 = vld [vmem:[%s7740_s2 + $0x8] sm:$0xff] }
 0xb58   : > { %6346 = vmatprep.subr.bf16.mxu0 %v6345_v36 }
 0xb5b   : > { %6348 = vmatpush3.bf16.msra.mxu0 %v6345_v36 }
 0xb5c   : > { %6350 = vmatprep.subr.bf16.mxu0 %v6349_v21 }
 0xb5f   : > { %6352 = vmatpush3.bf16.msra.mxu0 %v6349_v21 }
 0xb78   : > { %v3627_v25 = vpop.xlane.xlu1 %3626 }
 0xb79   : > { %v3635_v33 = vsub.f32 %v8881_v16, %v3627_v25  ;;  %v3625_v39 = vpop.xlane.xlu0 %3624 }
 0xb7a   : > { %v3634_v50 = vsub.f32 %v8886_v23, %v3625_v39 }
 0xb7b   : > { %v3650_v10 = vmul.f32 1.442695, %v3635_v33 }
 0xb7c   : > { %v3648_v18 = vmul.f32 1.442695, %v3634_v50  ;;  %v6778_v24 = vpop.permute.xlu1 %6777 }
 0xb7d   : > { %6839 = vpow2.f32 %v3650_v10  ;;  %v6780_v4 = vunpack.i.h.bf16 %v6778_v24  ;;  %v6773_v13 = vpop.permute.xlu0 %6772  ;;  %v6779_v35 = vunpack.i.l.bf16 %v6778_v24 }
 0xb7e   : > { %6841 = vpow2.f32 %v3648_v18  ;;  %v6775_v43 = vunpack.i.h.bf16 %v6773_v13  ;;  %v6774_v48 = vunpack.i.l.bf16 %v6773_v13 }
 0xb7f   : > { %v6357_v19 = vpack.c.bf16 %v6780_v4, %v6779_v35 }
 0xb80   : > { %v6353_v54 = vpack.c.bf16 %v6775_v43, %v6774_v48 }
 0xb82   : > { %6354 = vmatprep.subr.bf16.mxu0 %v6353_v54 }
 0xb83   : > { %6356 = vmatpush3.bf16.msra.mxu0 %v6353_v54 }
 0xb84   : > { %6358 = vmatprep.subr.bf16.mxu0 %v6357_v19 }
 0xb87   : > { %v6840_v41 = vpop.eup %6839  ;;  %6360 = vmatpush3.bf16.msra.mxu0 %v6357_v19 }
 0xb88   : > { %v6842_v55 = vpop.eup %6841  ;;  %3666 = vadd.xlane.f32.xlu0 %v6840_v41 }
 0xb89   : > { %3664 = vadd.xlane.f32.xlu1 %v6842_v55  ;;  %5784 = vmatprep.mubr.f32.mxu0 %v6842_v55 }
 0xb8a   : > { %5785 = vmatmul.mubr.f32.vlgmr.msra.gmra.mrb[88].mxu0 %v6840_v41 }
 0xb8b   : > { %4281 = vmatprep.mubr.f32.mxu0 %v9309_v47 }
 0xb8c   : > { %3654 = vadd.xlane.f32.xlu0 %v8874_v3 }
 0xb8d   : > { %3652 = vadd.xlane.f32.xlu1 %v8872_v42 }
 0xbaa   : > { %v8922_v56 = vpop.f32.mrb[84].mxu0 }
 0xbab   : > { %v8924_v59 = vpop.f32.mrb[85].mxu0 }
 0xbad   : > { %v3623_v20 = vpop.xlane.xlu1 %3622 }
 0xbae   : > { %v3633_v16 = vsub.f32 %v8900_v22, %v3623_v20  ;;  %v3621_v15 = vpop.xlane.xlu0 %3620  ;;  %v4008_v22 = vld [vmem:[%s7738_s5 + $0x20] sm:$0xff] }
 0xbaf   : > { %v3632_v30 = vsub.f32 %v8906_v49, %v3621_v15  ;;  %v4009_v49 = vld [vmem:[%s7738_s5 + $0x28] sm:$0xff] }
 0xbb0   : > { %v3646_v58 = vmul.f32 1.442695, %v3633_v16  ;;  %v6369_v44 = vpack.c.bf16 %v4009_v49, %v4008_v22  ;;  %v4022_v49 = vsub.s32 7, %v7984_v62 }
 0xbb1   : > { %v3644_v23 = vmul.f32 1.442695, %v3632_v30 }
 0xbb2   : > { %6843 = vpow2.f32 %v3646_v58 }
 0xbb3   : > { %6845 = vpow2.f32 %v3644_v23 }
 0xbbc   : > { %v6844_v42 = vpop.eup %6843 }
 0xbbd   : > { %v6846_v3 = vpop.eup %6845  ;;  %3662 = vadd.xlane.f32.xlu0 %v6844_v42 }
 0xbbe   : > { %3660 = vadd.xlane.f32.xlu1 %v6846_v3  ;;  %5749 = vmatprep.mubr.f32.mxu1 %v6846_v3 }
 0xbbf   : > { %5750 = vmatmul.mubr.f32.vlgmr.msra.gmra.mrb[24].mxu1 %v6844_v42 }
 0xbc0   : > { %6364 = vmatpush3.bf16.msra.mxu1 %v6361_v28 }
 0xbc1   : > { %6366 = vmatprep.subr.bf16.mxu1 %v6365_v11 }
 0xbc4   : > { %6368 = vmatpush3.bf16.msra.mxu1 %v6365_v11 }
 0xbc5   : > { %6370 = vmatprep.subr.bf16.mxu1 %v6369_v44 }
 0xbc8   : > { %6372 = vmatpush3.bf16.msra.mxu1 %v6369_v44  ;;  %v6880_v44 = vld [vmem:[%s7744_s17] sm:$0xff] }
 0xbc9   : > { %6374 = vmatprep.subr.bf16.mxu1 %v6373_v31  ;;  %v4023_v29 = vrot.slane %v6880_v44, %v4022_v49  ;;  %v4200_v49 = vld [vmem:[%s7740_s2 + $0xd8] sm:$0xff] }
 0xbcc   : > { %6376 = vmatpush3.bf16.msra.mxu1 %v6373_v31 }
 0xbcd   : > { %6378 = vmatprep.subr.bf16.mxu1 %v6377_v51 }
 0xbd0   : > { %6380 = vmatpush3.bf16.msra.mxu1 %v6377_v51  ;;  %v9310_v51 = vld [vmem:[#allocation45_spill] sm:$0xff] }
 0xbd1   : > { %6382 = vmatprep.subr.bf16.mxu1 %v6381_v27 }
 0xbd4   : > { %6384 = vmatpush3.bf16.msra.mxu1 %v6381_v27 }
 0xbd5   : > { %6386 = vmatprep.subr.bf16.mxu1 %v6385_v14 }
 0xbd6   : > { %v3657_v32 = vpop.xlane.xlu0 %3656 }
 0xbd8   : > { %6388 = vmatpush3.bf16.msra.mxu1 %v6385_v14 }
 0xbd9   : > { %6390 = vmatprep.subr.bf16.mxu1 %v6389_v63 }
 0xbda   : > { %v3659_v61 = vpop.xlane.xlu0 %3658 }
 0xbdb   : > { %6847 = vrcp.f32 %v3659_v61 }
 0xbdc   : > { %6849 = vrcp.f32 %v3657_v32  ;;  %6392 = vmatpush3.bf16.msra.mxu1 %v6389_v63  ;;  %v4176_v63 = vld [vmem:[%s7740_s2 + $0x18] sm:$0xff] }
 0xbe5   : > { %v6848_v7 = vpop.eup %6847 }
 0xbe6   : > { %v6850_v2 = vpop.eup %6849 }
 0xc15   : > { %v3667_v25 = vpop.xlane.xlu0 %3666 }
 0xc16   : > { %v3665_v33 = vpop.xlane.xlu1 %3664  ;;  %6851 = vrcp.f32 %v3667_v25  ;;  %v4179_v25 = vld [vmem:[%s7740_s2 + $0x30] sm:$0xff] }
 0xc17   : > { %6853 = vrcp.f32 %v3665_v33  ;;  %v4184_v33 = vld [vmem:[%s7740_s2 + $0x58] sm:$0xff] }
 0xc19   : > { %v3655_v35 = vpop.xlane.xlu0 %3654 }
 0xc1a   : > { %v3653_v43 = vpop.xlane.xlu1 %3652  ;;  %6855 = vrcp.f32 %v3655_v35 }
 0xc1b   : > { %6857 = vrcp.f32 %v3653_v43 }
 0xc1d   : > { %v5716_v12 = vpop.f32.mrb[86].mxu0 }
 0xc1e   : > { %v3979_v5 = vmul.f32 %v6848_v7, %v5716_v12  ;;  %v3809_v45 = vpop.f32.mrb[87].mxu0  ;;  %v4173_v7 = vld [vmem:[%s7740_s2] sm:$0xff]  ;;  %v6393_v12 = vpack.c.bf16 %v4176_v63, %v4174_v34 }
 0xc1f   : > { %v3978_v36 = vmul.f32 %v6850_v2, %v3809_v45  ;;  %v4175_v2 = vld [vmem:[%s7740_s2 + $0x10] sm:$0xff]  ;;  %v4180_v45 = vld [vmem:[%s7740_s2 + $0x38] sm:$0xff] }
 0xc20   : > { %v6852_v39 = vpop.eup %6851  ;;  %6394 = vmatprep.subr.bf16.mxu0 %v6393_v12 }
 0xc21   : > { %v6781_v21 = vpack.i.bf16 %v3979_v5, %v3978_v36  ;;  %v6854_v10 = vpop.eup %6853  ;;  %v4178_v5 = vld [vmem:[%s7740_s2 + $0x28] sm:$0xff]  ;;  %v6395_v36 = vpack.c.bf16 %v4175_v2, %v4173_v7 }
 0xc23   : > { %6782 = vrot.lane.b32.xlu1 %v6781_v21, %s7254_s18  ;;  %v4177_v21 = vld [vmem:[%s7740_s2 + $0x20] sm:$0xff]  ;;  %6396 = vmatpush1.bf16.msra.mxu0 %v6395_v36 }
 0xc24   : > { %v6856_v54 = vpop.eup %6855  ;;  %v4314_v36 = vld [vmem:[%s7742_s15] sm:$0xff] }
 0xc25   : > { %v6858_v41 = vpop.eup %6857  ;;  %v3977_v58 = vmul.f32 %v6856_v54, %v8922_v56 }
 0xc26   : > { %v3976_v30 = vmul.f32 %v6858_v41, %v8924_v59 }
 0xc4a   : > { %v3663_v3 = vpop.xlane.xlu0 %3662 }
 0xc4b   : > { %v3661_v48 = vpop.xlane.xlu1 %3660  ;;  %6859 = vrcp.f32 %v3663_v3 }
 0xc4c   : > { %6861 = vrcp.f32 %v3661_v48 }
 0xc55   : > { %v6860_v26 = vpop.eup %6859 }
 0xc56   : > { %v6862_v52 = vpop.eup %6861 }
 0xc5d   : > { %v5786_v50 = vpop.f32.mrb[88].mxu0 }
 0xc5e   : > { %v3983_v18 = vmul.f32 %v6852_v39, %v5786_v50  ;;  %v3959_v24 = vpop.f32.mrb[89].mxu0  ;;  %v6399_v39 = vpack.c.bf16 %v4179_v25, %v4177_v21  ;;  %v4333_v21 = vld [vmem:[%s7742_s15 + $0x98] sm:$0xff] }
 0xc5f   : > { %v3982_v4 = vmul.f32 %v6854_v10, %v3959_v24  ;;  %v4181_v10 = vld [vmem:[%s7740_s2 + $0x40] sm:$0xff] }
 0xc61   : > { %v6786_v13 = vpack.i.bf16 %v3983_v18, %v3982_v4  ;;  %v4183_v18 = vld [vmem:[%s7740_s2 + $0x50] sm:$0xff] }
 0xc62   : > { %v6403_v24 = vpack.c.bf16 %v4183_v18, %v4181_v10  ;;  %v4335_v10 = vld [vmem:[%s7742_s15 + $0xa8] sm:$0xff] }
 0xc63   : > { %6787 = vrot.lane.b32.xlu0 %v6786_v13, %s7254_s18 }
 0xc92   : > { %v5751_v19 = vpop.f32.mrb[24].mxu1 }
 0xc93   : > { %v3884_v55 = vpop.f32.mrb[25].mxu1  ;;  %v3981_v28 = vmul.f32 %v6860_v26, %v5751_v19  ;;  %v4189_v26 = vld [vmem:[%s7740_s2 + $0x80] sm:$0xff] }
 0xc94   : > { %v3980_v8 = vmul.f32 %v6862_v52, %v3884_v55  ;;  %v4186_v55 = vld [vmem:[%s7740_s2 + $0x68] sm:$0xff]  ;;  %v4191_v52 = vld [vmem:[%s7740_s2 + $0x90] sm:$0xff] }
 0xc95   : > { %v6783_v20 = vpop.permute.xlu1 %6782 }
 0xc96   : > { %v6785_v16 = vunpack.i.h.bf16 %v6783_v20  ;;  %v6784_v15 = vunpack.i.l.bf16 %v6783_v20  ;;  %v4188_v20 = vld [vmem:[%s7740_s2 + $0x78] sm:$0xff] }
 0xc98   : > { %v4000_v23 = vsel %vm1481_vm1, %v3976_v30, %v6784_v15  ;;  %v4001_v42 = vsel %vm1481_vm1, %v3977_v58, %v6785_v16  ;;  %v6405_v16 = vpack.c.bf16 %v4188_v20, %v4186_v55  ;;  %v4185_v15 = vld [vmem:[%s7740_s2 + $0x60] sm:$0xff]  ;;  %v4187_v30 = vld [vmem:[%s7740_s2 + $0x70] sm:$0xff]  ;;  %v4321_v20 = vld [vmem:[%s7742_s15 + $0x38] sm:$0xff] }
 0xc99   : > { %5819 = vmatprep.mubr.f32.mxu1 %v4000_v23  ;;  %v6407_v58 = vpack.c.bf16 %v4187_v30, %v4185_v15  ;;  %v4190_v23 = vld [vmem:[%s7740_s2 + $0x88] sm:$0xff]  ;;  %v4320_v55 = vld [vmem:[%s7742_s15 + $0x30] sm:$0xff] }
 0xc9a   : > { %5820 = vmatmul.mubr.f32.vlgmr.msra.gmra.mrb[26].mxu1 %v4001_v42  ;;  %v4192_v42 = vld [vmem:[%s7740_s2 + $0x98] sm:$0xff]  ;;  %v4339_v15 = vld [vmem:[%s7742_s15 + $0xc8] sm:$0xff]  ;;  %v6439_v30 = vpack.c.bf16 %v4321_v20, %v4320_v55 }
 0xc9b   : > { %v6409_v3 = vpack.c.bf16 %v4192_v42, %v4190_v23  ;;  %v4322_v23 = vld [vmem:[%s7742_s15 + $0x40] sm:$0xff]  ;;  %v4323_v42 = vld [vmem:[%s7742_s15 + $0x48] sm:$0xff] }
 0xcd5   : > { %v6788_v1 = vpop.permute.xlu0 %6787 }
 0xcd6   : > { %v6790_v11 = vunpack.i.h.bf16 %v6788_v1  ;;  %v6789_v22 = vunpack.i.l.bf16 %v6788_v1  ;;  %v4194_v1 = vld [vmem:[%s7740_s2 + $0xa8] sm:$0xff] }
 0xcd8   : > { %v4002_v59 = vsel %vm1481_vm1, %v3980_v8, %v6789_v22  ;;  %v4003_v56 = vsel %vm1481_vm1, %v3981_v28, %v6790_v11  ;;  %v6411_v28 = vpack.c.bf16 %v4191_v52, %v4189_v26  ;;  %v4196_v8 = vld [vmem:[%s7740_s2 + $0xb8] sm:$0xff]  ;;  %v4193_v11 = vld [vmem:[%s7740_s2 + $0xa0] sm:$0xff]  ;;  %v4195_v22 = vld [vmem:[%s7740_s2 + $0xb0] sm:$0xff]  ;;  %v6443_v52 = vpack.c.bf16 %v4323_v42, %v4322_v23 }
 0xcd9   : > { %5822 = vmatprep.mubr.f32.mxu1 %v4002_v59  ;;  %v6413_v59 = vpack.c.bf16 %v4196_v8, %v4194_v1  ;;  %v6415_v44 = vpack.c.bf16 %v4195_v22, %v4193_v11  ;;  %v4341_v26 = vld [vmem:[%s7742_s15 + $0xd8] sm:$0xff]  ;;  %v4342_v11 = vld [vmem:[%s7742_s15 + $0xe0] sm:$0xff]  ;;  %v4343_v22 = vld [vmem:[%s7742_s15 + $0xe8] sm:$0xff] }
 0xcda   : > { %5823 = vmatmul.mubr.f32.gmra.mrb[28].mxu1 %v4003_v56  ;;  %v4198_v56 = vld [vmem:[%s7740_s2 + $0xc8] sm:$0xff]  ;;  %v4325_v8 = vld [vmem:[%s7742_s15 + $0x58] sm:$0xff] }
 0xd6d   : > { %v5821_v60 = vpop.f32.mrb[26].mxu1 }
 0xd6e   : > { %v4096_v31 = vadd.f32 %v5821_v60, %v4023_v29  ;;  %v4090_v17 = vpop.f32.mrb[27].mxu1  ;;  %v4197_v60 = vld [vmem:[%s7740_s2 + $0xc0] sm:$0xff] }
 0xd6f   : > { %v4091_v0 = vadd.f32 %v4090_v17, %v4023_v29  ;;  %v4202_v17 = vld [vmem:[%s7740_s2 + $0xe8] sm:$0xff] }
 0xd70   : > { %v4110_v57 = vadd.f32 %v4096_v31, %v9310_v51  ;;  %v4199_v31 = vld [vmem:[%s7740_s2 + $0xd0] sm:$0xff] }
 0xd71   : > { %v4109_v27 = vadd.f32 %v4091_v0, %v9311_v9  ;;  %v4204_v0 = vld [vmem:[%s7740_s2 + $0xf8] sm:$0xff]  ;;  %v6419_v51 = vpack.c.bf16 %v4199_v31, %v4197_v60  ;;  %v4201_v9 = vld [vmem:[%s7740_s2 + $0xe0] sm:$0xff] }
 0xd72   : > { %4115 = vadd.xlane.f32.xlu0 %v4110_v57 }
 0xd73   : > { %4113 = vadd.xlane.f32.xlu1 %v4109_v27 }
 0xdad   : > { %v5824_v32 = vpop.f32.mrb[28].mxu1 }
 0xdae   : > { %v4106_v61 = vadd.f32 %v5824_v32, %v4023_v29  ;;  %v4100_v46 = vpop.f32.mrb[29].mxu1 }
 0xdaf   : > { %v4101_v38 = vadd.f32 %v4100_v46, %v4023_v29  ;;  %v6417_v29 = vpack.c.bf16 %v4200_v49, %v4198_v56  ;;  %v6449_v56 = vpack.c.bf16 %v4343_v22, %v4342_v11 }
 0xdb0   : > { %v8957_v14 = vadd.f32 %v4106_v61, %v8580_v6  ;;  %v6397_v6 = vpack.c.bf16 %v4180_v45, %v4178_v5  ;;  %v4330_v5 = vld [vmem:[%s7742_s15 + $0x80] sm:$0xff]  ;;  %v4331_v45 = vld [vmem:[%s7742_s15 + $0x88] sm:$0xff] }
 0xdb1   : > { %v8960_v53 = vadd.f32 %v4101_v38, %v8559_v37  ;;  %v4182_v37 = vld [vmem:[%s7740_s2 + $0x48] sm:$0xff] }
 0xdb2   : > { %4119 = vadd.xlane.f32.xlu0 %v8957_v14  ;;  %6398 = vmatprep.subr.bf16.mxu0 %v6397_v6  ;;  %v6401_v50 = vpack.c.bf16 %v4184_v33, %v4182_v37  ;;  %v4315_v6 = vld [vmem:[%s7742_s15 + $0x8] sm:$0xff]  ;;  %v4316_v33 = vld [vmem:[%s7742_s15 + $0x10] sm:$0xff] }
 0xdb3   : > { %4117 = vadd.xlane.f32.xlu1 %v8960_v53  ;;  %6400 = vmatpush1.bf16.msra.mxu0 %v6399_v39  ;;  %v6427_v25 = vpack.c.bf16 %v4315_v6, %v4314_v36  ;;  %v4317_v39 = vld [vmem:[%s7742_s15 + $0x18] sm:$0xff] }
 0xdb4   : > { %6402 = vmatprep.subr.bf16.mxu0 %v6401_v50  ;;  %v4334_v50 = vld [vmem:[%s7742_s15 + $0xa0] sm:$0xff]  ;;  %v6431_v18 = vpack.c.bf16 %v4317_v39, %v4316_v33 }
 0xdb7   : > { %6404 = vmatpush1.bf16.msra.mxu0 %v6403_v24  ;;  %v6433_v24 = vpack.c.bf16 %v4335_v10, %v4334_v50  ;;  %v4326_v50 = vld [vmem:[%s7742_s15 + $0x60] sm:$0xff]  ;;  %v4327_v10 = vld [vmem:[%s7742_s15 + $0x68] sm:$0xff] }
 0xdb8   : > { %6406 = vmatprep.subr.bf16.mxu0 %v6405_v16  ;;  %v4338_v16 = vld [vmem:[%s7742_s15 + $0xc0] sm:$0xff] }
 0xdbb   : > { %6408 = vmatpush1.bf16.msra.mxu0 %v6407_v58  ;;  %v6441_v58 = vpack.c.bf16 %v4339_v15, %v4338_v16 }
 0xdbc   : > { %6410 = vmatprep.subr.bf16.mxu0 %v6409_v3  ;;  %v4340_v3 = vld [vmem:[%s7742_s15 + $0xd0] sm:$0xff] }
 0xdbd   : > { %v6445_v1 = vpack.c.bf16 %v4341_v26, %v4340_v3 }
 0xdbf   : > { %6412 = vmatpush1.bf16.msra.mxu0 %v6411_v28  ;;  %v4324_v28 = vld [vmem:[%s7742_s15 + $0x50] sm:$0xff] }
 0xdc0   : > { %6414 = vmatprep.subr.bf16.mxu0 %v6413_v59  ;;  %v6447_v59 = vpack.c.bf16 %v4325_v8, %v4324_v28 }
 0xdc3   : > { %6416 = vmatpush1.bf16.msra.mxu0 %v6415_v44 }
 0xdc4   : > { %6418 = vmatprep.subr.bf16.mxu0 %v6417_v29 }
 0xdc7   : > { %6420 = vmatpush1.bf16.msra.mxu0 %v6419_v51  ;;  %v9041_v51 = vld [vmem:[%s7744_s17 + $0x8] sm:$0xff] }
 0xdff   : > { %v4116_v4 = vpop.xlane.xlu0 %4115 }
 0xe00   : > { %v4122_v13 = vmul.f32 0.0078125, %v4116_v4  ;;  %v4114_v35 = vpop.xlane.xlu1 %4113  ;;  %v4318_v4 = vld [vmem:[%s7742_s15 + $0x20] sm:$0xff] }
 0xe01   : > { %v4121_v43 = vmul.f32 0.0078125, %v4114_v35  ;;  %v4336_v35 = vld [vmem:[%s7742_s15 + $0xb0] sm:$0xff] }
 0xe02   : > { %v8976_v48 = vsub.f32 %v4110_v57, %v4122_v13  ;;  %v6421_v57 = vpack.c.bf16 %v4204_v0, %v4202_v17  ;;  %v4319_v13 = vld [vmem:[%s7742_s15 + $0x28] sm:$0xff] }
 0xe03   : > { %v8978_v54 = vsub.f32 %v4109_v27, %v4121_v43  ;;  %v4203_v27 = vld [vmem:[%s7740_s2 + $0xf0] sm:$0xff]  ;;  %v4337_v43 = vld [vmem:[%s7742_s15 + $0xb8] sm:$0xff] }
 0xe04   : > { %v4130_v19 = vmul.f32 %v8976_v48, %v8976_v48  ;;  %v6423_v32 = vpack.c.bf16 %v4203_v27, %v4201_v9  ;;  %6422 = vmatprep.subr.bf16.mxu0 %v6421_v57  ;;  %v9312_v57 = vsub.s32 3, %v7984_v62 }
 0xe05   : > { %v4129_v41 = vmul.f32 %v8978_v54, %v8978_v54 }
 0xe06   : > { %4135 = vadd.xlane.f32.xlu0 %v4130_v19  ;;  %6424 = vmatpush1.bf16.msra.mxu0 %v6423_v32  ;;  %v6435_v19 = vpack.c.bf16 %v4319_v13, %v4318_v4  ;;  %v4160_v9 = vrot.slane %v9041_v51, %v9312_v57  ;;  %v4168_v32 = vrot.slane %v9041_v51, %v2467_v40  ;;  %v4328_v4 = vld [vmem:[%s7742_s15 + $0x70] sm:$0xff]  ;;  %v4329_v13 = vld [vmem:[%s7742_s15 + $0x78] sm:$0xff] }
 0xe07   : > { %4133 = vadd.xlane.f32.xlu1 %v4129_v41  ;;  %v6437_v41 = vpack.c.bf16 %v4337_v43, %v4336_v35  ;;  %v6455_v35 = vpack.c.bf16 %v4329_v13, %v4328_v4  ;;  %v4205_v43 = vld [vmem:[%s7732_s4] sm:$0x3]  ;;  %s4513_s4 = sshll.u32 %s7255_s22, 4  ;;  %s4514_s4 = int_to_ptr.vmem [resolvable:$true] %s4513_s4 }
 0xe08   : > { %s7148_s7 = scalar_lea.vmem %s4514_s4, 512  ;;  %p7155_p1 = scmp.lt.s32.totalorder %s4514_s4, %s4514_s4 }
 0xe09   : > { %p7149_p5 = scmp.ne.s32.totalorder %s4514_s4, %s7148_s7  ;;  %p7156_p11 = scmp.lt.s32.totalorder %s7148_s7, %s7148_s7 }
 0xe0b   : > { %p7150_p12 = pnand %p7149_p5, %p6528_p3  ;;  %p7157_p13 = por %p7156_p11, %p7155_p1 }
 0xe0d   : > { %p7151_p6 = pneg %p7150_p12 }
 0xe0f   : > { %p7158_p4 = pnand %p7157_p13, %p7151_p6 }
 0xe3f   : > { %v4120_v61 = vpop.xlane.xlu0 %4119 }
 0xe40   : > { %v4124_v46 = vmul.f32 0.0078125, %v4120_v61  ;;  %v4118_v38 = vpop.xlane.xlu1 %4117 }
 0xe41   : > { %v4123_v34 = vmul.f32 0.0078125, %v4118_v38 }
 0xe42   : > { %v9005_v63 = vsub.f32 %v8957_v14, %v4124_v46  ;;  %v6425_v14 = vpack.c.bf16 %v4331_v45, %v4330_v5 }
 0xe43   : > { %v9008_v7 = vsub.f32 %v8960_v53, %v4123_v34  ;;  %v4332_v53 = vld [vmem:[%s7742_s15 + $0x90] sm:$0xff] }
 0xe44   : > { %v4132_v12 = vmul.f32 %v9005_v63, %v9005_v63  ;;  %v6429_v37 = vpack.c.bf16 %v4333_v21, %v4332_v53  ;;  %6426 = vmatprep.subr.bf16.mxu1 %v6425_v14 }
 0xe45   : > { %v4131_v2 = vmul.f32 %v9008_v7, %v9008_v7  ;;  %6428 = vmatpush3.bf16.msra.mxu1 %v6427_v25 }
 0xe46   : > { %4139 = vadd.xlane.f32.xlu0 %v4132_v12  ;;  %6430 = vmatprep.subr.bf16.mxu1 %v6429_v37 }
 0xe47   : > { %4137 = vadd.xlane.f32.xlu1 %v4131_v2 }
 0xe49   : > { %6432 = vmatpush3.bf16.msra.mxu1 %v6431_v18  ;;  %v4344_v18 = vld [vmem:[%s7742_s15 + $0xf0] sm:$0xff] }
 0xe4a   : > { %6434 = vmatprep.subr.bf16.mxu1 %v6433_v24 }
 0xe4d   : > { %6436 = vmatpush3.bf16.msra.mxu1 %v6435_v19  ;;  %v9313_v19 = vld [vmem:[#allocation25_spill] sm:$0xff] }
 0xe4e   : > { %6438 = vmatprep.subr.bf16.mxu1 %v6437_v41  ;;  %v4210_v41 = vrot.slane %v4205_v43, %v9313_v19 }
 0xe51   : > { %6440 = vmatpush3.bf16.msra.mxu1 %v6439_v30 }
 0xe52   : > { %6442 = vmatprep.subr.bf16.mxu1 %v6441_v58 }
 0xe55   : > { %6444 = vmatpush3.bf16.msra.mxu1 %v6443_v52 }
 0xe56   : > { %6446 = vmatprep.subr.bf16.mxu1 %v6445_v1 }
 0xe59   : > { %6448 = vmatpush3.bf16.msra.mxu1 %v6447_v59 }
 0xe5a   : > { %6450 = vmatprep.subr.bf16.mxu1 %v6449_v56 }
 0xe93   : > { %v4136_v49 = vpop.xlane.xlu0 %4135 }
 0xe94   : > { %v4142_v44 = vmul.f32 0.0078125, %v4136_v49  ;;  %v4134_v29 = vpop.xlane.xlu1 %4133 }
 0xe95   : > { %v4141_v60 = vmul.f32 0.0078125, %v4134_v29 }
 0xe96   : > { %v4146_v31 = vadd.f32 1e-05, %v4142_v44 }
 0xe97   : > { %v4145_v17 = vadd.f32 1e-05, %v4141_v60 }
 0xe98   : > { %6863 = vrsqrt.f32 %v4146_v31 }
 0xe99   : > { %6865 = vrsqrt.f32 %v4145_v17 }
 0xea2   : > { %v6864_v0 = vpop.eup %6863 }
 0xea3   : > { %v6866_v27 = vpop.eup %6865  ;;  %v4154_v46 = vmul.f32 %v6864_v0, %v8976_v48 }
 0xea4   : > { %v4153_v61 = vmul.f32 %v6866_v27, %v8978_v54 }
 0xea5   : > { %v4162_v12 = vmul.f32 %v4160_v9, %v4154_v46 }
 0xea6   : > { %v4161_v38 = vmul.f32 %v4160_v9, %v4153_v61 }
 0xea7   : > { %v9055_v2 = vadd.f32 %v4168_v32, %v4162_v12 }
 0xea8   : > { %v9051_v34 = vadd.f32 %v4168_v32, %v4161_v38 }
 0xeaa   : > { %4282 = vmatmul.mubr.f32.vlgmr.msra.gmra.mrb[90].mxu0 %v9051_v34 }
 0xeab   : > { %4287 = vmatprep.mubr.f32.mxu0 %v9309_v47 }
 0xeae   : > { %4288 = vmatmul.mubr.f32.gmra.mrb[92].mxu0 %v9055_v2 }
 0xeaf   : > { %4293 = vmatprep.mubr.f32.mxu0 %v9309_v47 }
 0xed3   : > { %v4140_v5 = vpop.xlane.xlu0 %4139 }
 0xed4   : > { %v4144_v40 = vmul.f32 0.0078125, %v4140_v5  ;;  %v4138_v45 = vpop.xlane.xlu1 %4137 }
 0xed5   : > { %v4143_v54 = vmul.f32 0.0078125, %v4138_v45 }
 0xed6   : > { %v4148_v48 = vadd.f32 1e-05, %v4144_v40 }
 0xed7   : > { %v4147_v36 = vadd.f32 1e-05, %v4143_v54 }
 0xed8   : > { %6867 = vrsqrt.f32 %v4148_v48 }
 0xed9   : > { %6869 = vrsqrt.f32 %v4147_v36 }
 0xee2   : > { %v6868_v14 = vpop.eup %6867 }
 0xee3   : > { %v6870_v6 = vpop.eup %6869  ;;  %v4156_v21 = vmul.f32 %v6868_v14, %v9005_v63  ;;  %v4345_v63 = vld [vmem:[%s7742_s15 + $0xf8] sm:$0xff] }
 0xee4   : > { %v4155_v53 = vmul.f32 %v6870_v6, %v9008_v7  ;;  %v6451_v7 = vpack.c.bf16 %v4327_v10, %v4326_v50  ;;  %v6453_v24 = vpack.c.bf16 %v4345_v63, %v4344_v18 }
 0xee5   : > { %v4164_v33 = vmul.f32 %v4160_v9, %v4156_v21 }
 0xee6   : > { %v4163_v25 = vmul.f32 %v4160_v9, %v4155_v53  ;;  %6452 = vmatpush3.bf16.msra.mxu1 %v6451_v7  ;;  %v4349_v9 = vrot.slane %v9041_v51, %v9313_v19 }
 0xee7   : > { %v9065_v39 = vadd.f32 %v4168_v32, %v4164_v33  ;;  %6454 = vmatprep.subr.bf16.mxu1 %v6453_v24 }
 0xee8   : > { %v9061_v37 = vadd.f32 %v4168_v32, %v4163_v25 }
 0xeea   : > { %4294 = vmatmul.mubr.f32.gmra.mrb[94].mxu0 %v9061_v37  ;;  %6456 = vmatpush3.bf16.msra.mxu1 %v6455_v35 }
 0xeeb   : > { %4299 = vmatprep.mubr.f32.mxu0 %v9309_v47  ;;  %v9314_v47 = vld [vmem:[#allocation26_spill] sm:$0xff] }
 0xeec   : > { %v4214_v55 = vrot.slane %v4205_v43, %v9314_v47 }
 0xeee   : > { %4300 = vmatmul.mubr.f32.gmra.mrb[96].mxu0 %v9065_v39 }
 0xf7d   : > { %v4283_v20 = vpop.f32.mrb[90].mxu0 }
 0xf7e   : > { %v4284_v16 = vadd.f32 %v4283_v20, %v4210_v41  ;;  %v4285_v15 = vpop.f32.mrb[91].mxu0 }
 0xf7f   : > { %v4286_v30 = vadd.f32 %v4285_v15, %v4214_v55 }
 0xf80   : > { %v4306_v42 = vmax.f32 %v4284_v16, 0.0 }
 0xf81   : > { %v4307_v58 = vmax.f32 %v4286_v30, 0.0  ;;  %v4289_v23 = vpop.f32.mrb[92].mxu0 }
 0xf82   : > { %v4290_v3 = vadd.f32 %v4289_v23, %v4210_v41  ;;  %v4291_v26 = vpop.f32.mrb[93].mxu0  ;;  %v9315_v23 = vsub.s32 5, %v7984_v62 }
 0xf83   : > { %v4292_v52 = vadd.f32 %v4291_v26, %v4214_v55  ;;  %4414 = vmatprep.mubr.f32.mxu1 %v4307_v58  ;;  %v9316_v26 = vsub.s32 6, %v7984_v62 }
 0xf84   : > { %4415 = vmatmul.mubr.f32.vlgmr.msra.gmra.mrb[30].mxu1 %v4306_v42  ;;  %v4308_v28 = vmax.f32 %v4290_v3, 0.0  ;;  %v4486_v42 = vrot.slane %v9041_v51, %v9315_v23 }
 0xf85   : > { %v4309_v1 = vmax.f32 %v4292_v52, 0.0  ;;  %v4494_v52 = vrot.slane %v9041_v51, %v9316_v26 }
 0xf87   : > { %4419 = vmatprep.mubr.f32.mxu1 %v4309_v1 }
 0xf88   : > { %4420 = vmatmul.mubr.f32.gmra.mrb[32].mxu1 %v4308_v28 }
 0xfbd   : > { %v4295_v8 = vpop.f32.mrb[94].mxu0 }
 0xfbe   : > { %v4296_v11 = vadd.f32 %v4295_v8, %v4210_v41  ;;  %v4297_v22 = vpop.f32.mrb[95].mxu0 }
 0xfbf   : > { %v4298_v59 = vadd.f32 %v4297_v22, %v4214_v55 }
 0xfc0   : > { %v4310_v44 = vmax.f32 %v4296_v11, 0.0 }
 0xfc1   : > { %v4311_v56 = vmax.f32 %v4298_v59, 0.0  ;;  %v4301_v49 = vpop.f32.mrb[96].mxu0 }
 0xfc2   : > { %v4302_v29 = vadd.f32 %v4301_v49, %v4210_v41  ;;  %v4303_v60 = vpop.f32.mrb[97].mxu0 }
 0xfc3   : > { %v4304_v31 = vadd.f32 %v4303_v60, %v4214_v55  ;;  %4424 = vmatprep.mubr.f32.mxu1 %v4311_v56 }
 0xfc4   : > { %4425 = vmatmul.mubr.f32.gmra.mrb[34].mxu1 %v4310_v44  ;;  %v4312_v0 = vmax.f32 %v4302_v29, 0.0 }
 0xfc5   : > { %v4313_v17 = vmax.f32 %v4304_v31, 0.0 }
 0xfc7   : > { %4429 = vmatprep.mubr.f32.mxu1 %v4313_v17 }
 0xfc8   : > { %4430 = vmatmul.mubr.f32.gmra.mrb[36].mxu1 %v4312_v0 }
0x1057   : > { %v5261_v57 = vpop.f32.mrb[30].mxu1 }
0x1058   : > { %v5262_v27 = vpop.f32.mrb[31].mxu1 }
0x1059   : > { %v5263_v32 = vadd.f32 %v5262_v27, %v5261_v57 }
0x105b   : > { %v4417_v61 = vadd.f32 %v5263_v32, %v4349_v9  ;;  %v5264_v46 = vpop.f32.mrb[32].mxu1 }
0x105c   : > { %v5265_v38 = vpop.f32.mrb[33].mxu1 }
0x105d   : > { %v5266_v12 = vadd.f32 %v5265_v38, %v5264_v46  ;;  %v4435_v5 = vadd.f32 %v4417_v61, %v9051_v34 }
0x105f   : > { %v4422_v40 = vadd.f32 %v5266_v12, %v4349_v9  ;;  %4439 = vadd.xlane.f32.xlu1 %v4435_v5 }
0x1061   : > { %v4436_v45 = vadd.f32 %v4422_v40, %v9055_v2 }
0x1063   : > { %4441 = vadd.xlane.f32.xlu0 %v4436_v45 }
0x1097   : > { %v5267_v54 = vpop.f32.mrb[34].mxu1 }
0x1098   : > { %v5268_v48 = vpop.f32.mrb[35].mxu1 }
0x1099   : > { %v5269_v36 = vadd.f32 %v5268_v48, %v5267_v54 }
0x109b   : > { %v4427_v14 = vadd.f32 %v5269_v36, %v4349_v9  ;;  %v5270_v6 = vpop.f32.mrb[36].mxu1 }
0x109c   : > { %v5271_v53 = vpop.f32.mrb[37].mxu1 }
0x109d   : > { %v5272_v21 = vadd.f32 %v5271_v53, %v5270_v6  ;;  %v4437_v25 = vadd.f32 %v4427_v14, %v9061_v37 }
0x109f   : > { %v4432_v33 = vadd.f32 %v5272_v21, %v4349_v9  ;;  %4443 = vadd.xlane.f32.xlu1 %v4437_v25 }
0x10a1   : > { %v4438_v50 = vadd.f32 %v4432_v33, %v9065_v39 }
0x10a3   : > { %4445 = vadd.xlane.f32.xlu0 %v4438_v50 }
0x10ec   : > { %v4440_v34 = vpop.xlane.xlu1 %4439 }
0x10ed   : > { %v4447_v10 = vmul.f32 0.0078125, %v4440_v34 }
0x10ef   : > { %v4451_v7 = vsub.f32 %v4435_v5, %v4447_v10 }
0x10f0   : > { %v4442_v18 = vpop.xlane.xlu0 %4441 }
0x10f1   : > { %v4448_v2 = vmul.f32 0.0078125, %v4442_v18  ;;  %v4455_v63 = vmul.f32 %v4451_v7, %v4451_v7 }
0x10f3   : > { %v4452_v24 = vsub.f32 %v4436_v45, %v4448_v2  ;;  %4459 = vadd.xlane.f32.xlu1 %v4455_v63 }
0x10f5   : > { %v4456_v4 = vmul.f32 %v4452_v24, %v4452_v24 }
0x10f7   : > { %4461 = vadd.xlane.f32.xlu0 %v4456_v4 }
0x112c   : > { %v4444_v13 = vpop.xlane.xlu1 %4443 }
0x112d   : > { %v4449_v35 = vmul.f32 0.0078125, %v4444_v13 }
0x112f   : > { %v4453_v43 = vsub.f32 %v4437_v25, %v4449_v35 }
0x1130   : > { %v4446_v19 = vpop.xlane.xlu0 %4445 }
0x1131   : > { %v4450_v37 = vmul.f32 0.0078125, %v4446_v19  ;;  %v4457_v41 = vmul.f32 %v4453_v43, %v4453_v43 }
0x1133   : > { %v4454_v47 = vsub.f32 %v4438_v50, %v4450_v37  ;;  %4463 = vadd.xlane.f32.xlu1 %v4457_v41 }
0x1135   : > { %v4458_v39 = vmul.f32 %v4454_v47, %v4454_v47 }
0x1137   : > { %4465 = vadd.xlane.f32.xlu0 %v4458_v39 }
0x1180   : > { %v4460_v55 = vpop.xlane.xlu1 %4459 }
0x1181   : > { %v4467_v20 = vmul.f32 0.0078125, %v4460_v55 }
0x1183   : > { %v4471_v16 = vadd.f32 1e-05, %v4467_v20 }
0x1184   : > { %v4462_v15 = vpop.xlane.xlu0 %4461 }
0x1185   : > { %6871 = vrsqrt.f32 %v4471_v16  ;;  %v4468_v30 = vmul.f32 0.0078125, %v4462_v15 }
0x1187   : > { %v4472_v58 = vadd.f32 1e-05, %v4468_v30 }
0x1189   : > { %6873 = vrsqrt.f32 %v4472_v58 }
0x118f   : > { %v6872_v3 = vpop.eup %6871 }
0x1190   : > { %v4479_v1 = vmul.f32 %v6872_v3, %v4451_v7 }
0x1192   : > { %v4487_v28 = vmul.f32 %v4486_v42, %v4479_v1 }
0x1193   : > { %v6874_v8 = vpop.eup %6873 }
0x1194   : > { %v4495_v11 = vadd.f32 %v4494_v52, %v4487_v28  ;;  %v4480_v22 = vmul.f32 %v6874_v8, %v4452_v24 }
0x1196   : > { %4499 = vst [vmem:[#allocation15] sm:$0xff] %v4495_v11  ;;  %v4488_v59 = vmul.f32 %v4486_v42, %v4480_v22 }
0x1198   : > { %v4496_v56 = vadd.f32 %v4494_v52, %v4488_v59 }
0x119a   : > { %4500 = vst [vmem:[#allocation15 + $0x8] sm:$0xff] %v4496_v56 }
0x11c0   : > { %v4464_v49 = vpop.xlane.xlu1 %4463 }
0x11c1   : > { %v4469_v44 = vmul.f32 0.0078125, %v4464_v49 }
0x11c3   : > { %v4473_v29 = vadd.f32 1e-05, %v4469_v44 }
0x11c4   : > { %v4466_v60 = vpop.xlane.xlu0 %4465 }
0x11c5   : > { %6875 = vrsqrt.f32 %v4473_v29  ;;  %v4470_v31 = vmul.f32 0.0078125, %v4466_v60 }
0x11c7   : > { %v4474_v17 = vadd.f32 1e-05, %v4470_v31 }
0x11c9   : > { %6877 = vrsqrt.f32 %v4474_v17 }
0x11cf   : > { %v6876_v62 = vpop.eup %6875 }
0x11d0   : > { %v4481_v51 = vmul.f32 %v6876_v62, %v4453_v43 }
0x11d2   : > { %v4489_v0 = vmul.f32 %v4486_v42, %v4481_v51 }
0x11d3   : > { %v6878_v57 = vpop.eup %6877 }
0x11d4   : > { %v4497_v9 = vadd.f32 %v4494_v52, %v4489_v0  ;;  %v4482_v27 = vmul.f32 %v6878_v57, %v4454_v47 }
0x11d6   : > { %4501 = vst [vmem:[#allocation15 + $0x10] sm:$0xff] %v4497_v9  ;;  %v4490_v32 = vmul.f32 %v4486_v42, %v4482_v27 }
0x11d8   : > { %v4498_v61 = vadd.f32 %v4494_v52, %v4490_v32 }
0x11da   : > { %4502 = vst [vmem:[#allocation15 + $0x18] sm:$0xff] %v4498_v61 }
0x11db   : > { %7161 = shalt.err (!%p7158_p4)
}
0x11dc   : > { %s9317_s2 = sld [smem:[#allocation54_spill]] }
0x11e2   : > { %s7162_s15 = scalar_lea.hbm %s9317_s2, 512 }
0x11e3   : > { %p7163_p0 = scmp.ne.s32.totalorder %s9317_s2, %s7162_s15  ;;  %p7168_p7 = scmp.lt.u32.totalorder %s7162_s15, %s9317_s2 }
0x11e5   : > { %p7164_p9 = pnand %p7163_p0, %p6528_p3 }
0x11e7   : > { %p7165_p2 = pneg %p7164_p9 }
0x11e9   : > { %p7170_p10 = pnand %p7168_p7, %p7165_p2 }
0x11eb   : > { %7173 = shalt.err (!%p7170_p10)
}
0x11ec   : > { %s7256_s23 = smov 128   ;;  %s7257_s19 = smov 8  }
0x11ed   : > { %6491 = dma.vmem_to_hbm [thread:$0]  (%p6528_p3), %s4514_s4, 512, %s9317_s2, [#allocation5], %s7256_s23, %s7256_s23, %s7257_s19  }
0x11ee   : > { %7211 = dma.done.wait (%p6528_p3), [#allocation5], 512  }
0x11ef   : > { %7213 = vsyncadd (%p6528_p3), [#allocation5], 4294966784 }
0x11f0 PF: > { %s26_s30 = sadd.s32 1, %s7236_s30   ;;  %s9318_s20 = sld [smem:[#allocation20_spill]] }
0x11f1   : > { %p23_p8 = scmp.ge.s32.totalorder %s26_s30, 5   ;;  %s9319_s27 = sld [smem:[#allocation24_spill]] }
0x11f2   : > { %s9320_s6 = sld [smem:[#allocation23_spill]]  ;;  %s9321_s25 = smov %s7220_s26 }
0x11f3   : > { %s9323_s28 = smov %s7232_s29  ;;  %25 = sbr.rel (!%p23_p8) target bundleno = 15 (0xf), region = 196 }
0x11f6   : > { %s9322_s26 = smov %s9318_s20 }
0x11f8   : > { %s9324_s29 = smov %s9320_s6 }
0x11fa   :  { %4529 = vsyncpa [#allocation4], 1 }
0x11fb   :  { %4531 = vsyncpa [#allocation4 + $0x1], 1 }
0x11fc   :  { %4532 = vsyncpa [#allocation7], 1 }
0x11fd   :  { %4533 = vsyncpa [#allocation5], 1 }
0x11fe   :  { %4535 = vsyncpa [#allocation5 + $0x1], 1 }

</bundles_post_ra>
